<compile_context>
chip_gen: v5e
topology: v5e:2x2
jax: 0.10.0
libtpu: 0.0.40
codegen_flags: <defaults>
</compile_context>

<pallas_src>
import functools

import jax
import jax.numpy as jnp
from jax import lax
from jax.experimental import pallas as pl
from jax.experimental.pallas import tpu as pltpu

CPAD = 128          # padded channel / feature width (one full lane group)
TILE_B_MAX = 8      # images per grid step (keeps blocks tiny vs. v7x 64 MiB VMEM)


# ----------------------------- Pallas kernels ------------------------------

def _conv_pool_kernel(x_ref, w_ref, b_ref, o_ref, *, ho, wo):
    """Fused im2col-matmul conv + bias + ReLU + 2x2/2 max-pool.

    x_ref: (tb*ho*wo, K)  bf16 im2col rows, row order = (image, oh, ow)
    w_ref: (K, 128)       bf16 conv weight, Cout zero-padded to 128 lanes
    b_ref: (1, 128)       f32 bias (padded lanes zero)
    o_ref: (tb*(ho//2)*(wo//2), 128) bf16 pooled output, rows = (image, ph, pw)
    """
    rows = x_ref.shape[0]
    tb = rows // (ho * wo)
    acc = jnp.dot(x_ref[...], w_ref[...], preferred_element_type=jnp.float32)
    acc = jnp.maximum(acc + b_ref[...], 0.0)               # (tb*ho*wo, 128) f32
    # pool along W: adjacent ow rows are adjacent sublanes -> extent-2 reduce
    y = acc.reshape(tb * ho, wo // 2, 2, CPAD)
    y = jnp.max(y, axis=2)                                 # (tb*ho, wo//2, 128)
    # pool along H: adjacent oh planes
    y = y.reshape(tb * (ho // 2), 2, wo // 2, CPAD)
    y = jnp.max(y, axis=1)                                 # (tb*ho//2, wo//2, 128)
    o_ref[...] = y.reshape(tb * (ho // 2) * (wo // 2), CPAD).astype(o_ref.dtype)


def _fc_kernel(x_ref, w1_ref, b1_ref, w2_ref, b2_ref, o_ref):
    """Fused FC1 + ReLU + FC2 + log_softmax (10 valid classes, rest masked)."""
    h = jnp.dot(x_ref[...], w1_ref[...], preferred_element_type=jnp.float32)
    h = jnp.maximum(h + b1_ref[...], 0.0)                  # (tb, 128) f32
    logits = jnp.dot(h, w2_ref[...], preferred_element_type=jnp.float32)
    logits = logits + b2_ref[...]                          # (tb, 128)
    col = lax.broadcasted_iota(jnp.int32, logits.shape, 1)
    logits = jnp.where(col < 10, logits, jnp.float32(-1e30))   # mask padded classes
    m = jnp.max(logits, axis=-1, keepdims=True)
    s = logits - m
    lse = jnp.log(jnp.sum(jnp.exp(s), axis=-1, keepdims=True))
    o_ref[...] = (s - lse).astype(o_ref.dtype)


# ----------------------------- pallas_call wrappers -------------------------

def _conv_pool(cols2d, w, b, *, tb, ho, wo):
    rows_in = tb * ho * wo
    rows_out = tb * (ho // 2) * (wo // 2)
    k = cols2d.shape[1]
    n_blocks = cols2d.shape[0] // rows_in
    kern = functools.partial(_conv_pool_kernel, ho=ho, wo=wo)
    return pl.pallas_call(
        kern,
        out_shape=jax.ShapeDtypeStruct((n_blocks * rows_out, CPAD), jnp.bfloat16),
        grid=(n_blocks,),
        in_specs=[pl.BlockSpec((rows_in, k), lambda i: (i, 0)),
                  pl.BlockSpec((k, CPAD), lambda i: (0, 0)),    # weight stays resident
                  pl.BlockSpec((1, CPAD), lambda i: (0, 0))],
        out_specs=pl.BlockSpec((rows_out, CPAD), lambda i: (i, 0)),
        compiler_params=pltpu.CompilerParams(dimension_semantics=("parallel",)),
    )(cols2d, w, b)


def _fc(xflat, w1, b1, w2, b2, *, tb):
    npad, kin = xflat.shape
    return pl.pallas_call(
        _fc_kernel,
        out_shape=jax.ShapeDtypeStruct((npad, CPAD), jnp.float32),
        grid=(npad // tb,),
        in_specs=[pl.BlockSpec((tb, kin), lambda i: (i, 0)),
                  pl.BlockSpec((kin, CPAD), lambda i: (0, 0)),
                  pl.BlockSpec((1, CPAD), lambda i: (0, 0)),
                  pl.BlockSpec((CPAD, CPAD), lambda i: (0, 0)),
                  pl.BlockSpec((1, CPAD), lambda i: (0, 0))],
        out_specs=pl.BlockSpec((tb, CPAD), lambda i: (i, 0)),
        compiler_params=pltpu.CompilerParams(dimension_semantics=("parallel",)),
    )(xflat, w1, b1, w2, b2)


# ----------------------------- JAX glue (layout plumbing) -------------------

def _im2col_nhwc(x, kh, kw):
    # x: (N, H, W, C) -> (N, Ho*Wo, kh*kw*C); column index = (i*kw + j)*C + c
    n, h, w, c = x.shape
    ho, wo = h - kh + 1, w - kw + 1
    taps = [x[:, i:i + ho, j:j + wo, :] for i in range(kh) for j in range(kw)]
    p = jnp.stack(taps, axis=3)                    # (n, ho, wo, kh*kw, c)
    return p.reshape(n, ho * wo, kh * kw * c)


# ------------------------------- params ------------------------------------

def init_params(key):
    ks = jax.random.split(key, 8)

    def u(k, shape, fan_in):
        bound = 1.0 / jnp.sqrt(fan_in)
        return jax.random.uniform(k, shape, jnp.float32, -bound, bound)

    return {
        "w1": u(ks[0], (16, 1, 5, 5), 1 * 5 * 5),
        "b1": u(ks[1], (16,), 1 * 5 * 5),
        "w2": u(ks[2], (24, 16, 5, 5), 16 * 5 * 5),
        "b2": u(ks[3], (24,), 16 * 5 * 5),
        "wl1": u(ks[4], (100, 24 * 4 * 4), 24 * 4 * 4),   # torch Linear: (out, in)
        "bl1": u(ks[5], (100,), 24 * 4 * 4),
        "wl2": u(ks[6], (10, 100), 100),
        "bl2": u(ks[7], (10,), 100),
    }


def prepare_params(p):
    """One-time weight relayout: transpose, reorder, lane-pad to 128, bf16 cast."""
    f32, bf16 = jnp.float32, jnp.bfloat16
    # conv1: (16,1,5,5) -> (K=25 padded to 32, Cout padded to 128), K order (i,j,cin)
    w1 = p["w1"].transpose(0, 2, 3, 1).reshape(16, 25).T               # (25, 16)
    w1p = jnp.zeros((32, CPAD), f32).at[:25, :16].set(w1).astype(bf16)
    b1p = jnp.zeros((1, CPAD), f32).at[0, :16].set(p["b1"])
    # conv2: (24,16,5,5) -> (K=400, 128), K order (i,j,cin)
    w2 = p["w2"].transpose(0, 2, 3, 1).reshape(24, 400).T              # (400, 24)
    w2p = jnp.zeros((400, CPAD), f32).at[:, :24].set(w2).astype(bf16)
    b2p = jnp.zeros((1, CPAD), f32).at[0, :24].set(p["b2"])
    # linear1: torch input index = c*16 + h*4 + w; our flat index = (h*4+w)*128 + c
    wl1 = p["wl1"].reshape(100, 24, 4, 4).transpose(2, 3, 1, 0)        # (h,w,c,out)
    wl1 = wl1.reshape(16, 24, 100)
    wl1p = jnp.zeros((16, CPAD, CPAD), f32).at[:, :24, :100].set(wl1)
    wl1p = wl1p.reshape(16 * CPAD, CPAD).astype(bf16)                  # (2048, 128)
    bl1p = jnp.zeros((1, CPAD), f32).at[0, :100].set(p["bl1"])
    # linear2: (10, 100) -> (128, 128) f32
    wl2p = jnp.zeros((CPAD, CPAD), f32).at[:100, :10].set(p["wl2"].T)
    bl2p = jnp.zeros((1, CPAD), f32).at[0, :10].set(p["bl2"])
    return dict(w1p=w1p, b1p=b1p, w2p=w2p, b2p=b2p,
                wl1p=wl1p, bl1p=bl1p, wl2p=wl2p, bl2p=bl2p)


# ------------------------------- forward ------------------------------------

def model_forward(prep, x):
    # x: (N, 1, 28, 28) f32 NCHW — same interface as the PyTorch module
    n = x.shape[0]
    tb = min(TILE_B_MAX, n)
    npad = ((n + tb - 1) // tb) * tb
    if npad != n:
        x = jnp.pad(x, ((0, npad - n), (0, 0), (0, 0), (0, 0)))

    # stage 1: conv1(1->16,5) + ReLU + maxpool2   (28x28 -> 12x12)
    xh = x.transpose(0, 2, 3, 1)                               # NHWC (npad,28,28,1)
    cols1 = _im2col_nhwc(xh, 5, 5)                             # (npad, 576, 25)
    cols1 = jnp.pad(cols1, ((0, 0), (0, 0), (0, 7))).astype(jnp.bfloat16)
    cols1 = cols1.reshape(npad * 576, 32)
    h1 = _conv_pool(cols1, prep["w1p"], prep["b1p"], tb=tb, ho=24, wo=24)
    # h1: (npad*144, 128) bf16, rows = (image, ph*12+pw), lanes 0..15 valid

    # stage 2: conv2(16->24,5) + ReLU + maxpool2   (12x12 -> 4x4)
    a1 = h1.reshape(npad, 12, 12, CPAD)[..., :16]              # drop padded channels
    cols2 = _im2col_nhwc(a1, 5, 5).reshape(npad * 64, 400)     # bf16
    h2 = _conv_pool(cols2, prep["w2p"], prep["b2p"], tb=tb, ho=8, wo=8)
    # h2: (npad*16, 128) bf16, rows = (image, h*4+w), lanes 0..23 valid

    # FC tail: Linear(384->100) + ReLU + Linear(100->10) + log_softmax
    xflat = h2.reshape(npad, 16 * CPAD)                        # (npad, 2048)
    out = _fc(xflat, prep["wl1p"], prep["bl1p"], prep["wl2p"], prep["bl2p"], tb=tb)
    return out[:n, :10]


if __name__ == "__main__":
    key = jax.random.PRNGKey(0)
    kx, kp = jax.random.split(key)
    x = jax.random.normal(kx, (2, 1, 28, 28), dtype=jnp.float32)
    params = init_params(kp)
    prep = prepare_params(params)

    fwd = jax.jit(model_forward)
    out = fwd(prep, x)
    out = jax.block_until_ready(out)

    assert out.shape == (2, 10)
    # rows of log_softmax must exp-sum to 1
    assert bool(jnp.allclose(jnp.exp(out).sum(axis=1), 1.0, atol=1e-4))
    print("KERNEL_OK")
</pallas_src>

<mosaic_0001>
module attributes {stable_mosaic.version = 11 : i64} {
  func.func @_conv_pool_kernel(%arg0: i32, %arg1: memref<1152x32xbf16, #tpu.memory_space<vmem>>, %arg2: memref<32x128xbf16, #tpu.memory_space<vmem>>, %arg3: memref<1x128xf32, #tpu.memory_space<vmem>>, %arg4: memref<288x128xbf16, #tpu.memory_space<vmem>>) attributes {dimension_semantics = [#tpu.dimension_semantics<parallel>], iteration_bounds = array<i64: 1>, scalar_prefetch = 0 : i64, scratch_operands = 0 : i64, tpu.core_type = #tpu.core_type<tc>, window_params = [{transform_indices = @transform_0, window_bounds = array<i64: 1152, 32>}, {pipeline_mode = #tpu.pipeline_mode<synchronous>, transform_indices = @transform_1, window_bounds = array<i64: 32, 128>}, {pipeline_mode = #tpu.pipeline_mode<synchronous>, transform_indices = @transform_2, window_bounds = array<i64: 1, 128>}, {transform_indices = @transform_3, window_bounds = array<i64: 288, 128>}]} {
    %c0 = arith.constant 0 : index
    %c0_0 = arith.constant 0 : index
    %0 = vector.load %arg1[%c0, %c0_0] : memref<1152x32xbf16, #tpu.memory_space<vmem>>, vector<1152x32xbf16>
    %c0_1 = arith.constant 0 : index
    %c0_2 = arith.constant 0 : index
    %1 = vector.load %arg2[%c0_1, %c0_2] : memref<32x128xbf16, #tpu.memory_space<vmem>>, vector<32x128xbf16>
    %cst = arith.constant dense<0.000000e+00> : vector<1152x128xf32>
    %2 = tpu.matmul %0, %1, %cst {dimension_numbers = #tpu.dot_dimension_numbers<[1], [0], [0], [1], [0, 0, 1, 1], [], []>} : vector<1152x32xbf16>, vector<32x128xbf16>, vector<1152x128xf32> -> vector<1152x128xf32>
    %c0_3 = arith.constant 0 : index
    %c0_4 = arith.constant 0 : index
    %3 = vector.load %arg3[%c0_3, %c0_4] : memref<1x128xf32, #tpu.memory_space<vmem>>, vector<1x128xf32>
    %4 = vector.broadcast %3 : vector<1x128xf32> to vector<1152x128xf32>
    %5 = arith.addf %2, %4 : vector<1152x128xf32>
    %cst_5 = arith.constant 0.000000e+00 : f32
    %6 = vector.broadcast %cst_5 : f32 to vector<1152x128xf32>
    %7 = arith.maximumf %5, %6 : vector<1152x128xf32>
    %8 = vector.shape_cast %7 : vector<1152x128xf32> to vector<48x12x2x128xf32>
    %cst_6 = arith.constant dense<0xFF800000> : vector<48x12x128xf32>
    %9 = vector.multi_reduction <maximumf>, %8, %cst_6 [2] : vector<48x12x2x128xf32> to vector<48x12x128xf32>
    %10 = vector.shape_cast %9 : vector<48x12x128xf32> to vector<24x2x12x128xf32>
    %cst_7 = arith.constant dense<0xFF800000> : vector<24x12x128xf32>
    %11 = vector.multi_reduction <maximumf>, %10, %cst_7 [1] : vector<24x2x12x128xf32> to vector<24x12x128xf32>
    %12 = vector.shape_cast %11 : vector<24x12x128xf32> to vector<288x128xf32>
    %13 = arith.truncf %12 : vector<288x128xf32> to vector<288x128xbf16>
    %c0_8 = arith.constant 0 : index
    %c0_9 = arith.constant 0 : index
    %14 = vector.load %arg4[%c0_8, %c0_9] : memref<288x128xbf16, #tpu.memory_space<vmem>>, vector<288x128xbf16>
    tpu.vector_store %arg4[%c0_8, %c0_9], %13 {strides = array<i32>} : memref<288x128xbf16, #tpu.memory_space<vmem>>, vector<288x128xbf16>,
    return
  }
  func.func @transform_0(%arg0: i32) -> (i32, i32) {
    %c0_i32 = arith.constant 0 : i32
    %c0_i32_0 = arith.constant 0 : i32
    return %arg0, %c0_i32 : i32, i32
  }
  func.func @transform_1(%arg0: i32) -> (i32, i32) {
    %c0_i32 = arith.constant 0 : i32
    %c0_i32_0 = arith.constant 0 : i32
    %c0_i32_1 = arith.constant 0 : i32
    return %c0_i32, %c0_i32_0 : i32, i32
  }
  func.func @transform_2(%arg0: i32) -> (i32, i32) {
    %c0_i32 = arith.constant 0 : i32
    %c0_i32_0 = arith.constant 0 : i32
    %c0_i32_1 = arith.constant 0 : i32
    return %c0_i32, %c0_i32_0 : i32, i32
  }
  func.func @transform_3(%arg0: i32) -> (i32, i32) {
    %c0_i32 = arith.constant 0 : i32
    %c0_i32_0 = arith.constant 0 : i32
    return %arg0, %c0_i32 : i32, i32
  }
}

module attributes {stable_mosaic.version = 11 : i64} {
  func.func @_conv_pool_kernel(%arg0: i32, %arg1: memref<128x400xbf16, #tpu.memory_space<vmem>>, %arg2: memref<400x128xbf16, #tpu.memory_space<vmem>>, %arg3: memref<1x128xf32, #tpu.memory_space<vmem>>, %arg4: memref<32x128xbf16, #tpu.memory_space<vmem>>) attributes {dimension_semantics = [#tpu.dimension_semantics<parallel>], iteration_bounds = array<i64: 1>, scalar_prefetch = 0 : i64, scratch_operands = 0 : i64, tpu.core_type = #tpu.core_type<tc>, window_params = [{transform_indices = @transform_0, window_bounds = array<i64: 128, 400>}, {pipeline_mode = #tpu.pipeline_mode<synchronous>, transform_indices = @transform_1, window_bounds = array<i64: 400, 128>}, {pipeline_mode = #tpu.pipeline_mode<synchronous>, transform_indices = @transform_2, window_bounds = array<i64: 1, 128>}, {transform_indices = @transform_3, window_bounds = array<i64: 32, 128>}]} {
    %c0 = arith.constant 0 : index
    %c0_0 = arith.constant 0 : index
    %0 = vector.load %arg1[%c0, %c0_0] : memref<128x400xbf16, #tpu.memory_space<vmem>>, vector<128x400xbf16>
    %c0_1 = arith.constant 0 : index
    %c0_2 = arith.constant 0 : index
    %1 = vector.load %arg2[%c0_1, %c0_2] : memref<400x128xbf16, #tpu.memory_space<vmem>>, vector<400x128xbf16>
    %cst = arith.constant dense<0.000000e+00> : vector<128x128xf32>
    %2 = tpu.matmul %0, %1, %cst {dimension_numbers = #tpu.dot_dimension_numbers<[1], [0], [0], [1], [0, 0, 1, 1], [], []>} : vector<128x400xbf16>, vector<400x128xbf16>, vector<128x128xf32> -> vector<128x128xf32>
    %c0_3 = arith.constant 0 : index
    %c0_4 = arith.constant 0 : index
    %3 = vector.load %arg3[%c0_3, %c0_4] : memref<1x128xf32, #tpu.memory_space<vmem>>, vector<1x128xf32>
    %4 = vector.broadcast %3 : vector<1x128xf32> to vector<128x128xf32>
    %5 = arith.addf %2, %4 : vector<128x128xf32>
    %cst_5 = arith.constant 0.000000e+00 : f32
    %6 = vector.broadcast %cst_5 : f32 to vector<128x128xf32>
    %7 = arith.maximumf %5, %6 : vector<128x128xf32>
    %8 = vector.shape_cast %7 : vector<128x128xf32> to vector<16x4x2x128xf32>
    %cst_6 = arith.constant dense<0xFF800000> : vector<16x4x128xf32>
    %9 = vector.multi_reduction <maximumf>, %8, %cst_6 [2] : vector<16x4x2x128xf32> to vector<16x4x128xf32>
    %10 = vector.shape_cast %9 : vector<16x4x128xf32> to vector<8x2x4x128xf32>
    %cst_7 = arith.constant dense<0xFF800000> : vector<8x4x128xf32>
    %11 = vector.multi_reduction <maximumf>, %10, %cst_7 [1] : vector<8x2x4x128xf32> to vector<8x4x128xf32>
    %12 = vector.shape_cast %11 : vector<8x4x128xf32> to vector<32x128xf32>
    %13 = arith.truncf %12 : vector<32x128xf32> to vector<32x128xbf16>
    %c0_8 = arith.constant 0 : index
    %c0_9 = arith.constant 0 : index
    %14 = vector.load %arg4[%c0_8, %c0_9] : memref<32x128xbf16, #tpu.memory_space<vmem>>, vector<32x128xbf16>
    tpu.vector_store %arg4[%c0_8, %c0_9], %13 {strides = array<i32>} : memref<32x128xbf16, #tpu.memory_space<vmem>>, vector<32x128xbf16>,
    return
  }
  func.func @transform_0(%arg0: i32) -> (i32, i32) {
    %c0_i32 = arith.constant 0 : i32
    %c0_i32_0 = arith.constant 0 : i32
    return %arg0, %c0_i32 : i32, i32
  }
  func.func @transform_1(%arg0: i32) -> (i32, i32) {
    %c0_i32 = arith.constant 0 : i32
    %c0_i32_0 = arith.constant 0 : i32
    %c0_i32_1 = arith.constant 0 : i32
    return %c0_i32, %c0_i32_0 : i32, i32
  }
  func.func @transform_2(%arg0: i32) -> (i32, i32) {
    %c0_i32 = arith.constant 0 : i32
    %c0_i32_0 = arith.constant 0 : i32
    %c0_i32_1 = arith.constant 0 : i32
    return %c0_i32, %c0_i32_0 : i32, i32
  }
  func.func @transform_3(%arg0: i32) -> (i32, i32) {
    %c0_i32 = arith.constant 0 : i32
    %c0_i32_0 = arith.constant 0 : i32
    return %arg0, %c0_i32 : i32, i32
  }
}

module attributes {stable_mosaic.version = 11 : i64} {
  func.func @_fc_kernel(%arg0: i32, %arg1: memref<2x2048xbf16, #tpu.memory_space<vmem>>, %arg2: memref<2048x128xbf16, #tpu.memory_space<vmem>>, %arg3: memref<1x128xf32, #tpu.memory_space<vmem>>, %arg4: memref<128x128xf32, #tpu.memory_space<vmem>>, %arg5: memref<1x128xf32, #tpu.memory_space<vmem>>, %arg6: memref<2x128xf32, #tpu.memory_space<vmem>>) attributes {dimension_semantics = [#tpu.dimension_semantics<parallel>], iteration_bounds = array<i64: 1>, scalar_prefetch = 0 : i64, scratch_operands = 0 : i64, tpu.core_type = #tpu.core_type<tc>, window_params = [{transform_indices = @transform_0, window_bounds = array<i64: 2, 2048>}, {pipeline_mode = #tpu.pipeline_mode<synchronous>, transform_indices = @transform_1, window_bounds = array<i64: 2048, 128>}, {pipeline_mode = #tpu.pipeline_mode<synchronous>, transform_indices = @transform_2, window_bounds = array<i64: 1, 128>}, {pipeline_mode = #tpu.pipeline_mode<synchronous>, transform_indices = @transform_3, window_bounds = array<i64: 128, 128>}, {pipeline_mode = #tpu.pipeline_mode<synchronous>, transform_indices = @transform_4, window_bounds = array<i64: 1, 128>}, {transform_indices = @transform_5, window_bounds = array<i64: 2, 128>}]} {
    %c0 = arith.constant 0 : index
    %c0_0 = arith.constant 0 : index
    %0 = vector.load %arg1[%c0, %c0_0] : memref<2x2048xbf16, #tpu.memory_space<vmem>>, vector<2x2048xbf16>
    %c0_1 = arith.constant 0 : index
    %c0_2 = arith.constant 0 : index
    %1 = vector.load %arg2[%c0_1, %c0_2] : memref<2048x128xbf16, #tpu.memory_space<vmem>>, vector<2048x128xbf16>
    %cst = arith.constant dense<0.000000e+00> : vector<2x128xf32>
    %2 = tpu.matmul %0, %1, %cst {dimension_numbers = #tpu.dot_dimension_numbers<[1], [0], [0], [1], [0, 0, 1, 1], [], []>} : vector<2x2048xbf16>, vector<2048x128xbf16>, vector<2x128xf32> -> vector<2x128xf32>
    %c0_3 = arith.constant 0 : index
    %c0_4 = arith.constant 0 : index
    %3 = vector.load %arg3[%c0_3, %c0_4] : memref<1x128xf32, #tpu.memory_space<vmem>>, vector<1x128xf32>
    %4 = vector.broadcast %3 : vector<1x128xf32> to vector<2x128xf32>
    %5 = arith.addf %2, %4 : vector<2x128xf32>
    %cst_5 = arith.constant 0.000000e+00 : f32
    %6 = vector.broadcast %cst_5 : f32 to vector<2x128xf32>
    %7 = arith.maximumf %5, %6 : vector<2x128xf32>
    %c0_6 = arith.constant 0 : index
    %c0_7 = arith.constant 0 : index
    %8 = vector.load %arg4[%c0_6, %c0_7] : memref<128x128xf32, #tpu.memory_space<vmem>>, vector<128x128xf32>
    %cst_8 = arith.constant dense<0.000000e+00> : vector<2x128xf32>
    %9 = tpu.matmul %7, %8, %cst_8 {dimension_numbers = #tpu.dot_dimension_numbers<[1], [0], [0], [1], [0, 0, 1, 1], [], []>} : vector<2x128xf32>, vector<128x128xf32>, vector<2x128xf32> -> vector<2x128xf32>
    %c0_9 = arith.constant 0 : index
    %c0_10 = arith.constant 0 : index
    %10 = vector.load %arg5[%c0_9, %c0_10] : memref<1x128xf32, #tpu.memory_space<vmem>>, vector<1x128xf32>
    %11 = vector.broadcast %10 : vector<1x128xf32> to vector<2x128xf32>
    %12 = arith.addf %9, %11 : vector<2x128xf32>
    %13 = tpu.iota {dimensions = array<i32: 1>} : vector<2x128xi32>
    %c10_i32 = arith.constant 10 : i32
    %14 = vector.broadcast %c10_i32 : i32 to vector<2x128xi32>
    %15 = arith.cmpi slt, %13, %14 : vector<2x128xi32>
    %cst_11 = arith.constant -1.000000e+30 : f32
    %16 = vector.broadcast %cst_11 : f32 to vector<2x128xf32>
    %17 = arith.select %15, %12, %16 : vector<2x128xi1>, vector<2x128xf32>
    %cst_12 = arith.constant dense<0xFF800000> : vector<2xf32>
    %18 = vector.multi_reduction <maximumf>, %17, %cst_12 [1] : vector<2x128xf32> to vector<2xf32>
    %19 = vector.shape_cast %18 : vector<2xf32> to vector<2x1xf32>
    %20 = vector.broadcast %19 : vector<2x1xf32> to vector<2x128xf32>
    %21 = arith.subf %17, %20 : vector<2x128xf32>
    %22 = math.exp %21 : vector<2x128xf32>
    %cst_13 = arith.constant dense<0.000000e+00> : vector<2xf32>
    %23 = vector.multi_reduction <add>, %22, %cst_13 [1] : vector<2x128xf32> to vector<2xf32>
    %24 = vector.shape_cast %23 : vector<2xf32> to vector<2x1xf32>
    %25 = math.log %24 : vector<2x1xf32>
    %26 = vector.broadcast %25 : vector<2x1xf32> to vector<2x128xf32>
    %27 = arith.subf %21, %26 : vector<2x128xf32>
    %c0_14 = arith.constant 0 : index
    %c0_15 = arith.constant 0 : index
    %28 = vector.load %arg6[%c0_14, %c0_15] : memref<2x128xf32, #tpu.memory_space<vmem>>, vector<2x128xf32>
    tpu.vector_store %arg6[%c0_14, %c0_15], %27 {strides = array<i32>} : memref<2x128xf32, #tpu.memory_space<vmem>>, vector<2x128xf32>,
    return
  }
  func.func @transform_0(%arg0: i32) -> (i32, i32) {
    %c0_i32 = arith.constant 0 : i32
    %c0_i32_0 = arith.constant 0 : i32
    return %arg0, %c0_i32 : i32, i32
  }
  func.func @transform_1(%arg0: i32) -> (i32, i32) {
    %c0_i32 = arith.constant 0 : i32
    %c0_i32_0 = arith.constant 0 : i32
    %c0_i32_1 = arith.constant 0 : i32
    return %c0_i32, %c0_i32_0 : i32, i32
  }
  func.func @transform_2(%arg0: i32) -> (i32, i32) {
    %c0_i32 = arith.constant 0 : i32
    %c0_i32_0 = arith.constant 0 : i32
    %c0_i32_1 = arith.constant 0 : i32
    return %c0_i32, %c0_i32_0 : i32, i32
  }
  func.func @transform_3(%arg0: i32) -> (i32, i32) {
    %c0_i32 = arith.constant 0 : i32
    %c0_i32_0 = arith.constant 0 : i32
    %c0_i32_1 = arith.constant 0 : i32
    return %c0_i32, %c0_i32_0 : i32, i32
  }
  func.func @transform_4(%arg0: i32) -> (i32, i32) {
    %c0_i32 = arith.constant 0 : i32
    %c0_i32_0 = arith.constant 0 : i32
    %c0_i32_1 = arith.constant 0 : i32
    return %c0_i32, %c0_i32_0 : i32, i32
  }
  func.func @transform_5(%arg0: i32) -> (i32, i32) {
    %c0_i32 = arith.constant 0 : i32
    %c0_i32_0 = arith.constant 0 : i32
    return %arg0, %c0_i32 : i32, i32
  }
}

</mosaic_0001>

<bundles_post_ra>
// kernel: model_forward.4
= control target key start
LH: loop header
LB: loop body
LE: loop exit
PB: predicated region body
PF: predicated region fallthrough
CT: control target
= control target key end

     0   :  { %vm403_vm0 = vcmask 130048   ;;  %vm752_vm1 = vcmask 1041408   ;;  %vm1329_vm2 = vcmask 1041409   ;;  %vm1331_vm3 = vcmask 1042434   ;;  %s2176_s1 = inlined_call_operand.vmem [shape: bf16[400,128], index: 1, kind: input, shape index: {}]   ;;  %s2177_s0 = inlined_call_operand.vmem [shape: bf16[128,400], index: 0, kind: input, shape index: {}]   ;;  %s2178_s2 = inlined_call_operand.vmem [shape: f32[1,128], index: 2, kind: input, shape index: {}]   ;;  %s2179_s3 = inlined_call_operand.vmem [shape: bf16[32,128], index: 3, kind: output, shape index: {}]  }
   0x1   :  { %v1655_v0 = vld [vmem:[%s2176_s1 + $0x38] sm:$0xff]  ;;  %v1654_v3 = vld [vmem:[%s2176_s1 + $0x30] sm:$0xff]  ;;  %v1653_v6 = vld [vmem:[%s2176_s1 + $0x28] sm:$0xff]  ;;  %vm1333_vm4 = vcmask 1043459   ;;  %vm1335_vm5 = vcmask 1044484   ;;  %vm1337_vm6 = vcmask 1045509  }
   0x2   :  { %v1663_v1 = vld [vmem:[%s2176_s1 + $0x78] sm:$0xff]  ;;  %428 = vmatpush.bf16.msra.mxu0 %v1655_v0  ;;  %v1662_v4 = vld [vmem:[%s2176_s1 + $0x70] sm:$0xff]  ;;  %v1661_v7 = vld [vmem:[%s2176_s1 + $0x68] sm:$0xff]  ;;  %vm1339_vm7 = vcmask 1046534   ;;  %vm1341_vm8 = vcmask 1047559  }
   0x3   :  { %v1671_v2 = vld [vmem:[%s2176_s1 + $0xb8] sm:$0xff]  ;;  %477 = vmatpush.bf16.msra.mxu1 %v1663_v1  ;;  %v1670_v5 = vld [vmem:[%s2176_s1 + $0xb0] sm:$0xff]  ;;  %v1672_v8 = vld [vmem:[%s2176_s1 + $0xc0] sm:$0xff] }
   0x4   :  { %526 = vmatpush.bf16.msra.mxu2 %v1671_v2  ;;  %v1669_v9 = vld [vmem:[%s2176_s1 + $0xa8] sm:$0xff]  ;;  %v1392_v11 = vld [vmem:[%s2177_s0 + $0x18] sm:$0xf0]  ;;  %582 = vmatpush.bf16.msra.mxu3 %v1672_v8  ;;  %v1652_v13 = vld [vmem:[%s2176_s1 + $0x20] sm:$0xff] }
   0x5   :  { %v1617_v10 = vld [vmem:[%s2177_s0 + $0xc] sm:$0xf]  ;;  %v1660_v14 = vld [vmem:[%s2176_s1 + $0x60] sm:$0xff]  ;;  %v1651_v16 = vld [vmem:[%s2176_s1 + $0x18] sm:$0xff] }
   0x6   :  { %429 = vmatpush.bf16.msra.mxu0 %v1654_v3  ;;  %v1395_v12 = vor.u32 %v1617_v10, %v1392_v11  ;;  %v1668_v15 = vld [vmem:[%s2176_s1 + $0xa0] sm:$0xff]  ;;  %v1659_v17 = vld [vmem:[%s2176_s1 + $0x58] sm:$0xff]  ;;  %v1650_v19 = vld [vmem:[%s2176_s1 + $0x10] sm:$0xff] }
   0x7   :  { %478 = vmatpush.bf16.msra.mxu1 %v1662_v4  ;;  %v1667_v18 = vld [vmem:[%s2176_s1 + $0x98] sm:$0xff]  ;;  %v1658_v20 = vld [vmem:[%s2176_s1 + $0x50] sm:$0xff]  ;;  %v1621_v22 = vld [vmem:[%s2177_s0 + $0x2c] sm:$0xf] }
   0x8   :  { %527 = vmatpush.bf16.msra.mxu2 %v1670_v5  ;;  %1608 = vmatmul.msk.bf16.vlgmr.msra.gmra.mxu3 %vm403_vm0, %v1395_v12  ;;  %v1666_v21 = vld [vmem:[%s2176_s1 + $0x90] sm:$0xff]  ;;  %v1408_v23 = vld [vmem:[%s2177_s0 + $0x38] sm:$0xf0]  ;;  %v1649_v24 = vld [vmem:[%s2176_s1 + $0x8] sm:$0xff] }
   0x9   :  { %v1657_v25 = vld [vmem:[%s2176_s1 + $0x48] sm:$0xff]  ;;  %v1411_v27 = vor.u32 %v1621_v22, %v1408_v23  ;;  %v1648_v28 = vld [vmem:[%s2176_s1] sm:$0xff]  ;;  %v1618_v31 = vld [vmem:[%s2177_s0 + $0xc] sm:$0xf0] }
   0xa   :  { %430 = vmatpush.bf16.msra.mxu0 %v1653_v6  ;;  %v1665_v26 = vld [vmem:[%s2176_s1 + $0x88] sm:$0xff]  ;;  %v1656_v29 = vld [vmem:[%s2176_s1 + $0x40] sm:$0xff]  ;;  %v1384_v33 = vld [vmem:[%s2177_s0 + $0x10] sm:$0xf0] }
   0xb   :  { %479 = vmatpush.bf16.msra.mxu1 %v1661_v7  ;;  %v1382_v30 = vld [vmem:[%s2177_s0] sm:$0xf]  ;;  %v1616_v32 = vld [vmem:[%s2177_s0 + $0x4] sm:$0xf]  ;;  %v1390_v35 = vld [vmem:[%s2177_s0 + $0x8] sm:$0xf] }
   0xc   :  { %528 = vmatpush.bf16.msra.mxu2 %v1669_v9  ;;  %v1664_v34 = vld [vmem:[%s2176_s1 + $0x80] sm:$0xff]  ;;  %v1619_v36 = vld [vmem:[%s2177_s0 + $0x14] sm:$0xf0]  ;;  %v1383_v37 = vor.u32 %v1618_v31, %v1382_v30  ;;  %v1387_v38 = vor.u32 %v1616_v32, %v1384_v33  ;;  %v1625_v40 = vld [vmem:[%s2177_s0 + $0x4c] sm:$0xf] }
   0xd   :  { %v1391_v39 = vor.u32 %v1619_v36, %v1390_v35  ;;  %v1424_v41 = vld [vmem:[%s2177_s0 + $0x58] sm:$0xf0]  ;;  %v1398_v43 = vld [vmem:[%s2177_s0 + $0x20] sm:$0xf]  ;;  %v1622_v44 = vld [vmem:[%s2177_s0 + $0x2c] sm:$0xf0] }
   0xe   :  { %431 = vmatpush.bf16.msra.mxu0 %v1652_v13  ;;  %v1427_v42 = vor.u32 %v1625_v40, %v1424_v41  ;;  %v1620_v45 = vld [vmem:[%s2177_s0 + $0x24] sm:$0xf]  ;;  %v1400_v46 = vld [vmem:[%s2177_s0 + $0x30] sm:$0xf0]  ;;  %v1406_v47 = vld [vmem:[%s2177_s0 + $0x28] sm:$0xf]  ;;  %v1399_v49 = vor.u32 %v1622_v44, %v1398_v43 }
   0xf   :  { %480 = vmatpush.bf16.msra.mxu1 %v1660_v14  ;;  %v1623_v48 = vld [vmem:[%s2177_s0 + $0x34] sm:$0xf0]  ;;  %v1403_v50 = vor.u32 %v1620_v45, %v1400_v46  ;;  %v1629_v52 = vld [vmem:[%s2177_s0 + $0x6c] sm:$0xf]  ;;  %v1440_v53 = vld [vmem:[%s2177_s0 + $0x78] sm:$0xf0] }
  0x10   :  { %529 = vmatpush.bf16.msra.mxu2 %v1668_v15  ;;  %v1407_v51 = vor.u32 %v1623_v48, %v1406_v47  ;;  %v1443_v54 = vor.u32 %v1629_v52, %v1440_v53  ;;  %v1414_v55 = vld [vmem:[%s2177_s0 + $0x40] sm:$0xf]  ;;  %v1626_v56 = vld [vmem:[%s2177_s0 + $0x4c] sm:$0xf0]  ;;  %v1624_v57 = vld [vmem:[%s2177_s0 + $0x44] sm:$0xf] }
  0x11   :  { %v1416_v58 = vld [vmem:[%s2177_s0 + $0x50] sm:$0xf0]  ;;  %v1422_v59 = vld [vmem:[%s2177_s0 + $0x48] sm:$0xf]  ;;  %v1627_v60 = vld [vmem:[%s2177_s0 + $0x54] sm:$0xf0]  ;;  %v1415_v61 = vor.u32 %v1626_v56, %v1414_v55 }
  0x12   :  { %432 = vmatpush.bf16.msra.mxu0 %v1651_v16  ;;  %v1419_v62 = vor.u32 %v1624_v57, %v1416_v58  ;;  %v1423_v63 = vor.u32 %v1627_v60, %v1422_v59  ;;  %v1633_v0 = vld [vmem:[%s2177_s0 + $0x8c] sm:$0xf]  ;;  %v1456_v1 = vld [vmem:[%s2177_s0 + $0x98] sm:$0xf0]  ;;  %v1430_v3 = vld [vmem:[%s2177_s0 + $0x60] sm:$0xf] }
  0x13   :  { %481 = vmatpush.bf16.msra.mxu1 %v1659_v17  ;;  %v1459_v2 = vor.u32 %v1633_v0, %v1456_v1  ;;  %v1630_v4 = vld [vmem:[%s2177_s0 + $0x6c] sm:$0xf0]  ;;  %v1628_v5 = vld [vmem:[%s2177_s0 + $0x64] sm:$0xf]  ;;  %v1432_v6 = vld [vmem:[%s2177_s0 + $0x70] sm:$0xf0] }
  0x14   :  { %530 = vmatpush.bf16.msra.mxu2 %v1667_v18  ;;  %v1438_v7 = vld [vmem:[%s2177_s0 + $0x68] sm:$0xf]  ;;  %v1631_v8 = vld [vmem:[%s2177_s0 + $0x74] sm:$0xf0]  ;;  %v1431_v9 = vor.u32 %v1630_v4, %v1430_v3  ;;  %v1435_v10 = vor.u32 %v1628_v5, %v1432_v6  ;;  %v1637_v12 = vld [vmem:[%s2177_s0 + $0xac] sm:$0xf] }
  0x15   :  { %v1439_v11 = vor.u32 %v1631_v8, %v1438_v7  ;;  %v1472_v13 = vld [vmem:[%s2177_s0 + $0xb8] sm:$0xf0]  ;;  %v1446_v15 = vld [vmem:[%s2177_s0 + $0x80] sm:$0xf]  ;;  %v1634_v16 = vld [vmem:[%s2177_s0 + $0x8c] sm:$0xf0] }
  0x16   :  { %433 = vmatpush.bf16.msra.mxu0 %v1650_v19  ;;  %v1475_v14 = vor.u32 %v1637_v12, %v1472_v13  ;;  %v1632_v17 = vld [vmem:[%s2177_s0 + $0x84] sm:$0xf]  ;;  %v1448_v18 = vld [vmem:[%s2177_s0 + $0x90] sm:$0xf0]  ;;  %v1454_v19 = vld [vmem:[%s2177_s0 + $0x88] sm:$0xf] }
  0x17   :  { %482 = vmatpush.bf16.msra.mxu1 %v1658_v20  ;;  %v1635_v20 = vld [vmem:[%s2177_s0 + $0x94] sm:$0xf0]  ;;  %v1451_v22 = vor.u32 %v1632_v17, %v1448_v18  ;;  %v1464_v30 = vld [vmem:[%s2177_s0 + $0xb0] sm:$0xf0]  ;;  %v1470_v31 = vld [vmem:[%s2177_s0 + $0xa8] sm:$0xf] }
  0x18   :  { %531 = vmatpush.bf16.msra.mxu2 %v1666_v21  ;;  %1609 = vmatmul.msk.bf16.gmra.mxu3 %vm403_vm0, %v1411_v27  ;;  %v1447_v21 = vor.u32 %v1634_v16, %v1446_v15  ;;  %v1455_v23 = vor.u32 %v1635_v20, %v1454_v19  ;;  %v1462_v27 = vld [vmem:[%s2177_s0 + $0xa0] sm:$0xf]  ;;  %v1639_v32 = vld [vmem:[%s2177_s0 + $0xb4] sm:$0xf0]  ;;  %v1645_v36 = vld [vmem:[%s2177_s0 + $0xec] sm:$0xf] }
  0x19   :  { %v1471_v35 = vor.u32 %v1639_v32, %v1470_v31  ;;  %v1642_v40 = vld [vmem:[%s2177_s0 + $0xcc] sm:$0xf0]  ;;  %v1640_v41 = vld [vmem:[%s2177_s0 + $0xc4] sm:$0xf]  ;;  %v1486_v43 = vld [vmem:[%s2177_s0 + $0xc8] sm:$0xf] }
  0x1a   :  { %434 = vmatpush.bf16.msra.mxu0 %v1649_v24  ;;  %v1641_v24 = vld [vmem:[%s2177_s0 + $0xcc] sm:$0xf]  ;;  %v1643_v44 = vld [vmem:[%s2177_s0 + $0xd4] sm:$0xf0]  ;;  %v1494_v48 = vld [vmem:[%s2177_s0 + $0xe0] sm:$0xf] }
  0x1b   :  { %483 = vmatpush.bf16.msra.mxu1 %v1657_v25  ;;  %v1488_v25 = vld [vmem:[%s2177_s0 + $0xd8] sm:$0xf0]  ;;  %v1487_v47 = vor.u32 %v1643_v44, %v1486_v43  ;;  %v1502_v52 = vld [vmem:[%s2177_s0 + $0xe8] sm:$0xf]  ;;  %v1647_v53 = vld [vmem:[%s2177_s0 + $0xf4] sm:$0xf0] }
  0x1c   :  { %532 = vmatpush.bf16.msra.mxu2 %v1665_v26  ;;  %v1491_v26 = vor.u32 %v1641_v24, %v1488_v25  ;;  %v1503_v56 = vor.u32 %v1647_v53, %v1502_v52  ;;  %v1973_v57 = vld [vmem:[%s2178_s2] ss:$0 sm:$0xff] }
  0x1e   :  { %435 = vmatpush.bf16.msra.mxu0 %v1648_v28  ;;  %v1638_v28 = vld [vmem:[%s2177_s0 + $0xac] sm:$0xf0] }
  0x1f   :  { %484 = vmatpush.bf16.msra.mxu1 %v1656_v29  ;;  %v1636_v29 = vld [vmem:[%s2177_s0 + $0xa4] sm:$0xf]  ;;  %v1463_v33 = vor.u32 %v1638_v28, %v1462_v27 }
  0x20   :  { %533 = vmatpush.bf16.msra.mxu2 %v1664_v34  ;;  %v1467_v34 = vor.u32 %v1636_v29, %v1464_v30 }
  0x21   :  { %436 = vmatmul.bf16.vlgmr.msra.gmra.mxu0 %v1383_v37  ;;  %v1504_v37 = vld [vmem:[%s2177_s0 + $0xf8] sm:$0xf0] }
  0x22   :  { %485 = vmatmul.bf16.vlgmr.msra.gmra.mxu1 %v1387_v38  ;;  %v1507_v38 = vor.u32 %v1645_v36, %v1504_v37 }
  0x23   :  { %534 = vmatmul.bf16.vlgmr.msra.gmra.mxu2 %v1391_v39  ;;  %v1478_v39 = vld [vmem:[%s2177_s0 + $0xc0] sm:$0xf] }
  0x24   :  { %v1479_v45 = vor.u32 %v1642_v40, %v1478_v39 }
  0x28   :  { %1610 = vmatmul.msk.bf16.gmra.mxu3 %vm403_vm0, %v1427_v42  ;;  %v1480_v42 = vld [vmem:[%s2177_s0 + $0xd0] sm:$0xf0] }
  0x29   :  { %v1483_v46 = vor.u32 %v1640_v41, %v1480_v42 }
  0x31   :  { %441 = vmatmul.bf16.gmra.mxu0 %v1399_v49  ;;  %v1646_v49 = vld [vmem:[%s2177_s0 + $0xec] sm:$0xf0] }
  0x32   :  { %490 = vmatmul.bf16.gmra.mxu1 %v1403_v50  ;;  %v1644_v50 = vld [vmem:[%s2177_s0 + $0xe4] sm:$0xf] }
  0x33   :  { %539 = vmatmul.bf16.gmra.mxu2 %v1407_v51  ;;  %v1496_v51 = vld [vmem:[%s2177_s0 + $0xf0] sm:$0xf0] }
  0x34   :  { %v1499_v55 = vor.u32 %v1644_v50, %v1496_v51 }
  0x38   :  { %1611 = vmatmul.msk.bf16.gmra.mxu3 %vm403_vm0, %v1443_v54  ;;  %v1495_v54 = vor.u32 %v1646_v49, %v1494_v48 }
  0x41   :  { %446 = vmatmul.bf16.gmra.mxu0 %v1415_v61 }
  0x42   :  { %495 = vmatmul.bf16.gmra.mxu1 %v1419_v62 }
  0x43   :  { %544 = vmatmul.bf16.gmra.mxu2 %v1423_v63 }
  0x48   :  { %1612 = vmatmul.msk.bf16.gmra.mxu3 %vm403_vm0, %v1459_v2 }
  0x51   :  { %451 = vmatmul.bf16.gmra.mxu0 %v1431_v9 }
  0x52   :  { %500 = vmatmul.bf16.gmra.mxu1 %v1435_v10 }
  0x53   :  { %549 = vmatmul.bf16.gmra.mxu2 %v1439_v11 }
  0x58   :  { %1613 = vmatmul.msk.bf16.gmra.mxu3 %vm403_vm0, %v1475_v14 }
  0x61   :  { %456 = vmatmul.bf16.gmra.mxu0 %v1447_v21 }
  0x62   :  { %505 = vmatmul.bf16.gmra.mxu1 %v1451_v22 }
  0x63   :  { %554 = vmatmul.bf16.gmra.mxu2 %v1455_v23 }
  0x68   :  { %1614 = vmatmul.msk.bf16.gmra.mxu3 %vm403_vm0, %v1491_v26 }
  0x71   :  { %461 = vmatmul.bf16.gmra.mxu0 %v1463_v33 }
  0x72   :  { %510 = vmatmul.bf16.gmra.mxu1 %v1467_v34 }
  0x73   :  { %559 = vmatmul.bf16.gmra.mxu2 %v1471_v35 }
  0x78   :  { %1615 = vmatmul.msk.bf16.gmra.mxu3 %vm403_vm0, %v1507_v38 }
  0x81   :  { %466 = vmatmul.bf16.gmra.mxu0 %v1479_v45 }
  0x82   :  { %515 = vmatmul.bf16.gmra.mxu1 %v1483_v46 }
  0x83   :  { %564 = vmatmul.bf16.gmra.mxu2 %v1487_v47 }
  0x8b   :  { %v584_v62 = vpop.f32.mrf.mxu3 }
  0x91   :  { %471 = vmatmul.bf16.gmra.mxu0 %v1495_v54 }
  0x92   :  { %520 = vmatmul.bf16.gmra.mxu1 %v1499_v55 }
  0x93   :  { %569 = vmatmul.bf16.gmra.mxu2 %v1503_v56  ;;  %v586_v12 = vpop.f32.mrf.mxu3 }
  0x9b   :  { %v589_v51 = vpop.f32.mrf.mxu3 }
  0x9e   :  { %v437_v58 = vpop.f32.mrf.mxu0 }
  0x9f   :  { %v486_v59 = vpop.f32.mrf.mxu1  ;;  %v438_v60 = vadd.f32 %v1973_v57, %v437_v58 }
  0xa1   :  { %v487_v61 = vadd.f32 %v486_v59, %v438_v60 }
  0xa6   :  { %v535_v63 = vpop.f32.mrf.mxu2  ;;  %v439_v1 = vpop.f32.mrf.mxu0 }
  0xa7   :  { %v536_v0 = vadd.f32 %v535_v63, %v487_v61  ;;  %v488_v2 = vpop.f32.mrf.mxu1  ;;  %v440_v3 = vadd.f32 %v1973_v57, %v439_v1 }
  0xa9   :  { %v585_v4 = vadd.f32 %v584_v62, %v536_v0  ;;  %v489_v6 = vadd.f32 %v488_v2, %v440_v3 }
  0xab   :  { %v624_v5 = vmax.f32 %v585_v4, 0.0 }
  0xad   :  { %v656_v7 = vrot.slane %v624_v5, 2  ;;  %v657_v8 = vrot.slane %v624_v5, 4  ;;  %v658_v9 = vrot.slane %v624_v5, 6  ;;  %v753_v10 = vsel %vm752_vm1, %v624_v5, -inf }
  0xae   :  { %v754_v11 = vrot.slane %v753_v10, 4  ;;  %v537_v13 = vpop.f32.mrf.mxu2  ;;  %v442_v18 = vpop.f32.mrf.mxu0 }
  0xaf   :  { %v760_v14 = vsel %vm752_vm1, %v656_v7, -inf  ;;  %v767_v15 = vsel %vm752_vm1, %v657_v8, -inf  ;;  %v774_v16 = vsel %vm752_vm1, %v658_v9, -inf  ;;  %v538_v17 = vadd.f32 %v537_v13, %v489_v6  ;;  %v491_v19 = vpop.f32.mrf.mxu1 }
  0xb0   :  { %v755_v20 = vmax.f32 %v753_v10, %v754_v11  ;;  %v761_v21 = vrot.slane %v760_v14, 4  ;;  %v768_v22 = vrot.slane %v767_v15, 4  ;;  %v775_v23 = vrot.slane %v774_v16, 4 }
  0xb1   :  { %v587_v24 = vadd.f32 %v586_v12, %v538_v17  ;;  %v443_v25 = vadd.f32 %v1973_v57, %v442_v18 }
  0xb2   :  { %v756_v26 = vrot.slane %v755_v20, 2  ;;  %v762_v27 = vmax.f32 %v760_v14, %v761_v21  ;;  %v769_v28 = vmax.f32 %v767_v15, %v768_v22  ;;  %v776_v29 = vmax.f32 %v774_v16, %v775_v23 }
  0xb3   :  { %v625_v30 = vmax.f32 %v587_v24, 0.0  ;;  %v492_v42 = vadd.f32 %v491_v19, %v443_v25 }
  0xb4   :  { %v757_v31 = vmax.f32 %v755_v20, %v756_v26  ;;  %v763_v32 = vrot.slane %v762_v27, 2  ;;  %v770_v33 = vrot.slane %v769_v28, 2  ;;  %v777_v34 = vrot.slane %v776_v29, 2 }
  0xb5   :  { %v659_v35 = vrot.slane %v625_v30, 2  ;;  %v660_v36 = vrot.slane %v625_v30, 4  ;;  %v661_v37 = vrot.slane %v625_v30, 6  ;;  %v781_v38 = vsel %vm752_vm1, %v625_v30, -inf  ;;  %v591_v30 = vpop.f32.mrf.mxu3 }
  0xb6   :  { %v764_v39 = vmax.f32 %v762_v27, %v763_v32  ;;  %v771_v40 = vmax.f32 %v769_v28, %v770_v33  ;;  %v778_v41 = vmax.f32 %v776_v29, %v777_v34  ;;  %v540_v43 = vpop.f32.mrf.mxu2  ;;  %v782_v44 = vrot.slane %v781_v38, 4  ;;  %v444_v48 = vpop.f32.mrf.mxu0 }
  0xb7   :  { %v788_v45 = vsel %vm752_vm1, %v659_v35, -inf  ;;  %v795_v46 = vsel %vm752_vm1, %v660_v36, -inf  ;;  %v802_v47 = vsel %vm752_vm1, %v661_v37, -inf  ;;  %v758_v49 = vrot.slane %v757_v31, 1  ;;  %v493_v52 = vpop.f32.mrf.mxu1 }
  0xb8   :  { %v765_v50 = vrot.slane %v764_v39, 1  ;;  %v783_v53 = vmax.f32 %v781_v38, %v782_v44  ;;  %v789_v54 = vrot.slane %v788_v45, 4  ;;  %v796_v55 = vrot.slane %v795_v46, 4 }
  0xb9   :  { %v803_v56 = vrot.slane %v802_v47, 4  ;;  %v772_v58 = vrot.slane %v771_v40, 1  ;;  %v779_v59 = vrot.slane %v778_v41, 1  ;;  %v541_v60 = vadd.f32 %v540_v43, %v492_v42 }
  0xba   :  { %v784_v61 = vrot.slane %v783_v53, 2  ;;  %v790_v62 = vmax.f32 %v788_v45, %v789_v54  ;;  %v797_v63 = vmax.f32 %v795_v46, %v796_v55  ;;  %v759_v1 = vmax.f32 %v757_v31, %v758_v49 }
  0xbb   :  { %v804_v0 = vmax.f32 %v802_v47, %v803_v56  ;;  %v766_v2 = vmax.f32 %v764_v39, %v765_v50  ;;  %v590_v3 = vadd.f32 %v589_v51, %v541_v60  ;;  %v773_v8 = vmax.f32 %v771_v40, %v772_v58 }
  0xbc   :  { %v785_v4 = vmax.f32 %v783_v53, %v784_v61  ;;  %v791_v5 = vrot.slane %v790_v62, 2  ;;  %v798_v6 = vrot.slane %v797_v63, 2  ;;  %v780_v9 = vmax.f32 %v778_v41, %v779_v59 }
  0xbd   :  { %v805_v7 = vrot.slane %v804_v0, 2  ;;  %v626_v10 = vmax.f32 %v590_v3, 0.0  ;;  %v445_v11 = vadd.f32 %v1973_v57, %v444_v48 }
  0xbe   :  { %v542_v12 = vpop.f32.mrf.mxu2  ;;  %v786_v13 = vrot.slane %v785_v4, 1  ;;  %v792_v14 = vmax.f32 %v790_v62, %v791_v5  ;;  %v799_v15 = vmax.f32 %v797_v63, %v798_v6  ;;  %v447_v17 = vpop.f32.mrf.mxu0 }
  0xbf   :  { %v806_v16 = vmax.f32 %v804_v0, %v805_v7  ;;  %v662_v18 = vrot.slane %v626_v10, 2  ;;  %v663_v19 = vrot.slane %v626_v10, 4  ;;  %v664_v20 = vrot.slane %v626_v10, 6  ;;  %v496_v31 = vpop.f32.mrf.mxu1 }
  0xc0   :  { %v809_v21 = vsel %vm752_vm1, %v626_v10, -inf  ;;  %v787_v22 = vmax.f32 %v785_v4, %v786_v13  ;;  %v793_v23 = vrot.slane %v792_v14, 1  ;;  %v800_v24 = vrot.slane %v799_v15, 1 }
  0xc1   :  { %v807_v25 = vrot.slane %v806_v16, 1  ;;  %v810_v26 = vrot.slane %v809_v21, 4  ;;  %v816_v27 = vsel %vm752_vm1, %v662_v18, -inf  ;;  %v823_v28 = vsel %vm752_vm1, %v663_v19, -inf }
  0xc2   :  { %v830_v29 = vsel %vm752_vm1, %v664_v20, -inf  ;;  %v794_v32 = vmax.f32 %v792_v14, %v793_v23  ;;  %v801_v33 = vmax.f32 %v799_v15, %v800_v24  ;;  %v1201_v35 = vmax.f32 %v759_v1, %v787_v22 }
  0xc3   :  { %v808_v34 = vmax.f32 %v806_v16, %v807_v25  ;;  %v811_v36 = vmax.f32 %v809_v21, %v810_v26  ;;  %v817_v37 = vrot.slane %v816_v27, 4  ;;  %v824_v38 = vrot.slane %v823_v28, 4 }
  0xc4   :  { %v831_v39 = vrot.slane %v830_v29, 4  ;;  %v1202_v40 = vmax.f32 %v766_v2, %v794_v32  ;;  %v1203_v41 = vmax.f32 %v773_v8, %v801_v33  ;;  %v1233_v43 = vpack.c.bf16 %v1201_v35, %v1201_v35 }
  0xc5   :  { %v1204_v42 = vmax.f32 %v780_v9, %v808_v34  ;;  %v812_v44 = vrot.slane %v811_v36, 2  ;;  %v818_v45 = vmax.f32 %v816_v27, %v817_v37  ;;  %v825_v46 = vmax.f32 %v823_v28, %v824_v38 }
  0xc6   :  { %v832_v47 = vmax.f32 %v830_v29, %v831_v39  ;;  %v1234_v48 = vpack.c.bf16 %v1202_v40, %v1202_v40  ;;  %v1235_v49 = vpack.c.bf16 %v1203_v41, %v1203_v41  ;;  %v494_v50 = vadd.f32 %v493_v52, %v445_v11  ;;  %v545_v55 = vpop.f32.mrf.mxu2  ;;  %v449_v56 = vpop.f32.mrf.mxu0 }
  0xc7   :  { %v813_v51 = vmax.f32 %v811_v36, %v812_v44  ;;  %v819_v53 = vrot.slane %v818_v45, 2  ;;  %v826_v54 = vrot.slane %v825_v46, 2  ;;  %v1236_v58 = vpack.c.bf16 %v1204_v42, %v1204_v42  ;;  %v594_v52 = vpop.f32.mrf.mxu3  ;;  %v498_v5 = vpop.f32.mrf.mxu1 }
  0xc8   :  { %v1297_v59 = vunpack.c.l.b16 %v1233_v43  ;;  %v1298_v60 = vunpack.c.l.b16 %v1234_v48  ;;  %v543_v61 = vadd.f32 %v542_v12, %v494_v50  ;;  %v1299_v62 = vunpack.c.l.b16 %v1235_v49 }
  0xc9   :  { %v814_v63 = vrot.slane %v813_v51, 1  ;;  %v833_v0 = vrot.slane %v832_v47, 2  ;;  %v820_v2 = vmax.f32 %v818_v45, %v819_v53  ;;  %v827_v4 = vmax.f32 %v825_v46, %v826_v54 }
  0xca   :  { %v1330_v1 = vsel %vm1329_vm2, %v1298_v60, %v1297_v59  ;;  %v592_v3 = vadd.f32 %v591_v30, %v543_v61  ;;  %v1992_v6 = vunpack.c.l.b16 %v1236_v58  ;;  %v448_v11 = vadd.f32 %v1973_v57, %v447_v17 }
  0xcb   :  { %v1995_v8 = vsel %vm1331_vm3, %v1299_v62, %v1330_v1  ;;  %v1997_v9 = vmax.f32 %v813_v51, %v814_v63  ;;  %v834_v10 = vmax.f32 %v832_v47, %v833_v0  ;;  %v821_v12 = vrot.slane %v820_v2, 1 }
  0xcc   :  { %v627_v7 = vmax.f32 %v592_v3, 0.0  ;;  %v828_v16 = vrot.slane %v827_v4, 1  ;;  %v497_v19 = vadd.f32 %v496_v31, %v448_v11  ;;  %v450_v20 = vadd.f32 %v1973_v57, %v449_v56 }
  0xcd   :  { %v835_v30 = vrot.slane %v834_v10, 1  ;;  %v822_v38 = vmax.f32 %v820_v2, %v821_v12 }
  0xce   :  { %v665_v13 = vrot.slane %v627_v7, 2  ;;  %v666_v14 = vrot.slane %v627_v7, 4  ;;  %v667_v15 = vrot.slane %v627_v7, 6  ;;  %v837_v18 = vsel %vm752_vm1, %v627_v7, -inf  ;;  %v547_v28 = vpop.f32.mrf.mxu2  ;;  %v452_v29 = vpop.f32.mrf.mxu0 }
  0xcf   :  { %v838_v21 = vrot.slane %v837_v18, 4  ;;  %v546_v27 = vadd.f32 %v545_v55, %v497_v19  ;;  %v499_v33 = vadd.f32 %v498_v5, %v450_v20  ;;  %v453_v31 = vadd.f32 %v1973_v57, %v452_v29  ;;  %v596_v46 = vpop.f32.mrf.mxu3  ;;  %v501_v47 = vpop.f32.mrf.mxu1 }
  0xd0   :  { %v844_v22 = vsel %vm752_vm1, %v665_v13, -inf  ;;  %v851_v23 = vsel %vm752_vm1, %v666_v14, -inf  ;;  %v858_v24 = vsel %vm752_vm1, %v667_v15, -inf  ;;  %v829_v39 = vmax.f32 %v827_v4, %v828_v16 }
  0xd1   :  { %v845_v25 = vrot.slane %v844_v22, 4  ;;  %v852_v26 = vrot.slane %v851_v23, 4  ;;  %v859_v17 = vrot.slane %v858_v24, 4  ;;  %v839_v32 = vmax.f32 %v837_v18, %v838_v21 }
  0xd2   :  { %v595_v37 = vadd.f32 %v594_v52, %v546_v27  ;;  %v548_v41 = vadd.f32 %v547_v28, %v499_v33  ;;  %v836_v48 = vmax.f32 %v834_v10, %v835_v30  ;;  %v502_v51 = vadd.f32 %v501_v47, %v453_v31 }
  0xd3   :  { %v846_v34 = vmax.f32 %v844_v22, %v845_v25  ;;  %v853_v35 = vmax.f32 %v851_v23, %v852_v26  ;;  %v860_v36 = vmax.f32 %v858_v24, %v859_v17  ;;  %v840_v40 = vrot.slane %v839_v32, 2 }
  0xd4   :  { %v628_v45 = vmax.f32 %v595_v37, 0.0  ;;  %v597_v50 = vadd.f32 %v596_v46, %v548_v41  ;;  %v1334_v31 = vsel %vm1333_vm4, %v1992_v6, %v1995_v8 }
  0xd5   :  { %v847_v42 = vrot.slane %v846_v34, 2  ;;  %v854_v43 = vrot.slane %v853_v35, 2  ;;  %v861_v44 = vrot.slane %v860_v36, 2  ;;  %v841_v49 = vmax.f32 %v839_v32, %v840_v40 }
  0xd6   :  { %v668_v56 = vrot.slane %v628_v45, 2  ;;  %v669_v59 = vrot.slane %v628_v45, 4  ;;  %v670_v60 = vrot.slane %v628_v45, 6  ;;  %v865_v61 = vsel %vm752_vm1, %v628_v45, -inf  ;;  %v550_v12 = vpop.f32.mrf.mxu2  ;;  %v2011_v22 = vpop.f32.mrf.mxu0 }
  0xd7   :  { %v848_v53 = vmax.f32 %v846_v34, %v847_v42  ;;  %v855_v54 = vmax.f32 %v853_v35, %v854_v43  ;;  %v862_v55 = vmax.f32 %v860_v36, %v861_v44  ;;  %v842_v58 = vrot.slane %v841_v49, 1  ;;  %v599_v36 = vpop.f32.mrf.mxu3  ;;  %v2016_v37 = vpop.f32.mrf.mxu1 }
  0xd8   :  { %v866_v1 = vrot.slane %v865_v61, 4  ;;  %v872_v3 = vsel %vm752_vm1, %v668_v56, -inf  ;;  %v879_v4 = vsel %vm752_vm1, %v669_v59, -inf  ;;  %v886_v52 = vsel %vm752_vm1, %v670_v60, -inf }
  0xd9   :  { %v849_v62 = vrot.slane %v848_v53, 1  ;;  %v856_v63 = vrot.slane %v855_v54, 1  ;;  %v863_v0 = vrot.slane %v862_v55, 1  ;;  %v843_v2 = vmax.f32 %v841_v49, %v842_v58 }
  0xda   :  { %v867_v11 = vmax.f32 %v865_v61, %v866_v1  ;;  %v873_v14 = vrot.slane %v872_v3, 4  ;;  %v880_v15 = vrot.slane %v879_v4, 4  ;;  %v887_v16 = vrot.slane %v886_v52, 4 }
  0xdb   :  { %v850_v5 = vmax.f32 %v848_v53, %v849_v62  ;;  %v857_v7 = vmax.f32 %v855_v54, %v856_v63  ;;  %v864_v10 = vmax.f32 %v862_v55, %v863_v0  ;;  %v1205_v13 = vmax.f32 %v1997_v9, %v843_v2 }
  0xdc   :  { %v868_v21 = vrot.slane %v867_v11, 2  ;;  %v874_v24 = vmax.f32 %v872_v3, %v873_v14  ;;  %v881_v25 = vmax.f32 %v879_v4, %v880_v15  ;;  %v888_v26 = vmax.f32 %v886_v52, %v887_v16 }
  0xdd   :  { %v1206_v18 = vmax.f32 %v822_v38, %v850_v5  ;;  %v1207_v19 = vmax.f32 %v829_v39, %v857_v7  ;;  %v1208_v20 = vmax.f32 %v836_v48, %v864_v10  ;;  %v1237_v23 = vpack.c.bf16 %v1205_v13, %v1205_v13 }
  0xde   :  { %v551_v29 = vadd.f32 %v550_v12, %v502_v51  ;;  %v875_v32 = vrot.slane %v874_v24, 2  ;;  %v882_v9 = vrot.slane %v881_v25, 2  ;;  %v889_v33 = vrot.slane %v888_v26, 2  ;;  %v2028_v53 = vpop.f32.mrf.mxu2  ;;  %v2035_v60 = vpop.f32.mrf.mxu0 }
  0xdf   :  { %v1238_v17 = vpack.c.bf16 %v1206_v18, %v1206_v18  ;;  %v1239_v27 = vpack.c.bf16 %v1207_v19, %v1207_v19  ;;  %v1240_v28 = vpack.c.bf16 %v1208_v20, %v1208_v20  ;;  %v1301_v30 = vunpack.c.l.b16 %v1237_v23  ;;  %v2043_v15 = vpop.f32.mrf.mxu3  ;;  %v506_v16 = vpop.f32.mrf.mxu1 }
  0xe0   :  { %v2019_v39 = vmax.f32 %v867_v11, %v868_v21  ;;  %v876_v40 = vmax.f32 %v874_v24, %v875_v32  ;;  %v2022_v43 = vmax.f32 %v881_v25, %v882_v9  ;;  %v629_v44 = vmax.f32 %v597_v50, 0.0 }
  0xe1   :  { %v1302_v34 = vunpack.c.l.b16 %v1238_v17  ;;  %v1303_v35 = vunpack.c.l.b16 %v1239_v27  ;;  %v1336_v38 = vsel %vm1335_vm5, %v1301_v30, %v1334_v31  ;;  %v1304_v41 = vunpack.c.l.b16 %v1240_v28 }
  0xe2   :  { %v877_v8 = vrot.slane %v876_v40, 1  ;;  %v2025_v45 = vmax.f32 %v888_v26, %v889_v33  ;;  %v600_v46 = vadd.f32 %v599_v36, %v551_v29  ;;  %v671_v48 = vrot.slane %v629_v44, 2 }
  0xe3   :  { %v1338_v42 = vsel %vm1337_vm6, %v1302_v34, %v1336_v38  ;;  %v672_v49 = vrot.slane %v629_v44, 4  ;;  %v673_v51 = vrot.slane %v629_v44, 6  ;;  %v870_v55 = vrot.slane %v2019_v39, 1 }
  0xe4   :  { %v1340_v6 = vsel %vm1339_vm7, %v1303_v35, %v1338_v42  ;;  %v893_v56 = vsel %vm752_vm1, %v629_v44, -inf  ;;  %v900_v50 = vsel %vm752_vm1, %v671_v48, -inf  ;;  %v878_v1 = vmax.f32 %v876_v40, %v877_v8 }
  0xe5   :  { %v1342_v47 = vsel %vm1341_vm8, %v1304_v41, %v1340_v6  ;;  %v907_v58 = vsel %vm752_vm1, %v672_v49, -inf  ;;  %v914_v59 = vsel %vm752_vm1, %v673_v51, -inf  ;;  %v894_v61 = vrot.slane %v893_v56, 4 }
  0xe6   :  { %v1364_v54 = vpack.c.b16 %v1342_v47, %v1342_v47  ;;  %v901_v62 = vrot.slane %v900_v50, 4  ;;  %v908_v63 = vrot.slane %v907_v58, 4  ;;  %v915_v0 = vrot.slane %v914_v59, 4  ;;  %v555_v31 = vpop.f32.mrf.mxu2  ;;  %v459_v6 = vpop.f32.mrf.mxu0 }
  0xe7   :  { %v884_v2 = vrot.slane %v2022_v43, 1  ;;  %v891_v3 = vrot.slane %v2025_v45, 1  ;;  %v630_v4 = vmax.f32 %v600_v46, 0.0  ;;  %v895_v52 = vmax.f32 %v893_v56, %v894_v61 }
  0xe8   :  { %1372 = vst [vmem:[%s2179_s3] sm:$0xf] %v1364_v54  ;;  %v902_v5 = vmax.f32 %v900_v50, %v901_v62  ;;  %v909_v7 = vmax.f32 %v907_v58, %v908_v63  ;;  %v916_v10 = vmax.f32 %v914_v59, %v915_v0  ;;  %v871_v49 = vmax.f32 %v2019_v39, %v870_v55  ;;  %v604_v0 = vpop.f32.mrf.mxu3 }
  0xe9   :  { %v674_v11 = vrot.slane %v630_v4, 2  ;;  %v675_v12 = vrot.slane %v630_v4, 4  ;;  %v676_v13 = vrot.slane %v630_v4, 6  ;;  %v921_v14 = vsel %vm752_vm1, %v630_v4, -inf  ;;  %v508_v4 = vpop.f32.mrf.mxu1 }
  0xea   :  { %v896_v18 = vrot.slane %v895_v52, 2  ;;  %v903_v19 = vrot.slane %v902_v5, 2  ;;  %v910_v20 = vrot.slane %v909_v7, 2  ;;  %v917_v21 = vrot.slane %v916_v10, 2 }
  0xeb   :  { %v922_v23 = vrot.slane %v921_v14, 4  ;;  %v928_v24 = vsel %vm752_vm1, %v674_v11, -inf  ;;  %v935_v25 = vsel %vm752_vm1, %v675_v12, -inf  ;;  %v942_v26 = vsel %vm752_vm1, %v676_v13, -inf }
  0xec   :  { %v897_v17 = vmax.f32 %v895_v52, %v896_v18  ;;  %v904_v27 = vmax.f32 %v902_v5, %v903_v19  ;;  %v911_v28 = vmax.f32 %v909_v7, %v910_v20  ;;  %v918_v29 = vmax.f32 %v916_v10, %v917_v21 }
  0xed   :  { %v923_v30 = vmax.f32 %v921_v14, %v922_v23  ;;  %v929_v32 = vrot.slane %v928_v24, 4  ;;  %v936_v9 = vrot.slane %v935_v25, 4  ;;  %v943_v33 = vrot.slane %v942_v26, 4 }
  0xee   :  { %v898_v34 = vrot.slane %v897_v17, 1  ;;  %v905_v35 = vrot.slane %v904_v27, 1  ;;  %v912_v36 = vrot.slane %v911_v28, 1  ;;  %v919_v38 = vrot.slane %v918_v29, 1  ;;  %v557_v11 = vpop.f32.mrf.mxu2  ;;  %v462_v21 = vpop.f32.mrf.mxu0 }
  0xef   :  { %v924_v40 = vrot.slane %v923_v30, 2  ;;  %v930_v41 = vmax.f32 %v928_v24, %v929_v32  ;;  %v937_v42 = vmax.f32 %v935_v25, %v936_v9  ;;  %v944_v44 = vmax.f32 %v942_v26, %v943_v33 }
  0xf0   :  { %v899_v8 = vmax.f32 %v897_v17, %v898_v34  ;;  %v906_v46 = vmax.f32 %v904_v27, %v905_v35  ;;  %v913_v47 = vmax.f32 %v911_v28, %v912_v36  ;;  %v920_v48 = vmax.f32 %v918_v29, %v919_v38  ;;  %v606_v33 = vpop.f32.mrf.mxu3 }
  0xf1   :  { %v931_v51 = vrot.slane %v930_v41, 2  ;;  %v938_v54 = vrot.slane %v937_v42, 2  ;;  %v945_v56 = vrot.slane %v944_v44, 2  ;;  %v885_v50 = vmax.f32 %v2022_v43, %v884_v2 }
  0xf2   :  { %v892_v58 = vmax.f32 %v2025_v45, %v891_v3  ;;  %v1210_v59 = vmax.f32 %v878_v1, %v906_v46  ;;  %v1209_v61 = vmax.f32 %v871_v49, %v899_v8  ;;  %v925_v62 = vmax.f32 %v923_v30, %v924_v40 }
  0xf3   :  { %v455_v63 = vadd.f32 %v1973_v57, %v2011_v22  ;;  %v1211_v52 = vmax.f32 %v885_v50, %v913_v47  ;;  %v458_v39 = vadd.f32 %v1973_v57, %v2035_v60  ;;  %v460_v55 = vadd.f32 %v1973_v57, %v459_v6 }
  0xf4   :  { %v1212_v5 = vmax.f32 %v892_v58, %v920_v48  ;;  %v932_v7 = vmax.f32 %v930_v41, %v931_v51  ;;  %v939_v10 = vmax.f32 %v937_v42, %v938_v54  ;;  %v946_v43 = vmax.f32 %v944_v44, %v945_v56 }
  0xf5   :  { %v1242_v2 = vpack.c.bf16 %v1210_v59, %v1210_v59  ;;  %v1241_v45 = vpack.c.bf16 %v1209_v61, %v1209_v61  ;;  %v926_v1 = vrot.slane %v925_v62, 1  ;;  %v504_v3 = vadd.f32 %v2016_v37, %v455_v63 }
  0xf6   :  { %v1243_v12 = vpack.c.bf16 %v1211_v52, %v1211_v52  ;;  %v1244_v22 = vpack.c.bf16 %v1212_v5, %v1212_v5  ;;  %v507_v13 = vadd.f32 %v506_v16, %v458_v39  ;;  %v509_v14 = vadd.f32 %v508_v4, %v460_v55 }
  0xf7   :  { %v933_v18 = vrot.slane %v932_v7, 1  ;;  %v940_v19 = vrot.slane %v939_v10, 1  ;;  %v947_v20 = vrot.slane %v946_v43, 1  ;;  %v553_v60 = vadd.f32 %v2028_v53, %v504_v3  ;;  %v560_v3 = vpop.f32.mrf.mxu2 }
  0xf8   :  { %v1306_v23 = vunpack.c.l.b16 %v1242_v2  ;;  %v556_v24 = vadd.f32 %v555_v31, %v507_v13  ;;  %v558_v25 = vadd.f32 %v557_v11, %v509_v14  ;;  %v463_v26 = vadd.f32 %v1973_v57, %v462_v21  ;;  %v511_v31 = vpop.f32.mrf.mxu1  ;;  %v464_v11 = vpop.f32.mrf.mxu0 }
  0xf9   :  { %v2059_v17 = vmax.f32 %v925_v62, %v926_v1  ;;  %v602_v37 = vadd.f32 %v2043_v15, %v553_v60  ;;  %v1305_v27 = vunpack.c.l.b16 %v1241_v45  ;;  %v1307_v28 = vunpack.c.l.b16 %v1243_v12 }
  0xfa   :  { %v2062_v29 = vunpack.c.l.b16 %v1244_v22  ;;  %v605_v16 = vadd.f32 %v604_v0, %v556_v24  ;;  %v2064_v30 = vmax.f32 %v932_v7, %v933_v18  ;;  %v2066_v32 = vmax.f32 %v939_v10, %v940_v19 }
  0xfb   :  { %v2068_v53 = vmax.f32 %v946_v43, %v947_v20  ;;  %v631_v9 = vmax.f32 %v602_v37, 0.0  ;;  %v1343_v34 = vsel %vm1329_vm2, %v1306_v23, %v1305_v27  ;;  %v607_v36 = vadd.f32 %v606_v33, %v558_v25 }
  0xfc   :  { %v632_v35 = vmax.f32 %v605_v16, 0.0  ;;  %v512_v38 = vadd.f32 %v511_v31, %v463_v26  ;;  %v1344_v21 = vsel %vm1331_vm3, %v1307_v28, %v1343_v34  ;;  %v465_v25 = vadd.f32 %v1973_v57, %v464_v11 }
  0xfd   :  { %v677_v15 = vrot.slane %v631_v9, 2  ;;  %v678_v40 = vrot.slane %v631_v9, 4  ;;  %v679_v41 = vrot.slane %v631_v9, 6  ;;  %v949_v42 = vsel %vm752_vm1, %v631_v9, -inf }
  0xfe   :  { %v950_v44 = vrot.slane %v949_v42, 4  ;;  %v680_v6 = vrot.slane %v632_v35, 2  ;;  %v681_v8 = vrot.slane %v632_v35, 4  ;;  %v682_v46 = vrot.slane %v632_v35, 6 }
  0xff   :  { %v956_v47 = vsel %vm752_vm1, %v677_v15, -inf  ;;  %v963_v48 = vsel %vm752_vm1, %v678_v40, -inf  ;;  %v970_v49 = vsel %vm752_vm1, %v679_v41, -inf  ;;  %v977_v51 = vsel %vm752_vm1, %v632_v35, -inf }
 0x100   :  { %v951_v54 = vmax.f32 %v949_v42, %v950_v44  ;;  %v957_v56 = vrot.slane %v956_v47, 4  ;;  %v964_v50 = vrot.slane %v963_v48, 4  ;;  %v971_v58 = vrot.slane %v970_v49, 4  ;;  %v609_v44 = vpop.f32.mrf.mxu3  ;;  %v513_v28 = vpop.f32.mrf.mxu1 }
 0x101   :  { %v978_v59 = vrot.slane %v977_v51, 4  ;;  %v984_v61 = vsel %vm752_vm1, %v680_v6, -inf  ;;  %v991_v62 = vsel %vm752_vm1, %v681_v8, -inf  ;;  %v998_v63 = vsel %vm752_vm1, %v682_v46, -inf }
 0x102   :  { %v952_v0 = vrot.slane %v951_v54, 2  ;;  %v958_v4 = vmax.f32 %v956_v47, %v957_v56  ;;  %v965_v52 = vmax.f32 %v963_v48, %v964_v50  ;;  %v972_v5 = vmax.f32 %v970_v49, %v971_v58 }
 0x103   :  { %v979_v39 = vmax.f32 %v977_v51, %v978_v59  ;;  %v985_v55 = vrot.slane %v984_v61, 4  ;;  %v992_v7 = vrot.slane %v991_v62, 4  ;;  %v999_v10 = vrot.slane %v998_v63, 4 }
 0x104   :  { %v953_v43 = vmax.f32 %v951_v54, %v952_v0  ;;  %v959_v2 = vrot.slane %v958_v4, 2  ;;  %v966_v45 = vrot.slane %v965_v52, 2  ;;  %v973_v1 = vrot.slane %v972_v5, 2 }
 0x105   :  { %v980_v12 = vrot.slane %v979_v39, 2  ;;  %v986_v22 = vmax.f32 %v984_v61, %v985_v55  ;;  %v993_v13 = vmax.f32 %v991_v62, %v992_v7  ;;  %v1000_v14 = vmax.f32 %v998_v63, %v999_v10 }
 0x106   :  { %v954_v18 = vrot.slane %v953_v43, 1  ;;  %v960_v19 = vmax.f32 %v958_v4, %v959_v2  ;;  %v967_v20 = vmax.f32 %v965_v52, %v966_v45  ;;  %v974_v60 = vmax.f32 %v972_v5, %v973_v1 }
 0x107   :  { %v2080_v23 = vmax.f32 %v979_v39, %v980_v12  ;;  %v561_v24 = vadd.f32 %v560_v3, %v512_v38  ;;  %v987_v9 = vrot.slane %v986_v22, 2  ;;  %v994_v33 = vrot.slane %v993_v13, 2 }
 0x108   :  { %v955_v26 = vmax.f32 %v953_v43, %v954_v18  ;;  %v961_v37 = vrot.slane %v960_v19, 1  ;;  %v968_v27 = vrot.slane %v967_v20, 1  ;;  %v975_v16 = vrot.slane %v974_v60, 1 }
 0x109   :  { %v1001_v31 = vrot.slane %v1000_v14, 2  ;;  %v633_v35 = vmax.f32 %v607_v36, 0.0  ;;  %v1345_v34 = vsel %vm1333_vm4, %v2062_v29, %v1344_v21  ;;  %v982_v57 = vrot.slane %v2080_v23, 1 }
 0x10a   :  { %v962_v15 = vmax.f32 %v960_v19, %v961_v37  ;;  %v969_v40 = vmax.f32 %v967_v20, %v968_v27  ;;  %v976_v41 = vmax.f32 %v974_v60, %v975_v16  ;;  %v1213_v42 = vmax.f32 %v2059_v17, %v955_v26 }
 0x10b   :  { %v610_v38 = vadd.f32 %v609_v44, %v561_v24  ;;  %v2087_v6 = vadd.f32 %v513_v28, %v465_v25  ;;  %v2092_v48 = vmax.f32 %v986_v22, %v987_v9  ;;  %v2094_v17 = vmax.f32 %v993_v13, %v994_v33  ;;  %v562_v25 = vpop.f32.mrf.mxu2  ;;  %v467_v44 = vpop.f32.mrf.mxu0 }
 0x10c   :  { %v1214_v8 = vmax.f32 %v2064_v30, %v962_v15  ;;  %v1215_v46 = vmax.f32 %v2066_v32, %v969_v40  ;;  %v1216_v36 = vmax.f32 %v2068_v53, %v976_v41  ;;  %v1245_v47 = vpack.c.bf16 %v1213_v42, %v1213_v42 }
 0x10d   :  { %v2096_v49 = vmax.f32 %v1000_v14, %v1001_v31  ;;  %v683_v51 = vrot.slane %v633_v35, 2  ;;  %v684_v58 = vrot.slane %v633_v35, 4  ;;  %v685_v59 = vrot.slane %v633_v35, 6 }
 0x10e   :  { %v1246_v29 = vpack.c.bf16 %v1214_v8, %v1214_v8  ;;  %v1247_v54 = vpack.c.bf16 %v1215_v46, %v1215_v46  ;;  %v1248_v56 = vpack.c.bf16 %v1216_v36, %v1216_v36  ;;  %v1309_v50 = vunpack.c.l.b16 %v1245_v47 }
 0x10f   :  { %v1005_v30 = vsel %vm752_vm1, %v633_v35, -inf  ;;  %v1012_v32 = vsel %vm752_vm1, %v683_v51, -inf  ;;  %v1019_v52 = vsel %vm752_vm1, %v684_v58, -inf  ;;  %v1026_v5 = vsel %vm752_vm1, %v685_v59, -inf  ;;  %v611_v58 = vpop.f32.mrf.mxu3 }
 0x110   :  { %v1310_v61 = vunpack.c.l.b16 %v1246_v29  ;;  %v1311_v53 = vunpack.c.l.b16 %v1247_v54  ;;  %v1312_v62 = vunpack.c.l.b16 %v1248_v56  ;;  %v1346_v63 = vsel %vm1335_vm5, %v1309_v50, %v1345_v34 }
 0x111   :  { %v1006_v0 = vrot.slane %v1005_v30, 4  ;;  %v1013_v4 = vrot.slane %v1012_v32, 4  ;;  %v1020_v55 = vrot.slane %v1019_v52, 4  ;;  %v1027_v7 = vrot.slane %v1026_v5, 4 }
 0x112   :  { %v1347_v39 = vsel %vm1337_vm6, %v1310_v61, %v1346_v63  ;;  %v634_v10 = vmax.f32 %v610_v38, 0.0  ;;  %v989_v2 = vrot.slane %v2092_v48, 1  ;;  %v996_v28 = vrot.slane %v2094_v17, 1 }
 0x113   :  { %v1348_v43 = vsel %vm1339_vm7, %v1311_v53, %v1347_v39  ;;  %v1007_v45 = vmax.f32 %v1005_v30, %v1006_v0  ;;  %v1014_v1 = vmax.f32 %v1012_v32, %v1013_v4  ;;  %v1021_v11 = vmax.f32 %v1019_v52, %v1020_v55 }
 0x114   :  { %v1349_v3 = vsel %vm1341_vm8, %v1312_v62, %v1348_v43  ;;  %v1028_v12 = vmax.f32 %v1026_v5, %v1027_v7  ;;  %v686_v22 = vrot.slane %v634_v10, 2  ;;  %v687_v19 = vrot.slane %v634_v10, 4  ;;  %v516_v62 = vpop.f32.mrf.mxu1  ;;  %v565_v7 = vpop.f32.mrf.mxu2 }
 0x115   :  { %v1365_v13 = vpack.c.b16 %v1349_v3, %v1349_v3  ;;  %v1008_v14 = vrot.slane %v1007_v45, 2  ;;  %v1015_v18 = vrot.slane %v1014_v1, 2  ;;  %v1022_v20 = vrot.slane %v1021_v11, 2 }
 0x116   :  { %v1029_v60 = vrot.slane %v1028_v12, 2  ;;  %v688_v21 = vrot.slane %v634_v10, 6  ;;  %v1033_v24 = vsel %vm752_vm1, %v634_v10, -inf  ;;  %v1040_v16 = vsel %vm752_vm1, %v686_v22, -inf }
 0x117   :  { %1373 = vst [vmem:[%s2179_s3 + $0x4] sm:$0xf] %v1365_v13  ;;  %v1009_v26 = vmax.f32 %v1007_v45, %v1008_v14  ;;  %v1016_v37 = vmax.f32 %v1014_v1, %v1015_v18  ;;  %v1034_v27 = vrot.slane %v1033_v24, 4  ;;  %v1023_v9 = vmax.f32 %v1021_v11, %v1022_v20 }
 0x118   :  { %v1030_v33 = vmax.f32 %v1028_v12, %v1029_v60  ;;  %v1041_v31 = vrot.slane %v1040_v16, 4  ;;  %v1047_v35 = vsel %vm752_vm1, %v687_v19, -inf  ;;  %v1054_v8 = vsel %vm752_vm1, %v688_v21, -inf  ;;  %v614_v60 = vpop.f32.mrf.mxu3 }
 0x119   :  { %v1010_v15 = vrot.slane %v1009_v26, 1  ;;  %v1017_v40 = vrot.slane %v1016_v37, 1  ;;  %v1035_v41 = vmax.f32 %v1033_v24, %v1034_v27  ;;  %v1048_v42 = vrot.slane %v1047_v35, 4 }
 0x11a   :  { %v1024_v34 = vrot.slane %v1023_v9, 1  ;;  %v1031_v38 = vrot.slane %v1030_v33, 1  ;;  %v1003_v46 = vrot.slane %v2096_v49, 1  ;;  %v1042_v47 = vmax.f32 %v1040_v16, %v1041_v31 }
 0x11b   :  { %v1011_v36 = vmax.f32 %v1009_v26, %v1010_v15  ;;  %v563_v51 = vadd.f32 %v562_v25, %v2087_v6  ;;  %v1018_v29 = vmax.f32 %v1016_v37, %v1017_v40  ;;  %v1036_v56 = vrot.slane %v1035_v41, 2 }
 0x11c   :  { %v1025_v54 = vmax.f32 %v1023_v9, %v1024_v34  ;;  %v1049_v50 = vmax.f32 %v1047_v35, %v1048_v42  ;;  %v983_v59 = vmax.f32 %v2080_v23, %v982_v57  ;;  %v1055_v30 = vrot.slane %v1054_v8, 4  ;;  %v518_v31 = vpop.f32.mrf.mxu1 }
 0x11d   :  { %v990_v32 = vmax.f32 %v2092_v48, %v989_v2  ;;  %v997_v61 = vmax.f32 %v2094_v17, %v996_v28  ;;  %v1032_v53 = vmax.f32 %v1030_v33, %v1031_v38  ;;  %v1004_v63 = vmax.f32 %v2096_v49, %v1003_v46  ;;  %v2128_v17 = vld [vmem:[%s2178_s2] ss:$0 sm:$0xff]  ;;  %v469_v2 = vpop.f32.mrf.mxu0  ;;  %v567_v38 = vpop.f32.mrf.mxu2 }
 0x11e   :  { %v1217_v0 = vmax.f32 %v983_v59, %v1011_v36  ;;  %v1043_v6 = vrot.slane %v1042_v47, 2  ;;  %v612_v4 = vadd.f32 %v611_v58, %v563_v51  ;;  %v1037_v39 = vmax.f32 %v1035_v41, %v1036_v56 }
 0x11f   :  { %v1218_v52 = vmax.f32 %v990_v32, %v1018_v29  ;;  %v1219_v5 = vmax.f32 %v997_v61, %v1025_v54  ;;  %v1050_v55 = vrot.slane %v1049_v50, 2  ;;  %v1056_v10 = vmax.f32 %v1054_v8, %v1055_v30 }
 0x120   :  { %v2123_v43 = vmax.f32 %v1004_v63, %v1032_v53  ;;  %v1249_v23 = vpack.c.bf16 %v1217_v0, %v1217_v0  ;;  %v1044_v57 = vmax.f32 %v1042_v47, %v1043_v6  ;;  %v635_v48 = vmax.f32 %v612_v4, 0.0 }
 0x121   :  { %v468_v49 = vadd.f32 %v2128_v17, %v467_v44  ;;  %v1250_v45 = vpack.c.bf16 %v1218_v52, %v1218_v52  ;;  %v1251_v1 = vpack.c.bf16 %v1219_v5, %v1219_v5  ;;  %v1038_v3 = vrot.slane %v1037_v39, 1 }
 0x122   :  { %v1051_v11 = vmax.f32 %v1049_v50, %v1050_v55  ;;  %v1057_v12 = vrot.slane %v1056_v10, 2  ;;  %v689_v22 = vrot.slane %v635_v48, 2  ;;  %v690_v13 = vrot.slane %v635_v48, 4 }
 0x123   :  { %v691_v14 = vrot.slane %v635_v48, 6  ;;  %v1252_v18 = vpack.c.bf16 %v2123_v43, %v2123_v43  ;;  %v1061_v19 = vsel %vm752_vm1, %v635_v48, -inf  ;;  %v517_v20 = vadd.f32 %v516_v62, %v468_v49 }
 0x124   :  { %v470_v21 = vadd.f32 %v2128_v17, %v469_v2  ;;  %v1062_v24 = vrot.slane %v1061_v19, 4  ;;  %v1068_v25 = vsel %vm752_vm1, %v689_v22, -inf  ;;  %v1075_v26 = vsel %vm752_vm1, %v690_v13, -inf }
 0x125   :  { %v1082_v37 = vsel %vm752_vm1, %v691_v14, -inf  ;;  %v1069_v27 = vrot.slane %v1068_v25, 4  ;;  %v1076_v16 = vrot.slane %v1075_v26, 4  ;;  %v566_v33 = vadd.f32 %v565_v7, %v517_v20  ;;  %v472_v63 = vpop.f32.mrf.mxu0 }
 0x126   :  { %v1083_v9 = vrot.slane %v1082_v37, 4  ;;  %v1313_v35 = vunpack.c.l.b16 %v1249_v23  ;;  %v1045_v15 = vrot.slane %v1044_v57, 1  ;;  %v1058_v40 = vmax.f32 %v1056_v10, %v1057_v12  ;;  %v616_v10 = vpop.f32.mrf.mxu3  ;;  %v521_v12 = vpop.f32.mrf.mxu1 }
 0x127   :  { %v1063_v41 = vmax.f32 %v1061_v19, %v1062_v24  ;;  %v1070_v42 = vmax.f32 %v1068_v25, %v1069_v27  ;;  %v1077_v44 = vmax.f32 %v1075_v26, %v1076_v16  ;;  %v615_v34 = vadd.f32 %v614_v60, %v566_v33 }
 0x128   :  { %v1084_v28 = vmax.f32 %v1082_v37, %v1083_v9  ;;  %v1314_v8 = vunpack.c.l.b16 %v1250_v45  ;;  %v1039_v46 = vmax.f32 %v1037_v39, %v1038_v3  ;;  %v519_v47 = vadd.f32 %v518_v31, %v470_v21  ;;  %v570_v21 = vpop.f32.mrf.mxu2 }
 0x129   :  { %v1064_v36 = vrot.slane %v1063_v41, 2  ;;  %v1052_v51 = vrot.slane %v1051_v11, 1  ;;  %v1071_v29 = vrot.slane %v1070_v42, 2  ;;  %v1078_v54 = vrot.slane %v1077_v44, 2 }
 0x12a   :  { %v1085_v56 = vrot.slane %v1084_v28, 2  ;;  %v1059_v50 = vrot.slane %v1058_v40, 1  ;;  %v636_v59 = vmax.f32 %v615_v34, 0.0  ;;  %v568_v30 = vadd.f32 %v567_v38, %v519_v47 }
 0x12b   :  { %v1065_v58 = vmax.f32 %v1063_v41, %v1064_v36  ;;  %v1315_v32 = vunpack.c.l.b16 %v1251_v1  ;;  %v1072_v61 = vmax.f32 %v1070_v42, %v1071_v29  ;;  %v1079_v53 = vmax.f32 %v1077_v44, %v1078_v54 }
 0x12c   :  { %v1086_v62 = vmax.f32 %v1084_v28, %v1085_v56  ;;  %v1350_v0 = vsel %vm1329_vm2, %v1314_v8, %v1313_v35  ;;  %v1046_v6 = vmax.f32 %v1044_v57, %v1045_v15  ;;  %v473_v52 = vadd.f32 %v2128_v17, %v472_v63 }
 0x12d   :  { %v1066_v4 = vrot.slane %v1065_v58, 1  ;;  %v1053_v5 = vmax.f32 %v1051_v11, %v1052_v51  ;;  %v1073_v39 = vrot.slane %v1072_v61, 1  ;;  %v1080_v55 = vrot.slane %v1079_v53, 1 }
 0x12e   :  { %v1087_v7 = vrot.slane %v1086_v62, 1  ;;  %v1060_v43 = vmax.f32 %v1058_v40, %v1059_v50  ;;  %v692_v48 = vrot.slane %v636_v59, 2  ;;  %v617_v49 = vadd.f32 %v616_v10, %v568_v30  ;;  %v619_v47 = vpop.f32.mrf.mxu3 }
 0x12f   :  { %v1067_v23 = vmax.f32 %v1065_v58, %v1066_v4  ;;  %v1074_v2 = vmax.f32 %v1072_v61, %v1073_v39  ;;  %v1081_v45 = vmax.f32 %v1079_v53, %v1080_v55  ;;  %v693_v3 = vrot.slane %v636_v59, 4 }
 0x130   :  { %v1088_v1 = vmax.f32 %v1086_v62, %v1087_v7  ;;  %v1316_v22 = vunpack.c.l.b16 %v1252_v18  ;;  %v1351_v57 = vsel %vm1331_vm3, %v1315_v32, %v1350_v0  ;;  %v522_v14 = vadd.f32 %v521_v12, %v473_v52  ;;  %v474_v62 = vpop.f32.mrf.mxu0 }
 0x131   :  { %v1221_v13 = vmax.f32 %v1039_v46, %v1067_v23  ;;  %v1222_v19 = vmax.f32 %v1046_v6, %v1074_v2  ;;  %v1223_v11 = vmax.f32 %v1053_v5, %v1081_v45  ;;  %v694_v60 = vrot.slane %v636_v59, 6 }
 0x132   :  { %v1224_v20 = vmax.f32 %v1060_v43, %v1088_v1  ;;  %v1089_v25 = vsel %vm752_vm1, %v636_v59, -inf  ;;  %v1096_v26 = vsel %vm752_vm1, %v692_v48, -inf  ;;  %v637_v37 = vmax.f32 %v617_v49, 0.0 }
 0x133   :  { %v1253_v24 = vpack.c.bf16 %v1221_v13, %v1221_v13  ;;  %v1254_v27 = vpack.c.bf16 %v1222_v19, %v1222_v19  ;;  %v1255_v16 = vpack.c.bf16 %v1223_v11, %v1223_v11  ;;  %v1103_v18 = vsel %vm752_vm1, %v693_v3, -inf  ;;  %v523_v19 = vpop.f32.mrf.mxu1  ;;  %v572_v11 = vpop.f32.mrf.mxu2 }
 0x134   :  { %v1256_v9 = vpack.c.bf16 %v1224_v20, %v1224_v20  ;;  %v571_v31 = vadd.f32 %v570_v21, %v522_v14  ;;  %v1352_v35 = vsel %vm1333_vm4, %v1316_v22, %v1351_v57  ;;  %v1110_v41 = vsel %vm752_vm1, %v694_v60, -inf }
 0x135   :  { %v1317_v33 = vunpack.c.l.b16 %v1253_v24  ;;  %v1318_v15 = vunpack.c.l.b16 %v1254_v27  ;;  %v1319_v40 = vunpack.c.l.b16 %v1255_v16  ;;  %v1090_v44 = vrot.slane %v1089_v25, 4 }
 0x136   :  { %v1097_v28 = vrot.slane %v1096_v26, 4  ;;  %v1104_v34 = vrot.slane %v1103_v18, 4  ;;  %v1320_v38 = vunpack.c.l.b16 %v1256_v9  ;;  %v695_v46 = vrot.slane %v637_v37, 2 }
 0x137   :  { %v1353_v42 = vsel %vm1335_vm5, %v1317_v33, %v1352_v35  ;;  %v696_v36 = vrot.slane %v637_v37, 4  ;;  %v1111_v29 = vrot.slane %v1110_v41, 4  ;;  %v620_v54 = vadd.f32 %v619_v47, %v571_v31 }
 0x138   :  { %v1354_v8 = vsel %vm1337_vm6, %v1318_v15, %v1353_v42  ;;  %v697_v50 = vrot.slane %v637_v37, 6  ;;  %v1117_v58 = vsel %vm752_vm1, %v637_v37, -inf  ;;  %v1124_v59 = vsel %vm752_vm1, %v695_v46, -inf }
 0x139   :  { %v1355_v51 = vsel %vm1339_vm7, %v1319_v40, %v1354_v8  ;;  %v1091_v32 = vmax.f32 %v1089_v25, %v1090_v44  ;;  %v1098_v61 = vmax.f32 %v1096_v26, %v1097_v28  ;;  %v1105_v53 = vmax.f32 %v1103_v18, %v1104_v34  ;;  %v621_v8 = vpop.f32.mrf.mxu3 }
 0x13a   :  { %v1356_v56 = vsel %vm1341_vm8, %v1320_v38, %v1355_v51  ;;  %v1118_v63 = vrot.slane %v1117_v58, 4  ;;  %v1125_v0 = vrot.slane %v1124_v59, 4  ;;  %v1131_v6 = vsel %vm752_vm1, %v696_v36, -inf }
 0x13b   :  { %v1366_v30 = vpack.c.b16 %v1356_v56, %v1356_v56  ;;  %v1138_v4 = vsel %vm752_vm1, %v697_v50, -inf  ;;  %v1112_v52 = vmax.f32 %v1110_v41, %v1111_v29  ;;  %v1132_v5 = vrot.slane %v1131_v6, 4 }
 0x13c   :  { %v1139_v39 = vrot.slane %v1138_v4, 4  ;;  %v638_v55 = vmax.f32 %v620_v54, 0.0  ;;  %v1119_v7 = vmax.f32 %v1117_v58, %v1118_v63  ;;  %v1126_v10 = vmax.f32 %v1124_v59, %v1125_v0 }
 0x13d   :  { %1374 = vst [vmem:[%s2179_s3 + $0x8] sm:$0xf] %v1366_v30  ;;  %v475_v43 = vadd.f32 %v2128_v17, %v474_v62  ;;  %v1133_v23 = vmax.f32 %v1131_v6, %v1132_v5  ;;  %v1092_v45 = vrot.slane %v1091_v32, 2  ;;  %v1099_v1 = vrot.slane %v1098_v61, 2 }
 0x13e   :  { %v1140_v48 = vmax.f32 %v1138_v4, %v1139_v39  ;;  %v698_v49 = vrot.slane %v638_v55, 2  ;;  %v699_v2 = vrot.slane %v638_v55, 4  ;;  %v1120_v3 = vrot.slane %v1119_v7, 2 }
 0x13f   :  { %v1127_v12 = vrot.slane %v1126_v10, 2  ;;  %v1106_v22 = vrot.slane %v1105_v53, 2  ;;  %v1113_v57 = vrot.slane %v1112_v52, 2  ;;  %v700_v13 = vrot.slane %v638_v55, 6 }
 0x140   :  { %v1145_v14 = vsel %vm752_vm1, %v638_v55, -inf  ;;  %v1134_v20 = vrot.slane %v1133_v23, 2  ;;  %v1141_v60 = vrot.slane %v1140_v48, 2  ;;  %v524_v21 = vadd.f32 %v523_v19, %v475_v43 }
 0x141   :  { %v1128_v24 = vmax.f32 %v1126_v10, %v1127_v12  ;;  %v1152_v17 = vsel %vm752_vm1, %v698_v49, -inf  ;;  %v1159_v25 = vsel %vm752_vm1, %v699_v2, -inf  ;;  %v1093_v26 = vmax.f32 %v1091_v32, %v1092_v45 }
 0x142   :  { %v1121_v37 = vmax.f32 %v1119_v7, %v1120_v3  ;;  %v1146_v27 = vrot.slane %v1145_v14, 4  ;;  %v573_v16 = vadd.f32 %v572_v11, %v524_v21  ;;  %v1100_v9 = vmax.f32 %v1098_v61, %v1099_v1 }
 0x143   :  { %v1107_v18 = vmax.f32 %v1105_v53, %v1106_v22  ;;  %v1114_v33 = vmax.f32 %v1112_v52, %v1113_v57  ;;  %v1166_v31 = vsel %vm752_vm1, %v700_v13, -inf  ;;  %v1135_v35 = vmax.f32 %v1133_v23, %v1134_v20 }
 0x144   :  { %v1142_v15 = vmax.f32 %v1140_v48, %v1141_v60  ;;  %v1153_v40 = vrot.slane %v1152_v17, 4  ;;  %v1160_v41 = vrot.slane %v1159_v25, 4  ;;  %v1129_v42 = vrot.slane %v1128_v24, 1 }
 0x145   :  { %v1094_v44 = vrot.slane %v1093_v26, 1  ;;  %v1122_v28 = vrot.slane %v1121_v37, 1  ;;  %v1147_v34 = vmax.f32 %v1145_v14, %v1146_v27  ;;  %v1167_v38 = vrot.slane %v1166_v31, 4 }
 0x146   :  { %v1101_v46 = vrot.slane %v1100_v9, 1  ;;  %v1108_v36 = vrot.slane %v1107_v18, 1  ;;  %v1115_v47 = vrot.slane %v1114_v33, 1  ;;  %v622_v51 = vadd.f32 %v621_v8, %v573_v16 }
 0x147   :  { %v1136_v29 = vrot.slane %v1135_v35, 1  ;;  %v1143_v54 = vrot.slane %v1142_v15, 1  ;;  %v1154_v56 = vmax.f32 %v1152_v17, %v1153_v40  ;;  %v1161_v50 = vmax.f32 %v1159_v25, %v1160_v41 }
 0x148   :  { %v1130_v58 = vmax.f32 %v1128_v24, %v1129_v42  ;;  %v1095_v59 = vmax.f32 %v1093_v26, %v1094_v44  ;;  %v1123_v30 = vmax.f32 %v1121_v37, %v1122_v28  ;;  %v1148_v32 = vrot.slane %v1147_v34, 2 }
 0x149   :  { %v1168_v61 = vmax.f32 %v1166_v31, %v1167_v38  ;;  %v1102_v53 = vmax.f32 %v1100_v9, %v1101_v46  ;;  %v1109_v62 = vmax.f32 %v1107_v18, %v1108_v36  ;;  %v1116_v63 = vmax.f32 %v1114_v33, %v1115_v47 }
 0x14a   :  { %v639_v0 = vmax.f32 %v622_v51, 0.0  ;;  %v1137_v6 = vmax.f32 %v1135_v35, %v1136_v29  ;;  %v1144_v4 = vmax.f32 %v1142_v15, %v1143_v54  ;;  %v1155_v52 = vrot.slane %v1154_v56, 2 }
 0x14b   :  { %v1162_v5 = vrot.slane %v1161_v50, 2  ;;  %v1226_v39 = vmax.f32 %v1102_v53, %v1130_v58  ;;  %v1225_v43 = vmax.f32 %v1095_v59, %v1123_v30  ;;  %v1149_v23 = vmax.f32 %v1147_v34, %v1148_v32 }
 0x14c   :  { %v701_v55 = vrot.slane %v639_v0, 2  ;;  %v702_v7 = vrot.slane %v639_v0, 4  ;;  %v703_v10 = vrot.slane %v639_v0, 6  ;;  %v1169_v48 = vrot.slane %v1168_v61, 2 }
 0x14d   :  { %v1173_v49 = vsel %vm752_vm1, %v639_v0, -inf  ;;  %v1156_v12 = vmax.f32 %v1154_v56, %v1155_v52  ;;  %v1227_v14 = vmax.f32 %v1109_v62, %v1137_v6  ;;  %v1258_v19 = vpack.c.bf16 %v1226_v39, %v1226_v39 }
 0x14e   :  { %v1174_v2 = vrot.slane %v1173_v49, 4  ;;  %v1180_v45 = vsel %vm752_vm1, %v701_v55, -inf  ;;  %v1187_v1 = vsel %vm752_vm1, %v702_v7, -inf  ;;  %v1194_v3 = vsel %vm752_vm1, %v703_v10, -inf }
 0x14f   :  { %v1181_v22 = vrot.slane %v1180_v45, 4  ;;  %v1188_v57 = vrot.slane %v1187_v1, 4  ;;  %v1195_v13 = vrot.slane %v1194_v3, 4  ;;  %v1163_v11 = vmax.f32 %v1161_v50, %v1162_v5 }
 0x150   :  { %v1175_v20 = vmax.f32 %v1173_v49, %v1174_v2  ;;  %v1170_v60 = vmax.f32 %v1168_v61, %v1169_v48  ;;  %v1228_v25 = vmax.f32 %v1116_v63, %v1144_v4  ;;  %v1257_v26 = vpack.c.bf16 %v1225_v43, %v1225_v43 }
 0x151   :  { %v1182_v21 = vmax.f32 %v1180_v45, %v1181_v22  ;;  %v1189_v24 = vmax.f32 %v1187_v1, %v1188_v57  ;;  %v1196_v17 = vmax.f32 %v1194_v3, %v1195_v13  ;;  %v1150_v37 = vrot.slane %v1149_v23, 1 }
 0x152   :  { %v1176_v27 = vrot.slane %v1175_v20, 2  ;;  %v1157_v16 = vrot.slane %v1156_v12, 1  ;;  %v1259_v31 = vpack.c.bf16 %v1227_v14, %v1227_v14  ;;  %v1322_v35 = vunpack.c.l.b16 %v1258_v19 }
 0x153   :  { %v1183_v9 = vrot.slane %v1182_v21, 2  ;;  %v1190_v18 = vrot.slane %v1189_v24, 2  ;;  %v1197_v33 = vrot.slane %v1196_v17, 2  ;;  %v1164_v15 = vrot.slane %v1163_v11, 1 }
 0x154   :  { %v1177_v40 = vmax.f32 %v1175_v20, %v1176_v27  ;;  %v1171_v41 = vrot.slane %v1170_v60, 1  ;;  %v1260_v34 = vpack.c.bf16 %v1228_v25, %v1228_v25  ;;  %v1321_v38 = vunpack.c.l.b16 %v1257_v26 }
 0x155   :  { %v1184_v42 = vmax.f32 %v1182_v21, %v1183_v9  ;;  %v1191_v44 = vmax.f32 %v1189_v24, %v1190_v18  ;;  %v1198_v28 = vmax.f32 %v1196_v17, %v1197_v33  ;;  %v1151_v8 = vmax.f32 %v1149_v23, %v1150_v37 }
 0x156   :  { %v1178_v46 = vrot.slane %v1177_v40, 1  ;;  %v1158_v36 = vmax.f32 %v1156_v12, %v1157_v16  ;;  %v1323_v54 = vunpack.c.l.b16 %v1259_v31  ;;  %v1357_v56 = vsel %vm1329_vm2, %v1322_v35, %v1321_v38 }
 0x157   :  { %v1185_v47 = vrot.slane %v1184_v42, 1  ;;  %v1192_v51 = vrot.slane %v1191_v44, 1  ;;  %v1199_v29 = vrot.slane %v1198_v28, 1  ;;  %v1165_v50 = vmax.f32 %v1163_v11, %v1164_v15 }
 0x158   :  { %v1179_v58 = vmax.f32 %v1177_v40, %v1178_v46  ;;  %v1172_v59 = vmax.f32 %v1170_v60, %v1171_v41  ;;  %v1358_v6 = vsel %vm1331_vm3, %v1323_v54, %v1357_v56  ;;  %v1324_v52 = vunpack.c.l.b16 %v1260_v34 }
 0x159   :  { %v1186_v30 = vmax.f32 %v1184_v42, %v1185_v47  ;;  %v1193_v32 = vmax.f32 %v1191_v44, %v1192_v51  ;;  %v1200_v61 = vmax.f32 %v1198_v28, %v1199_v29 }
 0x15a   :  { %v1229_v53 = vmax.f32 %v1151_v8, %v1179_v58  ;;  %v1359_v10 = vsel %vm1333_vm4, %v1324_v52, %v1358_v6 }
 0x15b   :  { %v1230_v62 = vmax.f32 %v1158_v36, %v1186_v30  ;;  %v1231_v63 = vmax.f32 %v1165_v50, %v1193_v32  ;;  %v1232_v0 = vmax.f32 %v1172_v59, %v1200_v61 }
 0x15c   :  { %v1261_v4 = vpack.c.bf16 %v1229_v53, %v1229_v53 }
 0x15d   :  { %v1262_v5 = vpack.c.bf16 %v1230_v62, %v1230_v62  ;;  %v1263_v39 = vpack.c.bf16 %v1231_v63, %v1231_v63  ;;  %v1264_v55 = vpack.c.bf16 %v1232_v0, %v1232_v0 }
 0x15e   :  { %v1325_v7 = vunpack.c.l.b16 %v1261_v4 }
 0x15f   :  { %v1326_v43 = vunpack.c.l.b16 %v1262_v5  ;;  %v1327_v23 = vunpack.c.l.b16 %v1263_v39  ;;  %v1328_v49 = vunpack.c.l.b16 %v1264_v55 }
 0x160   :  { %v1360_v48 = vsel %vm1335_vm5, %v1325_v7, %v1359_v10 }
 0x161   :  { %v1361_v2 = vsel %vm1337_vm6, %v1326_v43, %v1360_v48 }
 0x162   :  { %v1362_v45 = vsel %vm1339_vm7, %v1327_v23, %v1361_v2 }
 0x163   :  { %v1363_v1 = vsel %vm1341_vm8, %v1328_v49, %v1362_v45 }
 0x164   :  { %v1367_v3 = vpack.c.b16 %v1363_v1, %v1363_v1 }
 0x166   :  { %1375 = vst [vmem:[%s2179_s3 + $0xc] sm:$0xf] %v1367_v3 }

// kernel: model_forward.3
= control target key start
LH: loop header
LB: loop body
LE: loop exit
PB: predicated region body
PF: predicated region fallthrough
CT: control target
= control target key end

     0   :  { %vm539_vm0 = vcmask 261120   ;;  %vm2277_vm1 = vcmask 1041408   ;;  %vm7462_vm2 = vcmask 1041409   ;;  %vm7464_vm3 = vcmask 1042434   ;;  %s11044_s1 = inlined_call_operand.vmem [shape: bf16[32,128], index: 1, kind: input, shape index: {}]   ;;  %s11045_s0 = inlined_call_operand.vmem [shape: bf16[1152,32], index: 0, kind: input, shape index: {}]   ;;  %s11046_s2 = inlined_call_operand.vmem [shape: f32[1,128], index: 2, kind: input, shape index: {}]   ;;  %s11047_s3 = inlined_call_operand.vmem [shape: bf16[288,128], index: 3, kind: output, shape index: {}]  }
   0x1   :  { %v8274_v0 = vld [vmem:[%s11044_s1 + $0x8] sm:$0xff]  ;;  %v8273_v1 = vld [vmem:[%s11044_s1] sm:$0xff]  ;;  %v8219_v3 = vld [vmem:[%s11045_s0 + $0x90] sm:$0xff]  ;;  %vm7466_vm4 = vcmask 1043459   ;;  %vm7468_vm5 = vcmask 1044484   ;;  %vm7470_vm6 = vcmask 1045509  }
   0x2   :  { %762 = vmatpush.bf16.msra.mxu0 %v8274_v0  ;;  %8275 = vmatpush.bf16.msra.mxu1 %v8274_v0  ;;  %v8201_v2 = vld [vmem:[%s11045_s0] sm:$0xff]  ;;  %v8255_v5 = vld [vmem:[%s11045_s0 + $0x1b0] sm:$0xff]  ;;  %v8202_v6 = vld [vmem:[%s11045_s0 + $0x8] sm:$0xff]  ;;  %vm7472_vm7 = vcmask 1046534   ;;  %vm7474_vm8 = vcmask 1047559  }
   0x3   :  { %8276 = vmatpush.bf16.msra.mxu2 %v8274_v0  ;;  %8277 = vmatpush.bf16.msra.mxu3 %v8274_v0  ;;  %v8237_v4 = vld [vmem:[%s11045_s0 + $0x120] sm:$0xff]  ;;  %v8220_v7 = vld [vmem:[%s11045_s0 + $0x98] sm:$0xff]  ;;  %v8238_v8 = vld [vmem:[%s11045_s0 + $0x128] sm:$0xff] }
   0x4   :  { %v8256_v9 = vld [vmem:[%s11045_s0 + $0x1b8] sm:$0xff]  ;;  %v8203_v10 = vld [vmem:[%s11045_s0 + $0x10] sm:$0xff]  ;;  %v8221_v11 = vld [vmem:[%s11045_s0 + $0xa0] sm:$0xff] }
   0x5   :  { %v8239_v12 = vld [vmem:[%s11045_s0 + $0x130] sm:$0xff]  ;;  %v8257_v13 = vld [vmem:[%s11045_s0 + $0x1c0] sm:$0xff]  ;;  %v8204_v14 = vld [vmem:[%s11045_s0 + $0x18] sm:$0xff] }
   0x6   :  { %763 = vmatpush.bf16.msra.mxu0 %v8273_v1  ;;  %8278 = vmatpush.bf16.msra.mxu1 %v8273_v1  ;;  %v8222_v15 = vld [vmem:[%s11045_s0 + $0xa8] sm:$0xff]  ;;  %v8240_v16 = vld [vmem:[%s11045_s0 + $0x138] sm:$0xff]  ;;  %v8205_v18 = vld [vmem:[%s11045_s0 + $0x20] sm:$0xff] }
   0x7   :  { %8279 = vmatpush.bf16.msra.mxu2 %v8273_v1  ;;  %8280 = vmatpush.bf16.msra.mxu3 %v8273_v1  ;;  %v8258_v17 = vld [vmem:[%s11045_s0 + $0x1c8] sm:$0xff]  ;;  %v8223_v19 = vld [vmem:[%s11045_s0 + $0xb0] sm:$0xff]  ;;  %v8241_v20 = vld [vmem:[%s11045_s0 + $0x140] sm:$0xff] }
   0x8   :  { %v8259_v21 = vld [vmem:[%s11045_s0 + $0x1d0] sm:$0xff]  ;;  %v8206_v22 = vld [vmem:[%s11045_s0 + $0x28] sm:$0xff]  ;;  %v8224_v23 = vld [vmem:[%s11045_s0 + $0xb8] sm:$0xff] }
   0x9   :  { %8129 = vmatmul.msk.bf16.vlgmr.msra.gmra.mxu0 %vm539_vm0, %v8201_v2  ;;  %8147 = vmatmul.msk.bf16.vlgmr.msra.gmra.mxu1 %vm539_vm0, %v8219_v3  ;;  %v8242_v24 = vld [vmem:[%s11045_s0 + $0x148] sm:$0xff]  ;;  %v8260_v25 = vld [vmem:[%s11045_s0 + $0x1d8] sm:$0xff]  ;;  %v8207_v26 = vld [vmem:[%s11045_s0 + $0x30] sm:$0xff] }
   0xa   :  { %8165 = vmatmul.msk.bf16.vlgmr.msra.gmra.mxu2 %vm539_vm0, %v8237_v4  ;;  %8183 = vmatmul.msk.bf16.vlgmr.msra.gmra.mxu3 %vm539_vm0, %v8255_v5  ;;  %v8225_v27 = vld [vmem:[%s11045_s0 + $0xc0] sm:$0xff]  ;;  %v8243_v28 = vld [vmem:[%s11045_s0 + $0x150] sm:$0xff]  ;;  %v8208_v30 = vld [vmem:[%s11045_s0 + $0x38] sm:$0xff] }
   0xb   :  { %v8261_v29 = vld [vmem:[%s11045_s0 + $0x1e0] sm:$0xff]  ;;  %v8226_v31 = vld [vmem:[%s11045_s0 + $0xc8] sm:$0xff]  ;;  %v8244_v32 = vld [vmem:[%s11045_s0 + $0x158] sm:$0xff] }
   0xc   :  { %v8262_v33 = vld [vmem:[%s11045_s0 + $0x1e8] sm:$0xff]  ;;  %v8449_v34 = vld [vmem:[%s11046_s2] ss:$0 sm:$0xff]  ;;  %v8227_v36 = vld [vmem:[%s11045_s0 + $0xd0] sm:$0xff] }
   0xd   :  { %v8209_v35 = vld [vmem:[%s11045_s0 + $0x40] sm:$0xff]  ;;  %v8263_v40 = vld [vmem:[%s11045_s0 + $0x1f0] sm:$0xff] }
   0xe   :  { %v8245_v39 = vld [vmem:[%s11045_s0 + $0x160] sm:$0xff] }
  0x19   :  { %8130 = vmatmul.msk.bf16.gmra.mxu0 %vm539_vm0, %v8202_v6  ;;  %8148 = vmatmul.msk.bf16.gmra.mxu1 %vm539_vm0, %v8220_v7 }
  0x1a   :  { %8166 = vmatmul.msk.bf16.gmra.mxu2 %vm539_vm0, %v8238_v8  ;;  %8184 = vmatmul.msk.bf16.gmra.mxu3 %vm539_vm0, %v8256_v9 }
  0x29   :  { %8131 = vmatmul.msk.bf16.gmra.mxu0 %vm539_vm0, %v8203_v10  ;;  %8149 = vmatmul.msk.bf16.gmra.mxu1 %vm539_vm0, %v8221_v11 }
  0x2a   :  { %8167 = vmatmul.msk.bf16.gmra.mxu2 %vm539_vm0, %v8239_v12  ;;  %8185 = vmatmul.msk.bf16.gmra.mxu3 %vm539_vm0, %v8257_v13 }
  0x39   :  { %8132 = vmatmul.msk.bf16.gmra.mxu0 %vm539_vm0, %v8204_v14  ;;  %8150 = vmatmul.msk.bf16.gmra.mxu1 %vm539_vm0, %v8222_v15 }
  0x3a   :  { %8168 = vmatmul.msk.bf16.gmra.mxu2 %vm539_vm0, %v8240_v16  ;;  %8186 = vmatmul.msk.bf16.gmra.mxu3 %vm539_vm0, %v8258_v17 }
  0x49   :  { %8133 = vmatmul.msk.bf16.gmra.mxu0 %vm539_vm0, %v8205_v18  ;;  %8151 = vmatmul.msk.bf16.gmra.mxu1 %vm539_vm0, %v8223_v19 }
  0x4a   :  { %8169 = vmatmul.msk.bf16.gmra.mxu2 %vm539_vm0, %v8241_v20  ;;  %8187 = vmatmul.msk.bf16.gmra.mxu3 %vm539_vm0, %v8259_v21 }
  0x59   :  { %8134 = vmatmul.msk.bf16.gmra.mxu0 %vm539_vm0, %v8206_v22  ;;  %8152 = vmatmul.msk.bf16.gmra.mxu1 %vm539_vm0, %v8224_v23 }
  0x5a   :  { %8170 = vmatmul.msk.bf16.gmra.mxu2 %vm539_vm0, %v8242_v24  ;;  %8188 = vmatmul.msk.bf16.gmra.mxu3 %vm539_vm0, %v8260_v25 }
  0x69   :  { %8135 = vmatmul.msk.bf16.gmra.mxu0 %vm539_vm0, %v8207_v26  ;;  %8153 = vmatmul.msk.bf16.gmra.mxu1 %vm539_vm0, %v8225_v27 }
  0x6a   :  { %8171 = vmatmul.msk.bf16.gmra.mxu2 %vm539_vm0, %v8243_v28  ;;  %8189 = vmatmul.msk.bf16.gmra.mxu3 %vm539_vm0, %v8261_v29 }
  0x79   :  { %8136 = vmatmul.msk.bf16.gmra.mxu0 %vm539_vm0, %v8208_v30  ;;  %8154 = vmatmul.msk.bf16.gmra.mxu1 %vm539_vm0, %v8226_v31 }
  0x7a   :  { %8172 = vmatmul.msk.bf16.gmra.mxu2 %vm539_vm0, %v8244_v32  ;;  %8190 = vmatmul.msk.bf16.gmra.mxu3 %vm539_vm0, %v8262_v33 }
  0x86   :  { %v765_v37 = vpop.f32.mrf.mxu0  ;;  %v855_v38 = vpop.f32.mrf.mxu1 }
  0x87   :  { %v766_v41 = vadd.f32 %v8449_v34, %v765_v37  ;;  %v856_v42 = vadd.f32 %v8449_v34, %v855_v38 }
  0x89   :  { %v1125_v43 = vmax.f32 %v766_v41, 0.0  ;;  %v1161_v44 = vmax.f32 %v856_v42, 0.0  ;;  %8137 = vmatmul.msk.bf16.gmra.mxu0 %vm539_vm0, %v8209_v35  ;;  %8155 = vmatmul.msk.bf16.gmra.mxu1 %vm539_vm0, %v8227_v36 }
  0x8a   :  { %8173 = vmatmul.msk.bf16.gmra.mxu2 %vm539_vm0, %v8245_v39  ;;  %8191 = vmatmul.msk.bf16.gmra.mxu3 %vm539_vm0, %v8263_v40 }
  0x8b   :  { %v1413_v45 = vrot.slane %v1125_v43, 2  ;;  %v1414_v46 = vrot.slane %v1125_v43, 4  ;;  %v1415_v47 = vrot.slane %v1125_v43, 6  ;;  %v2278_v48 = vsel %vm2277_vm1, %v1125_v43, -inf }
  0x8c   :  { %v2279_v49 = vrot.slane %v2278_v48, 4  ;;  %v1521_v50 = vrot.slane %v1161_v44, 2  ;;  %v1522_v51 = vrot.slane %v1161_v44, 4  ;;  %v1523_v52 = vrot.slane %v1161_v44, 6 }
  0x8d   :  { %v2285_v53 = vsel %vm2277_vm1, %v1413_v45, -inf  ;;  %v2292_v54 = vsel %vm2277_vm1, %v1414_v46, -inf  ;;  %v2299_v55 = vsel %vm2277_vm1, %v1415_v47, -inf  ;;  %v3286_v56 = vsel %vm2277_vm1, %v1161_v44, -inf  ;;  %v945_v5 = vpop.f32.mrf.mxu2  ;;  %v1035_v33 = vpop.f32.mrf.mxu3 }
  0x8e   :  { %v2280_v57 = vmax.f32 %v2278_v48, %v2279_v49  ;;  %v2286_v58 = vrot.slane %v2285_v53, 4  ;;  %v2293_v59 = vrot.slane %v2292_v54, 4  ;;  %v2300_v60 = vrot.slane %v2299_v55, 4  ;;  %v767_v35 = vpop.f32.mrf.mxu0  ;;  %v857_v38 = vpop.f32.mrf.mxu1 }
  0x8f   :  { %v3287_v61 = vrot.slane %v3286_v56, 4  ;;  %v3293_v62 = vsel %vm2277_vm1, %v1521_v50, -inf  ;;  %v3300_v63 = vsel %vm2277_vm1, %v1522_v51, -inf  ;;  %v3307_v0 = vsel %vm2277_vm1, %v1523_v52, -inf }
  0x90   :  { %v2281_v1 = vrot.slane %v2280_v57, 2  ;;  %v2287_v2 = vmax.f32 %v2285_v53, %v2286_v58  ;;  %v2294_v3 = vmax.f32 %v2292_v54, %v2293_v59  ;;  %v2301_v4 = vmax.f32 %v2299_v55, %v2300_v60 }
  0x91   :  { %v3288_v6 = vmax.f32 %v3286_v56, %v3287_v61  ;;  %v3294_v7 = vrot.slane %v3293_v62, 4  ;;  %v3301_v8 = vrot.slane %v3300_v63, 4  ;;  %v3308_v9 = vrot.slane %v3307_v0, 4 }
  0x92   :  { %v2282_v10 = vmax.f32 %v2280_v57, %v2281_v1  ;;  %v2288_v11 = vrot.slane %v2287_v2, 2  ;;  %v2295_v12 = vrot.slane %v2294_v3, 2  ;;  %v2302_v13 = vrot.slane %v2301_v4, 2 }
  0x93   :  { %v3289_v14 = vrot.slane %v3288_v6, 2  ;;  %v3295_v15 = vmax.f32 %v3293_v62, %v3294_v7  ;;  %v3302_v16 = vmax.f32 %v3300_v63, %v3301_v8  ;;  %v3309_v17 = vmax.f32 %v3307_v0, %v3308_v9 }
  0x94   :  { %v2283_v18 = vrot.slane %v2282_v10, 1  ;;  %v2289_v19 = vmax.f32 %v2287_v2, %v2288_v11  ;;  %v2296_v20 = vmax.f32 %v2294_v3, %v2295_v12  ;;  %v2303_v21 = vmax.f32 %v2301_v4, %v2302_v13 }
  0x95   :  { %v3290_v22 = vmax.f32 %v3288_v6, %v3289_v14  ;;  %v3296_v23 = vrot.slane %v3295_v15, 2  ;;  %v3303_v24 = vrot.slane %v3302_v16, 2  ;;  %v3310_v25 = vrot.slane %v3309_v17, 2  ;;  %v947_v47 = vpop.f32.mrf.mxu2 }
  0x96   :  { %v2290_v26 = vrot.slane %v2289_v19, 1  ;;  %v2297_v27 = vrot.slane %v2296_v20, 1  ;;  %v2304_v28 = vrot.slane %v2303_v21, 1  ;;  %v8479_v36 = vmax.f32 %v2282_v10, %v2283_v18 }
  0x97   :  { %v3291_v29 = vrot.slane %v3290_v22, 1  ;;  %v3297_v30 = vmax.f32 %v3295_v15, %v3296_v23  ;;  %v3304_v31 = vmax.f32 %v3302_v16, %v3303_v24  ;;  %v8477_v32 = vmax.f32 %v3309_v17, %v3310_v25 }
  0x98   :  { %v946_v37 = vadd.f32 %v8449_v34, %v945_v5  ;;  %v8482_v39 = vmax.f32 %v2289_v19, %v2290_v26  ;;  %v8484_v40 = vmax.f32 %v2296_v20, %v2297_v27  ;;  %v8486_v43 = vmax.f32 %v2303_v21, %v2304_v28 }
  0x99   :  { %v3298_v41 = vrot.slane %v3297_v30, 1  ;;  %v3305_v42 = vrot.slane %v3304_v31, 1  ;;  %v1036_v45 = vadd.f32 %v8449_v34, %v1035_v33  ;;  %v768_v46 = vadd.f32 %v8449_v34, %v767_v35 }
  0x9a   :  { %v1197_v44 = vmax.f32 %v946_v37, 0.0  ;;  %v8490_v48 = vmax.f32 %v3290_v22, %v3291_v29  ;;  %v3312_v50 = vrot.slane %v8477_v32, 1  ;;  %v858_v51 = vadd.f32 %v8449_v34, %v857_v38 }
  0x9b   :  { %v8492_v49 = vmax.f32 %v3297_v30, %v3298_v41  ;;  %v8497_v56 = vmax.f32 %v3304_v31, %v3305_v42  ;;  %v1233_v58 = vmax.f32 %v1036_v45, 0.0  ;;  %v948_v59 = vadd.f32 %v8449_v34, %v947_v47 }
  0x9c   :  { %v1629_v52 = vrot.slane %v1197_v44, 2  ;;  %v1630_v53 = vrot.slane %v1197_v44, 4  ;;  %v1631_v54 = vrot.slane %v1197_v44, 6  ;;  %v4294_v55 = vsel %vm2277_vm1, %v1197_v44, -inf }
  0x9d   :  { %v4295_v57 = vrot.slane %v4294_v55, 4  ;;  %v1126_v63 = vmax.f32 %v768_v46, 0.0  ;;  %v1737_v4 = vrot.slane %v1233_v58, 2  ;;  %v1738_v5 = vrot.slane %v1233_v58, 4 }
  0x9e   :  { %v4301_v60 = vsel %vm2277_vm1, %v1629_v52, -inf  ;;  %v4308_v61 = vsel %vm2277_vm1, %v1630_v53, -inf  ;;  %v4315_v62 = vsel %vm2277_vm1, %v1631_v54, -inf  ;;  %v1739_v6 = vrot.slane %v1233_v58, 6 }
  0x9f   :  { %v4296_v0 = vmax.f32 %v4294_v55, %v4295_v57  ;;  %v4302_v1 = vrot.slane %v4301_v60, 4  ;;  %v4309_v2 = vrot.slane %v4308_v61, 4  ;;  %v4316_v3 = vrot.slane %v4315_v62, 4 }
  0xa0   :  { %v5302_v7 = vsel %vm2277_vm1, %v1233_v58, -inf  ;;  %v5309_v13 = vsel %vm2277_vm1, %v1737_v4, -inf  ;;  %v5316_v14 = vsel %vm2277_vm1, %v1738_v5, -inf  ;;  %v5323_v15 = vsel %vm2277_vm1, %v1739_v6, -inf }
  0xa1   :  { %v4297_v8 = vrot.slane %v4296_v0, 2  ;;  %v4303_v9 = vmax.f32 %v4301_v60, %v4302_v1  ;;  %v4310_v10 = vmax.f32 %v4308_v61, %v4309_v2  ;;  %v4317_v11 = vmax.f32 %v4315_v62, %v4316_v3 }
  0xa2   :  { %v5303_v12 = vrot.slane %v5302_v7, 4  ;;  %v5310_v21 = vrot.slane %v5309_v13, 4  ;;  %v5317_v22 = vrot.slane %v5316_v14, 4  ;;  %v5324_v23 = vrot.slane %v5323_v15, 4 }
  0xa3   :  { %v4298_v16 = vmax.f32 %v4296_v0, %v4297_v8  ;;  %v4304_v17 = vrot.slane %v4303_v9, 2  ;;  %v4311_v18 = vrot.slane %v4310_v10, 2  ;;  %v4318_v19 = vrot.slane %v4317_v11, 2 }
  0xa4   :  { %v5304_v20 = vmax.f32 %v5302_v7, %v5303_v12  ;;  %v5311_v29 = vmax.f32 %v5309_v13, %v5310_v21  ;;  %v5318_v30 = vmax.f32 %v5316_v14, %v5317_v22  ;;  %v5325_v31 = vmax.f32 %v5323_v15, %v5324_v23  ;;  %v8210_v12 = vld [vmem:[%s11045_s0 + $0x48] sm:$0xff]  ;;  %v8228_v13 = vld [vmem:[%s11045_s0 + $0xd8] sm:$0xff] }
  0xa5   :  { %v4299_v24 = vrot.slane %v4298_v16, 1  ;;  %v4305_v25 = vmax.f32 %v4303_v9, %v4304_v17  ;;  %v4312_v26 = vmax.f32 %v4310_v10, %v4311_v18  ;;  %v4319_v27 = vmax.f32 %v4317_v11, %v4318_v19  ;;  %v8246_v14 = vld [vmem:[%s11045_s0 + $0x168] sm:$0xff]  ;;  %v8264_v19 = vld [vmem:[%s11045_s0 + $0x1f8] sm:$0xff]  ;;  %8138 = vmatmul.msk.bf16.gmra.mxu0 %vm539_vm0, %v8210_v12  ;;  %8156 = vmatmul.msk.bf16.gmra.mxu1 %vm539_vm0, %v8228_v13 }
  0xa6   :  { %v5305_v28 = vrot.slane %v5304_v20, 2  ;;  %v8508_v33 = vmax.f32 %v8477_v32, %v3312_v50  ;;  %v5312_v42 = vrot.slane %v5311_v29, 2  ;;  %v5319_v44 = vrot.slane %v5318_v30, 2  ;;  %8174 = vmatmul.msk.bf16.gmra.mxu2 %vm539_vm0, %v8246_v14  ;;  %8192 = vmatmul.msk.bf16.gmra.mxu3 %vm539_vm0, %v8264_v19 }
  0xa7   :  { %v4306_v35 = vrot.slane %v4305_v25, 1  ;;  %v4313_v37 = vrot.slane %v4312_v26, 1  ;;  %v4320_v38 = vrot.slane %v4319_v27, 1  ;;  %v5326_v45 = vrot.slane %v5325_v31, 2 }
  0xa8   :  { %v5306_v41 = vmax.f32 %v5304_v20, %v5305_v28  ;;  %v8510_v46 = vmax.f32 %v4298_v16, %v4299_v24  ;;  %v1416_v47 = vrot.slane %v1126_v63, 2  ;;  %v1162_v52 = vmax.f32 %v858_v51, 0.0 }
  0xa9   :  { %v8512_v53 = vmax.f32 %v948_v59, 0.0  ;;  %v5313_v55 = vmax.f32 %v5311_v29, %v5312_v42  ;;  %v5320_v57 = vmax.f32 %v5318_v30, %v5319_v44  ;;  %v5327_v58 = vmax.f32 %v5325_v31, %v5326_v45 }
  0xaa   :  { %v5307_v54 = vrot.slane %v5306_v41, 1  ;;  %v1417_v60 = vrot.slane %v1126_v63, 4  ;;  %v1418_v32 = vrot.slane %v1126_v63, 6  ;;  %v2306_v50 = vsel %vm2277_vm1, %v1126_v63, -inf }
  0xab   :  { %v2313_v61 = vsel %vm2277_vm1, %v1416_v47, -inf  ;;  %v8516_v62 = vmax.f32 %v4305_v25, %v4306_v35  ;;  %v8518_v0 = vmax.f32 %v4312_v26, %v4313_v37  ;;  %v8520_v1 = vmax.f32 %v4319_v27, %v4320_v38 }
  0xac   :  { %v8522_v2 = vmax.f32 %v5306_v41, %v5307_v54  ;;  %v2307_v51 = vrot.slane %v2306_v50, 4  ;;  %v2314_v59 = vrot.slane %v2313_v61, 4  ;;  %v2320_v3 = vsel %vm2277_vm1, %v1417_v60, -inf }
  0xad   :  { %v2327_v4 = vsel %vm2277_vm1, %v1418_v32, -inf  ;;  %v5314_v5 = vrot.slane %v5313_v55, 1  ;;  %v5321_v6 = vrot.slane %v5320_v57, 1  ;;  %v5328_v7 = vrot.slane %v5327_v58, 1 }
  0xae   :  { %v2321_v63 = vrot.slane %v2320_v3, 4  ;;  %v2308_v8 = vmax.f32 %v2306_v50, %v2307_v51  ;;  %v2315_v9 = vmax.f32 %v2313_v61, %v2314_v59  ;;  %v2328_v10 = vrot.slane %v2327_v4, 4 }
  0xaf   :  { %v1524_v11 = vrot.slane %v1162_v52, 2  ;;  %v1525_v16 = vrot.slane %v1162_v52, 4  ;;  %v1526_v17 = vrot.slane %v1162_v52, 6  ;;  %v3314_v18 = vsel %vm2277_vm1, %v1162_v52, -inf }
  0xb0   :  { %v2322_v15 = vmax.f32 %v2320_v3, %v2321_v63  ;;  %v2309_v20 = vrot.slane %v2308_v8, 2  ;;  %v2316_v21 = vrot.slane %v2315_v9, 2  ;;  %v2329_v22 = vmax.f32 %v2327_v4, %v2328_v10 }
  0xb1   :  { %v3315_v23 = vrot.slane %v3314_v18, 4  ;;  %v3321_v25 = vsel %vm2277_vm1, %v1524_v11, -inf  ;;  %v3328_v26 = vsel %vm2277_vm1, %v1525_v16, -inf  ;;  %v3335_v27 = vsel %vm2277_vm1, %v1526_v17, -inf }
  0xb2   :  { %v2323_v24 = vrot.slane %v2322_v15, 2  ;;  %v2310_v28 = vmax.f32 %v2308_v8, %v2309_v20  ;;  %v2317_v29 = vmax.f32 %v2315_v9, %v2316_v21  ;;  %v2330_v30 = vrot.slane %v2329_v22, 2 }
  0xb3   :  { %v3316_v31 = vmax.f32 %v3314_v18, %v3315_v23  ;;  %v3322_v37 = vrot.slane %v3321_v25, 4  ;;  %v3329_v38 = vrot.slane %v3328_v26, 4  ;;  %v3336_v41 = vrot.slane %v3335_v27, 4 }
  0xb4   :  { %v2324_v35 = vmax.f32 %v2322_v15, %v2323_v24  ;;  %v8546_v42 = vmax.f32 %v5313_v55, %v5314_v5  ;;  %v2311_v44 = vrot.slane %v2310_v28, 1  ;;  %v2331_v45 = vmax.f32 %v2329_v22, %v2330_v30  ;;  %v770_v24 = vpop.f32.mrf.mxu0 }
  0xb5   :  { %v3317_v47 = vrot.slane %v3316_v31, 2  ;;  %v8548_v52 = vmax.f32 %v5320_v57, %v5321_v6  ;;  %v3323_v54 = vmax.f32 %v3321_v25, %v3322_v37  ;;  %v3330_v60 = vmax.f32 %v3328_v26, %v3329_v38 }
  0xb6   :  { %v3337_v32 = vmax.f32 %v3335_v27, %v3336_v41  ;;  %v8550_v50 = vmax.f32 %v5327_v58, %v5328_v7  ;;  %v2318_v61 = vrot.slane %v2317_v29, 1  ;;  %v2325_v51 = vrot.slane %v2324_v35, 1  ;;  %v1037_v7 = vpop.f32.mrf.mxu3 }
  0xb7   :  { %v3318_v59 = vmax.f32 %v3316_v31, %v3317_v47  ;;  %v8552_v3 = vmax.f32 %v2310_v28, %v2311_v44  ;;  %v3324_v4 = vrot.slane %v3323_v54, 2  ;;  %v3331_v63 = vrot.slane %v3330_v60, 2 }
  0xb8   :  { %v3338_v8 = vrot.slane %v3337_v32, 2  ;;  %v2332_v55 = vrot.slane %v2331_v45, 1  ;;  %v1632_v9 = vrot.slane %v8512_v53, 2  ;;  %v1633_v57 = vrot.slane %v8512_v53, 4 }
  0xb9   :  { %v3319_v5 = vrot.slane %v3318_v59, 1  ;;  %v3325_v6 = vmax.f32 %v3323_v54, %v3324_v4  ;;  %v3332_v10 = vmax.f32 %v3330_v60, %v3331_v63  ;;  %v1634_v58 = vrot.slane %v8512_v53, 6 }
  0xba   :  { %v3339_v11 = vmax.f32 %v3337_v32, %v3338_v8  ;;  %v8557_v12 = vmax.f32 %v2317_v29, %v2318_v61  ;;  %v4322_v13 = vsel %vm2277_vm1, %v8512_v53, -inf  ;;  %v4329_v14 = vsel %vm2277_vm1, %v1632_v9, -inf }
  0xbb   :  { %v4336_v15 = vsel %vm2277_vm1, %v1633_v57, -inf  ;;  %v8563_v16 = vmax.f32 %v2324_v35, %v2325_v51  ;;  %v3326_v17 = vrot.slane %v3325_v6, 1  ;;  %v3333_v18 = vrot.slane %v3332_v10, 1 }
  0xbc   :  { %v4323_v19 = vrot.slane %v4322_v13, 4  ;;  %v4330_v20 = vrot.slane %v4329_v14, 4  ;;  %v4337_v21 = vrot.slane %v4336_v15, 4  ;;  %v4343_v22 = vsel %vm2277_vm1, %v1634_v58, -inf }
  0xbd   :  { %v1038_v23 = vadd.f32 %v8449_v34, %v1037_v7  ;;  %v8567_v25 = vmax.f32 %v2331_v45, %v2332_v55  ;;  %v8569_v26 = vmax.f32 %v3318_v59, %v3319_v5  ;;  %v3340_v53 = vrot.slane %v3339_v11, 1  ;;  %v860_v59 = vpop.f32.mrf.mxu1 }
  0xbe   :  { %v4324_v27 = vmax.f32 %v4322_v13, %v4323_v19  ;;  %v4331_v28 = vmax.f32 %v4329_v14, %v4330_v20  ;;  %v4338_v29 = vmax.f32 %v4336_v15, %v4337_v21  ;;  %v4344_v30 = vrot.slane %v4343_v22, 4 }
  0xbf   :  { %v1234_v31 = vmax.f32 %v1038_v23, 0.0  ;;  %v8571_v35 = vmax.f32 %v3325_v6, %v3326_v17  ;;  %v8573_v37 = vmax.f32 %v3332_v10, %v3333_v18  ;;  %v771_v41 = vadd.f32 %v8449_v34, %v770_v24  ;;  %v950_v10 = vpop.f32.mrf.mxu2 }
  0xc0   :  { %v4325_v38 = vrot.slane %v4324_v27, 2  ;;  %v4332_v44 = vrot.slane %v4331_v28, 2  ;;  %v4339_v47 = vrot.slane %v4338_v29, 2  ;;  %v4345_v54 = vmax.f32 %v4343_v22, %v4344_v30 }
  0xc1   :  { %v1740_v45 = vrot.slane %v1234_v31, 2  ;;  %v1741_v32 = vrot.slane %v1234_v31, 4  ;;  %v1742_v61 = vrot.slane %v1234_v31, 6  ;;  %v5330_v51 = vsel %vm2277_vm1, %v1234_v31, -inf }
  0xc2   :  { %v4326_v60 = vmax.f32 %v4324_v27, %v4325_v38  ;;  %v4333_v4 = vmax.f32 %v4331_v28, %v4332_v44  ;;  %v4340_v63 = vmax.f32 %v4338_v29, %v4339_v47  ;;  %v4346_v8 = vrot.slane %v4345_v54, 2 }
  0xc3   :  { %v5331_v55 = vrot.slane %v5330_v51, 4  ;;  %v5337_v9 = vsel %vm2277_vm1, %v1740_v45, -inf  ;;  %v5344_v57 = vsel %vm2277_vm1, %v1741_v32, -inf  ;;  %v5351_v6 = vsel %vm2277_vm1, %v1742_v61, -inf }
  0xc4   :  { %v4327_v5 = vrot.slane %v4326_v60, 1  ;;  %v4334_v58 = vrot.slane %v4333_v4, 1  ;;  %v4347_v7 = vmax.f32 %v4345_v54, %v4346_v8  ;;  %v861_v14 = vadd.f32 %v8449_v34, %v860_v59 }
  0xc5   :  { %v5332_v13 = vmax.f32 %v5330_v51, %v5331_v55  ;;  %v8581_v15 = vmax.f32 %v3339_v11, %v3340_v53  ;;  %v5338_v17 = vrot.slane %v5337_v9, 4  ;;  %v5345_v18 = vrot.slane %v5344_v57, 4 }
  0xc6   :  { %v5352_v19 = vrot.slane %v5351_v6, 4  ;;  %v8583_v20 = vmax.f32 %v4326_v60, %v4327_v5  ;;  %v4341_v21 = vrot.slane %v4340_v63, 1  ;;  %v951_v23 = vadd.f32 %v8449_v34, %v950_v10 }
  0xc7   :  { %v5333_v22 = vrot.slane %v5332_v13, 2  ;;  %v5339_v24 = vmax.f32 %v5337_v9, %v5338_v17  ;;  %v5346_v27 = vmax.f32 %v5344_v57, %v5345_v18  ;;  %v1127_v29 = vmax.f32 %v771_v41, 0.0 }
  0xc8   :  { %v5353_v28 = vmax.f32 %v5351_v6, %v5352_v19  ;;  %v8586_v30 = vmax.f32 %v4333_v4, %v4334_v58  ;;  %v4348_v31 = vrot.slane %v4347_v7, 1  ;;  %v1163_v44 = vmax.f32 %v861_v14, 0.0 }
  0xc9   :  { %v5334_v38 = vmax.f32 %v5332_v13, %v5333_v22  ;;  %v5340_v11 = vrot.slane %v5339_v24, 2  ;;  %v5347_v53 = vrot.slane %v5346_v27, 2  ;;  %v1419_v54 = vrot.slane %v1127_v29, 2 }
  0xca   :  { %11048 = vst [vmem:[#allocation2_spill] sm:$0xff] %v8586_v30  ;;  %v5354_v47 = vrot.slane %v5353_v28, 2  ;;  %v1420_v60 = vrot.slane %v1127_v29, 4  ;;  %v1421_v32 = vrot.slane %v1127_v29, 6  ;;  %v2334_v61 = vsel %vm2277_vm1, %v1127_v29, -inf }
  0xcb   :  { %v5335_v45 = vrot.slane %v5334_v38, 1  ;;  %v5341_v51 = vmax.f32 %v5339_v24, %v5340_v11  ;;  %v5348_v59 = vmax.f32 %v5346_v27, %v5347_v53  ;;  %v2335_v55 = vrot.slane %v2334_v61, 4 }
  0xcc   :  { %v5355_v8 = vmax.f32 %v5353_v28, %v5354_v47  ;;  %v8589_v5 = vmax.f32 %v4340_v63, %v4341_v21  ;;  %v2341_v41 = vsel %vm2277_vm1, %v1419_v54, -inf  ;;  %v2348_v4 = vsel %vm2277_vm1, %v1420_v60, -inf }
  0xcd   :  { %v2355_v9 = vsel %vm2277_vm1, %v1421_v32, -inf  ;;  %v8594_v57 = vmax.f32 %v4347_v7, %v4348_v31  ;;  %v8596_v6 = vmax.f32 %v5334_v38, %v5335_v45  ;;  %v2336_v10 = vmax.f32 %v2334_v61, %v2335_v55 }
  0xce   :  { %11049 = vst [vmem:[#allocation3_spill] sm:$0xff] %v8589_v5  ;;  %v1199_v58 = vmax.f32 %v951_v23, 0.0  ;;  %v2342_v13 = vrot.slane %v2341_v41, 4  ;;  %v2349_v14 = vrot.slane %v2348_v4, 4  ;;  %v2356_v17 = vrot.slane %v2355_v9, 4 }
  0xcf   :  { %11050 = vst [vmem:[#allocation4_spill] sm:$0xff] %v8594_v57  ;;  %v1527_v18 = vrot.slane %v1163_v44, 2  ;;  %v5342_v19 = vrot.slane %v5341_v51, 1  ;;  %v5349_v22 = vrot.slane %v5348_v59, 1  ;;  %v5356_v63 = vrot.slane %v5355_v8, 1 }
  0xd0   :  { %11051 = vst [vmem:[#allocation5_spill] sm:$0xff] %v8596_v6  ;;  %v2337_v21 = vrot.slane %v2336_v10, 2  ;;  %v2343_v24 = vmax.f32 %v2341_v41, %v2342_v13  ;;  %v2350_v27 = vmax.f32 %v2348_v4, %v2349_v14  ;;  %v2357_v28 = vmax.f32 %v2355_v9, %v2356_v17 }
  0xd1   :  { %v1528_v29 = vrot.slane %v1163_v44, 4  ;;  %v1529_v53 = vrot.slane %v1163_v44, 6  ;;  %v3342_v7 = vsel %vm2277_vm1, %v1163_v44, -inf  ;;  %v3349_v31 = vsel %vm2277_vm1, %v1527_v18, -inf }
  0xd2   :  { %v2338_v11 = vmax.f32 %v2336_v10, %v2337_v21  ;;  %v2344_v38 = vrot.slane %v2343_v24, 2  ;;  %v2351_v23 = vrot.slane %v2350_v27, 2  ;;  %v2358_v47 = vrot.slane %v2357_v28, 2 }
  0xd3   :  { %v3343_v54 = vrot.slane %v3342_v7, 4  ;;  %v3350_v60 = vrot.slane %v3349_v31, 4  ;;  %v3356_v32 = vsel %vm2277_vm1, %v1528_v29, -inf  ;;  %v3363_v61 = vsel %vm2277_vm1, %v1529_v53, -inf }
  0xd4   :  { %v2339_v45 = vrot.slane %v2338_v11, 1  ;;  %v2345_v55 = vmax.f32 %v2343_v24, %v2344_v38  ;;  %v2352_v41 = vmax.f32 %v2350_v27, %v2351_v23  ;;  %v2359_v4 = vmax.f32 %v2357_v28, %v2358_v47 }
  0xd5   :  { %v3344_v9 = vmax.f32 %v3342_v7, %v3343_v54  ;;  %v8602_v10 = vmax.f32 %v5341_v51, %v5342_v19  ;;  %v3351_v13 = vmax.f32 %v3349_v31, %v3350_v60  ;;  %v3357_v44 = vrot.slane %v3356_v32, 4 }
  0xd6   :  { %v3364_v14 = vrot.slane %v3363_v61, 4  ;;  %v8604_v17 = vmax.f32 %v5348_v59, %v5349_v22  ;;  %v8606_v18 = vmax.f32 %v5355_v8, %v5356_v63  ;;  %v2346_v21 = vrot.slane %v2345_v55, 1 }
  0xd7   :  { %v3345_v6 = vrot.slane %v3344_v9, 2  ;;  %v3352_v57 = vrot.slane %v3351_v13, 2  ;;  %v3358_v5 = vmax.f32 %v3356_v32, %v3357_v44  ;;  %v1635_v30 = vrot.slane %v1199_v58, 2  ;;  %v772_v32 = vpop.f32.mrf.mxu0 }
  0xd8   :  { %v3365_v29 = vmax.f32 %v3363_v61, %v3364_v14  ;;  %v8608_v53 = vmax.f32 %v2338_v11, %v2339_v45  ;;  %v2353_v24 = vrot.slane %v2352_v41, 1  ;;  %v2360_v27 = vrot.slane %v2359_v4, 1  ;;  %v1040_v11 = vpop.f32.mrf.mxu3 }
  0xd9   :  { %v3346_v28 = vmax.f32 %v3344_v9, %v3345_v6  ;;  %v3353_v51 = vmax.f32 %v3351_v13, %v3352_v57  ;;  %v3359_v19 = vrot.slane %v3358_v5, 2  ;;  %v1636_v31 = vrot.slane %v1199_v58, 4 }
  0xda   :  { %11052 = vst [vmem:[#allocation6_spill] sm:$0xff] %v8608_v53  ;;  %v3366_v7 = vrot.slane %v3365_v29, 2  ;;  %v8610_v38 = vmax.f32 %v2345_v55, %v2346_v21  ;;  %v1637_v59 = vrot.slane %v1199_v58, 6  ;;  %v4350_v8 = vsel %vm2277_vm1, %v1199_v58, -inf }
  0xdb   :  { %v4357_v22 = vsel %vm2277_vm1, %v1635_v30, -inf  ;;  %v3347_v63 = vrot.slane %v3346_v28, 1  ;;  %v3354_v23 = vrot.slane %v3353_v51, 1  ;;  %v3360_v47 = vmax.f32 %v3358_v5, %v3359_v19 }
  0xdc   :  { %11053 = vst [vmem:[#allocation7_spill] sm:$0xff] %v8610_v38  ;;  %v4351_v54 = vrot.slane %v4350_v8, 4  ;;  %v8614_v45 = vmax.f32 %v2352_v41, %v2353_v24  ;;  %v4358_v60 = vrot.slane %v4357_v22, 4  ;;  %v4364_v57 = vsel %vm2277_vm1, %v1636_v31, -inf }
  0xdd   :  { %v4371_v6 = vsel %vm2277_vm1, %v1637_v59, -inf  ;;  %v8618_v61 = vmax.f32 %v2359_v4, %v2360_v27  ;;  %v3361_v55 = vrot.slane %v3360_v47, 1  ;;  %v3367_v9 = vmax.f32 %v3365_v29, %v3366_v7 }
  0xde   :  { %11054 = vst [vmem:[#allocation8_spill] sm:$0xff] %v8614_v45  ;;  %v4352_v58 = vmax.f32 %v4350_v8, %v4351_v54  ;;  %v4359_v13 = vmax.f32 %v4357_v22, %v4358_v60  ;;  %v4365_v30 = vrot.slane %v4364_v57, 4  ;;  %v4372_v44 = vrot.slane %v4371_v6, 4 }
  0xdf   :  { %11055 = vst [vmem:[#allocation9_spill] sm:$0xff] %v8618_v61  ;;  %v1041_v5 = vadd.f32 %v8449_v34, %v1040_v11  ;;  %v8621_v14 = vmax.f32 %v3346_v28, %v3347_v63  ;;  %v8623_v41 = vmax.f32 %v3353_v51, %v3354_v23  ;;  %v773_v24 = vadd.f32 %v8449_v34, %v772_v32 }
  0xe0   :  { %v4353_v21 = vrot.slane %v4352_v58, 2  ;;  %v4360_v19 = vrot.slane %v4359_v13, 2  ;;  %v4366_v31 = vmax.f32 %v4364_v57, %v4365_v30  ;;  %v4373_v59 = vmax.f32 %v4371_v6, %v4372_v44 }
  0xe1   :  { %11056 = vst [vmem:[#allocation10_spill] sm:$0xff] %v8621_v14  ;;  %v1235_v4 = vmax.f32 %v1041_v5, 0.0  ;;  %v8626_v27 = vmax.f32 %v3360_v47, %v3361_v55  ;;  %v3368_v29 = vrot.slane %v3367_v9, 1  ;;  %v1128_v8 = vmax.f32 %v773_v24, 0.0 }
  0xe2   :  { %11057 = vst [vmem:[#allocation11_spill] sm:$0xff] %v8623_v41  ;;  %v4354_v7 = vmax.f32 %v4352_v58, %v4353_v21  ;;  %v4361_v22 = vmax.f32 %v4359_v13, %v4360_v19  ;;  %v4367_v54 = vrot.slane %v4366_v31, 2  ;;  %v4374_v60 = vrot.slane %v4373_v59, 2 }
  0xe3   :  { %11058 = vst [vmem:[#allocation12_spill] sm:$0xff] %v8626_v27  ;;  %v1743_v11 = vrot.slane %v1235_v4, 2  ;;  %v1744_v63 = vrot.slane %v1235_v4, 4  ;;  %v1745_v51 = vrot.slane %v1235_v4, 6  ;;  %v5358_v23 = vsel %vm2277_vm1, %v1235_v4, -inf }
  0xe4   :  { %v4355_v28 = vrot.slane %v4354_v7, 1  ;;  %v4362_v41 = vrot.slane %v4361_v22, 1  ;;  %v4368_v32 = vmax.f32 %v4366_v31, %v4367_v54  ;;  %v4375_v14 = vmax.f32 %v4373_v59, %v4374_v60 }
  0xe5   :  { %v5359_v57 = vrot.slane %v5358_v23, 4  ;;  %v8629_v6 = vmax.f32 %v3367_v9, %v3368_v29  ;;  %v5365_v47 = vsel %vm2277_vm1, %v1743_v11, -inf  ;;  %v5372_v55 = vsel %vm2277_vm1, %v1744_v63, -inf }
  0xe6   :  { %v5379_v58 = vsel %vm2277_vm1, %v1745_v51, -inf  ;;  %v8634_v13 = vmax.f32 %v4354_v7, %v4355_v28  ;;  %v8636_v30 = vmax.f32 %v4361_v22, %v4362_v41  ;;  %v4369_v44 = vrot.slane %v4368_v32, 1 }
  0xe7   :  { %11059 = vst [vmem:[#allocation13_spill] sm:$0xff] %v8629_v6  ;;  %v5360_v5 = vmax.f32 %v5358_v23, %v5359_v57  ;;  %v5366_v21 = vrot.slane %v5365_v47, 4  ;;  %v5373_v24 = vrot.slane %v5372_v55, 4  ;;  %v5380_v19 = vrot.slane %v5379_v58, 4 }
  0xe8   :  { %11060 = vst [vmem:[#allocation14_spill] sm:$0xff] %v8634_v13  ;;  %v1422_v31 = vrot.slane %v1128_v8, 2  ;;  %v8638_v59 = vmax.f32 %v4368_v32, %v4369_v44  ;;  %v4376_v9 = vrot.slane %v4375_v14, 1  ;;  %v1423_v29 = vrot.slane %v1128_v8, 4 }
  0xe9   :  { %11061 = vst [vmem:[#allocation15_spill] sm:$0xff] %v8636_v30  ;;  %v5361_v4 = vrot.slane %v5360_v5, 2  ;;  %v5367_v54 = vmax.f32 %v5365_v47, %v5366_v21  ;;  %v5374_v60 = vmax.f32 %v5372_v55, %v5373_v24  ;;  %v5381_v11 = vmax.f32 %v5379_v58, %v5380_v19 }
  0xea   :  { %11062 = vst [vmem:[#allocation16_spill] sm:$0xff] %v8638_v59  ;;  %v1424_v63 = vrot.slane %v1128_v8, 6  ;;  %v2362_v7 = vsel %vm2277_vm1, %v1128_v8, -inf  ;;  %v2369_v41 = vsel %vm2277_vm1, %v1422_v31, -inf  ;;  %v2376_v22 = vsel %vm2277_vm1, %v1423_v29, -inf }
  0xeb   :  { %v5362_v51 = vmax.f32 %v5360_v5, %v5361_v4  ;;  %v5368_v28 = vrot.slane %v5367_v54, 2  ;;  %v5375_v23 = vrot.slane %v5374_v60, 2  ;;  %v5382_v57 = vrot.slane %v5381_v11, 2  ;;  %v862_v5 = vpop.f32.mrf.mxu1 }
  0xec   :  { %v2363_v30 = vrot.slane %v2362_v7, 4  ;;  %v2370_v44 = vrot.slane %v2369_v41, 4  ;;  %v2377_v59 = vrot.slane %v2376_v22, 4  ;;  %v2383_v13 = vsel %vm2277_vm1, %v1424_v63, -inf  ;;  %v952_v63 = vpop.f32.mrf.mxu2 }
  0xed   :  { %v5363_v32 = vrot.slane %v5362_v51, 1  ;;  %v5369_v47 = vmax.f32 %v5367_v54, %v5368_v28  ;;  %v5376_v55 = vmax.f32 %v5374_v60, %v5375_v23  ;;  %v5383_v58 = vmax.f32 %v5381_v11, %v5382_v57  ;;  %v1042_v54 = vpop.f32.mrf.mxu3 }
  0xee   :  { %v2364_v21 = vmax.f32 %v2362_v7, %v2363_v30  ;;  %v8644_v24 = vmax.f32 %v4375_v14, %v4376_v9  ;;  %v2371_v8 = vmax.f32 %v2369_v41, %v2370_v44  ;;  %v2378_v19 = vmax.f32 %v2376_v22, %v2377_v59 }
  0xef   :  { %v2384_v31 = vrot.slane %v2383_v13, 4  ;;  %v5370_v4 = vrot.slane %v5369_v47, 1  ;;  %v5377_v29 = vrot.slane %v5376_v55, 1  ;;  %v5384_v6 = vrot.slane %v5383_v58, 1 }
  0xf0   :  { %v2365_v27 = vrot.slane %v2364_v21, 2  ;;  %v2372_v61 = vrot.slane %v2371_v8, 2  ;;  %v2379_v45 = vrot.slane %v2378_v19, 2  ;;  %v863_v53 = vadd.f32 %v8449_v34, %v862_v5 }
  0xf1   :  { %v2385_v38 = vmax.f32 %v2383_v13, %v2384_v31  ;;  %v8647_v60 = vmax.f32 %v5362_v51, %v5363_v32  ;;  %v8649_v30 = vmax.f32 %v5369_v47, %v5370_v4  ;;  %v8651_v14 = vmax.f32 %v5376_v55, %v5377_v29 }
  0xf2   :  { %v2366_v9 = vmax.f32 %v2364_v21, %v2365_v27  ;;  %v2373_v59 = vmax.f32 %v2371_v8, %v2372_v61  ;;  %v2380_v11 = vmax.f32 %v2378_v19, %v2379_v45  ;;  %v1164_v41 = vmax.f32 %v863_v53, 0.0 }
  0xf3   :  { %v2386_v7 = vrot.slane %v2385_v38, 2  ;;  %v8653_v22 = vmax.f32 %v5383_v58, %v5384_v6  ;;  %v953_v13 = vadd.f32 %v8449_v34, %v952_v63  ;;  %v1043_v23 = vadd.f32 %v8449_v34, %v1042_v54  ;;  %v775_v63 = vpop.f32.mrf.mxu0 }
  0xf4   :  { %v2367_v28 = vrot.slane %v2366_v9, 1  ;;  %v2374_v57 = vrot.slane %v2373_v59, 1  ;;  %v2381_v51 = vrot.slane %v2380_v11, 1  ;;  %v1530_v44 = vrot.slane %v1164_v41, 2 }
  0xf5   :  { %v2387_v32 = vmax.f32 %v2385_v38, %v2386_v7  ;;  %v1531_v55 = vrot.slane %v1164_v41, 4  ;;  %v1532_v5 = vrot.slane %v1164_v41, 6  ;;  %v3370_v61 = vsel %vm2277_vm1, %v1164_v41, -inf }
  0xf6   :  { %v2368_v47 = vmax.f32 %v2366_v9, %v2367_v28  ;;  %v2375_v45 = vmax.f32 %v2373_v59, %v2374_v57  ;;  %v2382_v27 = vmax.f32 %v2380_v11, %v2381_v51  ;;  %v3371_v6 = vrot.slane %v3370_v61, 4 }
  0xf7   :  { %v2388_v53 = vrot.slane %v2387_v32, 1  ;;  %v3377_v21 = vsel %vm2277_vm1, %v1530_v44, -inf  ;;  %v3384_v8 = vsel %vm2277_vm1, %v1531_v55, -inf  ;;  %v3391_v19 = vsel %vm2277_vm1, %v1532_v5, -inf }
  0xf8   :  { %v6310_v58 = vmax.f32 %v8479_v36, %v2368_v47  ;;  %v6311_v38 = vmax.f32 %v8482_v39, %v2375_v45  ;;  %v6312_v4 = vmax.f32 %v8484_v40, %v2382_v27  ;;  %v3372_v29 = vmax.f32 %v3370_v61, %v3371_v6 }
  0xf9   :  { %v2389_v31 = vmax.f32 %v2387_v32, %v2388_v53  ;;  %v3378_v9 = vrot.slane %v3377_v21, 4  ;;  %v3385_v59 = vrot.slane %v3384_v8, 4  ;;  %v3392_v11 = vrot.slane %v3391_v19, 4 }
  0xfa   :  { %v6598_v54 = vpack.c.bf16 %v6310_v58, %v6310_v58  ;;  %v6599_v36 = vpack.c.bf16 %v6311_v38, %v6311_v38  ;;  %v6600_v41 = vpack.c.bf16 %v6312_v4, %v6312_v4  ;;  %v3373_v28 = vrot.slane %v3372_v29, 2 }
  0xfb   :  { %v6313_v7 = vmax.f32 %v8486_v43, %v2389_v31  ;;  %v3379_v57 = vmax.f32 %v3377_v21, %v3378_v9  ;;  %v3386_v51 = vmax.f32 %v3384_v8, %v3385_v59  ;;  %v3393_v44 = vmax.f32 %v3391_v19, %v3392_v11 }
  0xfc   :  { %v8666_v32 = vadd.f32 %v8449_v34, %v775_v63  ;;  %v7174_v40 = vunpack.c.l.b16 %v6598_v54  ;;  %v7175_v47 = vunpack.c.l.b16 %v6599_v36  ;;  %v3374_v55 = vmax.f32 %v3372_v29, %v3373_v28 }
  0xfd   :  { %v6601_v39 = vpack.c.bf16 %v6313_v7, %v6313_v7  ;;  %v3380_v5 = vrot.slane %v3379_v57, 2  ;;  %v3387_v61 = vrot.slane %v3386_v51, 2  ;;  %v3394_v45 = vrot.slane %v3393_v44, 2 }
  0xfe   :  { %v1200_v27 = vmax.f32 %v953_v13, 0.0  ;;  %v7176_v53 = vunpack.c.l.b16 %v6600_v41  ;;  %v7463_v6 = vsel %vm7462_vm2, %v7175_v47, %v7174_v40  ;;  %v3375_v58 = vrot.slane %v3374_v55, 1 }
  0xff   :  { %v8668_v43 = vunpack.c.l.b16 %v6601_v39  ;;  %v3381_v21 = vmax.f32 %v3379_v57, %v3380_v5  ;;  %v3388_v8 = vmax.f32 %v3386_v51, %v3387_v61  ;;  %v3395_v19 = vmax.f32 %v3393_v44, %v3394_v45 }
 0x100   :  { %v8671_v31 = vmax.f32 %v1043_v23, 0.0  ;;  %v3376_v34 = vmax.f32 %v3374_v55, %v3375_v58  ;;  %v1638_v38 = vrot.slane %v1200_v27, 2  ;;  %v1639_v4 = vrot.slane %v1200_v27, 4 }
 0x101   :  { %v1640_v63 = vrot.slane %v1200_v27, 6  ;;  %v3382_v29 = vrot.slane %v3381_v21, 1  ;;  %v3389_v54 = vrot.slane %v3388_v8, 1  ;;  %v3396_v9 = vrot.slane %v3395_v19, 1 }
 0x102   :  { %v4378_v13 = vsel %vm2277_vm1, %v1200_v27, -inf  ;;  %v6382_v59 = vmax.f32 %v8490_v48, %v3376_v34  ;;  %v4385_v7 = vsel %vm2277_vm1, %v1638_v38, -inf  ;;  %v4392_v36 = vsel %vm2277_vm1, %v1639_v4, -inf }
 0x103   :  { %v4379_v11 = vrot.slane %v4378_v13, 4  ;;  %v3383_v41 = vmax.f32 %v3381_v21, %v3382_v29  ;;  %v3390_v28 = vmax.f32 %v3388_v8, %v3389_v54  ;;  %v3397_v23 = vmax.f32 %v3395_v19, %v3396_v9  ;;  %v8211_v21 = vld [vmem:[%s11045_s0 + $0x50] sm:$0xff]  ;;  %v8229_v8 = vld [vmem:[%s11045_s0 + $0xe0] sm:$0xff] }
 0x104   :  { %v4386_v57 = vrot.slane %v4385_v7, 4  ;;  %v6670_v51 = vpack.c.bf16 %v6382_v59, %v6382_v59  ;;  %v4393_v39 = vrot.slane %v4392_v36, 4  ;;  %v4399_v40 = vsel %vm2277_vm1, %v1640_v63, -inf  ;;  %8139 = vmatmul.msk.bf16.gmra.mxu0 %vm539_vm0, %v8211_v21  ;;  %8157 = vmatmul.msk.bf16.gmra.mxu1 %vm539_vm0, %v8229_v8 }
 0x105   :  { %v4380_v44 = vmax.f32 %v4378_v13, %v4379_v11  ;;  %v6383_v47 = vmax.f32 %v8492_v49, %v3383_v41  ;;  %v6384_v55 = vmax.f32 %v8497_v56, %v3390_v28  ;;  %v6385_v48 = vmax.f32 %v8508_v33, %v3397_v23  ;;  %v8247_v49 = vld [vmem:[%s11045_s0 + $0x170] sm:$0xff] }
 0x106   :  { %v4387_v5 = vmax.f32 %v4385_v7, %v4386_v57  ;;  %v8682_v61 = vsel %vm7464_vm3, %v7176_v53, %v7463_v6  ;;  %v4394_v27 = vmax.f32 %v4392_v36, %v4393_v39  ;;  %v4400_v58 = vrot.slane %v4399_v40, 4  ;;  %v8265_v6 = vld [vmem:[%s11045_s0 + $0x200] sm:$0xff]  ;;  %8175 = vmatmul.msk.bf16.gmra.mxu2 %vm539_vm0, %v8247_v49 }
 0x107   :  { %v4381_v45 = vrot.slane %v4380_v44, 2  ;;  %v6671_v56 = vpack.c.bf16 %v6383_v47, %v6383_v47  ;;  %v6672_v33 = vpack.c.bf16 %v6384_v55, %v6384_v55  ;;  %v6673_v19 = vpack.c.bf16 %v6385_v48, %v6385_v48  ;;  %8193 = vmatmul.msk.bf16.gmra.mxu3 %vm539_vm0, %v8265_v6 }
 0x108   :  { %v4388_v53 = vrot.slane %v4387_v5, 2  ;;  %v7246_v34 = vunpack.c.l.b16 %v6670_v51  ;;  %v4395_v4 = vrot.slane %v4394_v27, 2  ;;  %v4401_v63 = vmax.f32 %v4399_v40, %v4400_v58 }
 0x109   :  { %v4382_v38 = vmax.f32 %v4380_v44, %v4381_v45  ;;  %v7247_v29 = vunpack.c.l.b16 %v6671_v56  ;;  %v7248_v54 = vunpack.c.l.b16 %v6672_v33  ;;  %v1746_v13 = vrot.slane %v8671_v31, 2 }
 0x10a   :  { %v4389_v9 = vmax.f32 %v4387_v5, %v4388_v53  ;;  %v4396_v11 = vmax.f32 %v4394_v27, %v4395_v4  ;;  %v4402_v7 = vrot.slane %v4401_v63, 2  ;;  %v1747_v36 = vrot.slane %v8671_v31, 4 }
 0x10b   :  { %v4383_v59 = vrot.slane %v4382_v38, 1  ;;  %v8702_v41 = vunpack.c.l.b16 %v6673_v19  ;;  %v1748_v23 = vrot.slane %v8671_v31, 6  ;;  %v5386_v57 = vsel %vm2277_vm1, %v8671_v31, -inf }
 0x10c   :  { %v4390_v28 = vrot.slane %v4389_v9, 1  ;;  %v7532_v51 = vsel %vm7462_vm2, %v7247_v29, %v7246_v34  ;;  %v4397_v39 = vrot.slane %v4396_v11, 1  ;;  %v4403_v40 = vmax.f32 %v4401_v63, %v4402_v7 }
 0x10d   :  { %v4384_v44 = vmax.f32 %v4382_v38, %v4383_v59  ;;  %v5387_v55 = vrot.slane %v5386_v57, 4  ;;  %v5393_v48 = vsel %vm2277_vm1, %v1746_v13, -inf  ;;  %v5400_v5 = vsel %vm2277_vm1, %v1747_v36, -inf }
 0x10e   :  { %v4391_v47 = vmax.f32 %v4389_v9, %v4390_v28  ;;  %v4398_v45 = vmax.f32 %v4396_v11, %v4397_v39  ;;  %v4404_v27 = vrot.slane %v4403_v40, 1  ;;  %v5394_v21 = vrot.slane %v5393_v48, 4 }
 0x10f   :  { %v6454_v58 = vmax.f32 %v8510_v46, %v4384_v44  ;;  %v5388_v49 = vmax.f32 %v5386_v57, %v5387_v55  ;;  %v5401_v31 = vrot.slane %v5400_v5, 4  ;;  %v5407_v56 = vsel %vm2277_vm1, %v1748_v23, -inf }
 0x110   :  { %v6455_v8 = vmax.f32 %v8516_v62, %v4391_v47  ;;  %v4405_v33 = vmax.f32 %v4403_v40, %v4404_v27  ;;  %v6456_v19 = vmax.f32 %v8518_v0, %v4398_v45  ;;  %v5395_v6 = vmax.f32 %v5393_v48, %v5394_v21 }
 0x111   :  { %v6742_v53 = vpack.c.bf16 %v6454_v58, %v6454_v58  ;;  %v5389_v38 = vrot.slane %v5388_v49, 2  ;;  %v5402_v4 = vmax.f32 %v5400_v5, %v5401_v31  ;;  %v5408_v63 = vrot.slane %v5407_v56, 4 }
 0x112   :  { %v6743_v34 = vpack.c.bf16 %v6455_v8, %v6455_v8  ;;  %v8715_v29 = vsel %vm7464_vm3, %v7248_v54, %v7532_v51  ;;  %v6457_v46 = vmax.f32 %v8520_v1, %v4405_v33  ;;  %v6744_v9 = vpack.c.bf16 %v6456_v19, %v6456_v19 }
 0x113   :  { %v5396_v62 = vrot.slane %v5395_v6, 2  ;;  %v5390_v59 = vmax.f32 %v5388_v49, %v5389_v38  ;;  %v5403_v11 = vrot.slane %v5402_v4, 2  ;;  %v5409_v7 = vmax.f32 %v5407_v56, %v5408_v63 }
 0x114   :  { %v7319_v13 = vunpack.c.l.b16 %v6743_v34  ;;  %v6745_v36 = vpack.c.bf16 %v6457_v46, %v6457_v46  ;;  %v7318_v28 = vunpack.c.l.b16 %v6742_v53  ;;  %v1129_v23 = vmax.f32 %v8666_v32, 0.0 }
 0x115   :  { %v5397_v0 = vmax.f32 %v5395_v6, %v5396_v62  ;;  %v7320_v57 = vunpack.c.l.b16 %v6744_v9  ;;  %v5391_v44 = vrot.slane %v5390_v59, 1  ;;  %v5404_v39 = vmax.f32 %v5402_v4, %v5403_v11 }
 0x116   :  { %v5410_v40 = vrot.slane %v5409_v7, 2  ;;  %v8719_v47 = vunpack.c.l.b16 %v6745_v36  ;;  %v7595_v54 = vsel %vm7462_vm2, %v7319_v13, %v7318_v28  ;;  %v1425_v51 = vrot.slane %v1129_v23, 2 }
 0x117   :  { %v5398_v1 = vrot.slane %v5397_v0, 1  ;;  %v5392_v55 = vmax.f32 %v5390_v59, %v5391_v44  ;;  %v5405_v48 = vrot.slane %v5404_v39, 1  ;;  %v1426_v45 = vrot.slane %v1129_v23, 4 }
 0x118   :  { %v5411_v5 = vmax.f32 %v5409_v7, %v5410_v40  ;;  %v1427_v58 = vrot.slane %v1129_v23, 6  ;;  %v2390_v21 = vsel %vm2277_vm1, %v1129_v23, -inf  ;;  %v2397_v32 = vsel %vm2277_vm1, %v1425_v51, -inf }
 0x119   :  { %v5399_v27 = vmax.f32 %v5397_v0, %v5398_v1  ;;  %v5406_v8 = vmax.f32 %v5404_v39, %v5405_v48  ;;  %v6526_v31 = vmax.f32 %v8522_v2, %v5392_v55  ;;  %v2391_v56 = vrot.slane %v2390_v21, 4 }
 0x11a   :  { %v5412_v49 = vrot.slane %v5411_v5, 1  ;;  %v2398_v19 = vrot.slane %v2397_v32, 4  ;;  %v2404_v53 = vsel %vm2277_vm1, %v1426_v45, -inf  ;;  %v2411_v6 = vsel %vm2277_vm1, %v1427_v58, -inf  ;;  %v865_v45 = vpop.f32.mrf.mxu1 }
 0x11b   :  { %v6527_v33 = vmax.f32 %v8546_v42, %v5399_v27  ;;  %v6528_v38 = vmax.f32 %v8548_v52, %v5406_v8  ;;  %v6814_v4 = vpack.c.bf16 %v6526_v31, %v6526_v31  ;;  %v2392_v63 = vmax.f32 %v2390_v21, %v2391_v56  ;;  %v955_v8 = vpop.f32.mrf.mxu2  ;;  %v8743_v56 = vld [vmem:[%s11046_s2] ss:$0 sm:$0xff] }
 0x11c   :  { %v5413_v34 = vmax.f32 %v5411_v5, %v5412_v49  ;;  %v2399_v9 = vmax.f32 %v2397_v32, %v2398_v19  ;;  %v2405_v62 = vrot.slane %v2404_v53, 4  ;;  %v2412_v13 = vrot.slane %v2411_v6, 4  ;;  %v1045_v19 = vpop.f32.mrf.mxu3 }
 0x11d   :  { %v6815_v46 = vpack.c.bf16 %v6527_v33, %v6527_v33  ;;  %v6816_v2 = vpack.c.bf16 %v6528_v38, %v6528_v38  ;;  %v7390_v11 = vunpack.c.l.b16 %v6814_v4  ;;  %v2393_v7 = vrot.slane %v2392_v63, 2 }
 0x11e   :  { %v6529_v59 = vmax.f32 %v8550_v50, %v5413_v34  ;;  %v2400_v36 = vrot.slane %v2399_v9, 2  ;;  %v2406_v28 = vmax.f32 %v2404_v53, %v2405_v62  ;;  %v2413_v0 = vmax.f32 %v2411_v6, %v2412_v13  ;;  %v777_v53 = vpop.f32.mrf.mxu0 }
 0x11f   :  { %v7391_v42 = vunpack.c.l.b16 %v6815_v46  ;;  %v7392_v44 = vunpack.c.l.b16 %v6816_v2  ;;  %v2394_v39 = vmax.f32 %v2392_v63, %v2393_v7  ;;  %v7596_v55 = vsel %vm7464_vm3, %v7320_v57, %v7595_v54 }
 0x120   :  { %v6817_v23 = vpack.c.bf16 %v6529_v59, %v6529_v59  ;;  %v2401_v40 = vmax.f32 %v2399_v9, %v2400_v36  ;;  %v2407_v1 = vrot.slane %v2406_v28, 2  ;;  %v2414_v51 = vrot.slane %v2413_v0, 2 }
 0x121   :  { %v7658_v52 = vsel %vm7462_vm2, %v7391_v42, %v7390_v11  ;;  %v2395_v5 = vrot.slane %v2394_v39, 1  ;;  %v7467_v32 = vsel %vm7466_vm4, %v8668_v43, %v8682_v61  ;;  %v866_v33 = vadd.f32 %v8743_v56, %v865_v45 }
 0x122   :  { %v8732_v48 = vunpack.c.l.b16 %v6817_v23  ;;  %v8735_v50 = vsel %vm7464_vm3, %v7392_v44, %v7658_v52  ;;  %v2402_v27 = vrot.slane %v2401_v40, 1  ;;  %v2408_v58 = vmax.f32 %v2406_v28, %v2407_v1 }
 0x123   :  { %v2415_v21 = vmax.f32 %v2413_v0, %v2414_v51  ;;  %v2396_v49 = vmax.f32 %v2394_v39, %v2395_v5  ;;  %v8750_v61 = vsel %vm7466_vm4, %v8702_v41, %v8715_v29  ;;  %v956_v6 = vadd.f32 %v8743_v56, %v955_v8 }
 0x124   :  { %v2403_v57 = vmax.f32 %v2401_v40, %v2402_v27  ;;  %v2409_v54 = vrot.slane %v2408_v58, 1  ;;  %v8755_v34 = vsel %vm7466_vm4, %v8719_v47, %v7596_v55  ;;  %v1165_v46 = vmax.f32 %v866_v33, 0.0 }
 0x125   :  { %v2416_v31 = vrot.slane %v2415_v21, 1  ;;  %v6314_v43 = vmax.f32 %v8552_v3, %v2396_v49  ;;  %v1201_v62 = vmax.f32 %v956_v6, 0.0  ;;  %v8759_v3 = vadd.f32 %v8743_v56, %v1045_v19 }
 0x126   :  { %v2410_v38 = vmax.f32 %v2408_v58, %v2409_v54  ;;  %v6315_v63 = vmax.f32 %v8557_v12, %v2403_v57  ;;  %v8762_v13 = vadd.f32 %v8743_v56, %v777_v53  ;;  %v1533_v47 = vrot.slane %v1165_v46, 2 }
 0x127   :  { %v2417_v4 = vmax.f32 %v2415_v21, %v2416_v31  ;;  %v6602_v9 = vpack.c.bf16 %v6314_v43, %v6314_v43  ;;  %v1534_v11 = vrot.slane %v1165_v46, 4  ;;  %v1535_v7 = vrot.slane %v1165_v46, 6 }
 0x128   :  { %v6316_v41 = vmax.f32 %v8563_v16, %v2410_v38  ;;  %v6603_v59 = vpack.c.bf16 %v6315_v63, %v6315_v63  ;;  %v3398_v12 = vsel %vm2277_vm1, %v1165_v46, -inf  ;;  %v3405_v44 = vsel %vm2277_vm1, %v1533_v47, -inf }
 0x129   :  { %v6317_v29 = vmax.f32 %v8567_v25, %v2417_v4  ;;  %v7178_v2 = vunpack.c.l.b16 %v6602_v9  ;;  %v3399_v0 = vrot.slane %v3398_v12, 4  ;;  %v3412_v39 = vsel %vm2277_vm1, %v1534_v11, -inf }
 0x12a   :  { %v6604_v42 = vpack.c.bf16 %v6316_v41, %v6316_v41  ;;  %v7179_v28 = vunpack.c.l.b16 %v6603_v59  ;;  %v3419_v16 = vsel %vm2277_vm1, %v1535_v7, -inf  ;;  %v3406_v51 = vrot.slane %v3405_v44, 4 }
 0x12b   :  { %v6605_v36 = vpack.c.bf16 %v6317_v29, %v6317_v29  ;;  %v7469_v23 = vsel %vm7468_vm5, %v7178_v2, %v7467_v32  ;;  %v3400_v1 = vmax.f32 %v3398_v12, %v3399_v0  ;;  %v3413_v55 = vrot.slane %v3412_v39, 4 }
 0x12c   :  { %v7180_v25 = vunpack.c.l.b16 %v6604_v42  ;;  %v7471_v40 = vsel %vm7470_vm6, %v7179_v28, %v7469_v23  ;;  %v3420_v5 = vrot.slane %v3419_v16, 4  ;;  %v1641_v45 = vrot.slane %v1201_v62, 2 }
 0x12d   :  { %v7181_v52 = vunpack.c.l.b16 %v6605_v36  ;;  %v3401_v58 = vrot.slane %v3400_v1, 2  ;;  %v1642_v21 = vrot.slane %v1201_v62, 4  ;;  %v1643_v32 = vrot.slane %v1201_v62, 6 }
 0x12e   :  { %v7473_v27 = vsel %vm7472_vm7, %v7180_v25, %v7471_v40  ;;  %v3407_v49 = vmax.f32 %v3405_v44, %v3406_v51  ;;  %v3414_v57 = vmax.f32 %v3412_v39, %v3413_v55  ;;  %v3421_v54 = vmax.f32 %v3419_v16, %v3420_v5 }
 0x12f   :  { %v7475_v8 = vsel %vm7474_vm8, %v7181_v52, %v7473_v27  ;;  %v3402_v33 = vmax.f32 %v3400_v1, %v3401_v58  ;;  %v4406_v19 = vsel %vm2277_vm1, %v1201_v62, -inf  ;;  %v4413_v53 = vsel %vm2277_vm1, %v1641_v45, -inf }
 0x130   :  { %v7721_v31 = vpack.c.b16 %v7475_v8, %v7475_v8  ;;  %v3408_v43 = vrot.slane %v3407_v49, 2  ;;  %v3415_v6 = vrot.slane %v3414_v57, 2  ;;  %v3422_v38 = vrot.slane %v3421_v54, 2 }
 0x131   :  { %v4407_v4 = vrot.slane %v4406_v19, 4  ;;  %v3403_v63 = vrot.slane %v3402_v33, 1  ;;  %v4414_v46 = vrot.slane %v4413_v53, 4  ;;  %v4420_v9 = vsel %vm2277_vm1, %v1642_v21, -inf }
 0x132   :  { %7793 = vst [vmem:[%s11047_s3] sm:$0xf] %v7721_v31  ;;  %v4427_v41 = vsel %vm2277_vm1, %v1643_v32, -inf  ;;  %v3409_v29 = vmax.f32 %v3407_v49, %v3408_v43  ;;  %v3416_v59 = vmax.f32 %v3414_v57, %v3415_v6  ;;  %v3423_v47 = vmax.f32 %v3421_v54, %v3422_v38 }
 0x133   :  { %v4408_v62 = vmax.f32 %v4406_v19, %v4407_v4  ;;  %v3404_v2 = vmax.f32 %v3402_v33, %v3403_v63  ;;  %v4415_v11 = vmax.f32 %v4413_v53, %v4414_v46  ;;  %v4421_v7 = vrot.slane %v4420_v9, 4 }
 0x134   :  { %v4428_v12 = vrot.slane %v4427_v41, 4  ;;  %v3410_v42 = vrot.slane %v3409_v29, 1  ;;  %v3417_v36 = vrot.slane %v3416_v59, 1  ;;  %v3424_v28 = vrot.slane %v3423_v47, 1 }
 0x135   :  { %v4409_v0 = vrot.slane %v4408_v62, 2  ;;  %v6386_v23 = vmax.f32 %v8569_v26, %v3404_v2  ;;  %v4416_v44 = vrot.slane %v4415_v11, 2  ;;  %v4422_v39 = vmax.f32 %v4420_v9, %v4421_v7  ;;  %v11063_v9 = vld [vmem:[#allocation2_spill] sm:$0xff]  ;;  %v11065_v7 = vld [vmem:[#allocation4_spill] sm:$0xff] }
 0x136   :  { %v4429_v16 = vmax.f32 %v4427_v41, %v4428_v12  ;;  %v3411_v25 = vmax.f32 %v3409_v29, %v3410_v42  ;;  %v3418_v52 = vmax.f32 %v3416_v59, %v3417_v36  ;;  %v3425_v40 = vmax.f32 %v3423_v47, %v3424_v28 }
 0x137   :  { %v4410_v1 = vmax.f32 %v4408_v62, %v4409_v0  ;;  %v6674_v51 = vpack.c.bf16 %v6386_v23, %v6386_v23  ;;  %v4417_v55 = vmax.f32 %v4415_v11, %v4416_v44  ;;  %v4423_v5 = vrot.slane %v4422_v39, 2  ;;  %v11064_v11 = vld [vmem:[#allocation3_spill] sm:$0xff] }
 0x138   :  { %v4430_v45 = vrot.slane %v4429_v16, 2  ;;  %v6387_v27 = vmax.f32 %v8571_v35, %v3411_v25  ;;  %v6388_v58 = vmax.f32 %v8573_v37, %v3418_v52  ;;  %v6389_v21 = vmax.f32 %v8581_v15, %v3425_v40 }
 0x139   :  { %v4411_v32 = vrot.slane %v4410_v1, 1  ;;  %v7250_v8 = vunpack.c.l.b16 %v6674_v51  ;;  %v4418_v26 = vrot.slane %v4417_v55, 1  ;;  %v4424_v49 = vmax.f32 %v4422_v39, %v4423_v5 }
 0x13a   :  { %v4431_v57 = vmax.f32 %v4429_v16, %v4430_v45  ;;  %v6675_v54 = vpack.c.bf16 %v6387_v27, %v6387_v27  ;;  %v6676_v31 = vpack.c.bf16 %v6388_v58, %v6388_v58  ;;  %v6677_v33 = vpack.c.bf16 %v6389_v21, %v6389_v21 }
 0x13b   :  { %v4412_v19 = vmax.f32 %v4410_v1, %v4411_v32  ;;  %v7535_v53 = vsel %vm7468_vm5, %v7250_v8, %v8750_v61  ;;  %v4419_v43 = vmax.f32 %v4417_v55, %v4418_v26  ;;  %v4425_v6 = vrot.slane %v4424_v49, 1 }
 0x13c   :  { %v4432_v38 = vrot.slane %v4431_v57, 1  ;;  %v7251_v35 = vunpack.c.l.b16 %v6675_v54  ;;  %v7252_v4 = vunpack.c.l.b16 %v6676_v31  ;;  %v7253_v37 = vunpack.c.l.b16 %v6677_v33 }
 0x13d   :  { %v6458_v15 = vmax.f32 %v8583_v20, %v4412_v19  ;;  %v4426_v63 = vmax.f32 %v4424_v49, %v4425_v6  ;;  %v6459_v41 = vmax.f32 %v11063_v9, %v4419_v43  ;;  %v1237_v29 = vmax.f32 %v8759_v3, 0.0 }
 0x13e   :  { %v4433_v46 = vmax.f32 %v4431_v57, %v4432_v38  ;;  %v7536_v59 = vsel %vm7470_vm6, %v7251_v35, %v7535_v53  ;;  %v8794_v61 = vsel %vm7466_vm4, %v8732_v48, %v8735_v50  ;;  %v1130_v62 = vmax.f32 %v8762_v13, 0.0 }
 0x13f   :  { %v6746_v47 = vpack.c.bf16 %v6458_v15, %v6458_v15  ;;  %v7537_v2 = vsel %vm7472_vm7, %v7252_v4, %v7536_v59  ;;  %v6460_v20 = vmax.f32 %v11064_v11, %v4426_v63  ;;  %v6747_v42 = vpack.c.bf16 %v6459_v41, %v6459_v41 }
 0x140   :  { %v6461_v12 = vmax.f32 %v11065_v7, %v4433_v46  ;;  %v7538_v36 = vsel %vm7474_vm8, %v7253_v37, %v7537_v2  ;;  %v1749_v28 = vrot.slane %v1237_v29, 2  ;;  %v1750_v0 = vrot.slane %v1237_v29, 4 }
 0x141   :  { %v7322_v3 = vunpack.c.l.b16 %v6746_v47  ;;  %v7730_v23 = vpack.c.b16 %v7538_v36, %v7538_v36  ;;  %v6748_v44 = vpack.c.bf16 %v6460_v20, %v6460_v20  ;;  %v7323_v16 = vunpack.c.l.b16 %v6747_v42 }
 0x142   :  { %v6749_v39 = vpack.c.bf16 %v6461_v12, %v6461_v12  ;;  %v1751_v50 = vrot.slane %v1237_v29, 6  ;;  %v5414_v13 = vsel %vm2277_vm1, %v1237_v29, -inf  ;;  %v5421_v25 = vsel %vm2277_vm1, %v1749_v28, -inf }
 0x143   :  { %v7598_v48 = vsel %vm7468_vm5, %v7322_v3, %v8755_v34  ;;  %7802 = vst [vmem:[%s11047_s3 + $0x24] sm:$0xf] %v7730_v23  ;;  %v7324_v52 = vunpack.c.l.b16 %v6748_v44  ;;  %v5415_v51 = vrot.slane %v5414_v13, 4  ;;  %v5422_v55 = vrot.slane %v5421_v25, 4 }
 0x144   :  { %v7325_v40 = vunpack.c.l.b16 %v6749_v39  ;;  %v7599_v1 = vsel %vm7470_vm6, %v7323_v16, %v7598_v48  ;;  %v5428_v5 = vsel %vm2277_vm1, %v1750_v0, -inf  ;;  %v5435_v45 = vsel %vm2277_vm1, %v1751_v50, -inf  ;;  %v11066_v48 = vld [vmem:[#allocation5_spill] sm:$0xff] }
 0x145   :  { %v1428_v34 = vrot.slane %v1130_v62, 2  ;;  %v7600_v27 = vsel %vm7472_vm7, %v7324_v52, %v7599_v1  ;;  %v5416_v58 = vmax.f32 %v5414_v13, %v5415_v51  ;;  %v5429_v21 = vrot.slane %v5428_v5, 4 }
 0x146   :  { %v5436_v32 = vrot.slane %v5435_v45, 4  ;;  %v7601_v8 = vsel %vm7474_vm8, %v7325_v40, %v7600_v27  ;;  %v5423_v26 = vmax.f32 %v5421_v25, %v5422_v55  ;;  %v1429_v49 = vrot.slane %v1130_v62, 4 }
 0x147   :  { %v1430_v57 = vrot.slane %v1130_v62, 6  ;;  %v7739_v54 = vpack.c.b16 %v7601_v8, %v7601_v8  ;;  %v5417_v31 = vrot.slane %v5416_v58, 2  ;;  %v5430_v33 = vmax.f32 %v5428_v5, %v5429_v21 }
 0x148   :  { %v5437_v19 = vmax.f32 %v5435_v45, %v5436_v32  ;;  %v5424_v53 = vrot.slane %v5423_v26, 2  ;;  %v2418_v43 = vsel %vm2277_vm1, %v1130_v62, -inf  ;;  %v2425_v6 = vsel %vm2277_vm1, %v1428_v34, -inf }
 0x149   :  { %v2432_v38 = vsel %vm2277_vm1, %v1429_v49, -inf  ;;  %7811 = vst [vmem:[%s11047_s3 + $0x48] sm:$0xf] %v7739_v54  ;;  %v5418_v35 = vmax.f32 %v5416_v58, %v5417_v31  ;;  %v5431_v4 = vrot.slane %v5430_v33, 2  ;;  %v2419_v15 = vrot.slane %v2418_v43, 4 }
 0x14a   :  { %v5438_v37 = vrot.slane %v5437_v19, 2  ;;  %v5425_v63 = vmax.f32 %v5423_v26, %v5424_v53  ;;  %v2426_v46 = vrot.slane %v2425_v6, 4  ;;  %v2433_v9 = vrot.slane %v2432_v38, 4 }
 0x14b   :  { %v2439_v41 = vsel %vm2277_vm1, %v1430_v57, -inf  ;;  %v5419_v29 = vrot.slane %v5418_v35, 1  ;;  %v5432_v59 = vmax.f32 %v5430_v33, %v5431_v4  ;;  %v2420_v62 = vmax.f32 %v2418_v43, %v2419_v15  ;;  %v867_v33 = vpop.f32.mrf.mxu1  ;;  %v11067_v43 = vld [vmem:[#allocation6_spill] sm:$0xff]  ;;  %v11068_v4 = vld [vmem:[#allocation7_spill] sm:$0xff]  ;;  %v11069_v15 = vld [vmem:[#allocation8_spill] sm:$0xff] }
 0x14c   :  { %v5439_v47 = vmax.f32 %v5437_v19, %v5438_v37  ;;  %v5426_v2 = vrot.slane %v5425_v63, 1  ;;  %v2427_v11 = vmax.f32 %v2425_v6, %v2426_v46  ;;  %v2434_v20 = vmax.f32 %v2432_v38, %v2433_v9  ;;  %v957_v19 = vpop.f32.mrf.mxu2 }
 0x14d   :  { %v2440_v7 = vrot.slane %v2439_v41, 4  ;;  %v5420_v12 = vmax.f32 %v5418_v35, %v5419_v29  ;;  %v5433_v42 = vrot.slane %v5432_v59, 1  ;;  %v2421_v3 = vrot.slane %v2420_v62, 2 }
 0x14e   :  { %v5440_v36 = vrot.slane %v5439_v47, 1  ;;  %v5427_v28 = vmax.f32 %v5425_v63, %v5426_v2  ;;  %v2428_v0 = vrot.slane %v2427_v11, 2  ;;  %v2435_v23 = vrot.slane %v2434_v20, 2 }
 0x14f   :  { %v2441_v44 = vmax.f32 %v2439_v41, %v2440_v7  ;;  %v5434_v39 = vmax.f32 %v5432_v59, %v5433_v42  ;;  %v6530_v50 = vmax.f32 %v11066_v48, %v5420_v12  ;;  %v2422_v13 = vmax.f32 %v2420_v62, %v2421_v3  ;;  %v1047_v59 = vpop.f32.mrf.mxu3 }
 0x150   :  { %v5441_v16 = vmax.f32 %v5439_v47, %v5440_v36  ;;  %v6531_v25 = vmax.f32 %v8602_v10, %v5427_v28  ;;  %v2429_v52 = vmax.f32 %v2427_v11, %v2428_v0  ;;  %v2436_v40 = vmax.f32 %v2434_v20, %v2435_v23 }
 0x151   :  { %v2442_v1 = vrot.slane %v2441_v44, 2  ;;  %v6532_v51 = vmax.f32 %v8604_v17, %v5434_v39  ;;  %v6818_v5 = vpack.c.bf16 %v6530_v50, %v6530_v50  ;;  %v2423_v45 = vrot.slane %v2422_v13, 1 }
 0x152   :  { %v6533_v55 = vmax.f32 %v8606_v18, %v5441_v16  ;;  %v6819_v34 = vpack.c.bf16 %v6531_v25, %v6531_v25  ;;  %v2430_v27 = vrot.slane %v2429_v52, 1  ;;  %v2437_v58 = vrot.slane %v2436_v40, 1 }
 0x153   :  { %v2443_v21 = vmax.f32 %v2441_v44, %v2442_v1  ;;  %v6820_v32 = vpack.c.bf16 %v6532_v51, %v6532_v51  ;;  %v7394_v26 = vunpack.c.l.b16 %v6818_v5  ;;  %v2424_v49 = vmax.f32 %v2422_v13, %v2423_v45 }
 0x154   :  { %v6821_v8 = vpack.c.bf16 %v6533_v55, %v6533_v55  ;;  %v7395_v57 = vunpack.c.l.b16 %v6819_v34  ;;  %v2431_v54 = vmax.f32 %v2429_v52, %v2430_v27  ;;  %v2438_v10 = vmax.f32 %v2436_v40, %v2437_v58 }
 0x155   :  { %v2444_v31 = vrot.slane %v2443_v21, 1  ;;  %v7396_v53 = vunpack.c.l.b16 %v6820_v32  ;;  %v7661_v18 = vsel %vm7468_vm5, %v7394_v26, %v8794_v61  ;;  %v6318_v6 = vmax.f32 %v11067_v43, %v2424_v49  ;;  %v11070_v61 = vld [vmem:[#allocation9_spill] sm:$0xff] }
 0x156   :  { %v7397_v17 = vunpack.c.l.b16 %v6821_v8  ;;  %v7662_v38 = vsel %vm7470_vm6, %v7395_v57, %v7661_v18  ;;  %v6319_v37 = vmax.f32 %v11068_v4, %v2431_v54  ;;  %v6320_v63 = vmax.f32 %v11069_v15, %v2438_v10 }
 0x157   :  { %v2445_v35 = vmax.f32 %v2443_v21, %v2444_v31  ;;  %v7663_v46 = vsel %vm7472_vm7, %v7396_v53, %v7662_v38  ;;  %v6606_v9 = vpack.c.bf16 %v6318_v6, %v6318_v6  ;;  %v868_v41 = vadd.f32 %v8743_v56, %v867_v33 }
 0x158   :  { %v958_v29 = vadd.f32 %v8743_v56, %v957_v19  ;;  %v7664_v47 = vsel %vm7474_vm8, %v7397_v17, %v7663_v46  ;;  %v6607_v2 = vpack.c.bf16 %v6319_v37, %v6319_v37  ;;  %v6608_v11 = vpack.c.bf16 %v6320_v63, %v6320_v63  ;;  %v8212_v46 = vld [vmem:[%s11045_s0 + $0x58] sm:$0xff] }
 0x159   :  { %v6321_v62 = vmax.f32 %v11070_v61, %v2445_v35  ;;  %v7748_v20 = vpack.c.b16 %v7664_v47, %v7664_v47  ;;  %v7182_v7 = vunpack.c.l.b16 %v6606_v9  ;;  %v1166_v12 = vmax.f32 %v868_v41, 0.0  ;;  %v8230_v9 = vld [vmem:[%s11045_s0 + $0xe8] sm:$0xff]  ;;  %v8248_v41 = vld [vmem:[%s11045_s0 + $0x178] sm:$0xff]  ;;  %8140 = vmatmul.msk.bf16.gmra.mxu0 %vm539_vm0, %v8212_v46 }
 0x15a   :  { %v1202_v42 = vmax.f32 %v958_v29, 0.0  ;;  %v7183_v3 = vunpack.c.l.b16 %v6607_v2  ;;  %v7184_v28 = vunpack.c.l.b16 %v6608_v11  ;;  %v8836_v0 = vadd.f32 %v8743_v56, %v1047_v59  ;;  %8158 = vmatmul.msk.bf16.gmra.mxu1 %vm539_vm0, %v8230_v9  ;;  %8176 = vmatmul.msk.bf16.gmra.mxu2 %vm539_vm0, %v8248_v41 }
 0x15b   :  { %v6609_v36 = vpack.c.bf16 %v6321_v62, %v6321_v62  ;;  %7820 = vst [vmem:[%s11047_s3 + $0x6c] sm:$0xf] %v7748_v20  ;;  %v1536_v23 = vrot.slane %v1166_v12, 2  ;;  %v1537_v44 = vrot.slane %v1166_v12, 4  ;;  %v1538_v39 = vrot.slane %v1166_v12, 6  ;;  %v8266_v62 = vld [vmem:[%s11045_s0 + $0x208] sm:$0xff] }
 0x15c   :  { %v3426_v16 = vsel %vm2277_vm1, %v1166_v12, -inf  ;;  %v7476_v50 = vsel %vm7462_vm2, %v7183_v3, %v7182_v7  ;;  %v1644_v25 = vrot.slane %v1202_v42, 2  ;;  %v1645_v58 = vrot.slane %v1202_v42, 4  ;;  %8194 = vmatmul.msk.bf16.gmra.mxu3 %vm539_vm0, %v8266_v62  ;;  %v780_v62 = vpop.f32.mrf.mxu0 }
 0x15d   :  { %v7185_v48 = vunpack.c.l.b16 %v6609_v36  ;;  %v3427_v13 = vrot.slane %v3426_v16, 4  ;;  %v7477_v52 = vsel %vm7464_vm3, %v7184_v28, %v7476_v50  ;;  %v3433_v40 = vsel %vm2277_vm1, %v1536_v23, -inf }
 0x15e   :  { %v3440_v1 = vsel %vm2277_vm1, %v1537_v44, -inf  ;;  %v3447_v51 = vsel %vm2277_vm1, %v1538_v39, -inf  ;;  %v3434_v45 = vrot.slane %v3433_v40, 4  ;;  %v1646_v21 = vrot.slane %v1202_v42, 6  ;;  %v11071_v44 = vld [vmem:[#allocation10_spill] sm:$0xff] }
 0x15f   :  { %v8848_v55 = vsel %vm7466_vm4, %v7185_v48, %v7477_v52  ;;  %v3428_v5 = vmax.f32 %v3426_v16, %v3427_v13  ;;  %v3441_v34 = vrot.slane %v3440_v1, 4  ;;  %v3448_v27 = vrot.slane %v3447_v51, 4  ;;  %v11072_v52 = vld [vmem:[#allocation11_spill] sm:$0xff] }
 0x160   :  { %v4434_v32 = vsel %vm2277_vm1, %v1202_v42, -inf  ;;  %v3435_v26 = vmax.f32 %v3433_v40, %v3434_v45  ;;  %v4441_v10 = vsel %vm2277_vm1, %v1644_v25, -inf  ;;  %v4448_v31 = vsel %vm2277_vm1, %v1645_v58, -inf }
 0x161   :  { %v3429_v8 = vrot.slane %v3428_v5, 2  ;;  %v3442_v49 = vmax.f32 %v3440_v1, %v3441_v34  ;;  %v4435_v57 = vrot.slane %v4434_v32, 4  ;;  %v3449_v54 = vmax.f32 %v3447_v51, %v3448_v27  ;;  %v11073_v1 = vld [vmem:[#allocation12_spill] sm:$0xff]  ;;  %v11074_v34 = vld [vmem:[#allocation13_spill] sm:$0xff] }
 0x162   :  { %v4455_v33 = vsel %vm2277_vm1, %v1646_v21, -inf  ;;  %v3436_v53 = vrot.slane %v3435_v26, 2  ;;  %v4442_v6 = vrot.slane %v4441_v10, 4  ;;  %v4449_v38 = vrot.slane %v4448_v31, 4 }
 0x163   :  { %v3430_v19 = vmax.f32 %v3428_v5, %v3429_v8  ;;  %v3443_v17 = vrot.slane %v3442_v49, 2  ;;  %v4436_v18 = vmax.f32 %v4434_v32, %v4435_v57  ;;  %v3450_v43 = vrot.slane %v3449_v54, 2  ;;  %v11075_v57 = vld [vmem:[#allocation14_spill] sm:$0xff] }
 0x164   :  { %v4456_v35 = vrot.slane %v4455_v33, 4  ;;  %v3437_v37 = vmax.f32 %v3435_v26, %v3436_v53  ;;  %v4443_v59 = vmax.f32 %v4441_v10, %v4442_v6  ;;  %v4450_v47 = vmax.f32 %v4448_v31, %v4449_v38  ;;  %v11076_v38 = vld [vmem:[#allocation15_spill] sm:$0xff] }
 0x165   :  { %v3431_v4 = vrot.slane %v3430_v19, 1  ;;  %v3444_v15 = vmax.f32 %v3442_v49, %v3443_v17  ;;  %v4437_v63 = vrot.slane %v4436_v18, 2  ;;  %v3451_v29 = vmax.f32 %v3449_v54, %v3450_v43 }
 0x166   :  { %v4457_v61 = vmax.f32 %v4455_v33, %v4456_v35  ;;  %v3438_v11 = vrot.slane %v3437_v37, 1  ;;  %v4444_v42 = vrot.slane %v4443_v59, 2  ;;  %v4451_v36 = vrot.slane %v4450_v47, 2 }
 0x167   :  { %v3432_v2 = vmax.f32 %v3430_v19, %v3431_v4  ;;  %v3445_v20 = vrot.slane %v3444_v15, 1  ;;  %v4438_v7 = vmax.f32 %v4436_v18, %v4437_v63  ;;  %v3452_v12 = vrot.slane %v3451_v29, 1  ;;  %v11077_v4 = vld [vmem:[#allocation16_spill] sm:$0xff] }
 0x168   :  { %v4458_v3 = vrot.slane %v4457_v61, 2  ;;  %v3439_v28 = vmax.f32 %v3437_v37, %v3438_v11  ;;  %v4445_v50 = vmax.f32 %v4443_v59, %v4444_v42  ;;  %v4452_v13 = vmax.f32 %v4450_v47, %v4451_v36  ;;  %v870_v36 = vpop.f32.mrf.mxu1 }
 0x169   :  { %v3446_v23 = vmax.f32 %v3444_v15, %v3445_v20  ;;  %v6390_v39 = vmax.f32 %v11071_v44, %v3432_v2  ;;  %v4439_v16 = vrot.slane %v4438_v7, 1  ;;  %v3453_v48 = vmax.f32 %v3451_v29, %v3452_v12 }
 0x16a   :  { %v4459_v25 = vmax.f32 %v4457_v61, %v4458_v3  ;;  %v6391_v40 = vmax.f32 %v11072_v52, %v3439_v28  ;;  %v4446_v58 = vrot.slane %v4445_v50, 1  ;;  %v4453_v21 = vrot.slane %v4452_v13, 1 }
 0x16b   :  { %v6392_v51 = vmax.f32 %v11073_v1, %v3446_v23  ;;  %v6678_v5 = vpack.c.bf16 %v6390_v39, %v6390_v39  ;;  %v4440_v45 = vmax.f32 %v4438_v7, %v4439_v16  ;;  %v6393_v27 = vmax.f32 %v11074_v34, %v3453_v48 }
 0x16c   :  { %v4460_v32 = vrot.slane %v4459_v25, 1  ;;  %v6679_v8 = vpack.c.bf16 %v6391_v40, %v6391_v40  ;;  %v4447_v31 = vmax.f32 %v4445_v50, %v4446_v58  ;;  %v4454_v33 = vmax.f32 %v4452_v13, %v4453_v21 }
 0x16d   :  { %v6680_v26 = vpack.c.bf16 %v6392_v51, %v6392_v51  ;;  %v7254_v49 = vunpack.c.l.b16 %v6678_v5  ;;  %v6462_v54 = vmax.f32 %v11075_v57, %v4440_v45  ;;  %v6681_v10 = vpack.c.bf16 %v6393_v27, %v6393_v27 }
 0x16e   :  { %v4461_v19 = vmax.f32 %v4459_v25, %v4460_v32  ;;  %v7255_v53 = vunpack.c.l.b16 %v6679_v8  ;;  %v1238_v43 = vmax.f32 %v8836_v0, 0.0  ;;  %v6463_v35 = vmax.f32 %v11076_v38, %v4447_v31 }
 0x16f   :  { %v7256_v17 = vunpack.c.l.b16 %v6680_v26  ;;  %v6750_v18 = vpack.c.bf16 %v6462_v54, %v6462_v54  ;;  %v7257_v6 = vunpack.c.l.b16 %v6681_v10  ;;  %v6464_v37 = vmax.f32 %v11077_v4, %v4454_v33 }
 0x170   :  { %v6465_v15 = vmax.f32 %v8644_v24, %v4461_v19  ;;  %v7539_v63 = vsel %vm7462_vm2, %v7255_v53, %v7254_v49  ;;  %v1752_v9 = vrot.slane %v1238_v43, 2  ;;  %v1753_v41 = vrot.slane %v1238_v43, 4 }
 0x171   :  { %v7326_v46 = vunpack.c.l.b16 %v6750_v18  ;;  %v7540_v29 = vsel %vm7464_vm3, %v7256_v17, %v7539_v63  ;;  %v6751_v59 = vpack.c.bf16 %v6463_v35, %v6463_v35  ;;  %v6752_v47 = vpack.c.bf16 %v6464_v37, %v6464_v37 }
 0x172   :  { %v6753_v61 = vpack.c.bf16 %v6465_v15, %v6465_v15  ;;  %v8882_v0 = vsel %vm7466_vm4, %v7257_v6, %v7540_v29  ;;  %v1754_v2 = vrot.slane %v1238_v43, 6  ;;  %v5442_v11 = vsel %vm2277_vm1, %v1238_v43, -inf }
 0x173   :  { %v5449_v20 = vsel %vm2277_vm1, %v1752_v9, -inf  ;;  %v7327_v24 = vunpack.c.l.b16 %v6751_v59  ;;  %v7328_v7 = vunpack.c.l.b16 %v6752_v47  ;;  %v5443_v42 = vrot.slane %v5442_v11, 4 }
 0x174   :  { %v7329_v12 = vunpack.c.l.b16 %v6753_v61  ;;  %v5450_v3 = vrot.slane %v5449_v20, 4  ;;  %v5456_v28 = vsel %vm2277_vm1, %v1753_v41, -inf  ;;  %v5463_v23 = vsel %vm2277_vm1, %v1754_v2, -inf }
 0x175   :  { %v781_v44 = vadd.f32 %v8743_v56, %v780_v62  ;;  %v7602_v39 = vsel %vm7462_vm2, %v7327_v24, %v7326_v46  ;;  %v5444_v16 = vmax.f32 %v5442_v11, %v5443_v42  ;;  %v5457_v48 = vrot.slane %v5456_v28, 4 }
 0x176   :  { %v5464_v50 = vrot.slane %v5463_v23, 4  ;;  %v7603_v13 = vsel %vm7464_vm3, %v7328_v7, %v7602_v39  ;;  %v5451_v25 = vmax.f32 %v5449_v20, %v5450_v3  ;;  %v871_v40 = vadd.f32 %v8743_v56, %v870_v36 }
 0x177   :  { %v1131_v52 = vmax.f32 %v781_v44, 0.0  ;;  %v8893_v1 = vsel %vm7466_vm4, %v7329_v12, %v7603_v13  ;;  %v5445_v51 = vrot.slane %v5444_v16, 2  ;;  %v5458_v5 = vmax.f32 %v5456_v28, %v5457_v48  ;;  %v960_v48 = vpop.f32.mrf.mxu2 }
 0x178   :  { %v5465_v45 = vmax.f32 %v5463_v23, %v5464_v50  ;;  %v5452_v34 = vrot.slane %v5451_v25, 2 }
 0x179   :  { %v1431_v27 = vrot.slane %v1131_v52, 2  ;;  %v1432_v58 = vrot.slane %v1131_v52, 4  ;;  %v1433_v21 = vrot.slane %v1131_v52, 6  ;;  %v5446_v32 = vmax.f32 %v5444_v16, %v5445_v51 }
 0x17a   :  { %v5459_v8 = vrot.slane %v5458_v5, 2  ;;  %v5466_v26 = vrot.slane %v5465_v45, 2  ;;  %v2446_v49 = vsel %vm2277_vm1, %v1131_v52, -inf  ;;  %v5453_v57 = vmax.f32 %v5451_v25, %v5452_v34 }
 0x17b   :  { %v2447_v54 = vrot.slane %v2446_v49, 4  ;;  %v2453_v10 = vsel %vm2277_vm1, %v1431_v27, -inf  ;;  %v2460_v31 = vsel %vm2277_vm1, %v1432_v58, -inf  ;;  %v5447_v33 = vrot.slane %v5446_v32, 1 }
 0x17c   :  { %v5460_v19 = vmax.f32 %v5458_v5, %v5459_v8  ;;  %v5467_v53 = vmax.f32 %v5465_v45, %v5466_v26  ;;  %v2454_v17 = vrot.slane %v2453_v10, 4  ;;  %v5454_v18 = vrot.slane %v5453_v57, 1 }
 0x17d   :  { %v2448_v43 = vmax.f32 %v2446_v49, %v2447_v54  ;;  %v2461_v6 = vrot.slane %v2460_v31, 4  ;;  %v2467_v38 = vsel %vm2277_vm1, %v1433_v21, -inf  ;;  %v5448_v35 = vmax.f32 %v5446_v32, %v5447_v33 }
 0x17e   :  { %v5461_v4 = vrot.slane %v5460_v19, 1  ;;  %v5468_v37 = vrot.slane %v5467_v53, 1  ;;  %v2455_v15 = vmax.f32 %v2453_v10, %v2454_v17  ;;  %v5455_v63 = vmax.f32 %v5453_v57, %v5454_v18 }
 0x17f   :  { %v2449_v46 = vrot.slane %v2448_v43, 2  ;;  %v2462_v9 = vmax.f32 %v2460_v31, %v2461_v6  ;;  %v2468_v41 = vrot.slane %v2467_v38, 4  ;;  %v6534_v47 = vmax.f32 %v8647_v60, %v5448_v35 }
 0x180   :  { %v5462_v29 = vmax.f32 %v5460_v19, %v5461_v4  ;;  %v5469_v59 = vmax.f32 %v5467_v53, %v5468_v37  ;;  %v2456_v61 = vrot.slane %v2455_v15, 2  ;;  %v6535_v62 = vmax.f32 %v8649_v30, %v5455_v63  ;;  %v1050_v4 = vpop.f32.mrf.mxu3 }
 0x181   :  { %v2450_v2 = vmax.f32 %v2448_v43, %v2449_v46  ;;  %v2463_v11 = vrot.slane %v2462_v9, 2  ;;  %v2469_v20 = vmax.f32 %v2467_v38, %v2468_v41  ;;  %v6822_v12 = vpack.c.bf16 %v6534_v47, %v6534_v47 }
 0x182   :  { %v6536_v24 = vmax.f32 %v8651_v14, %v5462_v29  ;;  %v6537_v7 = vmax.f32 %v8653_v22, %v5469_v59  ;;  %v2457_v42 = vmax.f32 %v2455_v15, %v2456_v61  ;;  %v6823_v36 = vpack.c.bf16 %v6535_v62, %v6535_v62 }
 0x183   :  { %v2451_v3 = vrot.slane %v2450_v2, 1  ;;  %v2464_v28 = vmax.f32 %v2462_v9, %v2463_v11  ;;  %v2470_v23 = vrot.slane %v2469_v20, 2  ;;  %v7398_v16 = vunpack.c.l.b16 %v6822_v12 }
 0x184   :  { %v6824_v44 = vpack.c.bf16 %v6536_v24, %v6536_v24  ;;  %v6825_v39 = vpack.c.bf16 %v6537_v7, %v6537_v7  ;;  %v2458_v60 = vrot.slane %v2457_v42, 1  ;;  %v7399_v50 = vunpack.c.l.b16 %v6823_v36 }
 0x185   :  { %v8903_v30 = vmax.f32 %v2450_v2, %v2451_v3  ;;  %v2465_v13 = vrot.slane %v2464_v28, 1  ;;  %v2471_v25 = vmax.f32 %v2469_v20, %v2470_v23  ;;  %v1167_v22 = vmax.f32 %v871_v40, 0.0 }
 0x186   :  { %v7400_v52 = vunpack.c.l.b16 %v6824_v44  ;;  %v7401_v14 = vunpack.c.l.b16 %v6825_v39  ;;  %v8905_v51 = vmax.f32 %v2457_v42, %v2458_v60  ;;  %v7665_v5 = vsel %vm7462_vm2, %v7399_v50, %v7398_v16 }
 0x187   :  { %v8908_v45 = vmax.f32 %v2464_v28, %v2465_v13  ;;  %v2472_v34 = vrot.slane %v2471_v25, 1  ;;  %v961_v27 = vadd.f32 %v8743_v56, %v960_v48  ;;  %v1539_v21 = vrot.slane %v1167_v22, 2  ;;  %v782_v13 = vpop.f32.mrf.mxu0 }
 0x188   :  { %v7666_v58 = vsel %vm7464_vm3, %v7400_v52, %v7665_v5  ;;  %v1540_v32 = vrot.slane %v1167_v22, 4  ;;  %v1541_v8 = vrot.slane %v1167_v22, 6  ;;  %v3454_v57 = vsel %vm2277_vm1, %v1167_v22, -inf  ;;  %v872_v5 = vpop.f32.mrf.mxu1 }
 0x189   :  { %v8913_v26 = vsel %vm7466_vm4, %v7401_v14, %v7666_v58  ;;  %v8915_v49 = vmax.f32 %v2471_v25, %v2472_v34  ;;  %v1203_v40 = vmax.f32 %v961_v27, 0.0  ;;  %v3455_v54 = vrot.slane %v3454_v57, 4  ;;  %v962_v34 = vpop.f32.mrf.mxu2 }
 0x18a   :  { %v3461_v10 = vsel %vm2277_vm1, %v1539_v21, -inf  ;;  %v3468_v31 = vsel %vm2277_vm1, %v1540_v32, -inf  ;;  %v3475_v33 = vsel %vm2277_vm1, %v1541_v8, -inf }
 0x18b   :  { %v3462_v19 = vrot.slane %v3461_v10, 4  ;;  %v3469_v53 = vrot.slane %v3468_v31, 4  ;;  %v3476_v17 = vrot.slane %v3475_v33, 4  ;;  %v1647_v18 = vrot.slane %v1203_v40, 2 }
 0x18c   :  { %v3456_v43 = vmax.f32 %v3454_v57, %v3455_v54  ;;  %v1648_v6 = vrot.slane %v1203_v40, 4  ;;  %v1649_v38 = vrot.slane %v1203_v40, 6  ;;  %v4462_v35 = vsel %vm2277_vm1, %v1203_v40, -inf }
 0x18d   :  { %v3463_v37 = vmax.f32 %v3461_v10, %v3462_v19  ;;  %v3470_v15 = vmax.f32 %v3468_v31, %v3469_v53  ;;  %v3477_v63 = vmax.f32 %v3475_v33, %v3476_v17  ;;  %v4463_v46 = vrot.slane %v4462_v35, 4  ;;  %v1052_v10 = vpop.f32.mrf.mxu3 }
 0x18e   :  { %v3457_v9 = vrot.slane %v3456_v43, 2  ;;  %v4469_v41 = vsel %vm2277_vm1, %v1647_v18, -inf  ;;  %v4476_v29 = vsel %vm2277_vm1, %v1648_v6, -inf  ;;  %v4483_v59 = vsel %vm2277_vm1, %v1649_v38, -inf }
 0x18f   :  { %v3464_v47 = vrot.slane %v3463_v37, 2  ;;  %v3471_v61 = vrot.slane %v3470_v15, 2  ;;  %v3478_v62 = vrot.slane %v3477_v63, 2  ;;  %v4464_v2 = vmax.f32 %v4462_v35, %v4463_v46 }
 0x190   :  { %v3458_v11 = vmax.f32 %v3456_v43, %v3457_v9  ;;  %v4470_v20 = vrot.slane %v4469_v41, 4  ;;  %v4477_v24 = vrot.slane %v4476_v29, 4  ;;  %v4484_v7 = vrot.slane %v4483_v59, 4 }
 0x191   :  { %v3465_v12 = vmax.f32 %v3463_v37, %v3464_v47  ;;  %v3472_v42 = vmax.f32 %v3470_v15, %v3471_v61  ;;  %v3479_v36 = vmax.f32 %v3477_v63, %v3478_v62  ;;  %v4465_v3 = vrot.slane %v4464_v2, 2 }
 0x192   :  { %v3459_v28 = vrot.slane %v3458_v11, 1  ;;  %v4471_v23 = vmax.f32 %v4469_v41, %v4470_v20  ;;  %v4478_v44 = vmax.f32 %v4476_v29, %v4477_v24  ;;  %v4485_v39 = vmax.f32 %v4483_v59, %v4484_v7 }
 0x193   :  { %v3466_v16 = vrot.slane %v3465_v12, 1  ;;  %v3473_v60 = vrot.slane %v3472_v42, 1  ;;  %v3480_v48 = vrot.slane %v3479_v36, 1  ;;  %v4466_v50 = vmax.f32 %v4464_v2, %v4465_v3 }
 0x194   :  { %v8925_v25 = vmax.f32 %v3458_v11, %v3459_v28  ;;  %v4472_v52 = vrot.slane %v4471_v23, 2  ;;  %v4479_v14 = vrot.slane %v4478_v44, 2  ;;  %v4486_v22 = vrot.slane %v4485_v39, 2 }
 0x195   :  { %v8927_v27 = vmax.f32 %v3465_v12, %v3466_v16  ;;  %v8929_v58 = vmax.f32 %v3472_v42, %v3473_v60  ;;  %v8931_v21 = vmax.f32 %v3479_v36, %v3480_v48  ;;  %v4467_v32 = vrot.slane %v4466_v50, 1 }
 0x196   :  { %v4473_v8 = vmax.f32 %v4471_v23, %v4472_v52  ;;  %v4480_v57 = vmax.f32 %v4478_v44, %v4479_v14  ;;  %v4487_v40 = vmax.f32 %v4485_v39, %v4486_v22  ;;  %v1051_v54 = vadd.f32 %v8743_v56, %v1050_v4 }
 0x197   :  { %v8934_v31 = vmax.f32 %v4466_v50, %v4467_v32  ;;  %v783_v33 = vadd.f32 %v8743_v56, %v782_v13  ;;  %v873_v19 = vadd.f32 %v8743_v56, %v872_v5  ;;  %v963_v53 = vadd.f32 %v8743_v56, %v962_v34 }
 0x198   :  { %v4474_v17 = vrot.slane %v4473_v8, 1  ;;  %v4481_v18 = vrot.slane %v4480_v57, 1  ;;  %v4488_v43 = vrot.slane %v4487_v40, 1  ;;  %v1239_v6 = vmax.f32 %v1051_v54, 0.0 }
 0x199   :  { %v1132_v38 = vmax.f32 %v783_v33, 0.0  ;;  %v8939_v35 = vmax.f32 %v873_v19, 0.0  ;;  %v8941_v37 = vmax.f32 %v963_v53, 0.0  ;;  %v8944_v4 = vadd.f32 %v8743_v56, %v1052_v10 }
 0x19a   :  { %v8946_v15 = vmax.f32 %v4473_v8, %v4474_v17  ;;  %v8948_v63 = vmax.f32 %v4480_v57, %v4481_v18  ;;  %v8950_v46 = vmax.f32 %v4487_v40, %v4488_v43  ;;  %v1755_v9 = vrot.slane %v1239_v6, 2 }
 0x19b   :  { %v1756_v41 = vrot.slane %v1239_v6, 4  ;;  %v1757_v29 = vrot.slane %v1239_v6, 6  ;;  %v5470_v59 = vsel %vm2277_vm1, %v1239_v6, -inf  ;;  %v1434_v47 = vrot.slane %v1132_v38, 2 }
 0x19c   :  { %v5471_v61 = vrot.slane %v5470_v59, 4  ;;  %v5477_v62 = vsel %vm2277_vm1, %v1755_v9, -inf  ;;  %v1435_v2 = vrot.slane %v1132_v38, 4  ;;  %v1436_v11 = vrot.slane %v1132_v38, 6 }
 0x19d   :  { %v5478_v20 = vrot.slane %v5477_v62, 4  ;;  %v5484_v56 = vsel %vm2277_vm1, %v1756_v41, -inf  ;;  %v5491_v24 = vsel %vm2277_vm1, %v1757_v29, -inf  ;;  %v2474_v7 = vsel %vm2277_vm1, %v1132_v38, -inf }
 0x19e   :  { %v5472_v12 = vmax.f32 %v5470_v59, %v5471_v61  ;;  %v5485_v42 = vrot.slane %v5484_v56, 4  ;;  %v5492_v36 = vrot.slane %v5491_v24, 4  ;;  %v2475_v3 = vrot.slane %v2474_v7, 4 }
 0x19f   :  { %v5479_v28 = vmax.f32 %v5477_v62, %v5478_v20  ;;  %v2481_v23 = vsel %vm2277_vm1, %v1434_v47, -inf  ;;  %v2488_v44 = vsel %vm2277_vm1, %v1435_v2, -inf  ;;  %v2495_v39 = vsel %vm2277_vm1, %v1436_v11, -inf  ;;  %v8213_v11 = vld [vmem:[%s11045_s0 + $0x60] sm:$0xff]  ;;  %v8231_v20 = vld [vmem:[%s11045_s0 + $0xf0] sm:$0xff] }
 0x1a0   :  { %v5473_v16 = vrot.slane %v5472_v12, 2  ;;  %v5486_v60 = vmax.f32 %v5484_v56, %v5485_v42  ;;  %v5493_v48 = vmax.f32 %v5491_v24, %v5492_v36  ;;  %v2476_v50 = vmax.f32 %v2474_v7, %v2475_v3  ;;  %v8249_v56 = vld [vmem:[%s11045_s0 + $0x180] sm:$0xff]  ;;  %v8267_v36 = vld [vmem:[%s11045_s0 + $0x210] sm:$0xff]  ;;  %8141 = vmatmul.msk.bf16.gmra.mxu0 %vm539_vm0, %v8213_v11  ;;  %8159 = vmatmul.msk.bf16.gmra.mxu1 %vm539_vm0, %v8231_v20 }
 0x1a1   :  { %v5480_v13 = vrot.slane %v5479_v28, 2  ;;  %v2482_v52 = vrot.slane %v2481_v23, 4  ;;  %v2489_v14 = vrot.slane %v2488_v44, 4  ;;  %v2496_v22 = vrot.slane %v2495_v39, 4  ;;  %8177 = vmatmul.msk.bf16.gmra.mxu2 %vm539_vm0, %v8249_v56  ;;  %8195 = vmatmul.msk.bf16.gmra.mxu3 %vm539_vm0, %v8267_v36 }
 0x1a2   :  { %v5474_v5 = vmax.f32 %v5472_v12, %v5473_v16  ;;  %v5487_v34 = vrot.slane %v5486_v60, 2  ;;  %v5494_v32 = vrot.slane %v5493_v48, 2  ;;  %v2477_v8 = vrot.slane %v2476_v50, 2 }
 0x1a3   :  { %v5481_v57 = vmax.f32 %v5479_v28, %v5480_v13  ;;  %v2483_v40 = vmax.f32 %v2481_v23, %v2482_v52  ;;  %v2490_v54 = vmax.f32 %v2488_v44, %v2489_v14  ;;  %v2497_v10 = vmax.f32 %v2495_v39, %v2496_v22 }
 0x1a4   :  { %v5475_v33 = vrot.slane %v5474_v5, 1  ;;  %v5488_v19 = vmax.f32 %v5486_v60, %v5487_v34  ;;  %v5495_v53 = vmax.f32 %v5493_v48, %v5494_v32  ;;  %v2478_v17 = vmax.f32 %v2476_v50, %v2477_v8 }
 0x1a5   :  { %v5482_v18 = vrot.slane %v5481_v57, 1  ;;  %v2484_v43 = vrot.slane %v2483_v40, 2  ;;  %v2491_v6 = vrot.slane %v2490_v54, 2  ;;  %v2498_v38 = vrot.slane %v2497_v10, 2 }
 0x1a6   :  { %v8960_v9 = vmax.f32 %v5474_v5, %v5475_v33  ;;  %v5489_v41 = vrot.slane %v5488_v19, 1  ;;  %v5496_v29 = vrot.slane %v5495_v53, 1  ;;  %v2479_v59 = vrot.slane %v2478_v17, 1 }
 0x1a7   :  { %v8962_v47 = vmax.f32 %v5481_v57, %v5482_v18  ;;  %v2485_v61 = vmax.f32 %v2483_v40, %v2484_v43  ;;  %v2492_v62 = vmax.f32 %v2490_v54, %v2491_v6  ;;  %v2499_v2 = vmax.f32 %v2497_v10, %v2498_v38 }
 0x1a8   :  { %v8973_v24 = vmax.f32 %v5488_v19, %v5489_v41  ;;  %v8975_v7 = vmax.f32 %v5495_v53, %v5496_v29  ;;  %v8977_v12 = vmax.f32 %v2478_v17, %v2479_v59  ;;  %v1542_v42 = vrot.slane %v8939_v35, 2 }
 0x1a9   :  { %v2486_v3 = vrot.slane %v2485_v61, 1  ;;  %v2493_v28 = vrot.slane %v2492_v62, 1  ;;  %v2500_v23 = vrot.slane %v2499_v2, 1  ;;  %v1543_v44 = vrot.slane %v8939_v35, 4 }
 0x1aa   :  { %v1544_v39 = vrot.slane %v8939_v35, 6  ;;  %v3482_v16 = vsel %vm2277_vm1, %v8939_v35, -inf  ;;  %v3489_v60 = vsel %vm2277_vm1, %v1542_v42, -inf  ;;  %v1650_v48 = vrot.slane %v8941_v37, 2 }
 0x1ab   :  { %v8993_v50 = vmax.f32 %v2485_v61, %v2486_v3  ;;  %v8995_v13 = vmax.f32 %v2492_v62, %v2493_v28  ;;  %v8997_v52 = vmax.f32 %v2499_v2, %v2500_v23  ;;  %v3483_v14 = vrot.slane %v3482_v16, 4 }
 0x1ac   :  { %v3490_v22 = vrot.slane %v3489_v60, 4  ;;  %v3496_v5 = vsel %vm2277_vm1, %v1543_v44, -inf  ;;  %v3503_v35 = vsel %vm2277_vm1, %v1544_v39, -inf  ;;  %v1651_v34 = vrot.slane %v8941_v37, 4 }
 0x1ad   :  { %v3484_v32 = vmax.f32 %v3482_v16, %v3483_v14  ;;  %v3497_v8 = vrot.slane %v3496_v5, 4  ;;  %v3504_v57 = vrot.slane %v3503_v35, 4  ;;  %v1652_v40 = vrot.slane %v8941_v37, 6 }
 0x1ae   :  { %v3491_v54 = vmax.f32 %v3489_v60, %v3490_v22  ;;  %v4490_v10 = vsel %vm2277_vm1, %v8941_v37, -inf  ;;  %v4497_v33 = vsel %vm2277_vm1, %v1650_v48, -inf  ;;  %v4504_v19 = vsel %vm2277_vm1, %v1651_v34, -inf }
 0x1af   :  { %v3485_v53 = vrot.slane %v3484_v32, 2  ;;  %v3498_v17 = vmax.f32 %v3496_v5, %v3497_v8  ;;  %v3505_v18 = vmax.f32 %v3503_v35, %v3504_v57  ;;  %v4491_v43 = vrot.slane %v4490_v10, 4  ;;  %v785_v5 = vpop.f32.mrf.mxu0 }
 0x1b0   :  { %v3492_v6 = vrot.slane %v3491_v54, 2  ;;  %v4498_v38 = vrot.slane %v4497_v33, 4  ;;  %v4505_v41 = vrot.slane %v4504_v19, 4  ;;  %v4511_v29 = vsel %vm2277_vm1, %v1652_v40, -inf }
 0x1b1   :  { %v3486_v59 = vmax.f32 %v3484_v32, %v3485_v53  ;;  %v3499_v61 = vrot.slane %v3498_v17, 2  ;;  %v3506_v62 = vrot.slane %v3505_v18, 2  ;;  %v4492_v2 = vmax.f32 %v4490_v10, %v4491_v43 }
 0x1b2   :  { %v3493_v11 = vmax.f32 %v3491_v54, %v3492_v6  ;;  %v4499_v20 = vmax.f32 %v4497_v33, %v4498_v38  ;;  %v4506_v37 = vmax.f32 %v4504_v19, %v4505_v41  ;;  %v4512_v56 = vrot.slane %v4511_v29, 4 }
 0x1b3   :  { %v3487_v42 = vrot.slane %v3486_v59, 1  ;;  %v3500_v36 = vmax.f32 %v3498_v17, %v3499_v61  ;;  %v3507_v3 = vmax.f32 %v3505_v18, %v3506_v62  ;;  %v4493_v28 = vrot.slane %v4492_v2, 2  ;;  %v9020_v17 = vld [vmem:[%s11046_s2] ss:$0 sm:$0xff]  ;;  %v875_v62 = vpop.f32.mrf.mxu1 }
 0x1b4   :  { %v3494_v23 = vrot.slane %v3493_v11, 1  ;;  %v4500_v44 = vrot.slane %v4499_v20, 2  ;;  %v4507_v39 = vrot.slane %v4506_v37, 2  ;;  %v4513_v16 = vmax.f32 %v4511_v29, %v4512_v56 }
 0x1b5   :  { %v9008_v60 = vmax.f32 %v3486_v59, %v3487_v42  ;;  %v3501_v48 = vrot.slane %v3500_v36, 1  ;;  %v3508_v14 = vrot.slane %v3507_v3, 1  ;;  %v4494_v22 = vmax.f32 %v4492_v2, %v4493_v28  ;;  %v965_v2 = vpop.f32.mrf.mxu2  ;;  %v1055_v42 = vpop.f32.mrf.mxu3 }
 0x1b6   :  { %v9010_v35 = vmax.f32 %v3493_v11, %v3494_v23  ;;  %v4501_v34 = vmax.f32 %v4499_v20, %v4500_v44  ;;  %v4508_v32 = vmax.f32 %v4506_v37, %v4507_v39  ;;  %v4514_v8 = vrot.slane %v4513_v16, 2 }
 0x1b7   :  { %v9012_v57 = vmax.f32 %v3500_v36, %v3501_v48  ;;  %v9014_v40 = vmax.f32 %v3507_v3, %v3508_v14  ;;  %v4495_v54 = vrot.slane %v4494_v22, 1  ;;  %v1240_v10 = vmax.f32 %v8944_v4, 0.0 }
 0x1b8   :  { %v4502_v33 = vrot.slane %v4501_v34, 1  ;;  %v4509_v19 = vrot.slane %v4508_v32, 1  ;;  %v4515_v53 = vmax.f32 %v4513_v16, %v4514_v8  ;;  %v786_v18 = vadd.f32 %v9020_v17, %v785_v5 }
 0x1b9   :  { %v9023_v43 = vmax.f32 %v4494_v22, %v4495_v54  ;;  %v1758_v6 = vrot.slane %v1240_v10, 2  ;;  %v1759_v38 = vrot.slane %v1240_v10, 4  ;;  %v1760_v41 = vrot.slane %v1240_v10, 6 }
 0x1ba   :  { %v9025_v29 = vmax.f32 %v4501_v34, %v4502_v33  ;;  %v9027_v59 = vmax.f32 %v4508_v32, %v4509_v19  ;;  %v4516_v4 = vrot.slane %v4515_v53, 1  ;;  %v5498_v61 = vsel %vm2277_vm1, %v1240_v10, -inf }
 0x1bb   :  { %v5499_v11 = vrot.slane %v5498_v61, 4  ;;  %v5505_v20 = vsel %vm2277_vm1, %v1758_v6, -inf  ;;  %v5512_v37 = vsel %vm2277_vm1, %v1759_v38, -inf  ;;  %v5519_v56 = vsel %vm2277_vm1, %v1760_v41, -inf }
 0x1bc   :  { %11078 = vst [vmem:[#allocation2_spill] sm:$0xff] %v9025_v29  ;;  %v9033_v36 = vmax.f32 %v4515_v53, %v4516_v4  ;;  %v5506_v3 = vrot.slane %v5505_v20, 4  ;;  %v5513_v28 = vrot.slane %v5512_v37, 4  ;;  %v5520_v23 = vrot.slane %v5519_v56, 4 }
 0x1bd   :  { %11079 = vst [vmem:[#allocation3_spill] sm:$0xff] %v9027_v59  ;;  %v5500_v44 = vmax.f32 %v5498_v61, %v5499_v11  ;;  %v1133_v39 = vmax.f32 %v786_v18, 0.0  ;;  %v876_v16 = vadd.f32 %v9020_v17, %v875_v62  ;;  %v966_v48 = vadd.f32 %v9020_v17, %v965_v2  ;;  %v787_v59 = vpop.f32.mrf.mxu0 }
 0x1be   :  { %11080 = vst [vmem:[#allocation4_spill] sm:$0xff] %v9033_v36  ;;  %v5507_v14 = vmax.f32 %v5505_v20, %v5506_v3  ;;  %v5514_v22 = vmax.f32 %v5512_v37, %v5513_v28  ;;  %v5521_v5 = vmax.f32 %v5519_v56, %v5520_v23  ;;  %v1056_v34 = vadd.f32 %v9020_v17, %v1055_v42 }
 0x1bf   :  { %v5501_v32 = vrot.slane %v5500_v44, 2  ;;  %v1437_v8 = vrot.slane %v1133_v39, 2  ;;  %v1438_v54 = vrot.slane %v1133_v39, 4  ;;  %v1439_v10 = vrot.slane %v1133_v39, 6 }
 0x1c0   :  { %v5508_v33 = vrot.slane %v5507_v14, 2  ;;  %v5515_v19 = vrot.slane %v5514_v22, 2  ;;  %v5522_v53 = vrot.slane %v5521_v5, 2  ;;  %v2502_v6 = vsel %vm2277_vm1, %v1133_v39, -inf }
 0x1c1   :  { %v5502_v38 = vmax.f32 %v5500_v44, %v5501_v32  ;;  %v2503_v18 = vrot.slane %v2502_v6, 4  ;;  %v2509_v41 = vsel %vm2277_vm1, %v1437_v8, -inf  ;;  %v2516_v4 = vsel %vm2277_vm1, %v1438_v54, -inf }
 0x1c2   :  { %v5509_v61 = vmax.f32 %v5507_v14, %v5508_v33  ;;  %v5516_v62 = vmax.f32 %v5514_v22, %v5515_v19  ;;  %v5523_v2 = vmax.f32 %v5521_v5, %v5522_v53  ;;  %v2510_v11 = vrot.slane %v2509_v41, 4 }
 0x1c3   :  { %v5503_v20 = vrot.slane %v5502_v38, 1  ;;  %v2504_v37 = vmax.f32 %v2502_v6, %v2503_v18  ;;  %v2517_v56 = vrot.slane %v2516_v4, 4  ;;  %v2523_v42 = vsel %vm2277_vm1, %v1439_v10, -inf }
 0x1c4   :  { %v5510_v3 = vrot.slane %v5509_v61, 1  ;;  %v5517_v28 = vrot.slane %v5516_v62, 1  ;;  %v5524_v23 = vrot.slane %v5523_v2, 1  ;;  %v2511_v36 = vmax.f32 %v2509_v41, %v2510_v11 }
 0x1c5   :  { %v9042_v39 = vmax.f32 %v5502_v38, %v5503_v20  ;;  %v2505_v44 = vrot.slane %v2504_v37, 2  ;;  %v2518_v32 = vmax.f32 %v2516_v4, %v2517_v56  ;;  %v2524_v8 = vrot.slane %v2523_v42, 4 }
 0x1c6   :  { %v9044_v54 = vmax.f32 %v5509_v61, %v5510_v3  ;;  %v9046_v14 = vmax.f32 %v5516_v62, %v5517_v28  ;;  %v9048_v22 = vmax.f32 %v5523_v2, %v5524_v23  ;;  %v2512_v5 = vrot.slane %v2511_v36, 2 }
 0x1c7   :  { %11081 = vst [vmem:[#allocation5_spill] sm:$0xff] %v9042_v39  ;;  %v2506_v33 = vmax.f32 %v2504_v37, %v2505_v44  ;;  %v2519_v19 = vrot.slane %v2518_v32, 2  ;;  %v2525_v10 = vmax.f32 %v2523_v42, %v2524_v8  ;;  %v1169_v53 = vmax.f32 %v876_v16, 0.0 }
 0x1c8   :  { %11082 = vst [vmem:[#allocation6_spill] sm:$0xff] %v9044_v54  ;;  %v2513_v6 = vmax.f32 %v2511_v36, %v2512_v5  ;;  %v1205_v18 = vmax.f32 %v966_v48, 0.0  ;;  %v9050_v41 = vmax.f32 %v1056_v34, 0.0  ;;  %v9053_v38 = vadd.f32 %v9020_v17, %v787_v59 }
 0x1c9   :  { %11083 = vst [vmem:[#allocation7_spill] sm:$0xff] %v9046_v14  ;;  %v2507_v4 = vrot.slane %v2506_v33, 1  ;;  %v2520_v11 = vmax.f32 %v2518_v32, %v2519_v19  ;;  %v2526_v61 = vrot.slane %v2525_v10, 2  ;;  %v1545_v20 = vrot.slane %v1169_v53, 2 }
 0x1ca   :  { %11084 = vst [vmem:[#allocation8_spill] sm:$0xff] %v9048_v22  ;;  %v2514_v62 = vrot.slane %v2513_v6, 1  ;;  %v1546_v56 = vrot.slane %v1169_v53, 4  ;;  %v1547_v2 = vrot.slane %v1169_v53, 6  ;;  %v3510_v3 = vsel %vm2277_vm1, %v1169_v53, -inf }
 0x1cb   :  { %v9056_v37 = vmax.f32 %v2506_v33, %v2507_v4  ;;  %v2521_v42 = vrot.slane %v2520_v11, 1  ;;  %v2527_v16 = vmax.f32 %v2525_v10, %v2526_v61  ;;  %v3511_v36 = vrot.slane %v3510_v3, 4 }
 0x1cc   :  { %v9058_v48 = vmax.f32 %v2513_v6, %v2514_v62  ;;  %v3517_v34 = vsel %vm2277_vm1, %v1545_v20, -inf  ;;  %v3524_v59 = vsel %vm2277_vm1, %v1546_v56, -inf  ;;  %v3531_v28 = vsel %vm2277_vm1, %v1547_v2, -inf }
 0x1cd   :  { %11085 = vst [vmem:[#allocation9_spill] sm:$0xff] %v9056_v37  ;;  %v9063_v23 = vmax.f32 %v2520_v11, %v2521_v42  ;;  %v2528_v44 = vrot.slane %v2527_v16, 1  ;;  %v3512_v32 = vmax.f32 %v3510_v3, %v3511_v36  ;;  %v3518_v8 = vrot.slane %v3517_v34, 4 }
 0x1ce   :  { %11086 = vst [vmem:[#allocation10_spill] sm:$0xff] %v9058_v48  ;;  %v3525_v5 = vrot.slane %v3524_v59, 4  ;;  %v3532_v19 = vrot.slane %v3531_v28, 4  ;;  %v1653_v33 = vrot.slane %v1205_v18, 2  ;;  %v1654_v53 = vrot.slane %v1205_v18, 4 }
 0x1cf   :  { %11087 = vst [vmem:[#allocation11_spill] sm:$0xff] %v9063_v23  ;;  %v9065_v4 = vmax.f32 %v2527_v16, %v2528_v44  ;;  %v3513_v10 = vrot.slane %v3512_v32, 2  ;;  %v3519_v6 = vmax.f32 %v3517_v34, %v3518_v8  ;;  %v1655_v61 = vrot.slane %v1205_v18, 6 }
 0x1d0   :  { %v3526_v62 = vmax.f32 %v3524_v59, %v3525_v5  ;;  %v3533_v20 = vmax.f32 %v3531_v28, %v3532_v19  ;;  %v4518_v56 = vsel %vm2277_vm1, %v1205_v18, -inf  ;;  %v4525_v2 = vsel %vm2277_vm1, %v1653_v33, -inf }
 0x1d1   :  { %11088 = vst [vmem:[#allocation12_spill] sm:$0xff] %v9065_v4  ;;  %v3514_v11 = vmax.f32 %v3512_v32, %v3513_v10  ;;  %v3520_v42 = vrot.slane %v3519_v6, 2  ;;  %v4519_v23 = vrot.slane %v4518_v56, 4  ;;  %v4526_v3 = vrot.slane %v4525_v2, 4 }
 0x1d2   :  { %v3527_v36 = vrot.slane %v3526_v62, 2  ;;  %v3534_v48 = vrot.slane %v3533_v20, 2  ;;  %v4532_v37 = vsel %vm2277_vm1, %v1654_v53, -inf  ;;  %v4539_v16 = vsel %vm2277_vm1, %v1655_v61, -inf }
 0x1d3   :  { %v3515_v44 = vrot.slane %v3514_v11, 1  ;;  %v3521_v4 = vmax.f32 %v3519_v6, %v3520_v42  ;;  %v4520_v34 = vmax.f32 %v4518_v56, %v4519_v23  ;;  %v4527_v8 = vmax.f32 %v4525_v2, %v4526_v3 }
 0x1d4   :  { %v3528_v59 = vmax.f32 %v3526_v62, %v3527_v36  ;;  %v3535_v28 = vmax.f32 %v3533_v20, %v3534_v48  ;;  %v4533_v5 = vrot.slane %v4532_v37, 4  ;;  %v4540_v18 = vrot.slane %v4539_v16, 4 }
 0x1d5   :  { %v9071_v19 = vmax.f32 %v3514_v11, %v3515_v44  ;;  %v3522_v32 = vrot.slane %v3521_v4, 1  ;;  %v4521_v33 = vrot.slane %v4520_v34, 2  ;;  %v4528_v10 = vrot.slane %v4527_v8, 2 }
 0x1d6   :  { %v3529_v22 = vrot.slane %v3528_v59, 1  ;;  %v3536_v14 = vrot.slane %v3535_v28, 1  ;;  %v4534_v54 = vmax.f32 %v4532_v37, %v4533_v5  ;;  %v4541_v39 = vmax.f32 %v4539_v16, %v4540_v18 }
 0x1d7   :  { %v9073_v53 = vmax.f32 %v3521_v4, %v3522_v32  ;;  %v4522_v61 = vmax.f32 %v4520_v34, %v4521_v33  ;;  %v4529_v29 = vmax.f32 %v4527_v8, %v4528_v10  ;;  %v1761_v23 = vrot.slane %v9050_v41, 2  ;;  %v877_v34 = vpop.f32.mrf.mxu1 }
 0x1d8   :  { %v9076_v6 = vmax.f32 %v3528_v59, %v3529_v22  ;;  %v9078_v48 = vmax.f32 %v3535_v28, %v3536_v14  ;;  %v4535_v62 = vrot.slane %v4534_v54, 2  ;;  %v4542_v20 = vrot.slane %v4541_v39, 2 }
 0x1d9   :  { %v4523_v56 = vrot.slane %v4522_v61, 1  ;;  %v4530_v2 = vrot.slane %v4529_v29, 1  ;;  %v1762_v11 = vrot.slane %v9050_v41, 4  ;;  %v1763_v42 = vrot.slane %v9050_v41, 6 }
 0x1da   :  { %11089 = vst [vmem:[#allocation13_spill] sm:$0xff] %v9078_v48  ;;  %v4536_v37 = vmax.f32 %v4534_v54, %v4535_v62  ;;  %v4543_v3 = vmax.f32 %v4541_v39, %v4542_v20  ;;  %v5526_v4 = vsel %vm2277_vm1, %v9050_v41, -inf  ;;  %v5533_v36 = vsel %vm2277_vm1, %v1761_v23, -inf }
 0x1db   :  { %v9085_v16 = vmax.f32 %v4522_v61, %v4523_v56  ;;  %v9087_v22 = vmax.f32 %v4529_v29, %v4530_v2  ;;  %v5527_v14 = vrot.slane %v5526_v4, 4  ;;  %v5534_v44 = vrot.slane %v5533_v36, 4 }
 0x1dc   :  { %v4537_v8 = vrot.slane %v4536_v37, 1  ;;  %v4544_v59 = vrot.slane %v4543_v3, 1  ;;  %v5540_v28 = vsel %vm2277_vm1, %v1762_v11, -inf  ;;  %v5547_v5 = vsel %vm2277_vm1, %v1763_v42, -inf }
 0x1dd   :  { %11090 = vst [vmem:[#allocation14_spill] sm:$0xff] %v9085_v16  ;;  %v5528_v54 = vmax.f32 %v5526_v4, %v5527_v14  ;;  %v5535_v39 = vmax.f32 %v5533_v36, %v5534_v44  ;;  %v5541_v18 = vrot.slane %v5540_v28, 4  ;;  %v5548_v32 = vrot.slane %v5547_v5, 4 }
 0x1de   :  { %11091 = vst [vmem:[#allocation15_spill] sm:$0xff] %v9087_v22  ;;  %v9091_v41 = vmax.f32 %v4536_v37, %v4537_v8  ;;  %v9093_v33 = vmax.f32 %v4543_v3, %v4544_v59  ;;  %v1134_v29 = vmax.f32 %v9053_v38, 0.0  ;;  %v878_v10 = vadd.f32 %v9020_v17, %v877_v34 }
 0x1df   :  { %v5529_v61 = vrot.slane %v5528_v54, 2  ;;  %v5536_v23 = vrot.slane %v5535_v39, 2  ;;  %v5542_v62 = vmax.f32 %v5540_v28, %v5541_v18  ;;  %v5549_v20 = vmax.f32 %v5547_v5, %v5548_v32 }
 0x1e0   :  { %11092 = vst [vmem:[#allocation16_spill] sm:$0xff] %v9091_v41  ;;  %v1440_v56 = vrot.slane %v1134_v29, 2  ;;  %v1441_v2 = vrot.slane %v1134_v29, 4  ;;  %v1442_v11 = vrot.slane %v1134_v29, 6  ;;  %v2530_v42 = vsel %vm2277_vm1, %v1134_v29, -inf  ;;  %v967_v29 = vpop.f32.mrf.mxu2 }
 0x1e1   :  { %11093 = vst [vmem:[#allocation17_spill] sm:$0xff] %v9093_v33  ;;  %v5530_v4 = vmax.f32 %v5528_v54, %v5529_v61  ;;  %v5537_v36 = vmax.f32 %v5535_v39, %v5536_v23  ;;  %v5543_v14 = vrot.slane %v5542_v62, 2  ;;  %v5550_v37 = vrot.slane %v5549_v20, 2 }
 0x1e2   :  { %v2531_v44 = vrot.slane %v2530_v42, 4  ;;  %v2537_v3 = vsel %vm2277_vm1, %v1440_v56, -inf  ;;  %v2544_v38 = vsel %vm2277_vm1, %v1441_v2, -inf  ;;  %v2551_v34 = vsel %vm2277_vm1, %v1442_v11, -inf }
 0x1e3   :  { %v5531_v8 = vrot.slane %v5530_v4, 1  ;;  %v5538_v59 = vrot.slane %v5537_v36, 1  ;;  %v5544_v28 = vmax.f32 %v5542_v62, %v5543_v14  ;;  %v5551_v5 = vmax.f32 %v5549_v20, %v5550_v37 }
 0x1e4   :  { %v2532_v18 = vmax.f32 %v2530_v42, %v2531_v44  ;;  %v2538_v32 = vrot.slane %v2537_v3, 4  ;;  %v2545_v33 = vrot.slane %v2544_v38, 4  ;;  %v2552_v41 = vrot.slane %v2551_v34, 4 }
 0x1e5   :  { %v9101_v54 = vmax.f32 %v5530_v4, %v5531_v8  ;;  %v9103_v39 = vmax.f32 %v5537_v36, %v5538_v59  ;;  %v5545_v61 = vrot.slane %v5544_v28, 1  ;;  %v5552_v23 = vrot.slane %v5551_v5, 1 }
 0x1e6   :  { %v2533_v56 = vrot.slane %v2532_v18, 2  ;;  %v2539_v22 = vmax.f32 %v2537_v3, %v2538_v32  ;;  %v2546_v2 = vmax.f32 %v2544_v38, %v2545_v33  ;;  %v2553_v16 = vmax.f32 %v2551_v34, %v2552_v41 }
 0x1e7   :  { %11094 = vst [vmem:[#allocation18_spill] sm:$0xff] %v9101_v54  ;;  %v9105_v11 = vmax.f32 %v5544_v28, %v5545_v61  ;;  %v9107_v48 = vmax.f32 %v5551_v5, %v5552_v23  ;;  %v1170_v62 = vmax.f32 %v878_v10, 0.0  ;;  %v968_v20 = vadd.f32 %v9020_v17, %v967_v29 }
 0x1e8   :  { %11095 = vst [vmem:[#allocation19_spill] sm:$0xff] %v9103_v39  ;;  %v2534_v42 = vmax.f32 %v2532_v18, %v2533_v56  ;;  %v2540_v14 = vrot.slane %v2539_v22, 2  ;;  %v2547_v37 = vrot.slane %v2546_v2, 2  ;;  %v2554_v4 = vrot.slane %v2553_v16, 2 }
 0x1e9   :  { %11096 = vst [vmem:[#allocation20_spill] sm:$0xff] %v9105_v11  ;;  %v1548_v44 = vrot.slane %v1170_v62, 2  ;;  %v1549_v36 = vrot.slane %v1170_v62, 4  ;;  %v1550_v8 = vrot.slane %v1170_v62, 6  ;;  %v3538_v59 = vsel %vm2277_vm1, %v1170_v62, -inf }
 0x1ea   :  { %11097 = vst [vmem:[#allocation21_spill] sm:$0xff] %v9107_v48  ;;  %v2535_v39 = vrot.slane %v2534_v42, 1  ;;  %v2541_v3 = vmax.f32 %v2539_v22, %v2540_v14  ;;  %v2548_v33 = vmax.f32 %v2546_v2, %v2547_v37  ;;  %v2555_v41 = vmax.f32 %v2553_v16, %v2554_v4 }
 0x1eb   :  { %v3539_v38 = vrot.slane %v3538_v59, 4  ;;  %v3545_v34 = vsel %vm2277_vm1, %v1548_v44, -inf  ;;  %v3552_v10 = vsel %vm2277_vm1, %v1549_v36, -inf  ;;  %v3559_v28 = vsel %vm2277_vm1, %v1550_v8, -inf }
 0x1ec   :  { %v2536_v5 = vmax.f32 %v2534_v42, %v2535_v39  ;;  %v2542_v18 = vrot.slane %v2541_v3, 1  ;;  %v2549_v32 = vrot.slane %v2548_v33, 1  ;;  %v2556_v29 = vrot.slane %v2555_v41, 1 }
 0x1ed   :  { %v3540_v61 = vmax.f32 %v3538_v59, %v3539_v38  ;;  %v3546_v23 = vrot.slane %v3545_v34, 4  ;;  %v3553_v56 = vrot.slane %v3552_v10, 4  ;;  %v3560_v48 = vrot.slane %v3559_v28, 4 }
 0x1ee   :  { %v2543_v62 = vmax.f32 %v2541_v3, %v2542_v18  ;;  %v2550_v11 = vmax.f32 %v2548_v33, %v2549_v32  ;;  %v2557_v22 = vmax.f32 %v2555_v41, %v2556_v29  ;;  %v6322_v16 = vmax.f32 %v8903_v30, %v2536_v5 }
 0x1ef   :  { %v3541_v2 = vrot.slane %v3540_v61, 2  ;;  %v3547_v14 = vmax.f32 %v3545_v34, %v3546_v23  ;;  %v3554_v37 = vmax.f32 %v3552_v10, %v3553_v56  ;;  %v3561_v4 = vmax.f32 %v3559_v28, %v3560_v48  ;;  %v1057_v48 = vpop.f32.mrf.mxu3  ;;  %v790_v28 = vpop.f32.mrf.mxu0 }
 0x1f0   :  { %v6323_v44 = vmax.f32 %v8905_v51, %v2543_v62  ;;  %v6324_v39 = vmax.f32 %v8908_v45, %v2550_v11  ;;  %v6325_v42 = vmax.f32 %v8915_v49, %v2557_v22  ;;  %v6610_v36 = vpack.c.bf16 %v6322_v16, %v6322_v16 }
 0x1f1   :  { %v3542_v8 = vmax.f32 %v3540_v61, %v3541_v2  ;;  %v3548_v59 = vrot.slane %v3547_v14, 2  ;;  %v3555_v38 = vrot.slane %v3554_v37, 2  ;;  %v3562_v54 = vrot.slane %v3561_v4, 2 }
 0x1f2   :  { %v6611_v3 = vpack.c.bf16 %v6323_v44, %v6323_v44  ;;  %v6612_v33 = vpack.c.bf16 %v6324_v39, %v6324_v39  ;;  %v6613_v41 = vpack.c.bf16 %v6325_v42, %v6325_v42  ;;  %v7186_v18 = vunpack.c.l.b16 %v6610_v36 }
 0x1f3   :  { %v3543_v30 = vrot.slane %v3542_v8, 1  ;;  %v3549_v5 = vmax.f32 %v3547_v14, %v3548_v59  ;;  %v3556_v34 = vmax.f32 %v3554_v37, %v3555_v38  ;;  %v3563_v10 = vmax.f32 %v3561_v4, %v3562_v54 }
 0x1f4   :  { %v7187_v51 = vunpack.c.l.b16 %v6611_v3  ;;  %v7188_v32 = vunpack.c.l.b16 %v6612_v33  ;;  %v7189_v45 = vunpack.c.l.b16 %v6613_v41  ;;  %v7479_v49 = vsel %vm7468_vm5, %v7186_v18, %v8848_v55 }
 0x1f5   :  { %v3544_v11 = vmax.f32 %v3542_v8, %v3543_v30  ;;  %v3550_v29 = vrot.slane %v3549_v5, 1  ;;  %v3557_v61 = vrot.slane %v3556_v34, 1  ;;  %v3564_v23 = vrot.slane %v3563_v10, 1 }
 0x1f6   :  { %v7480_v56 = vsel %vm7470_vm6, %v7187_v51, %v7479_v49  ;;  %v1206_v62 = vmax.f32 %v968_v20, 0.0  ;;  %v1058_v22 = vadd.f32 %v9020_v17, %v1057_v48  ;;  %v791_v16 = vadd.f32 %v9020_v17, %v790_v28  ;;  %v8250_v48 = vld [vmem:[%s11045_s0 + $0x188] sm:$0xff]  ;;  %v8268_v49 = vld [vmem:[%s11045_s0 + $0x218] sm:$0xff] }
 0x1f7   :  { %v7481_v54 = vsel %vm7472_vm7, %v7188_v32, %v7480_v56  ;;  %v3551_v2 = vmax.f32 %v3549_v5, %v3550_v29  ;;  %v3558_v14 = vmax.f32 %v3556_v34, %v3557_v61  ;;  %v3565_v37 = vmax.f32 %v3563_v10, %v3564_v23  ;;  %v8214_v34 = vld [vmem:[%s11045_s0 + $0x68] sm:$0xff]  ;;  %v8232_v10 = vld [vmem:[%s11045_s0 + $0xf8] sm:$0xff]  ;;  %8178 = vmatmul.msk.bf16.gmra.mxu2 %vm539_vm0, %v8250_v48 }
 0x1f8   :  { %v7482_v4 = vsel %vm7474_vm8, %v7189_v45, %v7481_v54  ;;  %v6394_v55 = vmax.f32 %v8925_v25, %v3544_v11  ;;  %v1656_v44 = vrot.slane %v1206_v62, 2  ;;  %v1657_v39 = vrot.slane %v1206_v62, 4  ;;  %8142 = vmatmul.msk.bf16.gmra.mxu0 %vm539_vm0, %v8214_v34  ;;  %8160 = vmatmul.msk.bf16.gmra.mxu1 %vm539_vm0, %v8232_v10 }
 0x1f9   :  { %v7722_v42 = vpack.c.b16 %v7482_v4, %v7482_v4  ;;  %v6395_v36 = vmax.f32 %v8927_v27, %v3551_v2  ;;  %v6396_v20 = vmax.f32 %v8929_v58, %v3558_v14  ;;  %v6397_v8 = vmax.f32 %v8931_v21, %v3565_v37  ;;  %8196 = vmatmul.msk.bf16.gmra.mxu3 %vm539_vm0, %v8268_v49 }
 0x1fa   :  { %v6682_v59 = vpack.c.bf16 %v6394_v55, %v6394_v55  ;;  %v1658_v38 = vrot.slane %v1206_v62, 6  ;;  %v4546_v3 = vsel %vm2277_vm1, %v1206_v62, -inf  ;;  %v4553_v33 = vsel %vm2277_vm1, %v1656_v44, -inf }
 0x1fb   :  { %7794 = vst [vmem:[%s11047_s3 + $0x4] sm:$0xf] %v7722_v42  ;;  %v6683_v25 = vpack.c.bf16 %v6395_v36, %v6395_v36  ;;  %v6684_v41 = vpack.c.bf16 %v6396_v20, %v6396_v20  ;;  %v6685_v18 = vpack.c.bf16 %v6397_v8, %v6397_v8  ;;  %v4547_v30 = vrot.slane %v4546_v3, 4 }
 0x1fc   :  { %v7258_v5 = vunpack.c.l.b16 %v6682_v59  ;;  %v4554_v27 = vrot.slane %v4553_v33, 4  ;;  %v4560_v58 = vsel %vm2277_vm1, %v1657_v39, -inf  ;;  %v4567_v21 = vsel %vm2277_vm1, %v1658_v38, -inf }
 0x1fd   :  { %v7259_v28 = vunpack.c.l.b16 %v6683_v25  ;;  %v7260_v51 = vunpack.c.l.b16 %v6684_v41  ;;  %v7261_v32 = vunpack.c.l.b16 %v6685_v18  ;;  %v4548_v45 = vmax.f32 %v4546_v3, %v4547_v30 }
 0x1fe   :  { %v7542_v11 = vsel %vm7468_vm5, %v7258_v5, %v8882_v0  ;;  %v4555_v29 = vmax.f32 %v4553_v33, %v4554_v27  ;;  %v4561_v61 = vrot.slane %v4560_v58, 4  ;;  %v4568_v23 = vrot.slane %v4567_v21, 4 }
 0x1ff   :  { %v7543_v56 = vsel %vm7470_vm6, %v7259_v28, %v7542_v11  ;;  %v4549_v62 = vrot.slane %v4548_v45, 2  ;;  %v1242_v54 = vmax.f32 %v1058_v22, 0.0  ;;  %v9153_v2 = vmax.f32 %v791_v16, 0.0 }
 0x200   :  { %v7544_v14 = vsel %vm7472_vm7, %v7260_v51, %v7543_v56  ;;  %v4556_v0 = vrot.slane %v4555_v29, 2  ;;  %v4562_v37 = vmax.f32 %v4560_v58, %v4561_v61  ;;  %v4569_v4 = vmax.f32 %v4567_v21, %v4568_v23 }
 0x201   :  { %v7545_v55 = vsel %vm7474_vm8, %v7261_v32, %v7544_v14  ;;  %v4550_v44 = vmax.f32 %v4548_v45, %v4549_v62  ;;  %v1764_v39 = vrot.slane %v1242_v54, 2  ;;  %v1765_v42 = vrot.slane %v1242_v54, 4 }
 0x202   :  { %v7731_v36 = vpack.c.b16 %v7545_v55, %v7545_v55  ;;  %v4557_v20 = vmax.f32 %v4555_v29, %v4556_v0  ;;  %v4563_v8 = vrot.slane %v4562_v37, 2  ;;  %v4570_v22 = vrot.slane %v4569_v4, 2 }
 0x203   :  { %v4551_v16 = vrot.slane %v4550_v44, 1  ;;  %v1766_v59 = vrot.slane %v1242_v54, 6  ;;  %v5554_v38 = vsel %vm2277_vm1, %v1242_v54, -inf  ;;  %v5561_v3 = vsel %vm2277_vm1, %v1764_v39, -inf }
 0x204   :  { %7803 = vst [vmem:[%s11047_s3 + $0x28] sm:$0xf] %v7731_v36  ;;  %v4558_v33 = vrot.slane %v4557_v20, 1  ;;  %v4564_v25 = vmax.f32 %v4562_v37, %v4563_v8  ;;  %v4571_v41 = vmax.f32 %v4569_v4, %v4570_v22  ;;  %v5555_v18 = vrot.slane %v5554_v38, 4 }
 0x205   :  { %v4552_v30 = vmax.f32 %v4550_v44, %v4551_v16  ;;  %v5562_v5 = vrot.slane %v5561_v3, 4  ;;  %v5568_v27 = vsel %vm2277_vm1, %v1765_v42, -inf  ;;  %v5575_v58 = vsel %vm2277_vm1, %v1766_v59, -inf }
 0x206   :  { %v4559_v21 = vmax.f32 %v4557_v20, %v4558_v33  ;;  %v4565_v34 = vrot.slane %v4564_v25, 1  ;;  %v4572_v10 = vrot.slane %v4571_v41, 1  ;;  %v5556_v48 = vmax.f32 %v5554_v38, %v5555_v18 }
 0x207   :  { %v6466_v28 = vmax.f32 %v8934_v31, %v4552_v30  ;;  %v5563_v51 = vmax.f32 %v5561_v3, %v5562_v5  ;;  %v5569_v32 = vrot.slane %v5568_v27, 4  ;;  %v5576_v45 = vrot.slane %v5575_v58, 4 }
 0x208   :  { %v4566_v49 = vmax.f32 %v4564_v25, %v4565_v34  ;;  %v4573_v11 = vmax.f32 %v4571_v41, %v4572_v10  ;;  %v6467_v29 = vmax.f32 %v8946_v15, %v4559_v21  ;;  %v5557_v61 = vrot.slane %v5556_v48, 2 }
 0x209   :  { %v6754_v23 = vpack.c.bf16 %v6466_v28, %v6466_v28  ;;  %v5564_v56 = vrot.slane %v5563_v51, 2  ;;  %v5570_v62 = vmax.f32 %v5568_v27, %v5569_v32  ;;  %v5577_v54 = vmax.f32 %v5575_v58, %v5576_v45 }
 0x20a   :  { %v6468_v14 = vmax.f32 %v8948_v63, %v4566_v49  ;;  %v6469_v0 = vmax.f32 %v8950_v46, %v4573_v11  ;;  %v6755_v37 = vpack.c.bf16 %v6467_v29, %v6467_v29  ;;  %v5558_v4 = vmax.f32 %v5556_v48, %v5557_v61 }
 0x20b   :  { %v7330_v55 = vunpack.c.l.b16 %v6754_v23  ;;  %v5565_v31 = vmax.f32 %v5563_v51, %v5564_v56  ;;  %v5571_v44 = vrot.slane %v5570_v62, 2  ;;  %v5578_v39 = vrot.slane %v5577_v54, 2 }
 0x20c   :  { %v6756_v42 = vpack.c.bf16 %v6468_v14, %v6468_v14  ;;  %v6757_v36 = vpack.c.bf16 %v6469_v0, %v6469_v0  ;;  %v7331_v20 = vunpack.c.l.b16 %v6755_v37  ;;  %v5559_v8 = vrot.slane %v5558_v4, 1  ;;  %v880_v14 = vpop.f32.mrf.mxu1 }
 0x20d   :  { %v7605_v15 = vsel %vm7468_vm5, %v7330_v55, %v8893_v1  ;;  %v5566_v22 = vrot.slane %v5565_v31, 1  ;;  %v5572_v16 = vmax.f32 %v5570_v62, %v5571_v44  ;;  %v5579_v59 = vmax.f32 %v5577_v54, %v5578_v39  ;;  %v1060_v55 = vpop.f32.mrf.mxu3 }
 0x20e   :  { %v7332_v38 = vunpack.c.l.b16 %v6756_v42  ;;  %v7333_v63 = vunpack.c.l.b16 %v6757_v36  ;;  %v7606_v46 = vsel %vm7470_vm6, %v7331_v20, %v7605_v15  ;;  %v5560_v3 = vmax.f32 %v5558_v4, %v5559_v8  ;;  %v970_v4 = vpop.f32.mrf.mxu2 }
 0x20f   :  { %v5567_v33 = vmax.f32 %v5565_v31, %v5566_v22  ;;  %v5573_v25 = vrot.slane %v5572_v16, 1  ;;  %v5580_v41 = vrot.slane %v5579_v59, 1  ;;  %v1443_v18 = vrot.slane %v9153_v2, 2 }
 0x210   :  { %v7607_v30 = vsel %vm7472_vm7, %v7332_v38, %v7606_v46  ;;  %v6538_v5 = vmax.f32 %v8960_v9, %v5560_v3  ;;  %v1444_v27 = vrot.slane %v9153_v2, 4  ;;  %v1445_v1 = vrot.slane %v9153_v2, 6 }
 0x211   :  { %v7608_v58 = vsel %vm7474_vm8, %v7333_v63, %v7607_v30  ;;  %v5574_v21 = vmax.f32 %v5572_v16, %v5573_v25  ;;  %v5581_v34 = vmax.f32 %v5579_v59, %v5580_v41  ;;  %v6539_v10 = vmax.f32 %v8962_v47, %v5567_v33 }
 0x212   :  { %v7740_v48 = vpack.c.b16 %v7608_v58, %v7608_v58  ;;  %v6826_v28 = vpack.c.bf16 %v6538_v5, %v6538_v5  ;;  %v2558_v51 = vsel %vm2277_vm1, %v9153_v2, -inf  ;;  %v2565_v32 = vsel %vm2277_vm1, %v1443_v18, -inf }
 0x213   :  { %v6540_v45 = vmax.f32 %v8973_v24, %v5574_v21  ;;  %v6541_v9 = vmax.f32 %v8975_v7, %v5581_v34  ;;  %v6827_v49 = vpack.c.bf16 %v6539_v10, %v6539_v10  ;;  %v2559_v11 = vrot.slane %v2558_v51, 4 }
 0x214   :  { %7812 = vst [vmem:[%s11047_s3 + $0x4c] sm:$0xf] %v7740_v48  ;;  %v7402_v29 = vunpack.c.l.b16 %v6826_v28  ;;  %v2566_v61 = vrot.slane %v2565_v32, 4  ;;  %v2572_v47 = vsel %vm2277_vm1, %v1444_v27, -inf  ;;  %v2579_v23 = vsel %vm2277_vm1, %v1445_v1, -inf }
 0x215   :  { %v6828_v56 = vpack.c.bf16 %v6540_v45, %v6540_v45  ;;  %v6829_v2 = vpack.c.bf16 %v6541_v9, %v6541_v9  ;;  %v7403_v62 = vunpack.c.l.b16 %v6827_v49  ;;  %v2560_v54 = vmax.f32 %v2558_v51, %v2559_v11 }
 0x216   :  { %v7668_v24 = vsel %vm7468_vm5, %v7402_v29, %v8913_v26  ;;  %v2567_v7 = vmax.f32 %v2565_v32, %v2566_v61  ;;  %v2573_v0 = vrot.slane %v2572_v47, 4  ;;  %v2580_v37 = vrot.slane %v2579_v23, 4 }
 0x217   :  { %v7404_v31 = vunpack.c.l.b16 %v6828_v56  ;;  %v7405_v44 = vunpack.c.l.b16 %v6829_v2  ;;  %v7669_v39 = vsel %vm7470_vm6, %v7403_v62, %v7668_v24  ;;  %v2561_v42 = vrot.slane %v2560_v54, 2 }
 0x218   :  { %v2568_v36 = vrot.slane %v2567_v7, 2  ;;  %v2574_v20 = vmax.f32 %v2572_v47, %v2573_v0  ;;  %v2581_v8 = vmax.f32 %v2579_v23, %v2580_v37  ;;  %v881_v15 = vadd.f32 %v9020_v17, %v880_v14 }
 0x219   :  { %v7670_v22 = vsel %vm7472_vm7, %v7404_v31, %v7669_v39  ;;  %v2562_v16 = vmax.f32 %v2560_v54, %v2561_v42  ;;  %v971_v26 = vadd.f32 %v9020_v17, %v970_v4  ;;  %v1061_v59 = vadd.f32 %v9020_v17, %v1060_v55 }
 0x21a   :  { %v7671_v38 = vsel %vm7474_vm8, %v7405_v44, %v7670_v22  ;;  %v2569_v63 = vmax.f32 %v2567_v7, %v2568_v36  ;;  %v2575_v46 = vrot.slane %v2574_v20, 2  ;;  %v2582_v3 = vrot.slane %v2581_v8, 2 }
 0x21b   :  { %v7749_v33 = vpack.c.b16 %v7671_v38, %v7671_v38  ;;  %v2563_v25 = vrot.slane %v2562_v16, 1  ;;  %v1171_v41 = vmax.f32 %v881_v15, 0.0  ;;  %v9198_v18 = vmax.f32 %v971_v26, 0.0 }
 0x21c   :  { %v2570_v30 = vrot.slane %v2569_v63, 1  ;;  %v2576_v5 = vmax.f32 %v2574_v20, %v2575_v46  ;;  %v2583_v27 = vmax.f32 %v2581_v8, %v2582_v3  ;;  %v9200_v1 = vmax.f32 %v1061_v59, 0.0 }
 0x21d   :  { %7821 = vst [vmem:[%s11047_s3 + $0x70] sm:$0xf] %v7749_v33  ;;  %v2564_v17 = vmax.f32 %v2562_v16, %v2563_v25  ;;  %v1551_v58 = vrot.slane %v1171_v41, 2  ;;  %v1552_v21 = vrot.slane %v1171_v41, 4  ;;  %v1553_v34 = vrot.slane %v1171_v41, 6 }
 0x21e   :  { %v2571_v10 = vmax.f32 %v2569_v63, %v2570_v30  ;;  %v2577_v48 = vrot.slane %v2576_v5, 1  ;;  %v2584_v28 = vrot.slane %v2583_v27, 1  ;;  %v3566_v51 = vsel %vm2277_vm1, %v1171_v41, -inf }
 0x21f   :  { %v6326_v32 = vmax.f32 %v8977_v12, %v2564_v17  ;;  %v3567_v45 = vrot.slane %v3566_v51, 4  ;;  %v3573_v9 = vsel %vm2277_vm1, %v1551_v58, -inf  ;;  %v3580_v49 = vsel %vm2277_vm1, %v1552_v21, -inf }
 0x220   :  { %v2578_v11 = vmax.f32 %v2576_v5, %v2577_v48  ;;  %v2585_v29 = vmax.f32 %v2583_v27, %v2584_v28  ;;  %v6327_v61 = vmax.f32 %v8993_v50, %v2571_v10  ;;  %v3574_v47 = vrot.slane %v3573_v9, 4 }
 0x221   :  { %v6614_v23 = vpack.c.bf16 %v6326_v32, %v6326_v32  ;;  %v3568_v56 = vmax.f32 %v3566_v51, %v3567_v45  ;;  %v3581_v2 = vrot.slane %v3580_v49, 4  ;;  %v3587_v62 = vsel %vm2277_vm1, %v1553_v34, -inf }
 0x222   :  { %v6328_v54 = vmax.f32 %v8995_v13, %v2578_v11  ;;  %v6329_v14 = vmax.f32 %v8997_v52, %v2585_v29  ;;  %v6615_v12 = vpack.c.bf16 %v6327_v61, %v6327_v61  ;;  %v3575_v24 = vmax.f32 %v3573_v9, %v3574_v47 }
 0x223   :  { %v7190_v7 = vunpack.c.l.b16 %v6614_v23  ;;  %v3569_v0 = vrot.slane %v3568_v56, 2  ;;  %v3582_v37 = vmax.f32 %v3580_v49, %v3581_v2  ;;  %v3588_v4 = vrot.slane %v3587_v62, 4 }
 0x224   :  { %v6616_v55 = vpack.c.bf16 %v6328_v54, %v6328_v54  ;;  %v6617_v31 = vpack.c.bf16 %v6329_v14, %v6329_v14  ;;  %v7191_v44 = vunpack.c.l.b16 %v6615_v12  ;;  %v3576_v50 = vrot.slane %v3575_v24, 2 }
 0x225   :  { %v3570_v39 = vmax.f32 %v3568_v56, %v3569_v0  ;;  %v3583_v42 = vrot.slane %v3582_v37, 2  ;;  %v3589_v36 = vmax.f32 %v3587_v62, %v3588_v4  ;;  %v1659_v20 = vrot.slane %v9198_v18, 2 }
 0x226   :  { %v7192_v8 = vunpack.c.l.b16 %v6616_v55  ;;  %v7193_v15 = vunpack.c.l.b16 %v6617_v31  ;;  %v7483_v13 = vsel %vm7462_vm2, %v7191_v44, %v7190_v7  ;;  %v3577_v52 = vmax.f32 %v3575_v24, %v3576_v50 }
 0x227   :  { %v3571_v22 = vrot.slane %v3570_v39, 1  ;;  %v3584_v16 = vmax.f32 %v3582_v37, %v3583_v42  ;;  %v3590_v26 = vrot.slane %v3589_v36, 2  ;;  %v1660_v59 = vrot.slane %v9198_v18, 4 }
 0x228   :  { %v7484_v38 = vsel %vm7464_vm3, %v7192_v8, %v7483_v13  ;;  %v3578_v63 = vrot.slane %v3577_v52, 1  ;;  %v1661_v46 = vrot.slane %v9198_v18, 6  ;;  %v4574_v3 = vsel %vm2277_vm1, %v9198_v18, -inf }
 0x229   :  { %v9221_v33 = vsel %vm7466_vm4, %v7193_v15, %v7484_v38  ;;  %v3572_v25 = vmax.f32 %v3570_v39, %v3571_v22  ;;  %v3585_v41 = vrot.slane %v3584_v16, 1  ;;  %v3591_v30 = vmax.f32 %v3589_v36, %v3590_v26 }
 0x22a   :  { %v3579_v5 = vmax.f32 %v3577_v52, %v3578_v63  ;;  %v4575_v27 = vrot.slane %v4574_v3, 4  ;;  %v4581_v17 = vsel %vm2277_vm1, %v1659_v20, -inf  ;;  %v4588_v58 = vsel %vm2277_vm1, %v1660_v59, -inf  ;;  %v11098_v63 = vld [vmem:[#allocation2_spill] sm:$0xff] }
 0x22b   :  { %v3586_v21 = vmax.f32 %v3584_v16, %v3585_v41  ;;  %v3592_v34 = vrot.slane %v3591_v30, 1  ;;  %v6398_v10 = vmax.f32 %v9008_v60, %v3572_v25  ;;  %v4582_v48 = vrot.slane %v4581_v17, 4 }
 0x22c   :  { %v6399_v28 = vmax.f32 %v9010_v35, %v3579_v5  ;;  %v4576_v18 = vmax.f32 %v4574_v3, %v4575_v27  ;;  %v4589_v51 = vrot.slane %v4588_v58, 4  ;;  %v4595_v32 = vsel %vm2277_vm1, %v1661_v46, -inf  ;;  %v11099_v5 = vld [vmem:[#allocation3_spill] sm:$0xff] }
 0x22d   :  { %v3593_v45 = vmax.f32 %v3591_v30, %v3592_v34  ;;  %v6400_v9 = vmax.f32 %v9012_v57, %v3586_v21  ;;  %v6686_v49 = vpack.c.bf16 %v6398_v10, %v6398_v10  ;;  %v4583_v11 = vmax.f32 %v4581_v17, %v4582_v48  ;;  %v792_v48 = vpop.f32.mrf.mxu0 }
 0x22e   :  { %v6687_v29 = vpack.c.bf16 %v6399_v28, %v6399_v28  ;;  %v4577_v61 = vrot.slane %v4576_v18, 2  ;;  %v4590_v47 = vmax.f32 %v4588_v58, %v4589_v51  ;;  %v4596_v23 = vrot.slane %v4595_v32, 4  ;;  %v11100_v28 = vld [vmem:[#allocation4_spill] sm:$0xff] }
 0x22f   :  { %v6401_v56 = vmax.f32 %v9014_v40, %v3593_v45  ;;  %v6688_v2 = vpack.c.bf16 %v6400_v9, %v6400_v9  ;;  %v7262_v60 = vunpack.c.l.b16 %v6686_v49  ;;  %v4584_v62 = vrot.slane %v4583_v11, 2 }
 0x230   :  { %v7263_v54 = vunpack.c.l.b16 %v6687_v29  ;;  %v4578_v35 = vmax.f32 %v4576_v18, %v4577_v61  ;;  %v4591_v14 = vrot.slane %v4590_v47, 2  ;;  %v4597_v12 = vmax.f32 %v4595_v32, %v4596_v23  ;;  %v9250_v23 = vld [vmem:[%s11046_s2] ss:$0 sm:$0xff] }
 0x231   :  { %v6689_v24 = vpack.c.bf16 %v6401_v56, %v6401_v56  ;;  %v7264_v7 = vunpack.c.l.b16 %v6688_v2  ;;  %v4585_v0 = vmax.f32 %v4583_v11, %v4584_v62  ;;  %v1767_v57 = vrot.slane %v9200_v1, 2  ;;  %v882_v2 = vpop.f32.mrf.mxu1 }
 0x232   :  { %v7546_v37 = vsel %vm7462_vm2, %v7263_v54, %v7262_v60  ;;  %v4579_v4 = vrot.slane %v4578_v35, 1  ;;  %v4592_v55 = vmax.f32 %v4590_v47, %v4591_v14  ;;  %v4598_v31 = vrot.slane %v4597_v12, 2 }
 0x233   :  { %v7265_v44 = vunpack.c.l.b16 %v6689_v24  ;;  %v7547_v40 = vsel %vm7464_vm3, %v7264_v7, %v7546_v37  ;;  %v4586_v50 = vrot.slane %v4585_v0, 1  ;;  %v1768_v39 = vrot.slane %v9200_v1, 4 }
 0x234   :  { %v4580_v42 = vmax.f32 %v4578_v35, %v4579_v4  ;;  %v4593_v36 = vrot.slane %v4592_v55, 1  ;;  %v4599_v20 = vmax.f32 %v4597_v12, %v4598_v31  ;;  %v1769_v8 = vrot.slane %v9200_v1, 6 }
 0x235   :  { %v9236_v15 = vsel %vm7466_vm4, %v7265_v44, %v7547_v40  ;;  %v4587_v13 = vmax.f32 %v4585_v0, %v4586_v50  ;;  %v5582_v52 = vsel %vm2277_vm1, %v9200_v1, -inf  ;;  %v5589_v22 = vsel %vm2277_vm1, %v1767_v57, -inf }
 0x236   :  { %v4594_v16 = vmax.f32 %v4592_v55, %v4593_v36  ;;  %v4600_v26 = vrot.slane %v4599_v20, 1  ;;  %v6470_v59 = vmax.f32 %v9023_v43, %v4580_v42  ;;  %v5583_v38 = vrot.slane %v5582_v52, 4 }
 0x237   :  { %v6471_v46 = vmax.f32 %v11098_v63, %v4587_v13  ;;  %v5590_v3 = vrot.slane %v5589_v22, 4  ;;  %v5596_v25 = vsel %vm2277_vm1, %v1768_v39, -inf  ;;  %v5603_v41 = vsel %vm2277_vm1, %v1769_v8, -inf }
 0x238   :  { %v4601_v30 = vmax.f32 %v4599_v20, %v4600_v26  ;;  %v6472_v27 = vmax.f32 %v11099_v5, %v4594_v16  ;;  %v6758_v17 = vpack.c.bf16 %v6470_v59, %v6470_v59  ;;  %v5584_v58 = vmax.f32 %v5582_v52, %v5583_v38  ;;  %v11101_v20 = vld [vmem:[#allocation5_spill] sm:$0xff]  ;;  %v11102_v59 = vld [vmem:[#allocation6_spill] sm:$0xff] }
 0x239   :  { %v6759_v1 = vpack.c.bf16 %v6471_v46, %v6471_v46  ;;  %v5591_v21 = vmax.f32 %v5589_v22, %v5590_v3  ;;  %v5597_v34 = vrot.slane %v5596_v25, 4  ;;  %v5604_v10 = vrot.slane %v5603_v41, 4 }
 0x23a   :  { %v6473_v43 = vmax.f32 %v11100_v28, %v4601_v30  ;;  %v6760_v18 = vpack.c.bf16 %v6472_v27, %v6472_v27  ;;  %v7334_v51 = vunpack.c.l.b16 %v6758_v17  ;;  %v5585_v32 = vrot.slane %v5584_v58, 2  ;;  %v11103_v30 = vld [vmem:[#allocation7_spill] sm:$0xff]  ;;  %v11104_v27 = vld [vmem:[#allocation8_spill] sm:$0xff] }
 0x23b   :  { %v7335_v45 = vunpack.c.l.b16 %v6759_v1  ;;  %v5592_v9 = vrot.slane %v5591_v21, 2  ;;  %v5598_v49 = vmax.f32 %v5596_v25, %v5597_v34  ;;  %v5605_v11 = vmax.f32 %v5603_v41, %v5604_v10 }
 0x23c   :  { %v6761_v29 = vpack.c.bf16 %v6473_v43, %v6473_v43  ;;  %v7336_v61 = vunpack.c.l.b16 %v6760_v18  ;;  %v5586_v47 = vmax.f32 %v5584_v58, %v5585_v32  ;;  %v793_v56 = vadd.f32 %v9250_v23, %v792_v48 }
 0x23d   :  { %v7609_v60 = vsel %vm7462_vm2, %v7335_v45, %v7334_v51  ;;  %v5593_v62 = vmax.f32 %v5591_v21, %v5592_v9  ;;  %v5599_v54 = vrot.slane %v5598_v49, 2  ;;  %v5606_v35 = vrot.slane %v5605_v11, 2 }
 0x23e   :  { %v7337_v14 = vunpack.c.l.b16 %v6761_v29  ;;  %v7610_v12 = vsel %vm7464_vm3, %v7336_v61, %v7609_v60  ;;  %v5587_v24 = vrot.slane %v5586_v47, 1  ;;  %v1136_v7 = vmax.f32 %v793_v56, 0.0 }
 0x23f   :  { %v5594_v0 = vrot.slane %v5593_v62, 1  ;;  %v5600_v57 = vmax.f32 %v5598_v49, %v5599_v54  ;;  %v5607_v37 = vmax.f32 %v5605_v11, %v5606_v35  ;;  %v883_v4 = vadd.f32 %v9250_v23, %v882_v2 }
 0x240   :  { %v9257_v55 = vsel %vm7466_vm4, %v7337_v14, %v7610_v12  ;;  %v5588_v31 = vmax.f32 %v5586_v47, %v5587_v24  ;;  %v1446_v44 = vrot.slane %v1136_v7, 2  ;;  %v1447_v40 = vrot.slane %v1136_v7, 4 }
 0x241   :  { %v5595_v50 = vmax.f32 %v5593_v62, %v5594_v0  ;;  %v5601_v39 = vrot.slane %v5600_v57, 1  ;;  %v5608_v42 = vrot.slane %v5607_v37, 1  ;;  %v1448_v36 = vrot.slane %v1136_v7, 6 }
 0x242   :  { %v6542_v8 = vmax.f32 %v11101_v20, %v5588_v31  ;;  %v2586_v13 = vsel %vm2277_vm1, %v1136_v7, -inf  ;;  %v2593_v52 = vsel %vm2277_vm1, %v1446_v44, -inf  ;;  %v2600_v22 = vsel %vm2277_vm1, %v1447_v40, -inf }
 0x243   :  { %v5602_v16 = vmax.f32 %v5600_v57, %v5601_v39  ;;  %v5609_v26 = vmax.f32 %v5607_v37, %v5608_v42  ;;  %v6543_v38 = vmax.f32 %v11102_v59, %v5595_v50  ;;  %v2587_v63 = vrot.slane %v2586_v13, 4  ;;  %v11107_v59 = vld [vmem:[#allocation11_spill] sm:$0xff] }
 0x244   :  { %v6830_v46 = vpack.c.bf16 %v6542_v8, %v6542_v8  ;;  %v2594_v3 = vrot.slane %v2593_v52, 4  ;;  %v2601_v25 = vrot.slane %v2600_v22, 4  ;;  %v2607_v41 = vsel %vm2277_vm1, %v1448_v36, -inf  ;;  %v11105_v36 = vld [vmem:[#allocation9_spill] sm:$0xff] }
 0x245   :  { %v6544_v5 = vmax.f32 %v11103_v30, %v5602_v16  ;;  %v6545_v17 = vmax.f32 %v11104_v27, %v5609_v26  ;;  %v6831_v58 = vpack.c.bf16 %v6543_v38, %v6543_v38  ;;  %v2588_v1 = vmax.f32 %v2586_v13, %v2587_v63  ;;  %v11106_v16 = vld [vmem:[#allocation10_spill] sm:$0xff]  ;;  %v11108_v30 = vld [vmem:[#allocation12_spill] sm:$0xff] }
 0x246   :  { %v7406_v21 = vunpack.c.l.b16 %v6830_v46  ;;  %v2595_v34 = vmax.f32 %v2593_v52, %v2594_v3  ;;  %v2602_v10 = vmax.f32 %v2600_v22, %v2601_v25  ;;  %v2608_v48 = vrot.slane %v2607_v41, 4 }
 0x247   :  { %v6832_v28 = vpack.c.bf16 %v6544_v5, %v6544_v5  ;;  %v6833_v43 = vpack.c.bf16 %v6545_v17, %v6545_v17  ;;  %v7407_v18 = vunpack.c.l.b16 %v6831_v58  ;;  %v2589_v51 = vrot.slane %v2588_v1, 2 }
 0x248   :  { %v2596_v32 = vrot.slane %v2595_v34, 2  ;;  %v2603_v45 = vrot.slane %v2602_v10, 2  ;;  %v2609_v9 = vmax.f32 %v2607_v41, %v2608_v48  ;;  %v1172_v49 = vmax.f32 %v883_v4, 0.0  ;;  %v972_v48 = vpop.f32.mrf.mxu2 }
 0x249   :  { %v7408_v11 = vunpack.c.l.b16 %v6832_v28  ;;  %v7409_v29 = vunpack.c.l.b16 %v6833_v43  ;;  %v7672_v61 = vsel %vm7462_vm2, %v7407_v18, %v7406_v21  ;;  %v2590_v47 = vmax.f32 %v2588_v1, %v2589_v51 }
 0x24a   :  { %v2597_v56 = vmax.f32 %v2595_v34, %v2596_v32  ;;  %v2604_v2 = vmax.f32 %v2602_v10, %v2603_v45  ;;  %v2610_v60 = vrot.slane %v2609_v9, 2  ;;  %v1554_v62 = vrot.slane %v1172_v49, 2 }
 0x24b   :  { %v7673_v54 = vsel %vm7464_vm3, %v7408_v11, %v7672_v61  ;;  %v2591_v35 = vrot.slane %v2590_v47, 1  ;;  %v1555_v14 = vrot.slane %v1172_v49, 4  ;;  %v1556_v12 = vrot.slane %v1172_v49, 6  ;;  %v1062_v11 = vpop.f32.mrf.mxu3 }
 0x24c   :  { %v9270_v24 = vsel %vm7466_vm4, %v7409_v29, %v7673_v54  ;;  %v2598_v7 = vrot.slane %v2597_v56, 1  ;;  %v2605_v0 = vrot.slane %v2604_v2, 1  ;;  %v2611_v57 = vmax.f32 %v2609_v9, %v2610_v60 }
 0x24d   :  { %v2592_v37 = vmax.f32 %v2590_v47, %v2591_v35  ;;  %v3594_v4 = vsel %vm2277_vm1, %v1172_v49, -inf  ;;  %v3601_v31 = vsel %vm2277_vm1, %v1554_v62, -inf  ;;  %v3608_v44 = vsel %vm2277_vm1, %v1555_v14, -inf }
 0x24e   :  { %v2599_v40 = vmax.f32 %v2597_v56, %v2598_v7  ;;  %v2606_v50 = vmax.f32 %v2604_v2, %v2605_v0  ;;  %v2612_v39 = vrot.slane %v2611_v57, 1  ;;  %v3595_v42 = vrot.slane %v3594_v4, 4 }
 0x24f   :  { %v6330_v20 = vmax.f32 %v11105_v36, %v2592_v37  ;;  %v3602_v8 = vrot.slane %v3601_v31, 4  ;;  %v3609_v13 = vrot.slane %v3608_v44, 4  ;;  %v3615_v52 = vsel %vm2277_vm1, %v1556_v12, -inf }
 0x250   :  { %v2613_v22 = vmax.f32 %v2611_v57, %v2612_v39  ;;  %v6331_v26 = vmax.f32 %v11106_v16, %v2599_v40  ;;  %v6332_v38 = vmax.f32 %v11107_v59, %v2606_v50  ;;  %v3596_v63 = vmax.f32 %v3594_v4, %v3595_v42  ;;  %v11109_v16 = vld [vmem:[#allocation13_spill] sm:$0xff] }
 0x251   :  { %v6618_v46 = vpack.c.bf16 %v6330_v20, %v6330_v20  ;;  %v3603_v3 = vmax.f32 %v3601_v31, %v3602_v8  ;;  %v3610_v25 = vmax.f32 %v3608_v44, %v3609_v13  ;;  %v3616_v41 = vrot.slane %v3615_v52, 4  ;;  %v8215_v20 = vld [vmem:[%s11045_s0 + $0x70] sm:$0xff] }
 0x252   :  { %v6333_v5 = vmax.f32 %v11108_v30, %v2613_v22  ;;  %v6619_v27 = vpack.c.bf16 %v6331_v26, %v6331_v26  ;;  %v6620_v17 = vpack.c.bf16 %v6332_v38, %v6332_v38  ;;  %v3597_v58 = vrot.slane %v3596_v63, 2  ;;  %v8251_v8 = vld [vmem:[%s11045_s0 + $0x190] sm:$0xff]  ;;  %v8269_v22 = vld [vmem:[%s11045_s0 + $0x220] sm:$0xff]  ;;  %8143 = vmatmul.msk.bf16.gmra.mxu0 %vm539_vm0, %v8215_v20 }
 0x253   :  { %v7194_v1 = vunpack.c.l.b16 %v6618_v46  ;;  %v3604_v21 = vrot.slane %v3603_v3, 2  ;;  %v3611_v34 = vrot.slane %v3610_v25, 2  ;;  %v3617_v10 = vmax.f32 %v3615_v52, %v3616_v41  ;;  %8179 = vmatmul.msk.bf16.gmra.mxu2 %vm539_vm0, %v8251_v8  ;;  %8197 = vmatmul.msk.bf16.gmra.mxu3 %vm539_vm0, %v8269_v22 }
 0x254   :  { %v6621_v28 = vpack.c.bf16 %v6333_v5, %v6333_v5  ;;  %v7195_v43 = vunpack.c.l.b16 %v6619_v27  ;;  %v7196_v18 = vunpack.c.l.b16 %v6620_v17  ;;  %v3598_v51 = vmax.f32 %v3596_v63, %v3597_v58 }
 0x255   :  { %v7486_v32 = vsel %vm7468_vm5, %v7194_v1, %v9221_v33  ;;  %v3605_v45 = vmax.f32 %v3603_v3, %v3604_v21  ;;  %v3612_v9 = vmax.f32 %v3610_v25, %v3611_v34  ;;  %v3618_v49 = vrot.slane %v3617_v10, 2 }
 0x256   :  { %v7197_v29 = vunpack.c.l.b16 %v6621_v28  ;;  %v7487_v61 = vsel %vm7470_vm6, %v7195_v43, %v7486_v32  ;;  %v3599_v47 = vrot.slane %v3598_v51, 1  ;;  %v973_v56 = vadd.f32 %v9250_v23, %v972_v48 }
 0x257   :  { %v7488_v2 = vsel %vm7472_vm7, %v7196_v18, %v7487_v61  ;;  %v3606_v60 = vrot.slane %v3605_v45, 1  ;;  %v3613_v62 = vrot.slane %v3612_v9, 1  ;;  %v3619_v54 = vmax.f32 %v3617_v10, %v3618_v49 }
 0x258   :  { %v7489_v35 = vsel %vm7474_vm8, %v7197_v29, %v7488_v2  ;;  %v3600_v14 = vmax.f32 %v3598_v51, %v3599_v47  ;;  %v1208_v12 = vmax.f32 %v973_v56, 0.0  ;;  %v1063_v33 = vadd.f32 %v9250_v23, %v1062_v11 }
 0x259   :  { %v7723_v7 = vpack.c.b16 %v7489_v35, %v7489_v35  ;;  %v3607_v0 = vmax.f32 %v3605_v45, %v3606_v60  ;;  %v3614_v57 = vmax.f32 %v3612_v9, %v3613_v62  ;;  %v3620_v37 = vrot.slane %v3619_v54, 1 }
 0x25a   :  { %v6402_v4 = vmax.f32 %v9071_v19, %v3600_v14  ;;  %v1662_v31 = vrot.slane %v1208_v12, 2  ;;  %v1663_v44 = vrot.slane %v1208_v12, 4  ;;  %v1664_v40 = vrot.slane %v1208_v12, 6  ;;  %v8233_v19 = vld [vmem:[%s11045_s0 + $0x100] sm:$0xff] }
 0x25b   :  { %7795 = vst [vmem:[%s11047_s3 + $0x8] sm:$0xf] %v7723_v7  ;;  %v3621_v50 = vmax.f32 %v3619_v54, %v3620_v37  ;;  %v6403_v39 = vmax.f32 %v9073_v53, %v3607_v0  ;;  %v6404_v42 = vmax.f32 %v9076_v6, %v3614_v57  ;;  %v4602_v36 = vsel %vm2277_vm1, %v1208_v12, -inf  ;;  %8161 = vmatmul.msk.bf16.gmra.mxu1 %vm539_vm0, %v8233_v19 }
 0x25c   :  { %v6690_v13 = vpack.c.bf16 %v6402_v4, %v6402_v4  ;;  %v4603_v52 = vrot.slane %v4602_v36, 4  ;;  %v4609_v53 = vsel %vm2277_vm1, %v1662_v31, -inf  ;;  %v4616_v6 = vsel %vm2277_vm1, %v1663_v44, -inf  ;;  %v11110_v44 = vld [vmem:[#allocation14_spill] sm:$0xff] }
 0x25d   :  { %v6405_v26 = vmax.f32 %v11109_v16, %v3621_v50  ;;  %v6691_v59 = vpack.c.bf16 %v6403_v39, %v6403_v39  ;;  %v6692_v38 = vpack.c.bf16 %v6404_v42, %v6404_v42  ;;  %v4610_v63 = vrot.slane %v4609_v53, 4  ;;  %v11111_v39 = vld [vmem:[#allocation15_spill] sm:$0xff] }
 0x25e   :  { %v7266_v46 = vunpack.c.l.b16 %v6690_v13  ;;  %v4604_v3 = vmax.f32 %v4602_v36, %v4603_v52  ;;  %v4617_v25 = vrot.slane %v4616_v6, 4  ;;  %v4623_v41 = vsel %vm2277_vm1, %v1664_v40, -inf  ;;  %v11112_v13 = vld [vmem:[#allocation16_spill] sm:$0xff] }
 0x25f   :  { %v6693_v30 = vpack.c.bf16 %v6405_v26, %v6405_v26  ;;  %v7267_v5 = vunpack.c.l.b16 %v6691_v59  ;;  %v7268_v27 = vunpack.c.l.b16 %v6692_v38  ;;  %v4611_v17 = vmax.f32 %v4609_v53, %v4610_v63  ;;  %v11113_v38 = vld [vmem:[#allocation17_spill] sm:$0xff] }
 0x260   :  { %v7549_v58 = vsel %vm7468_vm5, %v7266_v46, %v9236_v15  ;;  %v4605_v1 = vrot.slane %v4604_v3, 2  ;;  %v4618_v21 = vmax.f32 %v4616_v6, %v4617_v25  ;;  %v4624_v34 = vrot.slane %v4623_v41, 4 }
 0x261   :  { %v7269_v10 = vunpack.c.l.b16 %v6693_v30  ;;  %v7550_v48 = vsel %vm7470_vm6, %v7267_v5, %v7549_v58  ;;  %v4612_v28 = vrot.slane %v4611_v17, 2  ;;  %v1244_v43 = vmax.f32 %v1063_v33, 0.0 }
 0x262   :  { %v7551_v18 = vsel %vm7472_vm7, %v7268_v27, %v7550_v48  ;;  %v4606_v51 = vmax.f32 %v4604_v3, %v4605_v1  ;;  %v4619_v32 = vrot.slane %v4618_v21, 2  ;;  %v4625_v45 = vmax.f32 %v4623_v41, %v4624_v34 }
 0x263   :  { %v7552_v9 = vsel %vm7474_vm8, %v7269_v10, %v7551_v18  ;;  %v4613_v49 = vmax.f32 %v4611_v17, %v4612_v28  ;;  %v1770_v11 = vrot.slane %v1244_v43, 2  ;;  %v1771_v29 = vrot.slane %v1244_v43, 4  ;;  %v795_v17 = vpop.f32.mrf.mxu0  ;;  %v885_v10 = vpop.f32.mrf.mxu1 }
 0x264   :  { %v7732_v61 = vpack.c.b16 %v7552_v9, %v7552_v9  ;;  %v4607_v15 = vrot.slane %v4606_v51, 1  ;;  %v4620_v47 = vmax.f32 %v4618_v21, %v4619_v32  ;;  %v4626_v56 = vrot.slane %v4625_v45, 2 }
 0x265   :  { %v4614_v2 = vrot.slane %v4613_v49, 1  ;;  %v1772_v60 = vrot.slane %v1244_v43, 6  ;;  %v5610_v62 = vsel %vm2277_vm1, %v1244_v43, -inf  ;;  %v5617_v54 = vsel %vm2277_vm1, %v1770_v11, -inf }
 0x266   :  { %7804 = vst [vmem:[%s11047_s3 + $0x2c] sm:$0xf] %v7732_v61  ;;  %v4608_v35 = vmax.f32 %v4606_v51, %v4607_v15  ;;  %v4621_v14 = vrot.slane %v4620_v47, 1  ;;  %v4627_v12 = vmax.f32 %v4625_v45, %v4626_v56  ;;  %v5611_v33 = vrot.slane %v5610_v62, 4  ;;  %v975_v51 = vpop.f32.mrf.mxu2 }
 0x267   :  { %v4615_v7 = vmax.f32 %v4613_v49, %v4614_v2  ;;  %v5618_v0 = vrot.slane %v5617_v54, 4  ;;  %v5624_v57 = vsel %vm2277_vm1, %v1771_v29, -inf  ;;  %v5631_v37 = vsel %vm2277_vm1, %v1772_v60, -inf }
 0x268   :  { %v4622_v4 = vmax.f32 %v4620_v47, %v4621_v14  ;;  %v4628_v31 = vrot.slane %v4627_v12, 1  ;;  %v6474_v40 = vmax.f32 %v11110_v44, %v4608_v35  ;;  %v5612_v50 = vmax.f32 %v5610_v62, %v5611_v33  ;;  %v11114_v47 = vld [vmem:[#allocation18_spill] sm:$0xff]  ;;  %v11115_v14 = vld [vmem:[#allocation19_spill] sm:$0xff] }
 0x269   :  { %v6475_v42 = vmax.f32 %v11111_v39, %v4615_v7  ;;  %v5619_v36 = vmax.f32 %v5617_v54, %v5618_v0  ;;  %v5625_v20 = vrot.slane %v5624_v57, 4  ;;  %v5632_v19 = vrot.slane %v5631_v37, 4 }
 0x26a   :  { %v4629_v8 = vmax.f32 %v4627_v12, %v4628_v31  ;;  %v6476_v52 = vmax.f32 %v11112_v13, %v4622_v4  ;;  %v6762_v53 = vpack.c.bf16 %v6474_v40, %v6474_v40  ;;  %v5613_v6 = vrot.slane %v5612_v50, 2  ;;  %v11117_v31 = vld [vmem:[#allocation21_spill] sm:$0xff] }
 0x26b   :  { %v6763_v22 = vpack.c.bf16 %v6475_v42, %v6475_v42  ;;  %v5620_v16 = vrot.slane %v5619_v36, 2  ;;  %v5626_v26 = vmax.f32 %v5624_v57, %v5625_v20  ;;  %v5633_v59 = vmax.f32 %v5631_v37, %v5632_v19  ;;  %v11116_v37 = vld [vmem:[#allocation20_spill] sm:$0xff] }
 0x26c   :  { %v6477_v63 = vmax.f32 %v11113_v38, %v4629_v8  ;;  %v6764_v46 = vpack.c.bf16 %v6476_v52, %v6476_v52  ;;  %v7338_v3 = vunpack.c.l.b16 %v6762_v53  ;;  %v5614_v25 = vmax.f32 %v5612_v50, %v5613_v6 }
 0x26d   :  { %v7339_v41 = vunpack.c.l.b16 %v6763_v22  ;;  %v5621_v30 = vmax.f32 %v5619_v36, %v5620_v16  ;;  %v5627_v5 = vrot.slane %v5626_v26, 2  ;;  %v5634_v27 = vrot.slane %v5633_v59, 2 }
 0x26e   :  { %v6765_v58 = vpack.c.bf16 %v6477_v63, %v6477_v63  ;;  %v7340_v1 = vunpack.c.l.b16 %v6764_v46  ;;  %v7612_v21 = vsel %vm7468_vm5, %v7338_v3, %v9257_v55  ;;  %v5615_v34 = vrot.slane %v5614_v25, 1 }
 0x26f   :  { %v7613_v48 = vsel %vm7470_vm6, %v7339_v41, %v7612_v21  ;;  %v5622_v28 = vrot.slane %v5621_v30, 1  ;;  %v5628_v43 = vmax.f32 %v5626_v26, %v5627_v5  ;;  %v5635_v18 = vmax.f32 %v5633_v59, %v5634_v27 }
 0x270   :  { %v7341_v32 = vunpack.c.l.b16 %v6765_v58  ;;  %v7614_v45 = vsel %vm7472_vm7, %v7340_v1, %v7613_v48  ;;  %v5616_v9 = vmax.f32 %v5614_v25, %v5615_v34  ;;  %v796_v49 = vadd.f32 %v9250_v23, %v795_v17 }
 0x271   :  { %v5623_v11 = vmax.f32 %v5621_v30, %v5622_v28  ;;  %v5629_v29 = vrot.slane %v5628_v43, 1  ;;  %v5636_v61 = vrot.slane %v5635_v18, 1  ;;  %v886_v15 = vadd.f32 %v9250_v23, %v885_v10  ;;  %v1065_v28 = vpop.f32.mrf.mxu3 }
 0x272   :  { %v7615_v55 = vsel %vm7474_vm8, %v7341_v32, %v7614_v45  ;;  %v6546_v56 = vmax.f32 %v11114_v47, %v5616_v9  ;;  %v1137_v2 = vmax.f32 %v796_v49, 0.0  ;;  %v976_v60 = vadd.f32 %v9250_v23, %v975_v51 }
 0x273   :  { %v7741_v62 = vpack.c.b16 %v7615_v55, %v7615_v55  ;;  %v5630_v54 = vmax.f32 %v5628_v43, %v5629_v29  ;;  %v5637_v35 = vmax.f32 %v5635_v18, %v5636_v61  ;;  %v6547_v12 = vmax.f32 %v11115_v14, %v5623_v11 }
 0x274   :  { %v6834_v33 = vpack.c.bf16 %v6546_v56, %v6546_v56  ;;  %v1449_v7 = vrot.slane %v1137_v2, 2  ;;  %v1450_v0 = vrot.slane %v1137_v2, 4  ;;  %v1451_v57 = vrot.slane %v1137_v2, 6 }
 0x275   :  { %7813 = vst [vmem:[%s11047_s3 + $0x50] sm:$0xf] %v7741_v62  ;;  %v6548_v4 = vmax.f32 %v11116_v37, %v5630_v54  ;;  %v6549_v44 = vmax.f32 %v11117_v31, %v5637_v35  ;;  %v6835_v40 = vpack.c.bf16 %v6547_v12, %v6547_v12  ;;  %v2614_v50 = vsel %vm2277_vm1, %v1137_v2, -inf }
 0x276   :  { %v7410_v39 = vunpack.c.l.b16 %v6834_v33  ;;  %v2615_v42 = vrot.slane %v2614_v50, 4  ;;  %v2621_v36 = vsel %vm2277_vm1, %v1449_v7, -inf  ;;  %v2628_v20 = vsel %vm2277_vm1, %v1450_v0, -inf }
 0x277   :  { %v6836_v19 = vpack.c.bf16 %v6548_v4, %v6548_v4  ;;  %v6837_v8 = vpack.c.bf16 %v6549_v44, %v6549_v44  ;;  %v7411_v13 = vunpack.c.l.b16 %v6835_v40  ;;  %v2622_v52 = vrot.slane %v2621_v36, 4 }
 0x278   :  { %v7675_v53 = vsel %vm7468_vm5, %v7410_v39, %v9270_v24  ;;  %v2616_v6 = vmax.f32 %v2614_v50, %v2615_v42  ;;  %v2629_v22 = vrot.slane %v2628_v20, 4  ;;  %v2635_v16 = vsel %vm2277_vm1, %v1451_v57, -inf }
 0x279   :  { %v7412_v26 = vunpack.c.l.b16 %v6836_v19  ;;  %v7413_v59 = vunpack.c.l.b16 %v6837_v8  ;;  %v7676_v38 = vsel %vm7470_vm6, %v7411_v13, %v7675_v53  ;;  %v2623_v63 = vmax.f32 %v2621_v36, %v2622_v52 }
 0x27a   :  { %v2617_v46 = vrot.slane %v2616_v6, 2  ;;  %v2630_v3 = vmax.f32 %v2628_v20, %v2629_v22  ;;  %v2636_v25 = vrot.slane %v2635_v16, 4  ;;  %v1173_v41 = vmax.f32 %v886_v15, 0.0 }
 0x27b   :  { %v7677_v30 = vsel %vm7472_vm7, %v7412_v26, %v7676_v38  ;;  %v2624_v5 = vrot.slane %v2623_v63, 2  ;;  %v1209_v27 = vmax.f32 %v976_v60, 0.0  ;;  %v1066_v55 = vadd.f32 %v9250_v23, %v1065_v28 }
 0x27c   :  { %v7678_v17 = vsel %vm7474_vm8, %v7413_v59, %v7677_v30  ;;  %v2618_v24 = vmax.f32 %v2616_v6, %v2617_v46  ;;  %v2631_v58 = vrot.slane %v2630_v3, 2  ;;  %v2637_v1 = vmax.f32 %v2635_v16, %v2636_v25 }
 0x27d   :  { %v7750_v21 = vpack.c.b16 %v7678_v17, %v7678_v17  ;;  %v2625_v34 = vmax.f32 %v2623_v63, %v2624_v5  ;;  %v1557_v10 = vrot.slane %v1173_v41, 2  ;;  %v1558_v48 = vrot.slane %v1173_v41, 4  ;;  %v797_v5 = vpop.f32.mrf.mxu0 }
 0x27e   :  { %v2619_v43 = vrot.slane %v2618_v24, 1  ;;  %v2632_v18 = vmax.f32 %v2630_v3, %v2631_v58  ;;  %v2638_v51 = vrot.slane %v2637_v1, 2  ;;  %v1559_v32 = vrot.slane %v1173_v41, 6 }
 0x27f   :  { %7822 = vst [vmem:[%s11047_s3 + $0x74] sm:$0xf] %v7750_v21  ;;  %v2626_v45 = vrot.slane %v2625_v34, 1  ;;  %v3622_v9 = vsel %vm2277_vm1, %v1173_v41, -inf  ;;  %v3629_v49 = vsel %vm2277_vm1, %v1557_v10, -inf  ;;  %v3636_v11 = vsel %vm2277_vm1, %v1558_v48, -inf }
 0x280   :  { %v2633_v29 = vrot.slane %v2632_v18, 1  ;;  %v2639_v61 = vmax.f32 %v2637_v1, %v2638_v51  ;;  %v3623_v15 = vrot.slane %v3622_v9, 4  ;;  %v9361_v47 = vmax.f32 %v2618_v24, %v2619_v43  ;;  %v887_v51 = vpop.f32.mrf.mxu1 }
 0x281   :  { %v3630_v56 = vrot.slane %v3629_v49, 4  ;;  %v3637_v2 = vrot.slane %v3636_v11, 4  ;;  %v3643_v60 = vsel %vm2277_vm1, %v1559_v32, -inf  ;;  %v9364_v62 = vmax.f32 %v2625_v34, %v2626_v45 }
 0x282   :  { %v9366_v54 = vmax.f32 %v2632_v18, %v2633_v29  ;;  %v3624_v35 = vmax.f32 %v3622_v9, %v3623_v15  ;;  %v3644_v14 = vrot.slane %v3643_v60, 4  ;;  %v1665_v7 = vrot.slane %v1209_v27, 2 }
 0x283   :  { %v3631_v12 = vmax.f32 %v3629_v49, %v3630_v56  ;;  %v3638_v33 = vmax.f32 %v3636_v11, %v3637_v2  ;;  %v1666_v0 = vrot.slane %v1209_v27, 4  ;;  %v2640_v57 = vrot.slane %v2639_v61, 1 }
 0x284   :  { %v3625_v37 = vrot.slane %v3624_v35, 2  ;;  %v3645_v4 = vmax.f32 %v3643_v60, %v3644_v14  ;;  %v1667_v31 = vrot.slane %v1209_v27, 6  ;;  %v4630_v50 = vsel %vm2277_vm1, %v1209_v27, -inf }
 0x285   :  { %v3632_v44 = vrot.slane %v3631_v12, 2  ;;  %v3639_v40 = vrot.slane %v3638_v33, 2  ;;  %v4637_v39 = vsel %vm2277_vm1, %v1665_v7, -inf  ;;  %v4631_v20 = vrot.slane %v4630_v50, 4 }
 0x286   :  { %v3626_v42 = vmax.f32 %v3624_v35, %v3625_v37  ;;  %v3646_v36 = vrot.slane %v3645_v4, 2  ;;  %v4638_v19 = vrot.slane %v4637_v39, 4  ;;  %v4644_v52 = vsel %vm2277_vm1, %v1666_v0, -inf }
 0x287   :  { %v3633_v8 = vmax.f32 %v3631_v12, %v3632_v44  ;;  %v3640_v13 = vmax.f32 %v3638_v33, %v3639_v40  ;;  %v4651_v53 = vsel %vm2277_vm1, %v1667_v31, -inf  ;;  %v4632_v16 = vmax.f32 %v4630_v50, %v4631_v20 }
 0x288   :  { %v3627_v6 = vrot.slane %v3626_v42, 1  ;;  %v3647_v22 = vmax.f32 %v3645_v4, %v3646_v36  ;;  %v4639_v26 = vmax.f32 %v4637_v39, %v4638_v19  ;;  %v4645_v63 = vrot.slane %v4644_v52, 4 }
 0x289   :  { %v3634_v59 = vrot.slane %v3633_v8, 1  ;;  %v3641_v38 = vrot.slane %v3640_v13, 1  ;;  %v4652_v46 = vrot.slane %v4651_v53, 4  ;;  %v9372_v3 = vmax.f32 %v2639_v61, %v2640_v57 }
 0x28a   :  { %v3648_v25 = vrot.slane %v3647_v22, 1  ;;  %v4633_v41 = vrot.slane %v4632_v16, 2  ;;  %v4640_v30 = vrot.slane %v4639_v26, 2  ;;  %v9374_v27 = vmax.f32 %v3626_v42, %v3627_v6 }
 0x28b   :  { %v9376_v17 = vmax.f32 %v3633_v8, %v3634_v59  ;;  %v4646_v24 = vmax.f32 %v4644_v52, %v4645_v63  ;;  %v4653_v58 = vmax.f32 %v4651_v53, %v4652_v46  ;;  %v9378_v1 = vmax.f32 %v3640_v13, %v3641_v38 }
 0x28c   :  { %v4634_v21 = vmax.f32 %v4632_v16, %v4633_v41  ;;  %v4641_v34 = vmax.f32 %v4639_v26, %v4640_v30  ;;  %v1245_v10 = vmax.f32 %v1066_v55, 0.0  ;;  %v9380_v48 = vmax.f32 %v3647_v22, %v3648_v25 }
 0x28d   :  { %v4647_v28 = vrot.slane %v4646_v24, 2  ;;  %v4654_v43 = vrot.slane %v4653_v58, 2  ;;  %v798_v18 = vadd.f32 %v9250_v23, %v797_v5  ;;  %v888_v60 = vadd.f32 %v9250_v23, %v887_v51 }
 0x28e   :  { %v4635_v32 = vrot.slane %v4634_v21, 1  ;;  %v4642_v45 = vrot.slane %v4641_v34, 1  ;;  %v1773_v9 = vrot.slane %v1245_v10, 2  ;;  %v1774_v49 = vrot.slane %v1245_v10, 4 }
 0x28f   :  { %v4648_v11 = vmax.f32 %v4646_v24, %v4647_v28  ;;  %v4655_v29 = vmax.f32 %v4653_v58, %v4654_v43  ;;  %v1775_v61 = vrot.slane %v1245_v10, 6  ;;  %v5638_v15 = vsel %vm2277_vm1, %v1245_v10, -inf  ;;  %v977_v43 = vpop.f32.mrf.mxu2 }
 0x290   :  { %v9384_v56 = vmax.f32 %v4634_v21, %v4635_v32  ;;  %v5639_v2 = vrot.slane %v5638_v15, 4  ;;  %v5645_v55 = vsel %vm2277_vm1, %v1773_v9, -inf  ;;  %v9388_v35 = vmax.f32 %v4641_v34, %v4642_v45 }
 0x291   :  { %v4649_v14 = vrot.slane %v4648_v11, 1  ;;  %v5646_v12 = vrot.slane %v5645_v55, 4  ;;  %v5652_v33 = vsel %vm2277_vm1, %v1774_v49, -inf  ;;  %v5659_v57 = vsel %vm2277_vm1, %v1775_v61, -inf }
 0x292   :  { %v5640_v7 = vmax.f32 %v5638_v15, %v5639_v2  ;;  %v5653_v0 = vrot.slane %v5652_v33, 4  ;;  %v1138_v37 = vmax.f32 %v798_v18, 0.0  ;;  %v4656_v31 = vrot.slane %v4655_v29, 1 }
 0x293   :  { %v9392_v4 = vmax.f32 %v4648_v11, %v4649_v14  ;;  %v5647_v44 = vmax.f32 %v5645_v55, %v5646_v12  ;;  %v5660_v40 = vrot.slane %v5659_v57, 4  ;;  %v1174_v61 = vmax.f32 %v888_v60, 0.0  ;;  %v8252_v60 = vld [vmem:[%s11045_s0 + $0x198] sm:$0xff] }
 0x294   :  { %v5641_v50 = vrot.slane %v5640_v7, 2  ;;  %v5654_v39 = vmax.f32 %v5652_v33, %v5653_v0  ;;  %v1452_v42 = vrot.slane %v1138_v37, 2  ;;  %v1453_v36 = vrot.slane %v1138_v37, 4  ;;  %v8216_v0 = vld [vmem:[%s11045_s0 + $0x78] sm:$0xff]  ;;  %8180 = vmatmul.msk.bf16.gmra.mxu2 %vm539_vm0, %v8252_v60 }
 0x295   :  { %v5648_v20 = vrot.slane %v5647_v44, 2  ;;  %v5661_v19 = vmax.f32 %v5659_v57, %v5660_v40  ;;  %v1454_v8 = vrot.slane %v1138_v37, 6  ;;  %v2642_v13 = vsel %vm2277_vm1, %v1138_v37, -inf  ;;  %v8234_v57 = vld [vmem:[%s11045_s0 + $0x108] sm:$0xff]  ;;  %8144 = vmatmul.msk.bf16.gmra.mxu0 %vm539_vm0, %v8216_v0 }
 0x296   :  { %v5642_v52 = vmax.f32 %v5640_v7, %v5641_v50  ;;  %v5655_v53 = vrot.slane %v5654_v39, 2  ;;  %v2643_v6 = vrot.slane %v2642_v13, 4  ;;  %v2649_v22 = vsel %vm2277_vm1, %v1452_v42, -inf  ;;  %v8270_v50 = vld [vmem:[%s11045_s0 + $0x228] sm:$0xff]  ;;  %8162 = vmatmul.msk.bf16.gmra.mxu1 %vm539_vm0, %v8234_v57 }
 0x297   :  { %v5649_v16 = vmax.f32 %v5647_v44, %v5648_v20  ;;  %v5662_v26 = vrot.slane %v5661_v19, 2  ;;  %v2650_v59 = vrot.slane %v2649_v22, 4  ;;  %v2656_v38 = vsel %vm2277_vm1, %v1453_v36, -inf  ;;  %8198 = vmatmul.msk.bf16.gmra.mxu3 %vm539_vm0, %v8270_v50 }
 0x298   :  { %v5643_v63 = vrot.slane %v5642_v52, 1  ;;  %v5656_v46 = vmax.f32 %v5654_v39, %v5655_v53  ;;  %v2644_v25 = vmax.f32 %v2642_v13, %v2643_v6  ;;  %v2657_v41 = vrot.slane %v2656_v38, 4  ;;  %v1067_v53 = vpop.f32.mrf.mxu3 }
 0x299   :  { %v5650_v30 = vrot.slane %v5649_v16, 1  ;;  %v5663_v5 = vmax.f32 %v5661_v19, %v5662_v26  ;;  %v2651_v24 = vmax.f32 %v2649_v22, %v2650_v59  ;;  %v2663_v58 = vsel %vm2277_vm1, %v1454_v8, -inf  ;;  %v800_v59 = vpop.f32.mrf.mxu0 }
 0x29a   :  { %v9398_v21 = vmax.f32 %v4655_v29, %v4656_v31  ;;  %v5657_v34 = vrot.slane %v5656_v46, 1  ;;  %v2645_v10 = vrot.slane %v2644_v25, 2  ;;  %v2658_v28 = vmax.f32 %v2656_v38, %v2657_v41 }
 0x29b   :  { %v9400_v18 = vmax.f32 %v5642_v52, %v5643_v63  ;;  %v9402_v51 = vmax.f32 %v5649_v16, %v5650_v30  ;;  %v2652_v32 = vrot.slane %v2651_v24, 2  ;;  %v2664_v45 = vrot.slane %v2663_v58, 4 }
 0x29c   :  { %v5664_v9 = vrot.slane %v5663_v5, 1  ;;  %v2646_v49 = vmax.f32 %v2644_v25, %v2645_v10  ;;  %v2659_v11 = vrot.slane %v2658_v28, 2  ;;  %v9404_v15 = vmax.f32 %v5656_v46, %v5657_v34 }
 0x29d   :  { %v2653_v2 = vmax.f32 %v2651_v24, %v2652_v32  ;;  %v2665_v55 = vmax.f32 %v2663_v58, %v2664_v45  ;;  %v978_v29 = vadd.f32 %v9250_v23, %v977_v43  ;;  %v1560_v33 = vrot.slane %v1174_v61, 2 }
 0x29e   :  { %v2647_v14 = vrot.slane %v2646_v49, 1  ;;  %v2660_v12 = vmax.f32 %v2658_v28, %v2659_v11  ;;  %v1561_v7 = vrot.slane %v1174_v61, 4  ;;  %v1562_v44 = vrot.slane %v1174_v61, 6 }
 0x29f   :  { %v2654_v37 = vrot.slane %v2653_v2, 1  ;;  %v2666_v31 = vrot.slane %v2665_v55, 2  ;;  %v3650_v40 = vsel %vm2277_vm1, %v1174_v61, -inf  ;;  %v9420_v39 = vmax.f32 %v5663_v5, %v5664_v9 }
 0x2a0   :  { %v2661_v42 = vrot.slane %v2660_v12, 1  ;;  %v3651_v36 = vrot.slane %v3650_v40, 4  ;;  %v3657_v20 = vsel %vm2277_vm1, %v1560_v33, -inf  ;;  %v9425_v19 = vmax.f32 %v2646_v49, %v2647_v14 }
 0x2a1   :  { %v2667_v8 = vmax.f32 %v2665_v55, %v2666_v31  ;;  %v3658_v13 = vrot.slane %v3657_v20, 4  ;;  %v3664_v52 = vsel %vm2277_vm1, %v1561_v7, -inf  ;;  %v9430_v6 = vmax.f32 %v2653_v2, %v2654_v37 }
 0x2a2   :  { %v3652_v22 = vmax.f32 %v3650_v40, %v3651_v36  ;;  %v3665_v16 = vrot.slane %v3664_v52, 4  ;;  %v3671_v26 = vsel %vm2277_vm1, %v1562_v44, -inf  ;;  %v9433_v38 = vmax.f32 %v2660_v12, %v2661_v42 }
 0x2a3   :  { %v3659_v63 = vmax.f32 %v3657_v20, %v3658_v13  ;;  %v3672_v46 = vrot.slane %v3671_v26, 4  ;;  %v1210_v25 = vmax.f32 %v978_v29, 0.0  ;;  %v2668_v41 = vrot.slane %v2667_v8, 1 }
 0x2a4   :  { %v3653_v30 = vrot.slane %v3652_v22, 2  ;;  %v3666_v5 = vmax.f32 %v3664_v52, %v3665_v16  ;;  %v1068_v24 = vadd.f32 %v9250_v23, %v1067_v53  ;;  %v801_v28 = vadd.f32 %v9250_v23, %v800_v59 }
 0x2a5   :  { %v3660_v58 = vrot.slane %v3659_v63, 2  ;;  %v3673_v34 = vmax.f32 %v3671_v26, %v3672_v46  ;;  %v1668_v10 = vrot.slane %v1210_v25, 2  ;;  %v1669_v45 = vrot.slane %v1210_v25, 4 }
 0x2a6   :  { %v3654_v43 = vmax.f32 %v3652_v22, %v3653_v30  ;;  %v3667_v32 = vrot.slane %v3666_v5, 2  ;;  %v1670_v9 = vrot.slane %v1210_v25, 6  ;;  %v4658_v61 = vsel %vm2277_vm1, %v1210_v25, -inf }
 0x2a7   :  { %v3661_v49 = vmax.f32 %v3659_v63, %v3660_v58  ;;  %v3674_v11 = vrot.slane %v3673_v34, 2  ;;  %v4665_v2 = vsel %vm2277_vm1, %v1668_v10, -inf  ;;  %v4659_v14 = vrot.slane %v4658_v61, 4 }
 0x2a8   :  { %v3655_v55 = vrot.slane %v3654_v43, 1  ;;  %v3668_v29 = vmax.f32 %v3666_v5, %v3667_v32  ;;  %v4666_v12 = vrot.slane %v4665_v2, 4  ;;  %v4672_v0 = vsel %vm2277_vm1, %v1669_v45, -inf }
 0x2a9   :  { %v3662_v33 = vrot.slane %v3661_v49, 1  ;;  %v3675_v7 = vmax.f32 %v3673_v34, %v3674_v11  ;;  %v4679_v23 = vsel %vm2277_vm1, %v1670_v9, -inf  ;;  %v9441_v57 = vmax.f32 %v2667_v8, %v2668_v41 }
 0x2aa   :  { %v3669_v60 = vrot.slane %v3668_v29, 1  ;;  %v4660_v37 = vmax.f32 %v4658_v61, %v4659_v14  ;;  %v4667_v31 = vmax.f32 %v4665_v2, %v4666_v12  ;;  %v9443_v44 = vmax.f32 %v3654_v43, %v3655_v55 }
 0x2ab   :  { %v9445_v40 = vmax.f32 %v3661_v49, %v3662_v33  ;;  %v4673_v50 = vrot.slane %v4672_v0, 4  ;;  %v4680_v42 = vrot.slane %v4679_v23, 4  ;;  %v3676_v36 = vrot.slane %v3675_v7, 1 }
 0x2ac   :  { %v4661_v20 = vrot.slane %v4660_v37, 2  ;;  %v4668_v13 = vrot.slane %v4667_v31, 2  ;;  %v1246_v52 = vmax.f32 %v1068_v24, 0.0  ;;  %v9447_v53 = vmax.f32 %v3668_v29, %v3669_v60 }
 0x2ad   :  { %v4674_v22 = vmax.f32 %v4672_v0, %v4673_v50  ;;  %v4681_v16 = vmax.f32 %v4679_v23, %v4680_v42  ;;  %v1139_v26 = vmax.f32 %v801_v28, 0.0  ;;  %v9452_v28 = vmax.f32 %v3675_v7, %v3676_v36 }
 0x2ae   :  { %v4662_v8 = vmax.f32 %v4660_v37, %v4661_v20  ;;  %v4669_v59 = vmax.f32 %v4667_v31, %v4668_v13  ;;  %v1776_v63 = vrot.slane %v1246_v52, 2  ;;  %v1777_v46 = vrot.slane %v1246_v52, 4 }
 0x2af   :  { %v4675_v25 = vrot.slane %v4674_v22, 2  ;;  %v4682_v41 = vrot.slane %v4681_v16, 2  ;;  %v1778_v30 = vrot.slane %v1246_v52, 6  ;;  %v5666_v5 = vsel %vm2277_vm1, %v1246_v52, -inf }
 0x2b0   :  { %v4663_v58 = vrot.slane %v4662_v8, 1  ;;  %v4670_v34 = vrot.slane %v4669_v59, 1  ;;  %v5667_v10 = vrot.slane %v5666_v5, 4  ;;  %v5673_v43 = vsel %vm2277_vm1, %v1776_v63, -inf }
 0x2b1   :  { %v4676_v24 = vmax.f32 %v4674_v22, %v4675_v25  ;;  %v4683_v32 = vmax.f32 %v4681_v16, %v4682_v41  ;;  %v5674_v45 = vrot.slane %v5673_v43, 4  ;;  %v5680_v9 = vsel %vm2277_vm1, %v1777_v46, -inf }
 0x2b2   :  { %v9454_v49 = vmax.f32 %v4662_v8, %v4663_v58  ;;  %v5668_v11 = vmax.f32 %v5666_v5, %v5667_v10  ;;  %v5681_v61 = vrot.slane %v5680_v9, 4  ;;  %v9456_v2 = vmax.f32 %v4669_v59, %v4670_v34  ;;  %v890_v58 = vpop.f32.mrf.mxu1 }
 0x2b3   :  { %v4677_v55 = vrot.slane %v4676_v24, 1  ;;  %v5675_v29 = vmax.f32 %v5673_v43, %v5674_v45  ;;  %v5687_v14 = vsel %vm2277_vm1, %v1778_v30, -inf  ;;  %v1455_v23 = vrot.slane %v1139_v26, 2 }
 0x2b4   :  { %v5669_v12 = vrot.slane %v5668_v11, 2  ;;  %v5682_v33 = vmax.f32 %v5680_v9, %v5681_v61  ;;  %v5688_v0 = vrot.slane %v5687_v14, 4  ;;  %v4684_v37 = vrot.slane %v4683_v32, 1 }
 0x2b5   :  { %v9459_v60 = vmax.f32 %v4676_v24, %v4677_v55  ;;  %v5676_v31 = vrot.slane %v5675_v29, 2  ;;  %v1456_v7 = vrot.slane %v1139_v26, 4  ;;  %v1457_v20 = vrot.slane %v1139_v26, 6 }
 0x2b6   :  { %v5670_v50 = vmax.f32 %v5668_v11, %v5669_v12  ;;  %v5683_v42 = vrot.slane %v5682_v33, 2  ;;  %v5689_v36 = vmax.f32 %v5687_v14, %v5688_v0  ;;  %v2670_v52 = vsel %vm2277_vm1, %v1139_v26, -inf  ;;  %v980_v26 = vpop.f32.mrf.mxu2  ;;  %v9474_v12 = vld [vmem:[%s11046_s2] ss:$0 sm:$0xff] }
 0x2b7   :  { %v5677_v13 = vmax.f32 %v5675_v29, %v5676_v31  ;;  %v2677_v22 = vsel %vm2277_vm1, %v1455_v23, -inf  ;;  %v2684_v16 = vsel %vm2277_vm1, %v1456_v7, -inf  ;;  %v2671_v46 = vrot.slane %v2670_v52, 4 }
 0x2b8   :  { %v5671_v8 = vrot.slane %v5670_v50, 1  ;;  %v5684_v59 = vmax.f32 %v5682_v33, %v5683_v42  ;;  %v5690_v63 = vrot.slane %v5689_v36, 2  ;;  %v2678_v41 = vrot.slane %v2677_v22, 4 }
 0x2b9   :  { %v5678_v25 = vrot.slane %v5677_v13, 1  ;;  %v2685_v30 = vrot.slane %v2684_v16, 4  ;;  %v2691_v5 = vsel %vm2277_vm1, %v1457_v20, -inf  ;;  %v9465_v34 = vmax.f32 %v4683_v32, %v4684_v37 }
 0x2ba   :  { %v5685_v10 = vrot.slane %v5684_v59, 1  ;;  %v5691_v43 = vmax.f32 %v5689_v36, %v5690_v63  ;;  %v2672_v24 = vmax.f32 %v2670_v52, %v2671_v46  ;;  %v9467_v45 = vmax.f32 %v5670_v50, %v5671_v8 }
 0x2bb   :  { %v2679_v9 = vmax.f32 %v2677_v22, %v2678_v41  ;;  %v2686_v11 = vmax.f32 %v2684_v16, %v2685_v30  ;;  %v2692_v61 = vrot.slane %v2691_v5, 4  ;;  %v9469_v55 = vmax.f32 %v5677_v13, %v5678_v25  ;;  %v1070_v22 = vpop.f32.mrf.mxu3 }
 0x2bc   :  { %v5692_v29 = vrot.slane %v5691_v43, 1  ;;  %v2673_v14 = vrot.slane %v2672_v24, 2  ;;  %v891_v32 = vadd.f32 %v9474_v12, %v890_v58  ;;  %v981_v37 = vadd.f32 %v9474_v12, %v980_v26 }
 0x2bd   :  { %v2680_v33 = vrot.slane %v2679_v9, 2  ;;  %v2687_v0 = vrot.slane %v2686_v11, 2  ;;  %v2693_v23 = vmax.f32 %v2691_v5, %v2692_v61  ;;  %v9478_v31 = vmax.f32 %v5684_v59, %v5685_v10 }
 0x2be   :  { %v9480_v7 = vmax.f32 %v5691_v43, %v5692_v29  ;;  %v2674_v50 = vmax.f32 %v2672_v24, %v2673_v14  ;;  %v1175_v42 = vmax.f32 %v891_v32, 0.0  ;;  %v1211_v52 = vmax.f32 %v981_v37, 0.0 }
 0x2bf   :  { %11118 = vst [vmem:[#allocation2_spill] sm:$0xff] %v9478_v31  ;;  %v2681_v36 = vmax.f32 %v2679_v9, %v2680_v33  ;;  %v2688_v20 = vmax.f32 %v2686_v11, %v2687_v0  ;;  %v2694_v13 = vrot.slane %v2693_v23, 2  ;;  %v1071_v43 = vadd.f32 %v9474_v12, %v1070_v22 }
 0x2c0   :  { %11119 = vst [vmem:[#allocation3_spill] sm:$0xff] %v9480_v7  ;;  %v2675_v16 = vrot.slane %v2674_v50, 1  ;;  %v1563_v8 = vrot.slane %v1175_v42, 2  ;;  %v1564_v63 = vrot.slane %v1175_v42, 4  ;;  %v1565_v46 = vrot.slane %v1175_v42, 6 }
 0x2c1   :  { %v2682_v25 = vrot.slane %v2681_v36, 1  ;;  %v2689_v41 = vrot.slane %v2688_v20, 1  ;;  %v2695_v30 = vmax.f32 %v2693_v23, %v2694_v13  ;;  %v3678_v5 = vsel %vm2277_vm1, %v1175_v42, -inf }
 0x2c2   :  { %v3679_v59 = vrot.slane %v3678_v5, 4  ;;  %v3685_v58 = vsel %vm2277_vm1, %v1563_v8, -inf  ;;  %v3692_v10 = vsel %vm2277_vm1, %v1564_v63, -inf  ;;  %v9486_v24 = vmax.f32 %v2674_v50, %v2675_v16 }
 0x2c3   :  { %v9488_v26 = vmax.f32 %v2681_v36, %v2682_v25  ;;  %v9490_v9 = vmax.f32 %v2688_v20, %v2689_v41  ;;  %v3686_v11 = vrot.slane %v3685_v58, 4  ;;  %v3693_v29 = vrot.slane %v3692_v10, 4 }
 0x2c4   :  { %11120 = vst [vmem:[#allocation4_spill] sm:$0xff] %v9486_v24  ;;  %v3680_v61 = vmax.f32 %v3678_v5, %v3679_v59  ;;  %v3699_v14 = vsel %vm2277_vm1, %v1565_v46, -inf  ;;  %v1671_v32 = vrot.slane %v1211_v52, 2  ;;  %v2696_v33 = vrot.slane %v2695_v30, 1 }
 0x2c5   :  { %11121 = vst [vmem:[#allocation5_spill] sm:$0xff] %v9488_v26  ;;  %v3687_v0 = vmax.f32 %v3685_v58, %v3686_v11  ;;  %v3700_v23 = vrot.slane %v3699_v14, 4  ;;  %v1672_v37 = vrot.slane %v1211_v52, 4  ;;  %v3694_v13 = vmax.f32 %v3692_v10, %v3693_v29 }
 0x2c6   :  { %11122 = vst [vmem:[#allocation6_spill] sm:$0xff] %v9490_v9  ;;  %v3681_v42 = vrot.slane %v3680_v61, 2  ;;  %v1673_v8 = vrot.slane %v1211_v52, 6  ;;  %v4686_v50 = vsel %vm2277_vm1, %v1211_v52, -inf  ;;  %v4693_v20 = vsel %vm2277_vm1, %v1671_v32, -inf }
 0x2c7   :  { %v3688_v22 = vrot.slane %v3687_v0, 2  ;;  %v3701_v36 = vmax.f32 %v3699_v14, %v3700_v23  ;;  %v4687_v16 = vrot.slane %v4686_v50, 4  ;;  %v3695_v25 = vrot.slane %v3694_v13, 2 }
 0x2c8   :  { %v3682_v63 = vmax.f32 %v3680_v61, %v3681_v42  ;;  %v4694_v41 = vrot.slane %v4693_v20, 4  ;;  %v4700_v46 = vsel %vm2277_vm1, %v1672_v37, -inf  ;;  %v4707_v29 = vsel %vm2277_vm1, %v1673_v8, -inf  ;;  %v802_v8 = vpop.f32.mrf.mxu0 }
 0x2c9   :  { %v3689_v5 = vmax.f32 %v3687_v0, %v3688_v22  ;;  %v3702_v59 = vrot.slane %v3701_v36, 2  ;;  %v4688_v58 = vmax.f32 %v4686_v50, %v4687_v16  ;;  %v4701_v11 = vrot.slane %v4700_v46, 4 }
 0x2ca   :  { %v3683_v9 = vrot.slane %v3682_v63, 1  ;;  %v3696_v26 = vmax.f32 %v3694_v13, %v3695_v25  ;;  %v4695_v10 = vmax.f32 %v4693_v20, %v4694_v41  ;;  %v9497_v7 = vmax.f32 %v2695_v30, %v2696_v33 }
 0x2cb   :  { %v3690_v52 = vrot.slane %v3689_v5, 1  ;;  %v3703_v24 = vmax.f32 %v3701_v36, %v3702_v59  ;;  %v4689_v14 = vrot.slane %v4688_v58, 2  ;;  %v4702_v23 = vmax.f32 %v4700_v46, %v4701_v11 }
 0x2cc   :  { %v3697_v61 = vrot.slane %v3696_v26, 1  ;;  %v4696_v32 = vrot.slane %v4695_v10, 2  ;;  %v4708_v42 = vrot.slane %v4707_v29, 4  ;;  %v9499_v31 = vmax.f32 %v3682_v63, %v3683_v9 }
 0x2cd   :  { %v3704_v0 = vrot.slane %v3703_v24, 1  ;;  %v4690_v37 = vmax.f32 %v4688_v58, %v4689_v14  ;;  %v4703_v50 = vrot.slane %v4702_v23, 2  ;;  %v9501_v22 = vmax.f32 %v3689_v5, %v3690_v52 }
 0x2ce   :  { %v4697_v13 = vmax.f32 %v4695_v10, %v4696_v32  ;;  %v4709_v16 = vmax.f32 %v4707_v29, %v4708_v42  ;;  %v1247_v20 = vmax.f32 %v1071_v43, 0.0  ;;  %v9503_v25 = vmax.f32 %v3696_v26, %v3697_v61  ;;  %v982_v32 = vpop.f32.mrf.mxu2 }
 0x2cf   :  { %11123 = vst [vmem:[#allocation7_spill] sm:$0xff] %v9501_v22  ;;  %v9505_v36 = vmax.f32 %v3703_v24, %v3704_v0  ;;  %v4691_v30 = vrot.slane %v4690_v37, 1  ;;  %v4704_v33 = vmax.f32 %v4702_v23, %v4703_v50  ;;  %v803_v5 = vadd.f32 %v9474_v12, %v802_v8  ;;  %v892_v24 = vpop.f32.mrf.mxu1 }
 0x2d0   :  { %11124 = vst [vmem:[#allocation8_spill] sm:$0xff] %v9503_v25  ;;  %v4698_v41 = vrot.slane %v4697_v13, 1  ;;  %v4710_v46 = vrot.slane %v4709_v16, 2  ;;  %v1779_v59 = vrot.slane %v1247_v20, 2  ;;  %v1780_v9 = vrot.slane %v1247_v20, 4 }
 0x2d1   :  { %11125 = vst [vmem:[#allocation9_spill] sm:$0xff] %v9505_v36  ;;  %v4705_v63 = vrot.slane %v4704_v33, 1  ;;  %v1781_v11 = vrot.slane %v1247_v20, 6  ;;  %v5694_v58 = vsel %vm2277_vm1, %v1247_v20, -inf  ;;  %v9509_v10 = vmax.f32 %v4690_v37, %v4691_v30 }
 0x2d2   :  { %v4711_v43 = vmax.f32 %v4709_v16, %v4710_v46  ;;  %v5695_v29 = vrot.slane %v5694_v58, 4  ;;  %v5701_v26 = vsel %vm2277_vm1, %v1779_v59, -inf  ;;  %v9512_v52 = vmax.f32 %v4697_v13, %v4698_v41 }
 0x2d3   :  { %11126 = vst [vmem:[#allocation10_spill] sm:$0xff] %v9509_v10  ;;  %v5702_v14 = vrot.slane %v5701_v26, 4  ;;  %v5708_v23 = vsel %vm2277_vm1, %v1780_v9, -inf  ;;  %v5715_v61 = vsel %vm2277_vm1, %v1781_v11, -inf  ;;  %v9516_v42 = vmax.f32 %v4704_v33, %v4705_v63 }
 0x2d4   :  { %11127 = vst [vmem:[#allocation11_spill] sm:$0xff] %v9512_v52  ;;  %v5696_v0 = vmax.f32 %v5694_v58, %v5695_v29  ;;  %v5709_v50 = vrot.slane %v5708_v23, 4  ;;  %v5716_v20 = vrot.slane %v5715_v61, 4  ;;  %v4712_v37 = vrot.slane %v4711_v43, 1 }
 0x2d5   :  { %11128 = vst [vmem:[#allocation12_spill] sm:$0xff] %v9516_v42  ;;  %v5703_v8 = vmax.f32 %v5701_v26, %v5702_v14  ;;  %v1140_v16 = vmax.f32 %v803_v5, 0.0  ;;  %v893_v30 = vadd.f32 %v9474_v12, %v892_v24  ;;  %v983_v41 = vadd.f32 %v9474_v12, %v982_v32 }
 0x2d6   :  { %v5697_v46 = vrot.slane %v5696_v0, 2  ;;  %v5710_v59 = vmax.f32 %v5708_v23, %v5709_v50  ;;  %v5717_v13 = vmax.f32 %v5715_v61, %v5716_v20 }
 0x2d7   :  { %v5704_v52 = vrot.slane %v5703_v8, 2  ;;  %v1458_v9 = vrot.slane %v1140_v16, 2  ;;  %v1459_v10 = vrot.slane %v1140_v16, 4  ;;  %v1460_v11 = vrot.slane %v1140_v16, 6 }
 0x2d8   :  { %v5698_v36 = vmax.f32 %v5696_v0, %v5697_v46  ;;  %v5711_v33 = vrot.slane %v5710_v59, 2  ;;  %v5718_v63 = vrot.slane %v5717_v13, 2  ;;  %v2698_v58 = vsel %vm2277_vm1, %v1140_v16, -inf }
 0x2d9   :  { %v5705_v29 = vmax.f32 %v5703_v8, %v5704_v52  ;;  %v2699_v42 = vrot.slane %v2698_v58, 4  ;;  %v2705_v5 = vsel %vm2277_vm1, %v1458_v9, -inf  ;;  %v2712_v26 = vsel %vm2277_vm1, %v1459_v10, -inf }
 0x2da   :  { %v5699_v24 = vrot.slane %v5698_v36, 1  ;;  %v5712_v14 = vmax.f32 %v5710_v59, %v5711_v33  ;;  %v9523_v23 = vmax.f32 %v5717_v13, %v5718_v63  ;;  %v2706_v61 = vrot.slane %v2705_v5, 4 }
 0x2db   :  { %v5706_v32 = vrot.slane %v5705_v29, 1  ;;  %v2700_v50 = vmax.f32 %v2698_v58, %v2699_v42  ;;  %v2713_v20 = vrot.slane %v2712_v26, 4  ;;  %v2719_v0 = vsel %vm2277_vm1, %v1460_v11, -inf }
 0x2dc   :  { %v9526_v46 = vmax.f32 %v4711_v43, %v4712_v37  ;;  %v9528_v25 = vmax.f32 %v5698_v36, %v5699_v24  ;;  %v5713_v52 = vrot.slane %v5712_v14, 1  ;;  %v2707_v8 = vmax.f32 %v2705_v5, %v2706_v61 }
 0x2dd   :  { %v2701_v9 = vrot.slane %v2700_v50, 2  ;;  %v2714_v10 = vmax.f32 %v2712_v26, %v2713_v20  ;;  %v2720_v22 = vrot.slane %v2719_v0, 4  ;;  %v9531_v59 = vmax.f32 %v5705_v29, %v5706_v32 }
 0x2de   :  { %11129 = vst [vmem:[#allocation13_spill] sm:$0xff] %v9526_v46  ;;  %v9533_v13 = vmax.f32 %v5712_v14, %v5713_v52  ;;  %v2708_v33 = vrot.slane %v2707_v8, 2  ;;  %v1176_v42 = vmax.f32 %v893_v30, 0.0  ;;  %v9535_v43 = vmax.f32 %v983_v41, 0.0 }
 0x2df   :  { %11130 = vst [vmem:[#allocation14_spill] sm:$0xff] %v9528_v25  ;;  %v2702_v63 = vmax.f32 %v2700_v50, %v2701_v9  ;;  %v2715_v58 = vrot.slane %v2714_v10, 2  ;;  %v2721_v11 = vmax.f32 %v2719_v0, %v2720_v22 }
 0x2e0   :  { %11131 = vst [vmem:[#allocation15_spill] sm:$0xff] %v9531_v59  ;;  %v2709_v36 = vmax.f32 %v2707_v8, %v2708_v33  ;;  %v1566_v37 = vrot.slane %v1176_v42, 2  ;;  %v1567_v24 = vrot.slane %v1176_v42, 4  ;;  %v1568_v5 = vrot.slane %v1176_v42, 6 }
 0x2e1   :  { %11132 = vst [vmem:[#allocation16_spill] sm:$0xff] %v9533_v13  ;;  %v2703_v61 = vrot.slane %v2702_v63, 1  ;;  %v2716_v16 = vmax.f32 %v2714_v10, %v2715_v58  ;;  %v2722_v25 = vrot.slane %v2721_v11, 2  ;;  %v3706_v26 = vsel %vm2277_vm1, %v1176_v42, -inf }
 0x2e2   :  { %v2710_v29 = vrot.slane %v2709_v36, 1  ;;  %v3707_v32 = vrot.slane %v3706_v26, 4  ;;  %v3713_v14 = vsel %vm2277_vm1, %v1566_v37, -inf  ;;  %v3720_v30 = vsel %vm2277_vm1, %v1567_v24, -inf }
 0x2e3   :  { %v2704_v50 = vmax.f32 %v2702_v63, %v2703_v61  ;;  %v2717_v20 = vrot.slane %v2716_v16, 1  ;;  %v2723_v22 = vmax.f32 %v2721_v11, %v2722_v25  ;;  %v3714_v41 = vrot.slane %v3713_v14, 4 }
 0x2e4   :  { %v2711_v0 = vmax.f32 %v2709_v36, %v2710_v29  ;;  %v3708_v52 = vmax.f32 %v3706_v26, %v3707_v32  ;;  %v3721_v8 = vrot.slane %v3720_v30, 4  ;;  %v3727_v9 = vsel %vm2277_vm1, %v1568_v5, -inf }
 0x2e5   :  { %v2718_v33 = vmax.f32 %v2716_v16, %v2717_v20  ;;  %v2724_v10 = vrot.slane %v2723_v22, 1  ;;  %v6334_v58 = vmax.f32 %v9361_v47, %v2704_v50  ;;  %v3715_v42 = vmax.f32 %v3713_v14, %v3714_v41 }
 0x2e6   :  { %v6335_v13 = vmax.f32 %v9364_v62, %v2711_v0  ;;  %v3709_v59 = vrot.slane %v3708_v52, 2  ;;  %v3722_v37 = vmax.f32 %v3720_v30, %v3721_v8  ;;  %v3728_v46 = vrot.slane %v3727_v9, 4 }
 0x2e7   :  { %v2725_v24 = vmax.f32 %v2723_v22, %v2724_v10  ;;  %v6336_v63 = vmax.f32 %v9366_v54, %v2718_v33  ;;  %v6622_v25 = vpack.c.bf16 %v6334_v58, %v6334_v58  ;;  %v3716_v11 = vrot.slane %v3715_v42, 2 }
 0x2e8   :  { %v6623_v36 = vpack.c.bf16 %v6335_v13, %v6335_v13  ;;  %v3710_v61 = vmax.f32 %v3708_v52, %v3709_v59  ;;  %v3723_v26 = vrot.slane %v3722_v37, 2  ;;  %v3729_v29 = vmax.f32 %v3727_v9, %v3728_v46 }
 0x2e9   :  { %v6337_v16 = vmax.f32 %v9372_v3, %v2725_v24  ;;  %v6624_v5 = vpack.c.bf16 %v6336_v63, %v6336_v63  ;;  %v7198_v32 = vunpack.c.l.b16 %v6622_v25  ;;  %v3717_v47 = vmax.f32 %v3715_v42, %v3716_v11 }
 0x2ea   :  { %v7199_v14 = vunpack.c.l.b16 %v6623_v36  ;;  %v3711_v50 = vrot.slane %v3710_v61, 1  ;;  %v3724_v62 = vmax.f32 %v3722_v37, %v3723_v26  ;;  %v3730_v20 = vrot.slane %v3729_v29, 2 }
 0x2eb   :  { %v6625_v30 = vpack.c.bf16 %v6337_v16, %v6337_v16  ;;  %v7200_v41 = vunpack.c.l.b16 %v6624_v5  ;;  %v3718_v22 = vrot.slane %v3717_v47, 1  ;;  %v1674_v54 = vrot.slane %v9535_v43, 2 }
 0x2ec   :  { %v7490_v0 = vsel %vm7462_vm2, %v7199_v14, %v7198_v32  ;;  %v3712_v13 = vmax.f32 %v3710_v61, %v3711_v50  ;;  %v3725_v59 = vrot.slane %v3724_v62, 1  ;;  %v3731_v52 = vmax.f32 %v3729_v29, %v3730_v20  ;;  %v1072_v32 = vpop.f32.mrf.mxu3  ;;  %v8271_v20 = vld [vmem:[%s11045_s0 + $0x230] sm:$0xff] }
 0x2ed   :  { %v7201_v46 = vunpack.c.l.b16 %v6625_v30  ;;  %v7491_v3 = vsel %vm7464_vm3, %v7200_v41, %v7490_v0  ;;  %v3719_v8 = vmax.f32 %v3717_v47, %v3718_v22  ;;  %v1675_v9 = vrot.slane %v9535_v43, 4  ;;  %8199 = vmatmul.msk.bf16.gmra.mxu3 %vm539_vm0, %v8271_v20 }
 0x2ee   :  { %v3726_v33 = vmax.f32 %v3724_v62, %v3725_v59  ;;  %v3732_v10 = vrot.slane %v3731_v52, 1  ;;  %v6406_v58 = vmax.f32 %v9374_v27, %v3712_v13  ;;  %v1676_v42 = vrot.slane %v9535_v43, 6 }
 0x2ef   :  { %v9552_v37 = vsel %vm7466_vm4, %v7201_v46, %v7491_v3  ;;  %v6407_v24 = vmax.f32 %v9376_v17, %v3719_v8  ;;  %v4714_v63 = vsel %vm2277_vm1, %v9535_v43, -inf  ;;  %v4721_v25 = vsel %vm2277_vm1, %v1674_v54, -inf  ;;  %v8217_v17 = vld [vmem:[%s11045_s0 + $0x80] sm:$0xff]  ;;  %v8235_v43 = vld [vmem:[%s11045_s0 + $0x110] sm:$0xff] }
 0x2f0   :  { %v3733_v11 = vmax.f32 %v3731_v52, %v3732_v10  ;;  %v6408_v36 = vmax.f32 %v9378_v1, %v3726_v33  ;;  %v6694_v61 = vpack.c.bf16 %v6406_v58, %v6406_v58  ;;  %v4715_v26 = vrot.slane %v4714_v63, 4  ;;  %v8253_v1 = vld [vmem:[%s11045_s0 + $0x1a0] sm:$0xff]  ;;  %8145 = vmatmul.msk.bf16.gmra.mxu0 %vm539_vm0, %v8217_v17  ;;  %8163 = vmatmul.msk.bf16.gmra.mxu1 %vm539_vm0, %v8235_v43  ;;  %v805_v52 = vpop.f32.mrf.mxu0 }
 0x2f1   :  { %v6695_v29 = vpack.c.bf16 %v6407_v24, %v6407_v24  ;;  %v4722_v16 = vrot.slane %v4721_v25, 4  ;;  %v4728_v27 = vsel %vm2277_vm1, %v1675_v9, -inf  ;;  %v4735_v5 = vsel %vm2277_vm1, %v1676_v42, -inf  ;;  %8181 = vmatmul.msk.bf16.gmra.mxu2 %vm539_vm0, %v8253_v1 }
 0x2f2   :  { %v6409_v47 = vmax.f32 %v9380_v48, %v3733_v11  ;;  %v6696_v14 = vpack.c.bf16 %v6408_v36, %v6408_v36  ;;  %v7270_v50 = vunpack.c.l.b16 %v6694_v61  ;;  %v4716_v62 = vmax.f32 %v4714_v63, %v4715_v26 }
 0x2f3   :  { %v7271_v30 = vunpack.c.l.b16 %v6695_v29  ;;  %v4723_v41 = vmax.f32 %v4721_v25, %v4722_v16  ;;  %v4729_v22 = vrot.slane %v4728_v27, 4  ;;  %v4736_v54 = vrot.slane %v4735_v5, 4 }
 0x2f4   :  { %v6697_v0 = vpack.c.bf16 %v6409_v47, %v6409_v47  ;;  %v7272_v13 = vunpack.c.l.b16 %v6696_v14  ;;  %v4717_v59 = vrot.slane %v4716_v62, 2  ;;  %v1073_v48 = vadd.f32 %v9474_v12, %v1072_v32 }
 0x2f5   :  { %v7553_v46 = vsel %vm7462_vm2, %v7271_v30, %v7270_v50  ;;  %v4724_v3 = vrot.slane %v4723_v41, 2  ;;  %v4730_v8 = vmax.f32 %v4728_v27, %v4729_v22  ;;  %v4737_v9 = vmax.f32 %v4735_v5, %v4736_v54 }
 0x2f6   :  { %v7273_v33 = vunpack.c.l.b16 %v6697_v0  ;;  %v7554_v10 = vsel %vm7464_vm3, %v7272_v13, %v7553_v46  ;;  %v4718_v58 = vmax.f32 %v4716_v62, %v4717_v59  ;;  %v1248_v42 = vmax.f32 %v1073_v48, 0.0 }
 0x2f7   :  { %v4725_v24 = vmax.f32 %v4723_v41, %v4724_v3  ;;  %v4731_v63 = vrot.slane %v4730_v8, 2  ;;  %v4738_v25 = vrot.slane %v4737_v9, 2  ;;  %v806_v11 = vadd.f32 %v9474_v12, %v805_v52 }
 0x2f8   :  { %v9583_v36 = vsel %vm7466_vm4, %v7273_v33, %v7554_v10  ;;  %v4719_v61 = vrot.slane %v4718_v58, 1  ;;  %v1782_v26 = vrot.slane %v1248_v42, 2  ;;  %v1783_v29 = vrot.slane %v1248_v42, 4 }
 0x2f9   :  { %v4726_v16 = vrot.slane %v4725_v24, 1  ;;  %v4732_v32 = vmax.f32 %v4730_v8, %v4731_v63  ;;  %v4739_v27 = vmax.f32 %v4737_v9, %v4738_v25  ;;  %v1784_v5 = vrot.slane %v1248_v42, 6 }
 0x2fa   :  { %v4720_v17 = vmax.f32 %v4718_v58, %v4719_v61  ;;  %v5722_v43 = vsel %vm2277_vm1, %v1248_v42, -inf  ;;  %v5729_v1 = vsel %vm2277_vm1, %v1782_v26, -inf  ;;  %v5736_v47 = vsel %vm2277_vm1, %v1783_v29, -inf }
 0x2fb   :  { %v4727_v14 = vmax.f32 %v4725_v24, %v4726_v16  ;;  %v4733_v50 = vrot.slane %v4732_v32, 1  ;;  %v4740_v62 = vrot.slane %v4739_v27, 1  ;;  %v5723_v20 = vrot.slane %v5722_v43, 4 }
 0x2fc   :  { %v6478_v30 = vmax.f32 %v9384_v56, %v4720_v17  ;;  %v5730_v41 = vrot.slane %v5729_v1, 4  ;;  %v5737_v22 = vrot.slane %v5736_v47, 4  ;;  %v5743_v54 = vsel %vm2277_vm1, %v1784_v5, -inf }
 0x2fd   :  { %v4734_v0 = vmax.f32 %v4732_v32, %v4733_v50  ;;  %v4741_v13 = vmax.f32 %v4739_v27, %v4740_v62  ;;  %v6479_v59 = vmax.f32 %v9388_v35, %v4727_v14  ;;  %v5724_v48 = vmax.f32 %v5722_v43, %v5723_v20 }
 0x2fe   :  { %v6766_v52 = vpack.c.bf16 %v6478_v30, %v6478_v30  ;;  %v5731_v46 = vmax.f32 %v5729_v1, %v5730_v41  ;;  %v5738_v3 = vmax.f32 %v5736_v47, %v5737_v22  ;;  %v5744_v8 = vrot.slane %v5743_v54, 4 }
 0x2ff   :  { %v6480_v9 = vmax.f32 %v9392_v4, %v4734_v0  ;;  %v6481_v33 = vmax.f32 %v9398_v21, %v4741_v13  ;;  %v6767_v10 = vpack.c.bf16 %v6479_v59, %v6479_v59  ;;  %v5725_v58 = vrot.slane %v5724_v48, 2 }
 0x300   :  { %v7342_v56 = vunpack.c.l.b16 %v6766_v52  ;;  %v5732_v42 = vrot.slane %v5731_v46, 2  ;;  %v5739_v24 = vrot.slane %v5738_v3, 2  ;;  %v5745_v63 = vmax.f32 %v5743_v54, %v5744_v8 }
 0x301   :  { %v6768_v25 = vpack.c.bf16 %v6480_v9, %v6480_v9  ;;  %v6769_v61 = vpack.c.bf16 %v6481_v33, %v6481_v33  ;;  %v7343_v26 = vunpack.c.l.b16 %v6767_v10  ;;  %v5726_v29 = vmax.f32 %v5724_v48, %v5725_v58 }
 0x302   :  { %v5733_v35 = vmax.f32 %v5731_v46, %v5732_v42  ;;  %v5740_v16 = vmax.f32 %v5738_v3, %v5739_v24  ;;  %v5746_v32 = vrot.slane %v5745_v63, 2  ;;  %v1141_v27 = vmax.f32 %v806_v11, 0.0 }
 0x303   :  { %v7344_v5 = vunpack.c.l.b16 %v6768_v25  ;;  %v7345_v17 = vunpack.c.l.b16 %v6769_v61  ;;  %v7616_v4 = vsel %vm7462_vm2, %v7343_v26, %v7342_v56  ;;  %v5727_v43 = vrot.slane %v5726_v29, 1 }
 0x304   :  { %v5734_v21 = vrot.slane %v5733_v35, 1  ;;  %v5741_v1 = vrot.slane %v5740_v16, 1  ;;  %v5747_v47 = vmax.f32 %v5745_v63, %v5746_v32  ;;  %v1461_v14 = vrot.slane %v1141_v27, 2  ;;  %v895_v63 = vpop.f32.mrf.mxu1 }
 0x305   :  { %v7617_v50 = vsel %vm7464_vm3, %v7344_v5, %v7616_v4  ;;  %v5728_v62 = vmax.f32 %v5726_v29, %v5727_v43  ;;  %v1462_v20 = vrot.slane %v1141_v27, 4  ;;  %v1463_v30 = vrot.slane %v1141_v27, 6 }
 0x306   :  { %v9596_v41 = vsel %vm7466_vm4, %v7345_v17, %v7617_v50  ;;  %v5735_v22 = vmax.f32 %v5733_v35, %v5734_v21  ;;  %v5742_v54 = vmax.f32 %v5740_v16, %v5741_v1  ;;  %v5748_v11 = vrot.slane %v5747_v47, 1  ;;  %v985_v35 = vpop.f32.mrf.mxu2 }
 0x307   :  { %v6550_v0 = vmax.f32 %v9400_v18, %v5728_v62  ;;  %v2726_v13 = vsel %vm2277_vm1, %v1141_v27, -inf  ;;  %v2733_v59 = vsel %vm2277_vm1, %v1461_v14, -inf  ;;  %v2740_v48 = vsel %vm2277_vm1, %v1462_v20, -inf }
 0x308   :  { %v5749_v52 = vmax.f32 %v5747_v47, %v5748_v11  ;;  %v6551_v46 = vmax.f32 %v9402_v51, %v5735_v22  ;;  %v6552_v3 = vmax.f32 %v9404_v15, %v5742_v54  ;;  %v2727_v8 = vrot.slane %v2726_v13, 4  ;;  %v1075_v47 = vpop.f32.mrf.mxu3 }
 0x309   :  { %v6838_v9 = vpack.c.bf16 %v6550_v0, %v6550_v0  ;;  %v2734_v33 = vrot.slane %v2733_v59, 4  ;;  %v2741_v10 = vrot.slane %v2740_v48, 4  ;;  %v2747_v58 = vsel %vm2277_vm1, %v1463_v30, -inf }
 0x30a   :  { %v6553_v56 = vmax.f32 %v9420_v39, %v5749_v52  ;;  %v6839_v18 = vpack.c.bf16 %v6551_v46, %v6551_v46  ;;  %v6840_v42 = vpack.c.bf16 %v6552_v3, %v6552_v3  ;;  %v2728_v24 = vmax.f32 %v2726_v13, %v2727_v8 }
 0x30b   :  { %v7414_v25 = vunpack.c.l.b16 %v6838_v9  ;;  %v2735_v61 = vmax.f32 %v2733_v59, %v2734_v33  ;;  %v2742_v26 = vmax.f32 %v2740_v48, %v2741_v10  ;;  %v2748_v29 = vrot.slane %v2747_v58, 4 }
 0x30c   :  { %v6841_v51 = vpack.c.bf16 %v6553_v56, %v6553_v56  ;;  %v7415_v16 = vunpack.c.l.b16 %v6839_v18  ;;  %v7416_v15 = vunpack.c.l.b16 %v6840_v42  ;;  %v2729_v32 = vrot.slane %v2728_v24, 2 }
 0x30d   :  { %v2736_v27 = vrot.slane %v2735_v61, 2  ;;  %v2743_v5 = vrot.slane %v2742_v26, 2  ;;  %v2749_v17 = vmax.f32 %v2747_v58, %v2748_v29  ;;  %v896_v4 = vadd.f32 %v9474_v12, %v895_v63 }
 0x30e   :  { %v7417_v43 = vunpack.c.l.b16 %v6841_v51  ;;  %v7679_v39 = vsel %vm7462_vm2, %v7415_v16, %v7414_v25  ;;  %v2730_v21 = vmax.f32 %v2728_v24, %v2729_v32  ;;  %v986_v1 = vadd.f32 %v9474_v12, %v985_v35 }
 0x30f   :  { %v7680_v14 = vsel %vm7464_vm3, %v7416_v15, %v7679_v39  ;;  %v2737_v50 = vmax.f32 %v2735_v61, %v2736_v27  ;;  %v2744_v62 = vmax.f32 %v2742_v26, %v2743_v5  ;;  %v2750_v20 = vrot.slane %v2749_v17, 2 }
 0x310   :  { %v9611_v30 = vsel %vm7466_vm4, %v7417_v43, %v7680_v14  ;;  %v2731_v22 = vrot.slane %v2730_v21, 1  ;;  %v1177_v54 = vmax.f32 %v896_v4, 0.0  ;;  %v9613_v11 = vmax.f32 %v986_v1, 0.0 }
 0x311   :  { %v2738_v0 = vrot.slane %v2737_v50, 1  ;;  %v2745_v13 = vrot.slane %v2744_v62, 1  ;;  %v2751_v59 = vmax.f32 %v2749_v17, %v2750_v20  ;;  %v9616_v48 = vadd.f32 %v9474_v12, %v1075_v47 }
 0x312   :  { %v2732_v52 = vmax.f32 %v2730_v21, %v2731_v22  ;;  %v1569_v46 = vrot.slane %v1177_v54, 2  ;;  %v1570_v3 = vrot.slane %v1177_v54, 4  ;;  %v1571_v8 = vrot.slane %v1177_v54, 6 }
 0x313   :  { %v2739_v9 = vmax.f32 %v2737_v50, %v2738_v0  ;;  %v2746_v33 = vmax.f32 %v2744_v62, %v2745_v13  ;;  %v2752_v10 = vrot.slane %v2751_v59, 1  ;;  %v3734_v58 = vsel %vm2277_vm1, %v1177_v54, -inf }
 0x314   :  { %v6338_v56 = vmax.f32 %v9425_v19, %v2732_v52  ;;  %v3735_v18 = vrot.slane %v3734_v58, 4  ;;  %v3741_v42 = vsel %vm2277_vm1, %v1569_v46, -inf  ;;  %v3748_v24 = vsel %vm2277_vm1, %v1570_v3, -inf }
 0x315   :  { %v2753_v63 = vmax.f32 %v2751_v59, %v2752_v10  ;;  %v6339_v25 = vmax.f32 %v9430_v6, %v2739_v9  ;;  %v6340_v61 = vmax.f32 %v9433_v38, %v2746_v33  ;;  %v3742_v26 = vrot.slane %v3741_v42, 4 }
 0x316   :  { %v6626_v29 = vpack.c.bf16 %v6338_v56, %v6338_v56  ;;  %v3736_v35 = vmax.f32 %v3734_v58, %v3735_v18  ;;  %v3749_v51 = vrot.slane %v3748_v24, 4  ;;  %v3755_v16 = vsel %vm2277_vm1, %v1571_v8, -inf }
 0x317   :  { %v6341_v15 = vmax.f32 %v9441_v57, %v2753_v63  ;;  %v6627_v32 = vpack.c.bf16 %v6339_v25, %v6339_v25  ;;  %v6628_v19 = vpack.c.bf16 %v6340_v61, %v6340_v61  ;;  %v3743_v27 = vmax.f32 %v3741_v42, %v3742_v26 }
 0x318   :  { %v7202_v5 = vunpack.c.l.b16 %v6626_v29  ;;  %v3737_v17 = vrot.slane %v3736_v35, 2  ;;  %v3750_v4 = vmax.f32 %v3748_v24, %v3749_v51  ;;  %v3756_v43 = vrot.slane %v3755_v16, 4 }
 0x319   :  { %v6629_v39 = vpack.c.bf16 %v6341_v15, %v6341_v15  ;;  %v7203_v21 = vunpack.c.l.b16 %v6627_v32  ;;  %v7204_v6 = vunpack.c.l.b16 %v6628_v19  ;;  %v3744_v1 = vrot.slane %v3743_v27, 2 }
 0x31a   :  { %v7493_v38 = vsel %vm7468_vm5, %v7202_v5, %v9552_v37  ;;  %v3738_v47 = vmax.f32 %v3736_v35, %v3737_v17  ;;  %v3751_v14 = vrot.slane %v3750_v4, 2  ;;  %v3757_v50 = vmax.f32 %v3755_v16, %v3756_v43 }
 0x31b   :  { %v7205_v62 = vunpack.c.l.b16 %v6629_v39  ;;  %v7494_v57 = vsel %vm7470_vm6, %v7203_v21, %v7493_v38  ;;  %v3745_v20 = vmax.f32 %v3743_v27, %v3744_v1  ;;  %v1677_v22 = vrot.slane %v9613_v11, 2 }
 0x31c   :  { %v7495_v54 = vsel %vm7472_vm7, %v7204_v6, %v7494_v57  ;;  %v3739_v0 = vrot.slane %v3738_v47, 1  ;;  %v3752_v13 = vmax.f32 %v3750_v4, %v3751_v14  ;;  %v3758_v59 = vrot.slane %v3757_v50, 2 }
 0x31d   :  { %v7496_v52 = vsel %vm7474_vm8, %v7205_v62, %v7495_v54  ;;  %v3746_v46 = vrot.slane %v3745_v20, 1  ;;  %v1678_v3 = vrot.slane %v9613_v11, 4  ;;  %v1679_v37 = vrot.slane %v9613_v11, 6 }
 0x31e   :  { %v7724_v8 = vpack.c.b16 %v7496_v52, %v7496_v52  ;;  %v3740_v9 = vmax.f32 %v3738_v47, %v3739_v0  ;;  %v3753_v33 = vrot.slane %v3752_v13, 1  ;;  %v3759_v10 = vmax.f32 %v3757_v50, %v3758_v59  ;;  %v807_v50 = vpop.f32.mrf.mxu0 }
 0x31f   :  { %v3747_v58 = vmax.f32 %v3745_v20, %v3746_v46  ;;  %v4742_v56 = vsel %vm2277_vm1, %v9613_v11, -inf  ;;  %v4749_v18 = vsel %vm2277_vm1, %v1677_v22, -inf  ;;  %v4756_v42 = vsel %vm2277_vm1, %v1678_v3, -inf }
 0x320   :  { %7796 = vst [vmem:[%s11047_s3 + $0xc] sm:$0xf] %v7724_v8  ;;  %v3754_v24 = vmax.f32 %v3752_v13, %v3753_v33  ;;  %v3760_v63 = vrot.slane %v3759_v10, 1  ;;  %v6410_v25 = vmax.f32 %v9443_v44, %v3740_v9  ;;  %v4743_v61 = vrot.slane %v4742_v56, 4 }
 0x321   :  { %v6411_v26 = vmax.f32 %v9445_v40, %v3747_v58  ;;  %v4750_v29 = vrot.slane %v4749_v18, 4  ;;  %v4757_v35 = vrot.slane %v4756_v42, 4  ;;  %v4763_v51 = vsel %vm2277_vm1, %v1679_v37, -inf }
 0x322   :  { %v3761_v11 = vmax.f32 %v3759_v10, %v3760_v63  ;;  %v6412_v16 = vmax.f32 %v9447_v53, %v3754_v24  ;;  %v6698_v15 = vpack.c.bf16 %v6410_v25, %v6410_v25  ;;  %v4744_v32 = vmax.f32 %v4742_v56, %v4743_v61 }
 0x323   :  { %v6699_v19 = vpack.c.bf16 %v6411_v26, %v6411_v26  ;;  %v4751_v27 = vmax.f32 %v4749_v18, %v4750_v29  ;;  %v4758_v5 = vmax.f32 %v4756_v42, %v4757_v35  ;;  %v4764_v17 = vrot.slane %v4763_v51, 4 }
 0x324   :  { %v6413_v4 = vmax.f32 %v9452_v28, %v3761_v11  ;;  %v6700_v43 = vpack.c.bf16 %v6412_v16, %v6412_v16  ;;  %v7274_v44 = vunpack.c.l.b16 %v6698_v15  ;;  %v4745_v39 = vrot.slane %v4744_v32, 2 }
 0x325   :  { %v7275_v21 = vunpack.c.l.b16 %v6699_v19  ;;  %v4752_v40 = vrot.slane %v4751_v27, 2  ;;  %v4759_v6 = vrot.slane %v4758_v5, 2  ;;  %v4765_v1 = vmax.f32 %v4763_v51, %v4764_v17 }
 0x326   :  { %v6701_v38 = vpack.c.bf16 %v6413_v4, %v6413_v4  ;;  %v7276_v47 = vunpack.c.l.b16 %v6700_v43  ;;  %v7556_v53 = vsel %vm7468_vm5, %v7274_v44, %v9583_v36  ;;  %v4746_v14 = vmax.f32 %v4744_v32, %v4745_v39 }
 0x327   :  { %v7557_v62 = vsel %vm7470_vm6, %v7275_v21, %v7556_v53  ;;  %v4753_v57 = vmax.f32 %v4751_v27, %v4752_v40  ;;  %v4760_v20 = vmax.f32 %v4758_v5, %v4759_v6  ;;  %v4766_v22 = vrot.slane %v4765_v1, 2 }
 0x328   :  { %v7277_v28 = vunpack.c.l.b16 %v6701_v38  ;;  %v7558_v54 = vsel %vm7472_vm7, %v7276_v47, %v7557_v62  ;;  %v4747_v0 = vrot.slane %v4746_v14, 1  ;;  %v1249_v13 = vmax.f32 %v9616_v48, 0.0 }
 0x329   :  { %v4754_v59 = vrot.slane %v4753_v57, 1  ;;  %v4761_v52 = vrot.slane %v4760_v20, 1  ;;  %v4767_v46 = vmax.f32 %v4765_v1, %v4766_v22  ;;  %v808_v3 = vadd.f32 %v9474_v12, %v807_v50 }
 0x32a   :  { %v7559_v36 = vsel %vm7474_vm8, %v7277_v28, %v7558_v54  ;;  %v4748_v37 = vmax.f32 %v4746_v14, %v4747_v0  ;;  %v1785_v8 = vrot.slane %v1249_v13, 2  ;;  %v1786_v9 = vrot.slane %v1249_v13, 4 }
 0x32b   :  { %v7733_v33 = vpack.c.b16 %v7559_v36, %v7559_v36  ;;  %v4755_v10 = vmax.f32 %v4753_v57, %v4754_v59  ;;  %v4762_v58 = vmax.f32 %v4760_v20, %v4761_v52  ;;  %v4768_v56 = vrot.slane %v4767_v46, 1 }
 0x32c   :  { %v6482_v18 = vmax.f32 %v9454_v49, %v4748_v37  ;;  %v1787_v42 = vrot.slane %v1249_v13, 6  ;;  %v5750_v24 = vsel %vm2277_vm1, %v1249_v13, -inf  ;;  %v5757_v48 = vsel %vm2277_vm1, %v1785_v8, -inf }
 0x32d   :  { %7805 = vst [vmem:[%s11047_s3 + $0x30] sm:$0xf] %v7733_v33  ;;  %v4769_v12 = vmax.f32 %v4767_v46, %v4768_v56  ;;  %v6483_v63 = vmax.f32 %v9456_v2, %v4755_v10  ;;  %v6484_v25 = vmax.f32 %v9459_v60, %v4762_v58  ;;  %v5751_v61 = vrot.slane %v5750_v24, 4 }
 0x32e   :  { %v6770_v26 = vpack.c.bf16 %v6482_v18, %v6482_v18  ;;  %v5758_v29 = vrot.slane %v5757_v48, 4  ;;  %v5764_v35 = vsel %vm2277_vm1, %v1786_v9, -inf  ;;  %v5771_v49 = vsel %vm2277_vm1, %v1787_v42, -inf }
 0x32f   :  { %v6485_v51 = vmax.f32 %v9465_v34, %v4769_v12  ;;  %v6771_v11 = vpack.c.bf16 %v6483_v63, %v6483_v63  ;;  %v6772_v16 = vpack.c.bf16 %v6484_v25, %v6484_v25  ;;  %v5752_v15 = vmax.f32 %v5750_v24, %v5751_v61  ;;  %v11133_v25 = vld [vmem:[#allocation2_spill] sm:$0xff] }
 0x330   :  { %v7346_v32 = vunpack.c.l.b16 %v6770_v26  ;;  %v5759_v19 = vmax.f32 %v5757_v48, %v5758_v29  ;;  %v5765_v27 = vrot.slane %v5764_v35, 4  ;;  %v5772_v5 = vrot.slane %v5771_v49, 4  ;;  %v11134_v26 = vld [vmem:[#allocation3_spill] sm:$0xff] }
 0x331   :  { %v6773_v17 = vpack.c.bf16 %v6485_v51, %v6485_v51  ;;  %v7347_v2 = vunpack.c.l.b16 %v6771_v11  ;;  %v7348_v4 = vunpack.c.l.b16 %v6772_v16  ;;  %v5753_v60 = vrot.slane %v5752_v15, 2 }
 0x332   :  { %v7619_v43 = vsel %vm7468_vm5, %v7346_v32, %v9596_v41  ;;  %v5760_v44 = vrot.slane %v5759_v19, 2  ;;  %v5766_v39 = vmax.f32 %v5764_v35, %v5765_v27  ;;  %v5773_v21 = vmax.f32 %v5771_v49, %v5772_v5 }
 0x333   :  { %v7349_v40 = vunpack.c.l.b16 %v6773_v17  ;;  %v7620_v34 = vsel %vm7470_vm6, %v7347_v2, %v7619_v43  ;;  %v5754_v6 = vmax.f32 %v5752_v15, %v5753_v60  ;;  %v1142_v1 = vmax.f32 %v808_v3, 0.0  ;;  %v987_v60 = vpop.f32.mrf.mxu2 }
 0x334   :  { %v7621_v38 = vsel %vm7472_vm7, %v7348_v4, %v7620_v34  ;;  %v5761_v47 = vmax.f32 %v5759_v19, %v5760_v44  ;;  %v5767_v53 = vrot.slane %v5766_v39, 2  ;;  %v5774_v14 = vrot.slane %v5773_v21, 2 }
 0x335   :  { %v7622_v50 = vsel %vm7474_vm8, %v7349_v40, %v7621_v38  ;;  %v5755_v62 = vrot.slane %v5754_v6, 1  ;;  %v1464_v57 = vrot.slane %v1142_v1, 2  ;;  %v1465_v20 = vrot.slane %v1142_v1, 4 }
 0x336   :  { %v7742_v22 = vpack.c.b16 %v7622_v50, %v7622_v50  ;;  %v5762_v41 = vrot.slane %v5761_v47, 1  ;;  %v5768_v28 = vmax.f32 %v5766_v39, %v5767_v53  ;;  %v5775_v54 = vmax.f32 %v5773_v21, %v5774_v14 }
 0x337   :  { %v5756_v0 = vmax.f32 %v5754_v6, %v5755_v62  ;;  %v1466_v13 = vrot.slane %v1142_v1, 6  ;;  %v2754_v59 = vsel %vm2277_vm1, %v1142_v1, -inf  ;;  %v2761_v52 = vsel %vm2277_vm1, %v1464_v57, -inf  ;;  %v9686_v1 = vld [vmem:[%s11046_s2] ss:$0 sm:$0xff] }
 0x338   :  { %7814 = vst [vmem:[%s11047_s3 + $0x54] sm:$0xf] %v7742_v22  ;;  %v5763_v46 = vmax.f32 %v5761_v47, %v5762_v41  ;;  %v5769_v3 = vrot.slane %v5768_v28, 1  ;;  %v5776_v36 = vrot.slane %v5775_v54, 1  ;;  %v2755_v37 = vrot.slane %v2754_v59, 4 }
 0x339   :  { %v6554_v8 = vmax.f32 %v9467_v45, %v5756_v0  ;;  %v2762_v9 = vrot.slane %v2761_v52, 4  ;;  %v2768_v33 = vsel %vm2277_vm1, %v1465_v20, -inf  ;;  %v2775_v10 = vsel %vm2277_vm1, %v1466_v13, -inf }
 0x33a   :  { %v5770_v58 = vmax.f32 %v5768_v28, %v5769_v3  ;;  %v5777_v56 = vmax.f32 %v5775_v54, %v5776_v36  ;;  %v6555_v18 = vmax.f32 %v9469_v55, %v5763_v46  ;;  %v2756_v42 = vmax.f32 %v2754_v59, %v2755_v37  ;;  %v897_v55 = vpop.f32.mrf.mxu1  ;;  %v11136_v54 = vld [vmem:[#allocation4_spill] sm:$0xff] }
 0x33b   :  { %v6842_v24 = vpack.c.bf16 %v6554_v8, %v6554_v8  ;;  %v2763_v48 = vmax.f32 %v2761_v52, %v2762_v9  ;;  %v2769_v12 = vrot.slane %v2768_v33, 4  ;;  %v2776_v63 = vrot.slane %v2775_v10, 4 }
 0x33c   :  { %v6556_v61 = vmax.f32 %v11133_v25, %v5770_v58  ;;  %v6557_v29 = vmax.f32 %v11134_v26, %v5777_v56  ;;  %v6843_v35 = vpack.c.bf16 %v6555_v18, %v6555_v18  ;;  %v2757_v45 = vrot.slane %v2756_v42, 2 }
 0x33d   :  { %v7418_v49 = vunpack.c.l.b16 %v6842_v24  ;;  %v2764_v51 = vrot.slane %v2763_v48, 2  ;;  %v2770_v11 = vmax.f32 %v2768_v33, %v2769_v12  ;;  %v2777_v16 = vmax.f32 %v2775_v10, %v2776_v63  ;;  %v11138_v10 = vld [vmem:[#allocation6_spill] sm:$0xff] }
 0x33e   :  { %v6844_v15 = vpack.c.bf16 %v6556_v61, %v6556_v61  ;;  %v6845_v32 = vpack.c.bf16 %v6557_v29, %v6557_v29  ;;  %v7419_v19 = vunpack.c.l.b16 %v6843_v35  ;;  %v2758_v27 = vmax.f32 %v2756_v42, %v2757_v45 }
 0x33f   :  { %v7682_v5 = vsel %vm7468_vm5, %v7418_v49, %v9611_v30  ;;  %v2765_v17 = vmax.f32 %v2763_v48, %v2764_v51  ;;  %v2771_v2 = vrot.slane %v2770_v11, 2  ;;  %v2778_v4 = vrot.slane %v2777_v16, 2  ;;  %v1077_v30 = vpop.f32.mrf.mxu3 }
 0x340   :  { %v7420_v43 = vunpack.c.l.b16 %v6844_v15  ;;  %v7421_v44 = vunpack.c.l.b16 %v6845_v32  ;;  %v7683_v39 = vsel %vm7470_vm6, %v7419_v19, %v7682_v5  ;;  %v2759_v21 = vrot.slane %v2758_v27, 1 }
 0x341   :  { %v2766_v40 = vrot.slane %v2765_v17, 1  ;;  %v2772_v34 = vmax.f32 %v2770_v11, %v2771_v2  ;;  %v2779_v6 = vmax.f32 %v2777_v16, %v2778_v4  ;;  %v898_v38 = vadd.f32 %v9686_v1, %v897_v55 }
 0x342   :  { %v11135_v47 = vrot.slane %v9523_v23, 1  ;;  %v7684_v14 = vsel %vm7472_vm7, %v7420_v43, %v7683_v39  ;;  %v2760_v50 = vmax.f32 %v2758_v27, %v2759_v21  ;;  %v988_v62 = vadd.f32 %v9686_v1, %v987_v60 }
 0x343   :  { %v7685_v57 = vsel %vm7474_vm8, %v7421_v44, %v7684_v14  ;;  %v2767_v20 = vmax.f32 %v2765_v17, %v2766_v40  ;;  %v2773_v22 = vrot.slane %v2772_v34, 1  ;;  %v2780_v41 = vrot.slane %v2779_v6, 1 }
 0x344   :  { %v9692_v53 = vmax.f32 %v9523_v23, %v11135_v47  ;;  %v7751_v28 = vpack.c.b16 %v7685_v57, %v7685_v57  ;;  %v6342_v0 = vmax.f32 %v11136_v54, %v2760_v50  ;;  %v1178_v13 = vmax.f32 %v898_v38, 0.0  ;;  %v11137_v23 = vld [vmem:[#allocation5_spill] sm:$0xff] }
 0x345   :  { %v1078_v59 = vadd.f32 %v9686_v1, %v1077_v30  ;;  %v2774_v52 = vmax.f32 %v2772_v34, %v2773_v22  ;;  %v2781_v46 = vmax.f32 %v2779_v6, %v2780_v41  ;;  %v6343_v3 = vmax.f32 %v11137_v23, %v2767_v20  ;;  %v8218_v22 = vld [vmem:[%s11045_s0 + $0x88] sm:$0xff]  ;;  %v8236_v41 = vld [vmem:[%s11045_s0 + $0x118] sm:$0xff] }
 0x346   :  { %v1214_v36 = vmax.f32 %v988_v62, 0.0  ;;  %7823 = vst [vmem:[%s11047_s3 + $0x78] sm:$0xf] %v7751_v28  ;;  %v6630_v37 = vpack.c.bf16 %v6342_v0, %v6342_v0  ;;  %v1572_v8 = vrot.slane %v1178_v13, 2  ;;  %v1573_v9 = vrot.slane %v1178_v13, 4  ;;  %v8254_v28 = vld [vmem:[%s11045_s0 + $0x1a8] sm:$0xff]  ;;  %8146 = vmatmul.msk.bf16.gmra.mxu0 %vm539_vm0, %v8218_v22  ;;  %8164 = vmatmul.msk.bf16.gmra.mxu1 %vm539_vm0, %v8236_v41 }
 0x347   :  { %v1574_v33 = vrot.slane %v1178_v13, 6  ;;  %v6344_v58 = vmax.f32 %v11138_v10, %v2774_v52  ;;  %v6345_v56 = vmax.f32 %v9497_v7, %v2781_v46  ;;  %v6631_v18 = vpack.c.bf16 %v6343_v3, %v6343_v3  ;;  %v8272_v52 = vld [vmem:[%s11045_s0 + $0x238] sm:$0xff]  ;;  %8182 = vmatmul.msk.bf16.gmra.mxu2 %vm539_vm0, %v8254_v28  ;;  %v11139_v10 = vld [vmem:[#allocation7_spill] sm:$0xff] }
 0x348   :  { %v3762_v42 = vsel %vm2277_vm1, %v1178_v13, -inf  ;;  %v7206_v24 = vunpack.c.l.b16 %v6630_v37  ;;  %v3769_v12 = vsel %vm2277_vm1, %v1572_v8, -inf  ;;  %v3776_v63 = vsel %vm2277_vm1, %v1573_v9, -inf  ;;  %8200 = vmatmul.msk.bf16.gmra.mxu3 %vm539_vm0, %v8272_v52 }
 0x349   :  { %v3763_v48 = vrot.slane %v3762_v42, 4  ;;  %v6632_v25 = vpack.c.bf16 %v6344_v58, %v6344_v58  ;;  %v6633_v61 = vpack.c.bf16 %v6345_v56, %v6345_v56  ;;  %v7207_v26 = vunpack.c.l.b16 %v6631_v18 }
 0x34a   :  { %v3770_v29 = vrot.slane %v3769_v12, 4  ;;  %v3777_v45 = vrot.slane %v3776_v63, 4  ;;  %v3783_v49 = vsel %vm2277_vm1, %v1574_v33, -inf  ;;  %v9709_v51 = vmax.f32 %v1078_v59, 0.0 }
 0x34b   :  { %v3764_v35 = vmax.f32 %v3762_v42, %v3763_v48  ;;  %v7208_v7 = vunpack.c.l.b16 %v6632_v25  ;;  %v7497_v11 = vsel %vm7462_vm2, %v7207_v26, %v7206_v24  ;;  %v1680_v15 = vrot.slane %v1214_v36, 2  ;;  %v11140_v48 = vld [vmem:[#allocation8_spill] sm:$0xff] }
 0x34c   :  { %v3771_v16 = vmax.f32 %v3769_v12, %v3770_v29  ;;  %v3778_v19 = vmax.f32 %v3776_v63, %v3777_v45  ;;  %v3784_v27 = vrot.slane %v3783_v49, 4  ;;  %v1681_v55 = vrot.slane %v1214_v36, 4 }
 0x34d   :  { %v3765_v32 = vrot.slane %v3764_v35, 2  ;;  %v9712_v5 = vunpack.c.l.b16 %v6633_v61  ;;  %v1682_v2 = vrot.slane %v1214_v36, 6  ;;  %v4770_v4 = vsel %vm2277_vm1, %v1214_v36, -inf }
 0x34e   :  { %v3772_v17 = vrot.slane %v3771_v16, 2  ;;  %v9716_v60 = vsel %vm7464_vm3, %v7208_v7, %v7497_v11  ;;  %v3779_v44 = vrot.slane %v3778_v19, 2  ;;  %v3785_v39 = vmax.f32 %v3783_v49, %v3784_v27 }
 0x34f   :  { %v3766_v43 = vmax.f32 %v3764_v35, %v3765_v32  ;;  %v4771_v40 = vrot.slane %v4770_v4, 4  ;;  %v4777_v34 = vsel %vm2277_vm1, %v1680_v15, -inf  ;;  %v4784_v6 = vsel %vm2277_vm1, %v1681_v55, -inf }
 0x350   :  { %v3773_v21 = vmax.f32 %v3771_v16, %v3772_v17  ;;  %v3780_v30 = vmax.f32 %v3778_v19, %v3779_v44  ;;  %v3786_v47 = vrot.slane %v3785_v39, 2  ;;  %v4778_v14 = vrot.slane %v4777_v34, 4 }
 0x351   :  { %v3767_v38 = vrot.slane %v3766_v43, 1  ;;  %v4772_v62 = vmax.f32 %v4770_v4, %v4771_v40  ;;  %v4785_v57 = vrot.slane %v4784_v6, 4  ;;  %v4791_v20 = vsel %vm2277_vm1, %v1682_v2, -inf }
 0x352   :  { %v3774_v50 = vrot.slane %v3773_v21, 1  ;;  %v3781_v0 = vrot.slane %v3780_v30, 1  ;;  %v3787_v13 = vmax.f32 %v3785_v39, %v3786_v47  ;;  %v4779_v59 = vmax.f32 %v4777_v34, %v4778_v14  ;;  %v11142_v39 = vld [vmem:[#allocation10_spill] sm:$0xff]  ;;  %v11144_v14 = vld [vmem:[#allocation12_spill] sm:$0xff] }
 0x353   :  { %v3768_v54 = vmax.f32 %v3766_v43, %v3767_v38  ;;  %v4773_v23 = vrot.slane %v4772_v62, 2  ;;  %v4786_v3 = vmax.f32 %v4784_v6, %v4785_v57  ;;  %v4792_v36 = vrot.slane %v4791_v20, 4  ;;  %v11143_v6 = vld [vmem:[#allocation11_spill] sm:$0xff] }
 0x354   :  { %v3775_v46 = vmax.f32 %v3773_v21, %v3774_v50  ;;  %v3782_v37 = vmax.f32 %v3780_v30, %v3781_v0  ;;  %v3788_v8 = vrot.slane %v3787_v13, 1  ;;  %v4780_v33 = vrot.slane %v4779_v59, 2 }
 0x355   :  { %v6414_v9 = vmax.f32 %v9499_v31, %v3768_v54  ;;  %v4774_v56 = vmax.f32 %v4772_v62, %v4773_v23  ;;  %v4787_v18 = vrot.slane %v4786_v3, 2  ;;  %v4793_v42 = vmax.f32 %v4791_v20, %v4792_v36  ;;  %v11141_v31 = vld [vmem:[#allocation9_spill] sm:$0xff] }
 0x356   :  { %v6415_v58 = vmax.f32 %v11139_v10, %v3775_v46  ;;  %v3789_v24 = vmax.f32 %v3787_v13, %v3788_v8  ;;  %v6416_v12 = vmax.f32 %v11140_v48, %v3782_v37  ;;  %v4781_v25 = vmax.f32 %v4779_v59, %v4780_v33  ;;  %v810_v59 = vpop.f32.mrf.mxu0 }
 0x357   :  { %v6702_v63 = vpack.c.bf16 %v6414_v9, %v6414_v9  ;;  %v4775_v26 = vrot.slane %v4774_v56, 1  ;;  %v4788_v29 = vmax.f32 %v4786_v3, %v4787_v18  ;;  %v4794_v35 = vrot.slane %v4793_v42, 2  ;;  %v990_v18 = vpop.f32.mrf.mxu2 }
 0x358   :  { %v6703_v61 = vpack.c.bf16 %v6415_v58, %v6415_v58  ;;  %v6417_v45 = vmax.f32 %v11141_v31, %v3789_v24  ;;  %v6704_v49 = vpack.c.bf16 %v6416_v12, %v6416_v12  ;;  %v4782_v11 = vrot.slane %v4781_v25, 1 }
 0x359   :  { %v7278_v7 = vunpack.c.l.b16 %v6702_v63  ;;  %v4776_v15 = vmax.f32 %v4774_v56, %v4775_v26  ;;  %v4789_v32 = vrot.slane %v4788_v29, 1  ;;  %v4795_v19 = vmax.f32 %v4793_v42, %v4794_v35  ;;  %v900_v56 = vpop.f32.mrf.mxu1 }
 0x35a   :  { %v7279_v16 = vunpack.c.l.b16 %v6703_v61  ;;  %v6705_v27 = vpack.c.bf16 %v6417_v45, %v6417_v45  ;;  %v7280_v55 = vunpack.c.l.b16 %v6704_v49  ;;  %v4783_v17 = vmax.f32 %v4781_v25, %v4782_v11 }
 0x35b   :  { %v1788_v2 = vrot.slane %v9709_v51, 2  ;;  %v4790_v43 = vmax.f32 %v4788_v29, %v4789_v32  ;;  %v4796_v44 = vrot.slane %v4795_v19, 1  ;;  %v6486_v21 = vmax.f32 %v11142_v39, %v4776_v15 }
 0x35c   :  { %v7560_v4 = vsel %vm7462_vm2, %v7279_v16, %v7278_v7  ;;  %v9747_v40 = vsel %vm7466_vm4, %v9712_v5, %v9716_v60  ;;  %v7281_v34 = vunpack.c.l.b16 %v6705_v27  ;;  %v6487_v38 = vmax.f32 %v11143_v6, %v4783_v17  ;;  %v11145_v60 = vld [vmem:[#allocation13_spill] sm:$0xff] }
 0x35d   :  { %v1789_v30 = vrot.slane %v9709_v51, 4  ;;  %v4797_v47 = vmax.f32 %v4795_v19, %v4796_v44  ;;  %v6488_v50 = vmax.f32 %v11144_v14, %v4790_v43  ;;  %v6774_v62 = vpack.c.bf16 %v6486_v21, %v6486_v21  ;;  %v11146_v14 = vld [vmem:[#allocation14_spill] sm:$0xff] }
 0x35e   :  { %v1790_v57 = vrot.slane %v9709_v51, 6  ;;  %v7561_v20 = vsel %vm7464_vm3, %v7280_v55, %v7560_v4  ;;  %v6775_v22 = vpack.c.bf16 %v6487_v38, %v6487_v38  ;;  %v5778_v41 = vsel %vm2277_vm1, %v9709_v51, -inf }
 0x35f   :  { %v5785_v5 = vsel %vm2277_vm1, %v1788_v2, -inf  ;;  %v6489_v28 = vmax.f32 %v11145_v60, %v4797_v47  ;;  %v6776_v54 = vpack.c.bf16 %v6488_v50, %v6488_v50  ;;  %v7350_v0 = vunpack.c.l.b16 %v6774_v62 }
 0x360   :  { %v5779_v13 = vrot.slane %v5778_v41, 4  ;;  %v7351_v52 = vunpack.c.l.b16 %v6775_v22  ;;  %v5786_v46 = vrot.slane %v5785_v5, 4  ;;  %v5792_v23 = vsel %vm2277_vm1, %v1789_v30, -inf  ;;  %v11147_v22 = vld [vmem:[#allocation15_spill] sm:$0xff] }
 0x361   :  { %v5799_v3 = vsel %vm2277_vm1, %v1790_v57, -inf  ;;  %v6777_v36 = vpack.c.bf16 %v6489_v28, %v6489_v28  ;;  %v7352_v37 = vunpack.c.l.b16 %v6776_v54  ;;  %v5793_v9 = vrot.slane %v5792_v23, 4  ;;  %v11148_v28 = vld [vmem:[#allocation16_spill] sm:$0xff] }
 0x362   :  { %v5780_v8 = vmax.f32 %v5778_v41, %v5779_v13  ;;  %v7623_v51 = vsel %vm7462_vm2, %v7351_v52, %v7350_v0  ;;  %v5787_v33 = vmax.f32 %v5785_v5, %v5786_v46  ;;  %v5800_v10 = vrot.slane %v5799_v3, 4 }
 0x363   :  { %v811_v58 = vadd.f32 %v9686_v1, %v810_v59  ;;  %v9763_v42 = vsel %vm7466_vm4, %v7281_v34, %v7561_v20  ;;  %v7353_v24 = vunpack.c.l.b16 %v6777_v36  ;;  %v5794_v12 = vmax.f32 %v5792_v23, %v5793_v9 }
 0x364   :  { %v5781_v48 = vrot.slane %v5780_v8, 2  ;;  %v7624_v63 = vsel %vm7464_vm3, %v7352_v37, %v7623_v51  ;;  %v5788_v25 = vrot.slane %v5787_v33, 2  ;;  %v5801_v61 = vmax.f32 %v5799_v3, %v5800_v10 }
 0x365   :  { %v1143_v26 = vmax.f32 %v811_v58, 0.0  ;;  %v5795_v35 = vrot.slane %v5794_v12, 2  ;;  %v901_v31 = vadd.f32 %v9686_v1, %v900_v56  ;;  %v9768_v45 = vadd.f32 %v9686_v1, %v990_v18 }
 0x366   :  { %v5782_v29 = vmax.f32 %v5780_v8, %v5781_v48  ;;  %v5789_v49 = vmax.f32 %v5787_v33, %v5788_v25  ;;  %v5802_v7 = vrot.slane %v5801_v61, 2  ;;  %v9779_v25 = vsel %vm7466_vm4, %v7353_v24, %v7624_v63 }
 0x367   :  { %v1467_v11 = vrot.slane %v1143_v26, 2  ;;  %v1468_v16 = vrot.slane %v1143_v26, 4  ;;  %v5796_v32 = vmax.f32 %v5794_v12, %v5795_v35  ;;  %v1469_v19 = vrot.slane %v1143_v26, 6 }
 0x368   :  { %v5783_v15 = vrot.slane %v5782_v29, 1  ;;  %v2782_v27 = vsel %vm2277_vm1, %v1143_v26, -inf  ;;  %v5790_v55 = vrot.slane %v5789_v49, 1  ;;  %v5803_v17 = vmax.f32 %v5801_v61, %v5802_v7 }
 0x369   :  { %v2783_v2 = vrot.slane %v2782_v27, 4  ;;  %v2789_v4 = vsel %vm2277_vm1, %v1467_v11, -inf  ;;  %v5797_v44 = vrot.slane %v5796_v32, 1  ;;  %v2796_v21 = vsel %vm2277_vm1, %v1468_v16, -inf }
 0x36a   :  { %v5784_v43 = vmax.f32 %v5782_v29, %v5783_v15  ;;  %v2790_v39 = vrot.slane %v2789_v4, 4  ;;  %v5791_v34 = vmax.f32 %v5789_v49, %v5790_v55  ;;  %v5804_v6 = vrot.slane %v5803_v17, 1 }
 0x36b   :  { %v2784_v38 = vmax.f32 %v2782_v27, %v2783_v2  ;;  %v2797_v30 = vrot.slane %v2796_v21, 4  ;;  %v5798_v47 = vmax.f32 %v5796_v32, %v5797_v44  ;;  %v2803_v57 = vsel %vm2277_vm1, %v1469_v19, -inf }
 0x36c   :  { %v6558_v50 = vmax.f32 %v11146_v14, %v5784_v43  ;;  %v2791_v62 = vmax.f32 %v2789_v4, %v2790_v39  ;;  %v5805_v20 = vmax.f32 %v5803_v17, %v5804_v6  ;;  %v6559_v41 = vmax.f32 %v11147_v22, %v5791_v34 }
 0x36d   :  { %v2785_v5 = vrot.slane %v2784_v38, 2  ;;  %v2798_v60 = vmax.f32 %v2796_v21, %v2797_v30  ;;  %v6560_v54 = vmax.f32 %v11148_v28, %v5798_v47  ;;  %v2804_v59 = vrot.slane %v2803_v57, 4 }
 0x36e   :  { %v6846_v0 = vpack.c.bf16 %v6558_v50, %v6558_v50  ;;  %v2792_v13 = vrot.slane %v2791_v62, 2  ;;  %v6561_v52 = vmax.f32 %v9692_v53, %v5805_v20  ;;  %v6847_v46 = vpack.c.bf16 %v6559_v41, %v6559_v41 }
 0x36f   :  { %v2786_v23 = vmax.f32 %v2784_v38, %v2785_v5  ;;  %v2799_v3 = vrot.slane %v2798_v60, 2  ;;  %v6848_v36 = vpack.c.bf16 %v6560_v54, %v6560_v54  ;;  %v2805_v9 = vmax.f32 %v2803_v57, %v2804_v59 }
 0x370   :  { %v7422_v37 = vunpack.c.l.b16 %v6846_v0  ;;  %v2793_v8 = vmax.f32 %v2791_v62, %v2792_v13  ;;  %v6849_v51 = vpack.c.bf16 %v6561_v52, %v6561_v52  ;;  %v7423_v33 = vunpack.c.l.b16 %v6847_v46 }
 0x371   :  { %v2787_v10 = vrot.slane %v2786_v23, 1  ;;  %v2800_v58 = vmax.f32 %v2798_v60, %v2799_v3  ;;  %v7424_v56 = vunpack.c.l.b16 %v6848_v36  ;;  %v2806_v48 = vrot.slane %v2805_v9, 2 }
 0x372   :  { %v2794_v18 = vrot.slane %v2793_v8, 1  ;;  %v1179_v12 = vmax.f32 %v901_v31, 0.0  ;;  %v7425_v61 = vunpack.c.l.b16 %v6849_v51  ;;  %v7686_v53 = vsel %vm7462_vm2, %v7423_v33, %v7422_v37 }
 0x373   :  { %v2801_v26 = vrot.slane %v2800_v58, 1  ;;  %v7687_v29 = vsel %vm7464_vm3, %v7424_v56, %v7686_v53  ;;  %v9783_v35 = vmax.f32 %v2786_v23, %v2787_v10  ;;  %v2807_v49 = vmax.f32 %v2805_v9, %v2806_v48  ;;  %v812_v56 = vpop.f32.mrf.mxu0  ;;  %v902_v53 = vpop.f32.mrf.mxu1 }
 0x374   :  { %v1575_v7 = vrot.slane %v1179_v12, 2  ;;  %v9786_v11 = vsel %vm7466_vm4, %v7425_v61, %v7687_v29  ;;  %v9788_v16 = vmax.f32 %v2793_v8, %v2794_v18  ;;  %v1576_v15 = vrot.slane %v1179_v12, 4 }
 0x375   :  { %v1577_v31 = vrot.slane %v1179_v12, 6  ;;  %v9790_v32 = vmax.f32 %v2800_v58, %v2801_v26  ;;  %v3790_v24 = vsel %vm2277_vm1, %v1179_v12, -inf  ;;  %v1215_v19 = vmax.f32 %v9768_v45, 0.0  ;;  %v1080_v58 = vpop.f32.mrf.mxu3  ;;  %v992_v26 = vpop.f32.mrf.mxu2 }
 0x376   :  { %v3797_v63 = vsel %vm2277_vm1, %v1575_v7, -inf  ;;  %v3791_v27 = vrot.slane %v3790_v24, 4  ;;  %v3804_v17 = vsel %vm2277_vm1, %v1576_v15, -inf  ;;  %v2808_v4 = vrot.slane %v2807_v49, 1 }
 0x377   :  { %v3798_v55 = vrot.slane %v3797_v63, 4  ;;  %v3811_v2 = vsel %vm2277_vm1, %v1577_v31, -inf  ;;  %v3805_v43 = vrot.slane %v3804_v17, 4  ;;  %v1683_v39 = vrot.slane %v1215_v19, 2 }
 0x378   :  { %v3812_v44 = vrot.slane %v3811_v2, 4  ;;  %v3792_v21 = vmax.f32 %v3790_v24, %v3791_v27  ;;  %v1684_v6 = vrot.slane %v1215_v19, 4  ;;  %v1685_v38 = vrot.slane %v1215_v19, 6 }
 0x379   :  { %v3799_v34 = vmax.f32 %v3797_v63, %v3798_v55  ;;  %v3806_v30 = vmax.f32 %v3804_v17, %v3805_v43  ;;  %v4798_v14 = vsel %vm2277_vm1, %v1215_v19, -inf  ;;  %v4805_v45 = vsel %vm2277_vm1, %v1683_v39, -inf }
 0x37a   :  { %v3813_v47 = vmax.f32 %v3811_v2, %v3812_v44  ;;  %v3793_v50 = vrot.slane %v3792_v21, 2  ;;  %v4799_v57 = vrot.slane %v4798_v14, 4  ;;  %v4806_v20 = vrot.slane %v4805_v45, 4 }
 0x37b   :  { %v3800_v62 = vrot.slane %v3799_v34, 2  ;;  %v3807_v22 = vrot.slane %v3806_v30, 2  ;;  %v4812_v5 = vsel %vm2277_vm1, %v1684_v6, -inf  ;;  %v4819_v60 = vsel %vm2277_vm1, %v1685_v38, -inf }
 0x37c   :  { %v3814_v41 = vrot.slane %v3813_v47, 2  ;;  %v3794_v28 = vmax.f32 %v3792_v21, %v3793_v50  ;;  %v4800_v0 = vmax.f32 %v4798_v14, %v4799_v57  ;;  %v4807_v13 = vmax.f32 %v4805_v45, %v4806_v20 }
 0x37d   :  { %v3801_v54 = vmax.f32 %v3799_v34, %v3800_v62  ;;  %v3808_v59 = vmax.f32 %v3806_v30, %v3807_v22  ;;  %v4813_v46 = vrot.slane %v4812_v5, 4  ;;  %v4820_v23 = vrot.slane %v4819_v60, 4 }
 0x37e   :  { %v3815_v52 = vmax.f32 %v3813_v47, %v3814_v41  ;;  %v3795_v3 = vrot.slane %v3794_v28, 1  ;;  %v4801_v37 = vrot.slane %v4800_v0, 2  ;;  %v4808_v8 = vrot.slane %v4807_v13, 2 }
 0x37f   :  { %v3802_v36 = vrot.slane %v3801_v54, 1  ;;  %v9801_v9 = vmax.f32 %v2807_v49, %v2808_v4  ;;  %v3809_v51 = vrot.slane %v3808_v59, 1  ;;  %v4814_v33 = vmax.f32 %v4812_v5, %v4813_v46 }
 0x380   :  { %v4821_v10 = vmax.f32 %v4819_v60, %v4820_v23  ;;  %v9803_v18 = vmax.f32 %v3794_v28, %v3795_v3  ;;  %v3816_v48 = vrot.slane %v3815_v52, 1  ;;  %v4802_v12 = vmax.f32 %v4800_v0, %v4801_v37 }
 0x381   :  { %v4809_v61 = vmax.f32 %v4807_v13, %v4808_v8  ;;  %v9805_v29 = vmax.f32 %v3801_v54, %v3802_v36  ;;  %v9807_v7 = vmax.f32 %v3808_v59, %v3809_v51  ;;  %v4815_v15 = vrot.slane %v4814_v33, 2 }
 0x382   :  { %v4822_v31 = vrot.slane %v4821_v10, 2  ;;  %v4803_v49 = vrot.slane %v4802_v12, 1  ;;  %v1081_v63 = vadd.f32 %v9686_v1, %v1080_v58  ;;  %v813_v19 = vadd.f32 %v9686_v1, %v812_v56 }
 0x383   :  { %v4810_v24 = vrot.slane %v4809_v61, 1  ;;  %v4816_v27 = vmax.f32 %v4814_v33, %v4815_v15  ;;  %v903_v17 = vadd.f32 %v9686_v1, %v902_v53  ;;  %v993_v2 = vadd.f32 %v9686_v1, %v992_v26 }
 0x384   :  { %v4823_v55 = vmax.f32 %v4821_v10, %v4822_v31  ;;  %v9813_v4 = vmax.f32 %v3815_v52, %v3816_v48  ;;  %v9815_v43 = vmax.f32 %v4802_v12, %v4803_v49  ;;  %v1251_v44 = vmax.f32 %v1081_v63, 0.0 }
 0x385   :  { %v1144_v39 = vmax.f32 %v813_v19, 0.0  ;;  %v9817_v21 = vmax.f32 %v4809_v61, %v4810_v24  ;;  %v4817_v34 = vrot.slane %v4816_v27, 1  ;;  %v9819_v38 = vmax.f32 %v903_v17, 0.0 }
 0x386   :  { %v4824_v6 = vrot.slane %v4823_v55, 1  ;;  %v1791_v30 = vrot.slane %v1251_v44, 2  ;;  %v1792_v47 = vrot.slane %v1251_v44, 4  ;;  %v1793_v14 = vrot.slane %v1251_v44, 6 }
 0x387   :  { %v5806_v45 = vsel %vm2277_vm1, %v1251_v44, -inf  ;;  %v9822_v50 = vmax.f32 %v4816_v27, %v4817_v34  ;;  %v1470_v57 = vrot.slane %v1144_v39, 2  ;;  %v9824_v20 = vmax.f32 %v993_v2, 0.0 }
 0x388   :  { %v5807_v62 = vrot.slane %v5806_v45, 4  ;;  %v5813_v22 = vsel %vm2277_vm1, %v1791_v30, -inf  ;;  %v5820_v41 = vsel %vm2277_vm1, %v1792_v47, -inf  ;;  %v5827_v5 = vsel %vm2277_vm1, %v1793_v14, -inf }
 0x389   :  { %v1471_v60 = vrot.slane %v1144_v39, 4  ;;  %v5814_v54 = vrot.slane %v5813_v22, 4  ;;  %v5821_v0 = vrot.slane %v5820_v41, 4  ;;  %v5828_v13 = vrot.slane %v5827_v5, 4 }
 0x38a   :  { %v5808_v28 = vmax.f32 %v5806_v45, %v5807_v62  ;;  %v1472_v59 = vrot.slane %v1144_v39, 6  ;;  %v2810_v52 = vsel %vm2277_vm1, %v1144_v39, -inf  ;;  %v2817_v46 = vsel %vm2277_vm1, %v1470_v57, -inf }
 0x38b   :  { %v2824_v23 = vsel %vm2277_vm1, %v1471_v60, -inf  ;;  %v5815_v36 = vmax.f32 %v5813_v22, %v5814_v54  ;;  %v5822_v37 = vmax.f32 %v5820_v41, %v5821_v0  ;;  %v5829_v8 = vmax.f32 %v5827_v5, %v5828_v13 }
 0x38c   :  { %v5809_v3 = vrot.slane %v5808_v28, 2  ;;  %v2811_v51 = vrot.slane %v2810_v52, 4  ;;  %v2818_v33 = vrot.slane %v2817_v46, 4  ;;  %v2825_v10 = vrot.slane %v2824_v23, 4 }
 0x38d   :  { %v2831_v58 = vsel %vm2277_vm1, %v1472_v59, -inf  ;;  %v5816_v48 = vrot.slane %v5815_v36, 2  ;;  %v5823_v12 = vrot.slane %v5822_v37, 2  ;;  %v5830_v61 = vrot.slane %v5829_v8, 2 }
 0x38e   :  { %v5810_v56 = vmax.f32 %v5808_v28, %v5809_v3  ;;  %v2812_v53 = vmax.f32 %v2810_v52, %v2811_v51  ;;  %v2819_v26 = vmax.f32 %v2817_v46, %v2818_v33  ;;  %v2826_v15 = vmax.f32 %v2824_v23, %v2825_v10 }
 0x38f   :  { %v2832_v31 = vrot.slane %v2831_v58, 4  ;;  %v5817_v24 = vmax.f32 %v5815_v36, %v5816_v48  ;;  %v5824_v63 = vmax.f32 %v5822_v37, %v5823_v12  ;;  %v5831_v19 = vmax.f32 %v5829_v8, %v5830_v61 }
 0x390   :  { %v5811_v49 = vrot.slane %v5810_v56, 1  ;;  %v2813_v27 = vrot.slane %v2812_v53, 2  ;;  %v2820_v17 = vrot.slane %v2819_v26, 2  ;;  %v2827_v2 = vrot.slane %v2826_v15, 2 }
 0x391   :  { %v2833_v44 = vmax.f32 %v2831_v58, %v2832_v31  ;;  %v9833_v39 = vmax.f32 %v4823_v55, %v4824_v6  ;;  %v5818_v34 = vrot.slane %v5817_v24, 1  ;;  %v5825_v30 = vrot.slane %v5824_v63, 1 }
 0x392   :  { %v5832_v47 = vrot.slane %v5831_v19, 1  ;;  %v2814_v14 = vmax.f32 %v2812_v53, %v2813_v27  ;;  %v2821_v45 = vmax.f32 %v2819_v26, %v2820_v17  ;;  %v2828_v62 = vmax.f32 %v2826_v15, %v2827_v2 }
 0x393   :  { %v2834_v57 = vrot.slane %v2833_v44, 2  ;;  %v9835_v22 = vmax.f32 %v5810_v56, %v5811_v49  ;;  %v9837_v41 = vmax.f32 %v5817_v24, %v5818_v34  ;;  %v9839_v5 = vmax.f32 %v5824_v63, %v5825_v30 }
 0x394   :  { %v1578_v60 = vrot.slane %v9819_v38, 2  ;;  %v2815_v28 = vrot.slane %v2814_v14, 1  ;;  %v2822_v54 = vrot.slane %v2821_v45, 1  ;;  %v2829_v0 = vrot.slane %v2828_v62, 1 }
 0x395   :  { %v2835_v55 = vmax.f32 %v2833_v44, %v2834_v57  ;;  %v1579_v6 = vrot.slane %v9819_v38, 4  ;;  %v1580_v13 = vrot.slane %v9819_v38, 6  ;;  %v3818_v59 = vsel %vm2277_vm1, %v9819_v38, -inf }
 0x396   :  { %v3825_v52 = vsel %vm2277_vm1, %v1578_v60, -inf  ;;  %v9847_v46 = vmax.f32 %v5831_v19, %v5832_v47  ;;  %v9849_v23 = vmax.f32 %v2814_v14, %v2815_v28  ;;  %v9851_v3 = vmax.f32 %v2821_v45, %v2822_v54 }
 0x397   :  { %v9853_v36 = vmax.f32 %v2828_v62, %v2829_v0  ;;  %v3819_v37 = vrot.slane %v3818_v59, 4  ;;  %v3826_v8 = vrot.slane %v3825_v52, 4  ;;  %v3832_v51 = vsel %vm2277_vm1, %v1579_v6, -inf }
 0x398   :  { %v3839_v33 = vsel %vm2277_vm1, %v1580_v13, -inf  ;;  %v2836_v10 = vrot.slane %v2835_v55, 1  ;;  %v3833_v58 = vrot.slane %v3832_v51, 4  ;;  %v1686_v38 = vrot.slane %v9824_v20, 2 }
 0x399   :  { %v3840_v56 = vrot.slane %v3839_v33, 4  ;;  %v3820_v48 = vmax.f32 %v3818_v59, %v3819_v37  ;;  %v3827_v12 = vmax.f32 %v3825_v52, %v3826_v8  ;;  %v1687_v61 = vrot.slane %v9824_v20, 4  ;;  %v1082_v8 = vpop.f32.mrf.mxu3 }
 0x39a   :  { %v1688_v53 = vrot.slane %v9824_v20, 6  ;;  %v3834_v26 = vmax.f32 %v3832_v51, %v3833_v58  ;;  %v4826_v31 = vsel %vm2277_vm1, %v9824_v20, -inf  ;;  %v4833_v49 = vsel %vm2277_vm1, %v1686_v38, -inf  ;;  %v815_v51 = vpop.f32.mrf.mxu0 }
 0x39b   :  { %v3841_v15 = vmax.f32 %v3839_v33, %v3840_v56  ;;  %v3821_v24 = vrot.slane %v3820_v48, 2  ;;  %v3828_v63 = vrot.slane %v3827_v12, 2  ;;  %v4827_v19 = vrot.slane %v4826_v31, 4 }
 0x39c   :  { %v4834_v27 = vrot.slane %v4833_v49, 4  ;;  %v3835_v17 = vrot.slane %v3834_v26, 2  ;;  %v4840_v44 = vsel %vm2277_vm1, %v1687_v61, -inf  ;;  %v4847_v34 = vsel %vm2277_vm1, %v1688_v53, -inf }
 0x39d   :  { %v3842_v2 = vrot.slane %v3841_v15, 2  ;;  %v3822_v30 = vmax.f32 %v3820_v48, %v3821_v24  ;;  %v3829_v47 = vmax.f32 %v3827_v12, %v3828_v63  ;;  %v4828_v14 = vmax.f32 %v4826_v31, %v4827_v19  ;;  %v905_v48 = vpop.f32.mrf.mxu1  ;;  %v995_v12 = vpop.f32.mrf.mxu2 }
 0x39e   :  { %v4835_v45 = vmax.f32 %v4833_v49, %v4834_v27  ;;  %v3836_v62 = vmax.f32 %v3834_v26, %v3835_v17  ;;  %v4841_v60 = vrot.slane %v4840_v44, 4  ;;  %v4848_v20 = vrot.slane %v4847_v34, 4 }
 0x39f   :  { %v3843_v57 = vmax.f32 %v3841_v15, %v3842_v2  ;;  %v3823_v28 = vrot.slane %v3822_v30, 1  ;;  %v3830_v54 = vrot.slane %v3829_v47, 1  ;;  %v4829_v0 = vrot.slane %v4828_v14, 2 }
 0x3a0   :  { %v4836_v6 = vrot.slane %v4835_v45, 2  ;;  %v9865_v13 = vmax.f32 %v2835_v55, %v2836_v10  ;;  %v3837_v59 = vrot.slane %v3836_v62, 1  ;;  %v4842_v52 = vmax.f32 %v4840_v44, %v4841_v60 }
 0x3a1   :  { %v4849_v37 = vmax.f32 %v4847_v34, %v4848_v20  ;;  %v9867_v33 = vmax.f32 %v3822_v30, %v3823_v28  ;;  %v3844_v58 = vrot.slane %v3843_v57, 1  ;;  %v4830_v56 = vmax.f32 %v4828_v14, %v4829_v0 }
 0x3a2   :  { %v4837_v38 = vmax.f32 %v4835_v45, %v4836_v6  ;;  %v9869_v61 = vmax.f32 %v3829_v47, %v3830_v54  ;;  %v9871_v53 = vmax.f32 %v3836_v62, %v3837_v59  ;;  %v4843_v26 = vrot.slane %v4842_v52, 2 }
 0x3a3   :  { %v4850_v15 = vrot.slane %v4849_v37, 2  ;;  %v4831_v55 = vrot.slane %v4830_v56, 1  ;;  %v1083_v31 = vadd.f32 %v9686_v1, %v1082_v8  ;;  %v816_v49 = vadd.f32 %v9686_v1, %v815_v51 }
 0x3a4   :  { %v4838_v10 = vrot.slane %v4837_v38, 1  ;;  %v4844_v24 = vmax.f32 %v4842_v52, %v4843_v26  ;;  %v906_v19 = vadd.f32 %v9686_v1, %v905_v48  ;;  %v996_v27 = vadd.f32 %v9686_v1, %v995_v12 }
 0x3a5   :  { %v4851_v63 = vmax.f32 %v4849_v37, %v4850_v15  ;;  %v9877_v17 = vmax.f32 %v3843_v57, %v3844_v58  ;;  %v9879_v2 = vmax.f32 %v4830_v56, %v4831_v55  ;;  %v1252_v44 = vmax.f32 %v1083_v31, 0.0 }
 0x3a6   :  { %v1145_v34 = vmax.f32 %v816_v49, 0.0  ;;  %v9881_v30 = vmax.f32 %v4837_v38, %v4838_v10  ;;  %v4845_v47 = vrot.slane %v4844_v24, 1  ;;  %v9883_v45 = vmax.f32 %v906_v19, 0.0 }
 0x3a7   :  { %11149 = vst [vmem:[#allocation17_spill] sm:$0xff] %v9877_v17  ;;  %v4852_v14 = vrot.slane %v4851_v63, 1  ;;  %v1794_v62 = vrot.slane %v1252_v44, 2  ;;  %v1795_v60 = vrot.slane %v1252_v44, 4  ;;  %v1796_v20 = vrot.slane %v1252_v44, 6 }
 0x3a8   :  { %11150 = vst [vmem:[#allocation18_spill] sm:$0xff] %v9879_v2  ;;  %v5834_v28 = vsel %vm2277_vm1, %v1252_v44, -inf  ;;  %v9886_v54 = vmax.f32 %v4844_v24, %v4845_v47  ;;  %v1473_v57 = vrot.slane %v1145_v34, 2  ;;  %v9888_v0 = vmax.f32 %v996_v27, 0.0 }
 0x3a9   :  { %11151 = vst [vmem:[#allocation19_spill] sm:$0xff] %v9881_v30  ;;  %v5835_v1 = vrot.slane %v5834_v28, 4  ;;  %v5841_v6 = vsel %vm2277_vm1, %v1794_v62, -inf  ;;  %v5848_v59 = vsel %vm2277_vm1, %v1795_v60, -inf  ;;  %v5855_v52 = vsel %vm2277_vm1, %v1796_v20, -inf }
 0x3aa   :  { %11152 = vst [vmem:[#allocation20_spill] sm:$0xff] %v9886_v54  ;;  %v1474_v37 = vrot.slane %v1145_v34, 4  ;;  %v5842_v51 = vrot.slane %v5841_v6, 4  ;;  %v5849_v58 = vrot.slane %v5848_v59, 4  ;;  %v5856_v56 = vrot.slane %v5855_v52, 4 }
 0x3ab   :  { %v5836_v8 = vmax.f32 %v5834_v28, %v5835_v1  ;;  %v1475_v38 = vrot.slane %v1145_v34, 6  ;;  %v2838_v48 = vsel %vm2277_vm1, %v1145_v34, -inf  ;;  %v2845_v12 = vsel %vm2277_vm1, %v1473_v57, -inf }
 0x3ac   :  { %v2852_v26 = vsel %vm2277_vm1, %v1474_v37, -inf  ;;  %v5843_v55 = vmax.f32 %v5841_v6, %v5842_v51  ;;  %v5850_v10 = vmax.f32 %v5848_v59, %v5849_v58  ;;  %v5857_v31 = vmax.f32 %v5855_v52, %v5856_v56 }
 0x3ad   :  { %v5837_v15 = vrot.slane %v5836_v8, 2  ;;  %v2839_v49 = vrot.slane %v2838_v48, 4  ;;  %v2846_v24 = vrot.slane %v2845_v12, 4  ;;  %v2853_v19 = vrot.slane %v2852_v26, 4 }
 0x3ae   :  { %v2859_v27 = vsel %vm2277_vm1, %v1475_v38, -inf  ;;  %v5844_v47 = vrot.slane %v5843_v55, 2  ;;  %v5851_v62 = vrot.slane %v5850_v10, 2  ;;  %v5858_v60 = vrot.slane %v5857_v31, 2 }
 0x3af   :  { %v5838_v44 = vmax.f32 %v5836_v8, %v5837_v15  ;;  %v2840_v20 = vmax.f32 %v2838_v48, %v2839_v49  ;;  %v2847_v28 = vmax.f32 %v2845_v12, %v2846_v24  ;;  %v2854_v34 = vmax.f32 %v2852_v26, %v2853_v19 }
 0x3b0   :  { %v2860_v1 = vrot.slane %v2859_v27, 4  ;;  %v5845_v54 = vmax.f32 %v5843_v55, %v5844_v47  ;;  %v5852_v37 = vmax.f32 %v5850_v10, %v5851_v62  ;;  %v5859_v30 = vmax.f32 %v5857_v31, %v5858_v60 }
 0x3b1   :  { %v5839_v57 = vrot.slane %v5838_v44, 1  ;;  %v2841_v6 = vrot.slane %v2840_v20, 2  ;;  %v2848_v59 = vrot.slane %v2847_v28, 2  ;;  %v2855_v52 = vrot.slane %v2854_v34, 2 }
 0x3b2   :  { %v2861_v51 = vmax.f32 %v2859_v27, %v2860_v1  ;;  %v9897_v58 = vmax.f32 %v4851_v63, %v4852_v14  ;;  %v5846_v56 = vrot.slane %v5845_v54, 1  ;;  %v5853_v38 = vrot.slane %v5852_v37, 1 }
 0x3b3   :  { %v5860_v8 = vrot.slane %v5859_v30, 1  ;;  %v2842_v15 = vmax.f32 %v2840_v20, %v2841_v6  ;;  %v2849_v2 = vmax.f32 %v2847_v28, %v2848_v59  ;;  %v2856_v17 = vmax.f32 %v2854_v34, %v2855_v52 }
 0x3b4   :  { %v2862_v48 = vrot.slane %v2861_v51, 2  ;;  %v9899_v12 = vmax.f32 %v5838_v44, %v5839_v57  ;;  %v9901_v26 = vmax.f32 %v5845_v54, %v5846_v56  ;;  %v9903_v55 = vmax.f32 %v5852_v37, %v5853_v38 }
 0x3b5   :  { %v1581_v10 = vrot.slane %v9883_v45, 2  ;;  %v2843_v31 = vrot.slane %v2842_v15, 1  ;;  %v2850_v49 = vrot.slane %v2849_v2, 1  ;;  %v2857_v24 = vrot.slane %v2856_v17, 1 }
 0x3b6   :  { %11153 = vst [vmem:[#allocation21_spill] sm:$0xff] %v9899_v12  ;;  %v2863_v63 = vmax.f32 %v2861_v51, %v2862_v48  ;;  %v1582_v14 = vrot.slane %v9883_v45, 4  ;;  %v1583_v19 = vrot.slane %v9883_v45, 6  ;;  %v3846_v27 = vsel %vm2277_vm1, %v9883_v45, -inf }
 0x3b7   :  { %11154 = vst [vmem:[#allocation2_spill] sm:$0xff] %v9901_v26  ;;  %v3853_v44 = vsel %vm2277_vm1, %v1581_v10, -inf  ;;  %v9911_v47 = vmax.f32 %v5859_v30, %v5860_v8  ;;  %v9913_v54 = vmax.f32 %v2842_v15, %v2843_v31  ;;  %v9915_v62 = vmax.f32 %v2849_v2, %v2850_v49  ;;  %v817_v26 = vpop.f32.mrf.mxu0 }
 0x3b8   :  { %11155 = vst [vmem:[#allocation3_spill] sm:$0xff] %v9903_v55  ;;  %v9917_v60 = vmax.f32 %v2856_v17, %v2857_v24  ;;  %v3847_v20 = vrot.slane %v3846_v27, 4  ;;  %v3854_v28 = vrot.slane %v3853_v44, 4  ;;  %v3860_v34 = vsel %vm2277_vm1, %v1582_v14, -inf }
 0x3b9   :  { %11156 = vst [vmem:[#allocation4_spill] sm:$0xff] %v9911_v47  ;;  %v3867_v1 = vsel %vm2277_vm1, %v1583_v19, -inf  ;;  %v2864_v57 = vrot.slane %v2863_v63, 1  ;;  %v3861_v37 = vrot.slane %v3860_v34, 4  ;;  %v1689_v45 = vrot.slane %v9888_v0, 2 }
 0x3ba   :  { %11157 = vst [vmem:[#allocation5_spill] sm:$0xff] %v9913_v54  ;;  %v3868_v6 = vrot.slane %v3867_v1, 4  ;;  %v3848_v59 = vmax.f32 %v3846_v27, %v3847_v20  ;;  %v3855_v30 = vmax.f32 %v3853_v44, %v3854_v28  ;;  %v1690_v52 = vrot.slane %v9888_v0, 4 }
 0x3bb   :  { %11158 = vst [vmem:[#allocation6_spill] sm:$0xff] %v9915_v62  ;;  %v1691_v2 = vrot.slane %v9888_v0, 6  ;;  %v3862_v51 = vmax.f32 %v3860_v34, %v3861_v37  ;;  %v4854_v56 = vsel %vm2277_vm1, %v9888_v0, -inf  ;;  %v4861_v38 = vsel %vm2277_vm1, %v1689_v45, -inf }
 0x3bc   :  { %11159 = vst [vmem:[#allocation7_spill] sm:$0xff] %v9917_v60  ;;  %v3869_v17 = vmax.f32 %v3867_v1, %v3868_v6  ;;  %v3849_v8 = vrot.slane %v3848_v59, 2  ;;  %v3856_v15 = vrot.slane %v3855_v30, 2  ;;  %v4855_v48 = vrot.slane %v4854_v56, 4 }
 0x3bd   :  { %v4862_v10 = vrot.slane %v4861_v38, 4  ;;  %v3863_v31 = vrot.slane %v3862_v51, 2  ;;  %v4868_v24 = vsel %vm2277_vm1, %v1690_v52, -inf  ;;  %v4875_v14 = vsel %vm2277_vm1, %v1691_v2, -inf  ;;  %v1085_v52 = vpop.f32.mrf.mxu3 }
 0x3be   :  { %v3870_v49 = vrot.slane %v3869_v17, 2  ;;  %v3850_v19 = vmax.f32 %v3848_v59, %v3849_v8  ;;  %v3857_v27 = vmax.f32 %v3855_v30, %v3856_v15  ;;  %v4856_v44 = vmax.f32 %v4854_v56, %v4855_v48 }
 0x3bf   :  { %v4863_v20 = vmax.f32 %v4861_v38, %v4862_v10  ;;  %v3864_v28 = vmax.f32 %v3862_v51, %v3863_v31  ;;  %v4869_v1 = vrot.slane %v4868_v24, 4  ;;  %v4876_v0 = vrot.slane %v4875_v14, 4  ;;  %v907_v51 = vpop.f32.mrf.mxu1  ;;  %v9940_v10 = vld [vmem:[%s11046_s2] ss:$0 sm:$0xff] }
 0x3c0   :  { %v3871_v34 = vmax.f32 %v3869_v17, %v3870_v49  ;;  %v3851_v37 = vrot.slane %v3850_v19, 1  ;;  %v3858_v6 = vrot.slane %v3857_v27, 1  ;;  %v4857_v45 = vrot.slane %v4856_v44, 2  ;;  %v997_v17 = vpop.f32.mrf.mxu2 }
 0x3c1   :  { %v4864_v60 = vrot.slane %v4863_v20, 2  ;;  %v9929_v62 = vmax.f32 %v2863_v63, %v2864_v57  ;;  %v3865_v54 = vrot.slane %v3864_v28, 1  ;;  %v4870_v47 = vmax.f32 %v4868_v24, %v4869_v1 }
 0x3c2   :  { %v4877_v55 = vmax.f32 %v4875_v14, %v4876_v0  ;;  %v9931_v2 = vmax.f32 %v3850_v19, %v3851_v37  ;;  %v3872_v59 = vrot.slane %v3871_v34, 1  ;;  %v4858_v30 = vmax.f32 %v4856_v44, %v4857_v45 }
 0x3c3   :  { %11160 = vst [vmem:[#allocation8_spill] sm:$0xff] %v9929_v62  ;;  %v4865_v56 = vmax.f32 %v4863_v20, %v4864_v60  ;;  %v9933_v38 = vmax.f32 %v3857_v27, %v3858_v6  ;;  %v9935_v8 = vmax.f32 %v3864_v28, %v3865_v54  ;;  %v4871_v15 = vrot.slane %v4870_v47, 2 }
 0x3c4   :  { %11161 = vst [vmem:[#allocation9_spill] sm:$0xff] %v9931_v2  ;;  %v4878_v48 = vrot.slane %v4877_v55, 2  ;;  %v4859_v63 = vrot.slane %v4858_v30, 1  ;;  %v1086_v31 = vadd.f32 %v9940_v10, %v1085_v52  ;;  %v818_v49 = vadd.f32 %v9940_v10, %v817_v26 }
 0x3c5   :  { %11162 = vst [vmem:[#allocation10_spill] sm:$0xff] %v9933_v38  ;;  %v4866_v57 = vrot.slane %v4865_v56, 1  ;;  %v4872_v60 = vmax.f32 %v4870_v47, %v4871_v15  ;;  %v908_v14 = vadd.f32 %v9940_v10, %v907_v51  ;;  %v998_v54 = vadd.f32 %v9940_v10, %v997_v17 }
 0x3c6   :  { %11163 = vst [vmem:[#allocation11_spill] sm:$0xff] %v9935_v8  ;;  %v4879_v24 = vmax.f32 %v4877_v55, %v4878_v48  ;;  %v9946_v19 = vmax.f32 %v3871_v34, %v3872_v59  ;;  %v9948_v27 = vmax.f32 %v4858_v30, %v4859_v63  ;;  %v1253_v44 = vmax.f32 %v1086_v31, 0.0 }
 0x3c7   :  { %v1146_v20 = vmax.f32 %v818_v49, 0.0  ;;  %v9950_v28 = vmax.f32 %v4865_v56, %v4866_v57  ;;  %v4873_v1 = vrot.slane %v4872_v60, 1  ;;  %v9952_v37 = vmax.f32 %v908_v14, 0.0 }
 0x3c8   :  { %11164 = vst [vmem:[#allocation12_spill] sm:$0xff] %v9946_v19  ;;  %v4880_v0 = vrot.slane %v4879_v24, 1  ;;  %v1797_v6 = vrot.slane %v1253_v44, 2  ;;  %v1798_v26 = vrot.slane %v1253_v44, 4  ;;  %v1799_v47 = vrot.slane %v1253_v44, 6 }
 0x3c9   :  { %11165 = vst [vmem:[#allocation13_spill] sm:$0xff] %v9948_v27  ;;  %v5862_v55 = vsel %vm2277_vm1, %v1253_v44, -inf  ;;  %v9955_v45 = vmax.f32 %v4872_v60, %v4873_v1  ;;  %v1476_v34 = vrot.slane %v1146_v20, 2  ;;  %v9957_v59 = vmax.f32 %v998_v54, 0.0 }
 0x3ca   :  { %11166 = vst [vmem:[#allocation14_spill] sm:$0xff] %v9950_v28  ;;  %v5863_v52 = vrot.slane %v5862_v55, 4  ;;  %v5869_v30 = vsel %vm2277_vm1, %v1797_v6, -inf  ;;  %v5876_v56 = vsel %vm2277_vm1, %v1798_v26, -inf  ;;  %v5883_v51 = vsel %vm2277_vm1, %v1799_v47, -inf }
 0x3cb   :  { %11167 = vst [vmem:[#allocation15_spill] sm:$0xff] %v9955_v45  ;;  %v1477_v17 = vrot.slane %v1146_v20, 4  ;;  %v5870_v48 = vrot.slane %v5869_v30, 4  ;;  %v5877_v63 = vrot.slane %v5876_v56, 4  ;;  %v5884_v57 = vrot.slane %v5883_v51, 4 }
 0x3cc   :  { %v5864_v15 = vmax.f32 %v5862_v55, %v5863_v52  ;;  %v1478_v31 = vrot.slane %v1146_v20, 6  ;;  %v2866_v49 = vsel %vm2277_vm1, %v1146_v20, -inf  ;;  %v2873_v60 = vsel %vm2277_vm1, %v1476_v34, -inf }
 0x3cd   :  { %v2880_v14 = vsel %vm2277_vm1, %v1477_v17, -inf  ;;  %v5871_v44 = vmax.f32 %v5869_v30, %v5870_v48  ;;  %v5878_v1 = vmax.f32 %v5876_v56, %v5877_v63  ;;  %v5885_v6 = vmax.f32 %v5883_v51, %v5884_v57 }
 0x3ce   :  { %v5865_v54 = vrot.slane %v5864_v15, 2  ;;  %v2867_v45 = vrot.slane %v2866_v49, 4  ;;  %v2874_v26 = vrot.slane %v2873_v60, 4  ;;  %v2881_v28 = vrot.slane %v2880_v14, 4 }
 0x3cf   :  { %v2887_v47 = vsel %vm2277_vm1, %v1478_v31, -inf  ;;  %v5872_v52 = vrot.slane %v5871_v44, 2  ;;  %v5879_v27 = vrot.slane %v5878_v1, 2  ;;  %v5886_v19 = vrot.slane %v5885_v6, 2 }
 0x3d0   :  { %v5866_v55 = vmax.f32 %v5864_v15, %v5865_v54  ;;  %v2868_v8 = vmax.f32 %v2866_v49, %v2867_v45  ;;  %v2875_v38 = vmax.f32 %v2873_v60, %v2874_v26  ;;  %v2882_v20 = vmax.f32 %v2880_v14, %v2881_v28 }
 0x3d1   :  { %v2888_v2 = vrot.slane %v2887_v47, 4  ;;  %v5873_v62 = vmax.f32 %v5871_v44, %v5872_v52  ;;  %v5880_v17 = vmax.f32 %v5878_v1, %v5879_v27  ;;  %v9966_v12 = vmax.f32 %v5885_v6, %v5886_v19 }
 0x3d2   :  { %v5867_v34 = vrot.slane %v5866_v55, 1  ;;  %v2869_v30 = vrot.slane %v2868_v8, 2  ;;  %v2876_v56 = vrot.slane %v2875_v38, 2  ;;  %v2883_v51 = vrot.slane %v2882_v20, 2 }
 0x3d3   :  { %v2889_v48 = vmax.f32 %v2887_v47, %v2888_v2  ;;  %v9968_v63 = vmax.f32 %v4879_v24, %v4880_v0  ;;  %v5874_v15 = vrot.slane %v5873_v62, 1  ;;  %v5881_v31 = vrot.slane %v5880_v17, 1 }
 0x3d4   :  { %v9970_v57 = vmax.f32 %v5866_v55, %v5867_v34  ;;  %v2870_v54 = vmax.f32 %v2868_v8, %v2869_v30  ;;  %v2877_v45 = vmax.f32 %v2875_v38, %v2876_v56  ;;  %v2884_v49 = vmax.f32 %v2882_v20, %v2883_v51 }
 0x3d5   :  { %v2890_v28 = vrot.slane %v2889_v48, 2  ;;  %v9972_v60 = vmax.f32 %v5873_v62, %v5874_v15  ;;  %v9974_v14 = vmax.f32 %v5880_v17, %v5881_v31  ;;  %v5888_v19 = vrot.slane %v9966_v12, 1 }
 0x3d6   :  { %v1584_v27 = vrot.slane %v9952_v37, 2  ;;  %v2871_v44 = vrot.slane %v2870_v54, 1  ;;  %v2878_v2 = vrot.slane %v2877_v45, 1  ;;  %v2885_v24 = vrot.slane %v2884_v49, 1 }
 0x3d7   :  { %v2891_v0 = vmax.f32 %v2889_v48, %v2890_v28  ;;  %v1585_v1 = vrot.slane %v9952_v37, 4  ;;  %v1586_v6 = vrot.slane %v9952_v37, 6  ;;  %v3874_v38 = vsel %vm2277_vm1, %v9952_v37, -inf }
 0x3d8   :  { %v3881_v62 = vsel %vm2277_vm1, %v1584_v27, -inf  ;;  %v2872_v8 = vmax.f32 %v2870_v54, %v2871_v44  ;;  %v2879_v26 = vmax.f32 %v2877_v45, %v2878_v2  ;;  %v2886_v47 = vmax.f32 %v2884_v49, %v2885_v24 }
 0x3d9   :  { %v2892_v55 = vrot.slane %v2891_v0, 1  ;;  %v3875_v52 = vrot.slane %v3874_v38, 4  ;;  %v3882_v20 = vrot.slane %v3881_v62, 4  ;;  %v3888_v34 = vsel %vm2277_vm1, %v1585_v1, -inf }
 0x3da   :  { %v3895_v17 = vsel %vm2277_vm1, %v1586_v6, -inf  ;;  %v6346_v56 = vmax.f32 %v9783_v35, %v2872_v8  ;;  %v6347_v51 = vmax.f32 %v9788_v16, %v2879_v26  ;;  %v6348_v48 = vmax.f32 %v9790_v32, %v2886_v47 }
 0x3db   :  { %v2893_v30 = vmax.f32 %v2891_v0, %v2892_v55  ;;  %v3876_v37 = vmax.f32 %v3874_v38, %v3875_v52  ;;  %v3883_v15 = vmax.f32 %v3881_v62, %v3882_v20  ;;  %v3889_v31 = vrot.slane %v3888_v34, 4 }
 0x3dc   :  { %v3896_v54 = vrot.slane %v3895_v17, 4  ;;  %v6634_v49 = vpack.c.bf16 %v6346_v56, %v6346_v56  ;;  %v6635_v28 = vpack.c.bf16 %v6347_v51, %v6347_v51  ;;  %v6636_v27 = vpack.c.bf16 %v6348_v48, %v6348_v48 }
 0x3dd   :  { %v6349_v45 = vmax.f32 %v9801_v9, %v2893_v30  ;;  %v3877_v44 = vrot.slane %v3876_v37, 2  ;;  %v3884_v2 = vrot.slane %v3883_v15, 2  ;;  %v3890_v24 = vmax.f32 %v3888_v34, %v3889_v31 }
 0x3de   :  { %v3897_v1 = vmax.f32 %v3895_v17, %v3896_v54  ;;  %v7210_v6 = vunpack.c.l.b16 %v6634_v49  ;;  %v7211_v35 = vunpack.c.l.b16 %v6635_v28  ;;  %v7212_v8 = vunpack.c.l.b16 %v6636_v27 }
 0x3df   :  { %v6637_v0 = vpack.c.bf16 %v6349_v45, %v6349_v45  ;;  %v3878_v16 = vmax.f32 %v3876_v37, %v3877_v44  ;;  %v3885_v26 = vmax.f32 %v3883_v15, %v3884_v2  ;;  %v3891_v32 = vrot.slane %v3890_v24, 2 }
 0x3e0   :  { %v3898_v38 = vrot.slane %v3897_v1, 2  ;;  %v7500_v47 = vsel %vm7468_vm5, %v7210_v6, %v9747_v40  ;;  %v1692_v9 = vrot.slane %v9957_v59, 2  ;;  %v1693_v55 = vrot.slane %v9957_v59, 4 }
 0x3e1   :  { %v7213_v62 = vunpack.c.l.b16 %v6637_v0  ;;  %v7501_v52 = vsel %vm7470_vm6, %v7211_v35, %v7500_v47  ;;  %v3879_v20 = vrot.slane %v3878_v16, 1  ;;  %v3886_v34 = vrot.slane %v3885_v26, 1 }
 0x3e2   :  { %v3892_v17 = vmax.f32 %v3890_v24, %v3891_v32  ;;  %v7502_v30 = vsel %vm7472_vm7, %v7212_v8, %v7501_v52  ;;  %v3899_v56 = vmax.f32 %v3897_v1, %v3898_v38  ;;  %v1694_v51 = vrot.slane %v9957_v59, 6 }
 0x3e3   :  { %v4882_v48 = vsel %vm2277_vm1, %v9957_v59, -inf  ;;  %v7503_v37 = vsel %vm7474_vm8, %v7213_v62, %v7502_v30  ;;  %v3880_v40 = vmax.f32 %v3878_v16, %v3879_v20  ;;  %v3887_v15 = vmax.f32 %v3885_v26, %v3886_v34  ;;  %v1087_v62 = vpop.f32.mrf.mxu3 }
 0x3e4   :  { %v3893_v31 = vrot.slane %v3892_v17, 1  ;;  %v7725_v54 = vpack.c.b16 %v7503_v37, %v7503_v37  ;;  %v3900_v45 = vrot.slane %v3899_v56, 1  ;;  %v4883_v49 = vrot.slane %v4882_v48, 4 }
 0x3e5   :  { %v4889_v28 = vsel %vm2277_vm1, %v1692_v9, -inf  ;;  %v6418_v44 = vmax.f32 %v9803_v18, %v3880_v40  ;;  %v6419_v2 = vmax.f32 %v9805_v29, %v3887_v15  ;;  %v4896_v0 = vsel %vm2277_vm1, %v1693_v55, -inf }
 0x3e6   :  { %v3894_v27 = vmax.f32 %v3892_v17, %v3893_v31  ;;  %v4890_v24 = vrot.slane %v4889_v28, 4  ;;  %7797 = vst [vmem:[%s11047_s3 + $0x10] sm:$0xf] %v7725_v54  ;;  %v3901_v59 = vmax.f32 %v3899_v56, %v3900_v45  ;;  %v4884_v1 = vmax.f32 %v4882_v48, %v4883_v49 }
 0x3e7   :  { %v4903_v6 = vsel %vm2277_vm1, %v1694_v51, -inf  ;;  %v6706_v8 = vpack.c.bf16 %v6418_v44, %v6418_v44  ;;  %v6707_v16 = vpack.c.bf16 %v6419_v2, %v6419_v2  ;;  %v4897_v29 = vrot.slane %v4896_v0, 4 }
 0x3e8   :  { %v6420_v35 = vmax.f32 %v9807_v7, %v3894_v27  ;;  %v4891_v26 = vmax.f32 %v4889_v28, %v4890_v24  ;;  %v6421_v18 = vmax.f32 %v9813_v4, %v3901_v59  ;;  %v4885_v32 = vrot.slane %v4884_v1, 2  ;;  %v820_v4 = vpop.f32.mrf.mxu0 }
 0x3e9   :  { %v4904_v38 = vrot.slane %v4903_v6, 4  ;;  %v7282_v9 = vunpack.c.l.b16 %v6706_v8  ;;  %v7283_v52 = vunpack.c.l.b16 %v6707_v16  ;;  %v4898_v55 = vmax.f32 %v4896_v0, %v4897_v29 }
 0x3ea   :  { %v6708_v47 = vpack.c.bf16 %v6420_v35, %v6420_v35  ;;  %v4892_v20 = vrot.slane %v4891_v26, 2  ;;  %v6709_v34 = vpack.c.bf16 %v6421_v18, %v6421_v18  ;;  %v4886_v17 = vmax.f32 %v4884_v1, %v4885_v32 }
 0x3eb   :  { %v4905_v30 = vmax.f32 %v4903_v6, %v4904_v38  ;;  %v7563_v7 = vsel %vm7468_vm5, %v7282_v9, %v9763_v42  ;;  %v1088_v48 = vadd.f32 %v9940_v10, %v1087_v62  ;;  %v4899_v31 = vrot.slane %v4898_v55, 2 }
 0x3ec   :  { %v7284_v56 = vunpack.c.l.b16 %v6708_v47  ;;  %v4893_v51 = vmax.f32 %v4891_v26, %v4892_v20  ;;  %v7285_v37 = vunpack.c.l.b16 %v6709_v34  ;;  %v7564_v40 = vsel %vm7470_vm6, %v7283_v52, %v7563_v7 }
 0x3ed   :  { %v4887_v15 = vrot.slane %v4886_v17, 1  ;;  %v4906_v49 = vrot.slane %v4905_v30, 2  ;;  %v1254_v28 = vmax.f32 %v1088_v48, 0.0  ;;  %v4900_v2 = vmax.f32 %v4898_v55, %v4899_v31  ;;  %v910_v31 = vpop.f32.mrf.mxu1 }
 0x3ee   :  { %v7565_v54 = vsel %vm7472_vm7, %v7284_v56, %v7564_v40  ;;  %v4894_v45 = vrot.slane %v4893_v51, 1  ;;  %v821_v42 = vadd.f32 %v9940_v10, %v820_v4 }
 0x3ef   :  { %v7566_v27 = vsel %vm7474_vm8, %v7285_v37, %v7565_v54  ;;  %v4888_v44 = vmax.f32 %v4886_v17, %v4887_v15  ;;  %v4907_v1 = vmax.f32 %v4905_v30, %v4906_v49  ;;  %v1800_v0 = vrot.slane %v1254_v28, 2 }
 0x3f0   :  { %v7734_v24 = vpack.c.b16 %v7566_v27, %v7566_v27  ;;  %v4895_v59 = vmax.f32 %v4893_v51, %v4894_v45  ;;  %v4901_v6 = vrot.slane %v4900_v2, 1  ;;  %v1801_v8 = vrot.slane %v1254_v28, 4 }
 0x3f1   :  { %v6490_v35 = vmax.f32 %v9815_v43, %v4888_v44  ;;  %v1802_v16 = vrot.slane %v1254_v28, 6  ;;  %v4908_v26 = vrot.slane %v4907_v1, 1  ;;  %v5890_v32 = vsel %vm2277_vm1, %v1254_v28, -inf }
 0x3f2   :  { %7806 = vst [vmem:[%s11047_s3 + $0x34] sm:$0xf] %v7734_v24  ;;  %v6491_v18 = vmax.f32 %v9817_v21, %v4895_v59  ;;  %v5897_v29 = vsel %vm2277_vm1, %v1800_v0, -inf  ;;  %v4902_v38 = vmax.f32 %v4900_v2, %v4901_v6  ;;  %v5891_v47 = vrot.slane %v5890_v32, 4 }
 0x3f3   :  { %v6778_v62 = vpack.c.bf16 %v6490_v35, %v6490_v35  ;;  %v5898_v9 = vrot.slane %v5897_v29, 4  ;;  %v4909_v52 = vmax.f32 %v4907_v1, %v4908_v26  ;;  %v5904_v43 = vsel %vm2277_vm1, %v1801_v8, -inf }
 0x3f4   :  { %v6779_v20 = vpack.c.bf16 %v6491_v18, %v6491_v18  ;;  %v5911_v34 = vsel %vm2277_vm1, %v1802_v16, -inf  ;;  %v6492_v17 = vmax.f32 %v9822_v50, %v4902_v38  ;;  %v5892_v30 = vmax.f32 %v5890_v32, %v5891_v47 }
 0x3f5   :  { %v7354_v55 = vunpack.c.l.b16 %v6778_v62  ;;  %v5899_v56 = vmax.f32 %v5897_v29, %v5898_v9  ;;  %v6493_v21 = vmax.f32 %v9833_v39, %v4909_v52  ;;  %v5905_v51 = vrot.slane %v5904_v43, 4 }
 0x3f6   :  { %v7355_v7 = vunpack.c.l.b16 %v6779_v20  ;;  %v5912_v48 = vrot.slane %v5911_v34, 4  ;;  %v6780_v4 = vpack.c.bf16 %v6492_v17, %v6492_v17  ;;  %v5893_v40 = vrot.slane %v5892_v30, 2 }
 0x3f7   :  { %v7626_v37 = vsel %vm7468_vm5, %v7354_v55, %v9779_v25  ;;  %v5900_v15 = vrot.slane %v5899_v56, 2  ;;  %v6781_v54 = vpack.c.bf16 %v6493_v21, %v6493_v21  ;;  %v5906_v49 = vmax.f32 %v5904_v43, %v5905_v51 }
 0x3f8   :  { %v7627_v45 = vsel %vm7470_vm6, %v7355_v7, %v7626_v37  ;;  %v5913_v50 = vmax.f32 %v5911_v34, %v5912_v48  ;;  %v7356_v28 = vunpack.c.l.b16 %v6780_v4  ;;  %v5894_v27 = vmax.f32 %v5892_v30, %v5893_v40 }
 0x3f9   :  { %v5901_v44 = vmax.f32 %v5899_v56, %v5900_v15  ;;  %v1147_v2 = vmax.f32 %v821_v42, 0.0  ;;  %v7357_v39 = vunpack.c.l.b16 %v6781_v54  ;;  %v5907_v24 = vrot.slane %v5906_v49, 2 }
 0x3fa   :  { %v5914_v59 = vrot.slane %v5913_v50, 2  ;;  %v911_v1 = vadd.f32 %v9940_v10, %v910_v31  ;;  %v7628_v0 = vsel %vm7472_vm7, %v7356_v28, %v7627_v45  ;;  %v5895_v25 = vrot.slane %v5894_v27, 1 }
 0x3fb   :  { %v5902_v6 = vrot.slane %v5901_v44, 1  ;;  %v1479_v35 = vrot.slane %v1147_v2, 2  ;;  %v7629_v8 = vsel %vm7474_vm8, %v7357_v39, %v7628_v0  ;;  %v5908_v16 = vmax.f32 %v5906_v49, %v5907_v24 }
 0x3fc   :  { %v5915_v26 = vmax.f32 %v5913_v50, %v5914_v59  ;;  %v1480_v18 = vrot.slane %v1147_v2, 4  ;;  %v7743_v32 = vpack.c.b16 %v7629_v8, %v7629_v8  ;;  %v5896_v29 = vmax.f32 %v5894_v27, %v5895_v25 }
 0x3fd   :  { %v5903_v38 = vmax.f32 %v5901_v44, %v5902_v6  ;;  %v1481_v62 = vrot.slane %v1147_v2, 6  ;;  %v5909_v42 = vrot.slane %v5908_v16, 1  ;;  %v2894_v9 = vsel %vm2277_vm1, %v1147_v2, -inf }
 0x3fe   :  { %v5916_v47 = vrot.slane %v5915_v26, 1  ;;  %v2901_v52 = vsel %vm2277_vm1, %v1479_v35, -inf  ;;  %7815 = vst [vmem:[%s11047_s3 + $0x58] sm:$0xf] %v7743_v32  ;;  %v6562_v20 = vmax.f32 %v9835_v22, %v5896_v29  ;;  %v2895_v34 = vrot.slane %v2894_v9, 4 }
 0x3ff   :  { %v6563_v43 = vmax.f32 %v9837_v41, %v5903_v38  ;;  %v2902_v17 = vrot.slane %v2901_v52, 4  ;;  %v5910_v55 = vmax.f32 %v5908_v16, %v5909_v42  ;;  %v2908_v56 = vsel %vm2277_vm1, %v1480_v18, -inf }
 0x400   :  { %v5917_v30 = vmax.f32 %v5915_v26, %v5916_v47  ;;  %v2915_v21 = vsel %vm2277_vm1, %v1481_v62, -inf  ;;  %v6850_v7 = vpack.c.bf16 %v6562_v20, %v6562_v20  ;;  %v2896_v48 = vmax.f32 %v2894_v9, %v2895_v34 }
 0x401   :  { %v6851_v51 = vpack.c.bf16 %v6563_v43, %v6563_v43  ;;  %v2903_v4 = vmax.f32 %v2901_v52, %v2902_v17  ;;  %v6564_v37 = vmax.f32 %v9839_v5, %v5910_v55  ;;  %v2909_v15 = vrot.slane %v2908_v56, 4 }
 0x402   :  { %v6565_v40 = vmax.f32 %v9847_v46, %v5917_v30  ;;  %v2916_v22 = vrot.slane %v2915_v21, 4  ;;  %v7426_v31 = vunpack.c.l.b16 %v6850_v7  ;;  %v2897_v54 = vrot.slane %v2896_v48, 2 }
 0x403   :  { %v7427_v41 = vunpack.c.l.b16 %v6851_v51  ;;  %v2904_v45 = vrot.slane %v2903_v4, 2  ;;  %v6852_v49 = vpack.c.bf16 %v6564_v37, %v6564_v37  ;;  %v2910_v28 = vmax.f32 %v2908_v56, %v2909_v15 }
 0x404   :  { %v6853_v50 = vpack.c.bf16 %v6565_v40, %v6565_v40  ;;  %v2917_v27 = vmax.f32 %v2915_v21, %v2916_v22  ;;  %v7689_v44 = vsel %vm7468_vm5, %v7426_v31, %v9786_v11  ;;  %v2898_v2 = vmax.f32 %v2896_v48, %v2897_v54  ;;  %v1000_v40 = vpop.f32.mrf.mxu2 }
 0x405   :  { %v2905_v39 = vmax.f32 %v2903_v4, %v2904_v45  ;;  %v1183_v24 = vmax.f32 %v911_v1, 0.0  ;;  %v7428_v59 = vunpack.c.l.b16 %v6852_v49  ;;  %v7690_v46 = vsel %vm7470_vm6, %v7427_v41, %v7689_v44 }
 0x406   :  { %v7429_v5 = vunpack.c.l.b16 %v6853_v50  ;;  %v2911_v0 = vrot.slane %v2910_v28, 2  ;;  %v2899_v25 = vrot.slane %v2898_v2, 1  ;;  %v2918_v35 = vrot.slane %v2917_v27, 2 }
 0x407   :  { %v2906_v6 = vrot.slane %v2905_v39, 1  ;;  %v1587_v8 = vrot.slane %v1183_v24, 2  ;;  %v7691_v16 = vsel %vm7472_vm7, %v7428_v59, %v7690_v46  ;;  %v1588_v18 = vrot.slane %v1183_v24, 4 }
 0x408   :  { %v2912_v26 = vmax.f32 %v2910_v28, %v2911_v0  ;;  %v1589_v32 = vrot.slane %v1183_v24, 6  ;;  %v7692_v29 = vsel %vm7474_vm8, %v7429_v5, %v7691_v16  ;;  %v2900_v11 = vmax.f32 %v2898_v2, %v2899_v25 }
 0x409   :  { %v2907_v38 = vmax.f32 %v2905_v39, %v2906_v6  ;;  %v2919_v62 = vmax.f32 %v2917_v27, %v2918_v35  ;;  %v7752_v1 = vpack.c.b16 %v7692_v29, %v7692_v29  ;;  %v3902_v47 = vsel %vm2277_vm1, %v1183_v24, -inf }
 0x40a   :  { %v2913_v42 = vrot.slane %v2912_v26, 1  ;;  %v3909_v9 = vsel %vm2277_vm1, %v1587_v8, -inf  ;;  %v6350_v20 = vmax.f32 %v9849_v23, %v2900_v11  ;;  %v3903_v34 = vrot.slane %v3902_v47, 4 }
 0x40b   :  { %v2920_v52 = vrot.slane %v2919_v62, 1  ;;  %v6351_v43 = vmax.f32 %v9851_v3, %v2907_v38  ;;  %7824 = vst [vmem:[%s11047_s3 + $0x7c] sm:$0xf] %v7752_v1  ;;  %v3910_v55 = vrot.slane %v3909_v9, 4  ;;  %v3916_v30 = vsel %vm2277_vm1, %v1588_v18, -inf }
 0x40c   :  { %v2914_v17 = vmax.f32 %v2912_v26, %v2913_v42  ;;  %v3923_v56 = vsel %vm2277_vm1, %v1589_v32, -inf  ;;  %v6638_v7 = vpack.c.bf16 %v6350_v20, %v6350_v20  ;;  %v3904_v48 = vmax.f32 %v3902_v47, %v3903_v34 }
 0x40d   :  { %v2921_v21 = vmax.f32 %v2919_v62, %v2920_v52  ;;  %v6639_v51 = vpack.c.bf16 %v6351_v43, %v6351_v43  ;;  %v3911_v23 = vmax.f32 %v3909_v9, %v3910_v55  ;;  %v3917_v37 = vrot.slane %v3916_v30, 4 }
 0x40e   :  { %v6352_v4 = vmax.f32 %v9853_v36, %v2914_v17  ;;  %v3924_v3 = vrot.slane %v3923_v56, 4  ;;  %v7214_v22 = vunpack.c.l.b16 %v6638_v7  ;;  %v3905_v41 = vrot.slane %v3904_v48, 2  ;;  %v1090_v36 = vpop.f32.mrf.mxu3 }
 0x40f   :  { %v6353_v15 = vmax.f32 %v9865_v13, %v2921_v21  ;;  %v7215_v31 = vunpack.c.l.b16 %v6639_v51  ;;  %v3912_v45 = vrot.slane %v3911_v23, 2  ;;  %v3918_v49 = vmax.f32 %v3916_v30, %v3917_v37  ;;  %v11168_v21 = vld [vmem:[#allocation17_spill] sm:$0xff] }
 0x410   :  { %v6640_v54 = vpack.c.bf16 %v6352_v4, %v6352_v4  ;;  %v3925_v50 = vmax.f32 %v3923_v56, %v3924_v3  ;;  %v3906_v44 = vmax.f32 %v3904_v48, %v3905_v41  ;;  %v1001_v2 = vadd.f32 %v9940_v10, %v1000_v40 }
 0x411   :  { %v6641_v28 = vpack.c.bf16 %v6353_v15, %v6353_v15  ;;  %v7504_v27 = vsel %vm7462_vm2, %v7215_v31, %v7214_v22  ;;  %v3913_v24 = vmax.f32 %v3911_v23, %v3912_v45  ;;  %v3919_v59 = vrot.slane %v3918_v49, 2 }
 0x412   :  { %v7216_v39 = vunpack.c.l.b16 %v6640_v54  ;;  %v3926_v5 = vrot.slane %v3925_v50, 2  ;;  %v10065_v13 = vmax.f32 %v9966_v12, %v5888_v19  ;;  %v3907_v0 = vrot.slane %v3906_v44, 1 }
 0x413   :  { %v7217_v46 = vunpack.c.l.b16 %v6641_v28  ;;  %v1219_v25 = vmax.f32 %v1001_v2, 0.0  ;;  %v3914_v6 = vrot.slane %v3913_v24, 1  ;;  %v3920_v35 = vmax.f32 %v3918_v49, %v3919_v59 }
 0x414   :  { %v3927_v8 = vmax.f32 %v3925_v50, %v3926_v5  ;;  %v1091_v16 = vadd.f32 %v9940_v10, %v1090_v36  ;;  %v7505_v26 = vsel %vm7464_vm3, %v7216_v39, %v7504_v27  ;;  %v3908_v18 = vmax.f32 %v3906_v44, %v3907_v0 }
 0x415   :  { %v1695_v32 = vrot.slane %v1219_v25, 2  ;;  %v1696_v29 = vrot.slane %v1219_v25, 4  ;;  %v3915_v11 = vmax.f32 %v3913_v24, %v3914_v6  ;;  %v3921_v38 = vrot.slane %v3920_v35, 1 }
 0x416   :  { %v3928_v62 = vrot.slane %v3927_v8, 1  ;;  %v1697_v1 = vrot.slane %v1219_v25, 6  ;;  %v6422_v12 = vmax.f32 %v9867_v33, %v3908_v18  ;;  %v4910_v19 = vsel %vm2277_vm1, %v1219_v25, -inf }
 0x417   :  { %v4917_v42 = vsel %vm2277_vm1, %v1695_v32, -inf  ;;  %v4924_v47 = vsel %vm2277_vm1, %v1696_v29, -inf  ;;  %v3922_v9 = vmax.f32 %v3920_v35, %v3921_v38  ;;  %v6423_v20 = vmax.f32 %v9869_v61, %v3915_v11  ;;  %v11169_v11 = vld [vmem:[#allocation18_spill] sm:$0xff] }
 0x418   :  { %v3929_v52 = vmax.f32 %v3927_v8, %v3928_v62  ;;  %v4911_v43 = vrot.slane %v4910_v19, 4  ;;  %v6710_v34 = vpack.c.bf16 %v6422_v12, %v6422_v12  ;;  %v4918_v17 = vrot.slane %v4917_v42, 4 }
 0x419   :  { %v4925_v55 = vrot.slane %v4924_v47, 4  ;;  %v4931_v30 = vsel %vm2277_vm1, %v1697_v1, -inf  ;;  %v6424_v56 = vmax.f32 %v9871_v53, %v3922_v9  ;;  %v6711_v7 = vpack.c.bf16 %v6423_v20, %v6423_v20  ;;  %v11171_v9 = vld [vmem:[#allocation20_spill] sm:$0xff] }
 0x41a   :  { %v6425_v33 = vmax.f32 %v11168_v21, %v3929_v52  ;;  %v4912_v51 = vmax.f32 %v4910_v19, %v4911_v43  ;;  %v7286_v48 = vunpack.c.l.b16 %v6710_v34  ;;  %v4919_v4 = vmax.f32 %v4917_v42, %v4918_v17  ;;  %v11170_v42 = vld [vmem:[#allocation19_spill] sm:$0xff] }
 0x41b   :  { %v4926_v23 = vmax.f32 %v4924_v47, %v4925_v55  ;;  %v4932_v37 = vrot.slane %v4931_v30, 4  ;;  %v6712_v3 = vpack.c.bf16 %v6424_v56, %v6424_v56  ;;  %v7287_v15 = vunpack.c.l.b16 %v6711_v7  ;;  %v822_v7 = vpop.f32.mrf.mxu0 }
 0x41c   :  { %v6713_v40 = vpack.c.bf16 %v6425_v33, %v6425_v33  ;;  %v4913_v61 = vrot.slane %v4912_v51, 2  ;;  %v4920_v22 = vrot.slane %v4919_v4, 2  ;;  %v1255_v54 = vmax.f32 %v1091_v16, 0.0 }
 0x41d   :  { %v4927_v31 = vrot.slane %v4926_v23, 2  ;;  %v4933_v41 = vmax.f32 %v4931_v30, %v4932_v37  ;;  %v10078_v45 = vsel %vm7466_vm4, %v7217_v46, %v7505_v26  ;;  %v7288_v53 = vunpack.c.l.b16 %v6712_v3  ;;  %v912_v37 = vpop.f32.mrf.mxu1 }
 0x41e   :  { %v7567_v49 = vsel %vm7462_vm2, %v7287_v15, %v7286_v48  ;;  %v4914_v50 = vmax.f32 %v4912_v51, %v4913_v61  ;;  %v4921_v28 = vmax.f32 %v4919_v4, %v4920_v22  ;;  %v1803_v2 = vrot.slane %v1255_v54, 2 }
 0x41f   :  { %v4928_v27 = vmax.f32 %v4926_v23, %v4927_v31  ;;  %v4934_v44 = vrot.slane %v4933_v41, 2  ;;  %v7289_v36 = vunpack.c.l.b16 %v6713_v40  ;;  %v1804_v24 = vrot.slane %v1255_v54, 4 }
 0x420   :  { %v4915_v39 = vrot.slane %v4914_v50, 1  ;;  %v1805_v59 = vrot.slane %v1255_v54, 6  ;;  %v7568_v5 = vsel %vm7464_vm3, %v7288_v53, %v7567_v49  ;;  %v4922_v0 = vrot.slane %v4921_v28, 1 }
 0x421   :  { %v4929_v25 = vrot.slane %v4928_v27, 1  ;;  %v4935_v6 = vmax.f32 %v4933_v41, %v4934_v44  ;;  %v5918_v46 = vsel %vm2277_vm1, %v1255_v54, -inf  ;;  %v5925_v8 = vsel %vm2277_vm1, %v1803_v2, -inf }
 0x422   :  { %v4916_v35 = vmax.f32 %v4914_v50, %v4915_v39  ;;  %v5932_v16 = vsel %vm2277_vm1, %v1804_v24, -inf  ;;  %v4923_v26 = vmax.f32 %v4921_v28, %v4922_v0  ;;  %v5919_v29 = vrot.slane %v5918_v46, 4 }
 0x423   :  { %v4930_v18 = vmax.f32 %v4928_v27, %v4929_v25  ;;  %v4936_v32 = vrot.slane %v4935_v6, 1  ;;  %v5926_v62 = vrot.slane %v5925_v8, 4  ;;  %v5933_v1 = vrot.slane %v5932_v16, 4 }
 0x424   :  { %v6494_v38 = vmax.f32 %v11169_v11, %v4916_v35  ;;  %v5939_v12 = vsel %vm2277_vm1, %v1805_v59, -inf  ;;  %v6495_v47 = vmax.f32 %v11170_v42, %v4923_v26  ;;  %v5920_v20 = vmax.f32 %v5918_v46, %v5919_v29  ;;  %v11173_v11 = vld [vmem:[#allocation2_spill] sm:$0xff] }
 0x425   :  { %v4937_v19 = vmax.f32 %v4935_v6, %v4936_v32  ;;  %v6496_v52 = vmax.f32 %v11171_v9, %v4930_v18  ;;  %v5927_v34 = vmax.f32 %v5925_v8, %v5926_v62  ;;  %v5934_v17 = vmax.f32 %v5932_v16, %v5933_v1  ;;  %v11172_v8 = vld [vmem:[#allocation21_spill] sm:$0xff]  ;;  %v11174_v62 = vld [vmem:[#allocation3_spill] sm:$0xff] }
 0x426   :  { %v6782_v43 = vpack.c.bf16 %v6494_v38, %v6494_v38  ;;  %v5940_v55 = vrot.slane %v5939_v12, 4  ;;  %v6783_v56 = vpack.c.bf16 %v6495_v47, %v6495_v47  ;;  %v5921_v33 = vrot.slane %v5920_v20, 2  ;;  %v11175_v47 = vld [vmem:[#allocation4_spill] sm:$0xff] }
 0x427   :  { %v6497_v30 = vmax.f32 %v9897_v58, %v4937_v19  ;;  %v6784_v21 = vpack.c.bf16 %v6496_v52, %v6496_v52  ;;  %v5928_v48 = vrot.slane %v5927_v34, 2  ;;  %v5935_v4 = vrot.slane %v5934_v17, 2 }
 0x428   :  { %v7358_v51 = vunpack.c.l.b16 %v6782_v43  ;;  %v5941_v23 = vmax.f32 %v5939_v12, %v5940_v55  ;;  %v7359_v40 = vunpack.c.l.b16 %v6783_v56  ;;  %v5922_v61 = vmax.f32 %v5920_v20, %v5921_v33 }
 0x429   :  { %v6785_v3 = vpack.c.bf16 %v6497_v30, %v6497_v30  ;;  %v7360_v15 = vunpack.c.l.b16 %v6784_v21  ;;  %v5929_v22 = vmax.f32 %v5927_v34, %v5928_v48  ;;  %v5936_v31 = vmax.f32 %v5934_v17, %v5935_v4  ;;  %v1002_v34 = vpop.f32.mrf.mxu2 }
 0x42a   :  { %v5942_v41 = vrot.slane %v5941_v23, 2  ;;  %v823_v54 = vadd.f32 %v9940_v10, %v822_v7  ;;  %v7630_v58 = vsel %vm7462_vm2, %v7359_v40, %v7358_v51  ;;  %v5923_v49 = vrot.slane %v5922_v61, 1 }
 0x42b   :  { %v7361_v53 = vunpack.c.l.b16 %v6785_v3  ;;  %v913_v50 = vadd.f32 %v9940_v10, %v912_v37  ;;  %v7631_v28 = vsel %vm7464_vm3, %v7360_v15, %v7630_v58  ;;  %v5930_v27 = vrot.slane %v5929_v22, 1 }
 0x42c   :  { %v5937_v44 = vrot.slane %v5936_v31, 1  ;;  %v5943_v2 = vmax.f32 %v5941_v23, %v5942_v41  ;;  %v10095_v39 = vsel %vm7466_vm4, %v7289_v36, %v7568_v5  ;;  %v5924_v59 = vmax.f32 %v5922_v61, %v5923_v49 }
 0x42d   :  { %v10098_v24 = vsel %vm7466_vm4, %v7361_v53, %v7631_v28  ;;  %v1148_v0 = vmax.f32 %v823_v54, 0.0  ;;  %v5931_v25 = vmax.f32 %v5929_v22, %v5930_v27  ;;  %v1184_v46 = vmax.f32 %v913_v50, 0.0 }
 0x42e   :  { %v5938_v6 = vmax.f32 %v5936_v31, %v5937_v44  ;;  %v5944_v35 = vrot.slane %v5943_v2, 1  ;;  %v6566_v16 = vmax.f32 %v11172_v8, %v5924_v59  ;;  %v10109_v37 = vadd.f32 %v9940_v10, %v1002_v34 }
 0x42f   :  { %v1482_v26 = vrot.slane %v1148_v0, 2  ;;  %v1483_v18 = vrot.slane %v1148_v0, 4  ;;  %v1484_v32 = vrot.slane %v1148_v0, 6  ;;  %v6567_v38 = vmax.f32 %v11173_v11, %v5931_v25 }
 0x430   :  { %v5945_v29 = vmax.f32 %v5943_v2, %v5944_v35  ;;  %v6568_v36 = vmax.f32 %v11174_v62, %v5938_v6  ;;  %v2922_v5 = vsel %vm2277_vm1, %v1148_v0, -inf  ;;  %v6854_v1 = vpack.c.bf16 %v6566_v16, %v6566_v16 }
 0x431   :  { %v2923_v12 = vrot.slane %v2922_v5, 4  ;;  %v2929_v19 = vsel %vm2277_vm1, %v1482_v26, -inf  ;;  %v2936_v42 = vsel %vm2277_vm1, %v1483_v18, -inf  ;;  %v6855_v52 = vpack.c.bf16 %v6567_v38, %v6567_v38  ;;  %v11176_v38 = vld [vmem:[#allocation5_spill] sm:$0xff] }
 0x432   :  { %v6569_v9 = vmax.f32 %v11175_v47, %v5945_v29  ;;  %v6856_v20 = vpack.c.bf16 %v6568_v36, %v6568_v36  ;;  %v2930_v43 = vrot.slane %v2929_v19, 4  ;;  %v7430_v17 = vunpack.c.l.b16 %v6854_v1 }
 0x433   :  { %v2924_v55 = vmax.f32 %v2922_v5, %v2923_v12  ;;  %v2937_v30 = vrot.slane %v2936_v42, 4  ;;  %v2943_v56 = vsel %vm2277_vm1, %v1484_v32, -inf  ;;  %v7431_v33 = vunpack.c.l.b16 %v6855_v52  ;;  %v11177_v5 = vld [vmem:[#allocation6_spill] sm:$0xff] }
 0x434   :  { %v6857_v21 = vpack.c.bf16 %v6569_v9, %v6569_v9  ;;  %v7432_v7 = vunpack.c.l.b16 %v6856_v20  ;;  %v2931_v51 = vmax.f32 %v2929_v19, %v2930_v43  ;;  %v2944_v23 = vrot.slane %v2943_v56, 4  ;;  %v11178_v9 = vld [vmem:[#allocation7_spill] sm:$0xff] }
 0x435   :  { %v2925_v48 = vrot.slane %v2924_v55, 2  ;;  %v2938_v4 = vmax.f32 %v2936_v42, %v2937_v30  ;;  %v7693_v3 = vsel %vm7462_vm2, %v7431_v33, %v7430_v17  ;;  %v1590_v15 = vrot.slane %v1184_v46, 2 }
 0x436   :  { %v2932_v40 = vrot.slane %v2931_v51, 2  ;;  %v1591_v61 = vrot.slane %v1184_v46, 4  ;;  %v10112_v22 = vunpack.c.l.b16 %v6857_v21  ;;  %v2945_v54 = vmax.f32 %v2943_v56, %v2944_v23  ;;  %v11179_v56 = vld [vmem:[#allocation8_spill] sm:$0xff] }
 0x437   :  { %v2926_v31 = vmax.f32 %v2924_v55, %v2925_v48  ;;  %v2939_v41 = vrot.slane %v2938_v4, 2  ;;  %v10115_v53 = vsel %vm7464_vm3, %v7432_v7, %v7693_v3  ;;  %v1592_v49 = vrot.slane %v1184_v46, 6 }
 0x438   :  { %v2933_v58 = vmax.f32 %v2931_v51, %v2932_v40  ;;  %v3930_v50 = vsel %vm2277_vm1, %v1184_v46, -inf  ;;  %v2946_v27 = vrot.slane %v2945_v54, 2  ;;  %v3937_v59 = vsel %vm2277_vm1, %v1590_v15, -inf }
 0x439   :  { %v2927_v28 = vrot.slane %v2926_v31, 1  ;;  %v2940_v10 = vmax.f32 %v2938_v4, %v2939_v41  ;;  %v3931_v44 = vrot.slane %v3930_v50, 4  ;;  %v3944_v0 = vsel %vm2277_vm1, %v1591_v61, -inf  ;;  %v1092_v41 = vpop.f32.mrf.mxu3 }
 0x43a   :  { %v2934_v2 = vrot.slane %v2933_v58, 1  ;;  %v3951_v25 = vsel %vm2277_vm1, %v1592_v49, -inf  ;;  %v2947_v8 = vmax.f32 %v2945_v54, %v2946_v27  ;;  %v3938_v18 = vrot.slane %v3937_v59, 4  ;;  %v11180_v27 = vld [vmem:[#allocation9_spill] sm:$0xff] }
 0x43b   :  { %v2928_v6 = vmax.f32 %v2926_v31, %v2927_v28  ;;  %v2941_v35 = vrot.slane %v2940_v10, 1  ;;  %v3932_v16 = vmax.f32 %v3930_v50, %v3931_v44  ;;  %v3945_v32 = vrot.slane %v3944_v0, 4 }
 0x43c   :  { %v2935_v26 = vmax.f32 %v2933_v58, %v2934_v2  ;;  %v3952_v29 = vrot.slane %v3951_v25, 4  ;;  %v2948_v11 = vrot.slane %v2947_v8, 1  ;;  %v3939_v12 = vmax.f32 %v3937_v59, %v3938_v18 }
 0x43d   :  { %v2942_v46 = vmax.f32 %v2940_v10, %v2941_v35  ;;  %v6354_v62 = vmax.f32 %v11176_v38, %v2928_v6  ;;  %v3933_v36 = vrot.slane %v3932_v16, 2  ;;  %v3946_v19 = vmax.f32 %v3944_v0, %v3945_v32  ;;  %v11181_v32 = vld [vmem:[#allocation10_spill] sm:$0xff] }
 0x43e   :  { %v6355_v1 = vmax.f32 %v11177_v5, %v2935_v26  ;;  %v3953_v42 = vmax.f32 %v3951_v25, %v3952_v29  ;;  %v2949_v47 = vmax.f32 %v2947_v8, %v2948_v11  ;;  %v3940_v17 = vrot.slane %v3939_v12, 2  ;;  %v11183_v11 = vld [vmem:[#allocation12_spill] sm:$0xff] }
 0x43f   :  { %v6356_v52 = vmax.f32 %v11178_v9, %v2942_v46  ;;  %v6642_v20 = vpack.c.bf16 %v6354_v62, %v6354_v62  ;;  %v3934_v43 = vmax.f32 %v3932_v16, %v3933_v36  ;;  %v3947_v55 = vrot.slane %v3946_v19, 2  ;;  %v11182_v46 = vld [vmem:[#allocation11_spill] sm:$0xff] }
 0x440   :  { %v6643_v34 = vpack.c.bf16 %v6355_v1, %v6355_v1  ;;  %v3954_v30 = vrot.slane %v3953_v42, 2  ;;  %v6357_v21 = vmax.f32 %v11179_v56, %v2949_v47  ;;  %v3941_v4 = vmax.f32 %v3939_v12, %v3940_v17  ;;  %v915_v17 = vpop.f32.mrf.mxu1 }
 0x441   :  { %v6644_v33 = vpack.c.bf16 %v6356_v52, %v6356_v52  ;;  %v7218_v7 = vunpack.c.l.b16 %v6642_v20  ;;  %v3935_v51 = vrot.slane %v3934_v43, 1  ;;  %v3948_v23 = vmax.f32 %v3946_v19, %v3947_v55 }
 0x442   :  { %v7219_v48 = vunpack.c.l.b16 %v6643_v34  ;;  %v3955_v3 = vmax.f32 %v3953_v42, %v3954_v30  ;;  %v6645_v40 = vpack.c.bf16 %v6357_v21, %v6357_v21  ;;  %v3942_v58 = vrot.slane %v3941_v4, 1  ;;  %v825_v34 = vpop.f32.mrf.mxu0 }
 0x443   :  { %v7220_v15 = vunpack.c.l.b16 %v6644_v33  ;;  %v7507_v61 = vsel %vm7468_vm5, %v7218_v7, %v10078_v45  ;;  %v3936_v31 = vmax.f32 %v3934_v43, %v3935_v51  ;;  %v3949_v49 = vrot.slane %v3948_v23, 1  ;;  %v10134_v45 = vld [vmem:[%s11046_s2] ss:$0 sm:$0xff] }
 0x444   :  { %v7508_v54 = vsel %vm7470_vm6, %v7219_v48, %v7507_v61  ;;  %v3956_v50 = vrot.slane %v3955_v3, 1  ;;  %v7221_v28 = vunpack.c.l.b16 %v6645_v40  ;;  %v1220_v2 = vmax.f32 %v10109_v37, 0.0 }
 0x445   :  { %v7509_v10 = vsel %vm7472_vm7, %v7220_v15, %v7508_v54  ;;  %v6426_v44 = vmax.f32 %v11180_v27, %v3936_v31  ;;  %v3943_v59 = vmax.f32 %v3941_v4, %v3942_v58  ;;  %v3950_v0 = vmax.f32 %v3948_v23, %v3949_v49 }
 0x446   :  { %v3957_v25 = vmax.f32 %v3955_v3, %v3956_v50  ;;  %v1093_v6 = vadd.f32 %v10134_v45, %v1092_v41  ;;  %v7510_v35 = vsel %vm7474_vm8, %v7221_v28, %v7509_v10  ;;  %v1698_v16 = vrot.slane %v1220_v2, 2 }
 0x447   :  { %v6714_v8 = vpack.c.bf16 %v6426_v44, %v6426_v44  ;;  %v1699_v26 = vrot.slane %v1220_v2, 4  ;;  %v7726_v18 = vpack.c.b16 %v7510_v35, %v7510_v35  ;;  %v6427_v29 = vmax.f32 %v11181_v32, %v3943_v59 }
 0x448   :  { %v6428_v37 = vmax.f32 %v11182_v46, %v3950_v0  ;;  %v6429_v38 = vmax.f32 %v11183_v11, %v3957_v25  ;;  %v1700_v36 = vrot.slane %v1220_v2, 6  ;;  %v4938_v5 = vsel %vm2277_vm1, %v1220_v2, -inf }
 0x449   :  { %v7290_v62 = vunpack.c.l.b16 %v6714_v8  ;;  %v4945_v1 = vsel %vm2277_vm1, %v1698_v16, -inf  ;;  %7798 = vst [vmem:[%s11047_s3 + $0x14] sm:$0xf] %v7726_v18  ;;  %v6715_v12 = vpack.c.bf16 %v6427_v29, %v6427_v29  ;;  %v4939_v47 = vrot.slane %v4938_v5, 4 }
 0x44a   :  { %v6716_v19 = vpack.c.bf16 %v6428_v37, %v6428_v37  ;;  %v6717_v42 = vpack.c.bf16 %v6429_v38, %v6429_v38  ;;  %v4946_v52 = vrot.slane %v4945_v1, 4  ;;  %v4952_v20 = vsel %vm2277_vm1, %v1699_v26, -inf  ;;  %v11184_v38 = vld [vmem:[#allocation13_spill] sm:$0xff] }
 0x44b   :  { %v7570_v9 = vsel %vm7468_vm5, %v7290_v62, %v10095_v39  ;;  %v4959_v43 = vsel %vm2277_vm1, %v1700_v36, -inf  ;;  %v7291_v55 = vunpack.c.l.b16 %v6715_v12  ;;  %v4940_v21 = vmax.f32 %v4938_v5, %v4939_v47 }
 0x44c   :  { %v7292_v30 = vunpack.c.l.b16 %v6716_v19  ;;  %v7293_v56 = vunpack.c.l.b16 %v6717_v42  ;;  %v4947_v33 = vmax.f32 %v4945_v1, %v4946_v52  ;;  %v4953_v7 = vrot.slane %v4952_v20, 4  ;;  %v11185_v42 = vld [vmem:[#allocation14_spill] sm:$0xff] }
 0x44d   :  { %v4960_v51 = vrot.slane %v4959_v43, 4  ;;  %v1256_v48 = vmax.f32 %v1093_v6, 0.0  ;;  %v7571_v4 = vsel %vm7470_vm6, %v7291_v55, %v7570_v9  ;;  %v4941_v23 = vrot.slane %v4940_v21, 2 }
 0x44e   :  { %v10152_v39 = vadd.f32 %v10134_v45, %v825_v34  ;;  %v10155_v3 = vadd.f32 %v10134_v45, %v915_v17  ;;  %v7572_v40 = vsel %vm7472_vm7, %v7292_v30, %v7571_v4  ;;  %v4948_v15 = vrot.slane %v4947_v33, 2  ;;  %v11186_v17 = vld [vmem:[#allocation15_spill] sm:$0xff] }
 0x44f   :  { %v4954_v61 = vmax.f32 %v4952_v20, %v4953_v7  ;;  %v4961_v31 = vmax.f32 %v4959_v43, %v4960_v51  ;;  %v7573_v41 = vsel %vm7474_vm8, %v7293_v56, %v7572_v40  ;;  %v4942_v54 = vmax.f32 %v4940_v21, %v4941_v23 }
 0x450   :  { %v1806_v58 = vrot.slane %v1256_v48, 2  ;;  %v1807_v49 = vrot.slane %v1256_v48, 4  ;;  %v7735_v50 = vpack.c.b16 %v7573_v41, %v7573_v41  ;;  %v4949_v28 = vmax.f32 %v4947_v33, %v4948_v15 }
 0x451   :  { %v4955_v10 = vrot.slane %v4954_v61, 2  ;;  %v4962_v27 = vrot.slane %v4961_v31, 2  ;;  %v4943_v44 = vrot.slane %v4942_v54, 1  ;;  %v1808_v2 = vrot.slane %v1256_v48, 6 }
 0x452   :  { %v5946_v59 = vsel %vm2277_vm1, %v1256_v48, -inf  ;;  %v5953_v0 = vsel %vm2277_vm1, %v1806_v58, -inf  ;;  %7807 = vst [vmem:[%s11047_s3 + $0x38] sm:$0xf] %v7735_v50  ;;  %v4950_v25 = vrot.slane %v4949_v28, 1  ;;  %v5960_v18 = vsel %vm2277_vm1, %v1807_v49, -inf }
 0x453   :  { %v4956_v6 = vmax.f32 %v4954_v61, %v4955_v10  ;;  %v4963_v35 = vmax.f32 %v4961_v31, %v4962_v27  ;;  %v5947_v8 = vrot.slane %v5946_v59, 4  ;;  %v4944_v16 = vmax.f32 %v4942_v54, %v4943_v44 }
 0x454   :  { %v5954_v26 = vrot.slane %v5953_v0, 4  ;;  %v5967_v32 = vsel %vm2277_vm1, %v1808_v2, -inf  ;;  %v4951_v29 = vmax.f32 %v4949_v28, %v4950_v25  ;;  %v5961_v5 = vrot.slane %v5960_v18, 4 }
 0x455   :  { %v4957_v46 = vrot.slane %v4956_v6, 1  ;;  %v4964_v37 = vrot.slane %v4963_v35, 1  ;;  %v5948_v11 = vmax.f32 %v5946_v59, %v5947_v8  ;;  %v6498_v62 = vmax.f32 %v11184_v38, %v4944_v16 }
 0x456   :  { %v5955_v36 = vmax.f32 %v5953_v0, %v5954_v26  ;;  %v5968_v1 = vrot.slane %v5967_v32, 4  ;;  %v6499_v47 = vmax.f32 %v11185_v42, %v4951_v29  ;;  %v5962_v43 = vmax.f32 %v5960_v18, %v5961_v5 }
 0x457   :  { %v4958_v12 = vmax.f32 %v4956_v6, %v4957_v46  ;;  %v4965_v19 = vmax.f32 %v4963_v35, %v4964_v37  ;;  %v5949_v9 = vrot.slane %v5948_v11, 2  ;;  %v6786_v52 = vpack.c.bf16 %v6498_v62, %v6498_v62 }
 0x458   :  { %v5956_v20 = vrot.slane %v5955_v36, 2  ;;  %v5969_v34 = vmax.f32 %v5967_v32, %v5968_v1  ;;  %v6787_v56 = vpack.c.bf16 %v6499_v47, %v6499_v47  ;;  %v5963_v51 = vrot.slane %v5962_v43, 2 }
 0x459   :  { %v6500_v55 = vmax.f32 %v11186_v17, %v4958_v12  ;;  %v6501_v30 = vmax.f32 %v9968_v63, %v4965_v19  ;;  %v5950_v21 = vmax.f32 %v5948_v11, %v5949_v9  ;;  %v7362_v33 = vunpack.c.l.b16 %v6786_v52 }
 0x45a   :  { %v5957_v7 = vmax.f32 %v5955_v36, %v5956_v20  ;;  %v5970_v48 = vrot.slane %v5969_v34, 2  ;;  %v7363_v40 = vunpack.c.l.b16 %v6787_v56  ;;  %v5964_v41 = vmax.f32 %v5962_v43, %v5963_v51 }
 0x45b   :  { %v6788_v4 = vpack.c.bf16 %v6500_v55, %v6500_v55  ;;  %v6789_v23 = vpack.c.bf16 %v6501_v30, %v6501_v30  ;;  %v5951_v15 = vrot.slane %v5950_v21, 1  ;;  %v7633_v61 = vsel %vm7468_vm5, %v7362_v33, %v10098_v24 }
 0x45c   :  { %v5958_v31 = vrot.slane %v5957_v7, 1  ;;  %v5971_v54 = vmax.f32 %v5969_v34, %v5970_v48  ;;  %v7634_v63 = vsel %vm7470_vm6, %v7363_v40, %v7633_v61  ;;  %v5965_v10 = vrot.slane %v5964_v41, 1 }
 0x45d   :  { %v7364_v58 = vunpack.c.l.b16 %v6788_v4  ;;  %v7365_v49 = vunpack.c.l.b16 %v6789_v23  ;;  %v5952_v50 = vmax.f32 %v5950_v21, %v5951_v15  ;;  %v1149_v44 = vmax.f32 %v10152_v39, 0.0 }
 0x45e   :  { %v5959_v28 = vmax.f32 %v5957_v7, %v5958_v31  ;;  %v5972_v27 = vrot.slane %v5971_v54, 1  ;;  %v7695_v2 = vsel %vm7466_vm4, %v10112_v22, %v10115_v53  ;;  %v1185_v0 = vmax.f32 %v10155_v3, 0.0  ;;  %v1005_v7 = vpop.f32.mrf.mxu2 }
 0x45f   :  { %v7635_v59 = vsel %vm7472_vm7, %v7364_v58, %v7634_v63  ;;  %v6570_v24 = vmax.f32 %v9970_v57, %v5952_v50  ;;  %v5966_v6 = vmax.f32 %v5964_v41, %v5965_v10  ;;  %v1485_v18 = vrot.slane %v1149_v44, 2 }
 0x460   :  { %v7636_v25 = vsel %vm7474_vm8, %v7365_v49, %v7635_v59  ;;  %v5973_v35 = vmax.f32 %v5971_v54, %v5972_v27  ;;  %v6571_v8 = vmax.f32 %v9972_v60, %v5959_v28  ;;  %v1486_v39 = vrot.slane %v1149_v44, 4 }
 0x461   :  { %v7744_v16 = vpack.c.b16 %v7636_v25, %v7636_v25  ;;  %v6858_v26 = vpack.c.bf16 %v6570_v24, %v6570_v24  ;;  %v6572_v32 = vmax.f32 %v9974_v14, %v5966_v6  ;;  %v1487_v29 = vrot.slane %v1149_v44, 6 }
 0x462   :  { %v6573_v22 = vmax.f32 %v10065_v13, %v5973_v35  ;;  %v6859_v53 = vpack.c.bf16 %v6571_v8, %v6571_v8  ;;  %v2950_v3 = vsel %vm2277_vm1, %v1149_v44, -inf  ;;  %v2957_v46 = vsel %vm2277_vm1, %v1485_v18, -inf  ;;  %v1095_v35 = vpop.f32.mrf.mxu3 }
 0x463   :  { %7816 = vst [vmem:[%s11047_s3 + $0x5c] sm:$0xf] %v7744_v16  ;;  %v7434_v57 = vunpack.c.l.b16 %v6858_v26  ;;  %v2964_v60 = vsel %vm2277_vm1, %v1486_v39, -inf  ;;  %v6860_v37 = vpack.c.bf16 %v6572_v32, %v6572_v32  ;;  %v2951_v62 = vrot.slane %v2950_v3, 4 }
 0x464   :  { %v6861_v11 = vpack.c.bf16 %v6573_v22, %v6573_v22  ;;  %v7435_v38 = vunpack.c.l.b16 %v6859_v53  ;;  %v2958_v13 = vrot.slane %v2957_v46, 4  ;;  %v2965_v36 = vrot.slane %v2964_v60, 4 }
 0x465   :  { %v7696_v14 = vsel %vm7468_vm5, %v7434_v57, %v7695_v2  ;;  %v2971_v5 = vsel %vm2277_vm1, %v1487_v29, -inf  ;;  %v7436_v1 = vunpack.c.l.b16 %v6860_v37  ;;  %v2952_v42 = vmax.f32 %v2950_v3, %v2951_v62  ;;  %v827_v3 = vpop.f32.mrf.mxu0 }
 0x466   :  { %v7437_v12 = vunpack.c.l.b16 %v6861_v11  ;;  %v7697_v19 = vsel %vm7470_vm6, %v7435_v38, %v7696_v14  ;;  %v2959_v47 = vmax.f32 %v2957_v46, %v2958_v13  ;;  %v2966_v9 = vmax.f32 %v2964_v60, %v2965_v36 }
 0x467   :  { %v2972_v52 = vrot.slane %v2971_v5, 4  ;;  %v1593_v20 = vrot.slane %v1185_v0, 2  ;;  %v7698_v43 = vsel %vm7472_vm7, %v7436_v1, %v7697_v19  ;;  %v2953_v34 = vrot.slane %v2952_v42, 2 }
 0x468   :  { %v1594_v17 = vrot.slane %v1185_v0, 4  ;;  %v1595_v55 = vrot.slane %v1185_v0, 6  ;;  %v7699_v30 = vsel %vm7474_vm8, %v7437_v12, %v7698_v43  ;;  %v2960_v56 = vrot.slane %v2959_v47, 2 }
 0x469   :  { %v2967_v21 = vrot.slane %v2966_v9, 2  ;;  %v2973_v33 = vmax.f32 %v2971_v5, %v2972_v52  ;;  %v7753_v51 = vpack.c.b16 %v7699_v30, %v7699_v30  ;;  %v2954_v48 = vmax.f32 %v2952_v42, %v2953_v34 }
 0x46a   :  { %v3958_v4 = vsel %vm2277_vm1, %v1185_v0, -inf  ;;  %v3965_v23 = vsel %vm2277_vm1, %v1593_v20, -inf  ;;  %v2961_v40 = vmax.f32 %v2959_v47, %v2960_v56  ;;  %v3972_v41 = vsel %vm2277_vm1, %v1594_v17, -inf }
 0x46b   :  { %v2974_v15 = vrot.slane %v2973_v33, 2  ;;  %v3959_v61 = vrot.slane %v3958_v4, 4  ;;  %7825 = vst [vmem:[%s11047_s3 + $0x80] sm:$0xf] %v7753_v51  ;;  %v3966_v31 = vrot.slane %v3965_v23, 4  ;;  %v3979_v54 = vsel %vm2277_vm1, %v1595_v55, -inf }
 0x46c   :  { %v1006_v58 = vadd.f32 %v10134_v45, %v1005_v7  ;;  %v2955_v49 = vrot.slane %v2954_v48, 1  ;;  %v2962_v63 = vrot.slane %v2961_v40, 1  ;;  %v2968_v50 = vmax.f32 %v2966_v9, %v2967_v21 }
 0x46d   :  { %v3960_v28 = vmax.f32 %v3958_v4, %v3959_v61  ;;  %v2975_v10 = vmax.f32 %v2973_v33, %v2974_v15  ;;  %v3967_v27 = vmax.f32 %v3965_v23, %v3966_v31  ;;  %v3973_v44 = vrot.slane %v3972_v41, 4 }
 0x46e   :  { %v3980_v2 = vrot.slane %v3979_v54, 4  ;;  %v1221_v6 = vmax.f32 %v1006_v58, 0.0  ;;  %v10203_v8 = vmax.f32 %v2954_v48, %v2955_v49  ;;  %v2969_v16 = vrot.slane %v2968_v50, 1 }
 0x46f   :  { %v3961_v59 = vrot.slane %v3960_v28, 2  ;;  %v3968_v24 = vrot.slane %v3967_v27, 2  ;;  %v3974_v0 = vmax.f32 %v3972_v41, %v3973_v44  ;;  %v10205_v26 = vmax.f32 %v2961_v40, %v2962_v63 }
 0x470   :  { %v3981_v25 = vmax.f32 %v3979_v54, %v3980_v2  ;;  %v2976_v18 = vrot.slane %v2975_v10, 1  ;;  %v1701_v32 = vrot.slane %v1221_v6, 2  ;;  %v1702_v22 = vrot.slane %v1221_v6, 4 }
 0x471   :  { %v3962_v39 = vmax.f32 %v3960_v28, %v3961_v59  ;;  %v1703_v53 = vrot.slane %v1221_v6, 6  ;;  %v4966_v29 = vsel %vm2277_vm1, %v1221_v6, -inf  ;;  %v1096_v57 = vadd.f32 %v10134_v45, %v1095_v35 }
 0x472   :  { %v3969_v46 = vmax.f32 %v3967_v27, %v3968_v24  ;;  %v3975_v60 = vrot.slane %v3974_v0, 2  ;;  %v3982_v37 = vrot.slane %v3981_v25, 2  ;;  %v4967_v11 = vrot.slane %v4966_v29, 4 }
 0x473   :  { %v10209_v38 = vmax.f32 %v2968_v50, %v2969_v16  ;;  %v4973_v62 = vsel %vm2277_vm1, %v1701_v32, -inf  ;;  %v4980_v14 = vsel %vm2277_vm1, %v1702_v22, -inf  ;;  %v4987_v13 = vsel %vm2277_vm1, %v1703_v53, -inf }
 0x474   :  { %v10214_v36 = vmax.f32 %v2975_v10, %v2976_v18  ;;  %v3963_v5 = vrot.slane %v3962_v39, 1  ;;  %v4968_v1 = vmax.f32 %v4966_v29, %v4967_v11  ;;  %v828_v12 = vadd.f32 %v10134_v45, %v827_v3 }
 0x475   :  { %v4974_v19 = vrot.slane %v4973_v62, 4  ;;  %v4981_v42 = vrot.slane %v4980_v14, 4  ;;  %v4988_v47 = vrot.slane %v4987_v13, 4  ;;  %v1257_v9 = vmax.f32 %v1096_v57, 0.0 }
 0x476   :  { %v3970_v52 = vrot.slane %v3969_v46, 1  ;;  %v3976_v20 = vmax.f32 %v3974_v0, %v3975_v60  ;;  %v10217_v43 = vmax.f32 %v3981_v25, %v3982_v37  ;;  %v4969_v34 = vrot.slane %v4968_v1, 2 }
 0x477   :  { %v4975_v17 = vmax.f32 %v4973_v62, %v4974_v19  ;;  %v4982_v55 = vmax.f32 %v4980_v14, %v4981_v42  ;;  %v4989_v30 = vmax.f32 %v4987_v13, %v4988_v47  ;;  %v1809_v56 = vrot.slane %v1257_v9, 2 }
 0x478   :  { %v10219_v21 = vmax.f32 %v3962_v39, %v3963_v5  ;;  %v1810_v33 = vrot.slane %v1257_v9, 4  ;;  %v1811_v7 = vrot.slane %v1257_v9, 6  ;;  %v5974_v51 = vsel %vm2277_vm1, %v1257_v9, -inf  ;;  %v917_v5 = vpop.f32.mrf.mxu1 }
 0x479   :  { %v4976_v48 = vrot.slane %v4975_v17, 2  ;;  %v4983_v4 = vrot.slane %v4982_v55, 2  ;;  %v4990_v23 = vrot.slane %v4989_v30, 2  ;;  %v5975_v40 = vrot.slane %v5974_v51, 4 }
 0x47a   :  { %v5981_v15 = vsel %vm2277_vm1, %v1809_v56, -inf  ;;  %v5988_v61 = vsel %vm2277_vm1, %v1810_v33, -inf  ;;  %v5995_v31 = vsel %vm2277_vm1, %v1811_v7, -inf  ;;  %v1150_v41 = vmax.f32 %v828_v12, 0.0 }
 0x47b   :  { %v3977_v54 = vrot.slane %v3976_v20, 1  ;;  %v4970_v58 = vmax.f32 %v4968_v1, %v4969_v34  ;;  %v4977_v49 = vmax.f32 %v4975_v17, %v4976_v48  ;;  %v5976_v63 = vmax.f32 %v5974_v51, %v5975_v40 }
 0x47c   :  { %v10225_v50 = vmax.f32 %v3969_v46, %v3970_v52  ;;  %v5982_v28 = vrot.slane %v5981_v15, 4  ;;  %v5989_v10 = vrot.slane %v5988_v61, 4  ;;  %v5996_v27 = vrot.slane %v5995_v31, 4 }
 0x47d   :  { %v3984_v44 = vrot.slane %v10217_v43, 1  ;;  %v4984_v2 = vmax.f32 %v4982_v55, %v4983_v4  ;;  %v4991_v59 = vmax.f32 %v4989_v30, %v4990_v23  ;;  %v5977_v24 = vrot.slane %v5976_v63, 2 }
 0x47e   :  { %v5983_v0 = vmax.f32 %v5981_v15, %v5982_v28  ;;  %v5990_v25 = vmax.f32 %v5988_v61, %v5989_v10  ;;  %v5997_v6 = vmax.f32 %v5995_v31, %v5996_v27  ;;  %v1488_v35 = vrot.slane %v1150_v41, 2  ;;  %v1007_v15 = vpop.f32.mrf.mxu2 }
 0x47f   :  { %v10228_v16 = vmax.f32 %v3976_v20, %v3977_v54  ;;  %v4971_v18 = vrot.slane %v4970_v58, 1  ;;  %v4978_v39 = vrot.slane %v4977_v49, 1  ;;  %v5978_v32 = vmax.f32 %v5976_v63, %v5977_v24  ;;  %v1097_v24 = vpop.f32.mrf.mxu3 }
 0x480   :  { %v5984_v22 = vrot.slane %v5983_v0, 2  ;;  %v5991_v53 = vrot.slane %v5990_v25, 2  ;;  %v5998_v29 = vrot.slane %v5997_v6, 2  ;;  %v1489_v57 = vrot.slane %v1150_v41, 4 }
 0x481   :  { %v4985_v3 = vrot.slane %v4984_v2, 1  ;;  %v1490_v46 = vrot.slane %v1150_v41, 6  ;;  %v2978_v60 = vsel %vm2277_vm1, %v1150_v41, -inf  ;;  %v2985_v37 = vsel %vm2277_vm1, %v1488_v35, -inf }
 0x482   :  { %v4992_v11 = vrot.slane %v4991_v59, 1  ;;  %v5985_v62 = vmax.f32 %v5983_v0, %v5984_v22  ;;  %v5992_v14 = vmax.f32 %v5990_v25, %v5991_v53  ;;  %v2979_v13 = vrot.slane %v2978_v60, 4 }
 0x483   :  { %v5979_v1 = vrot.slane %v5978_v32, 1  ;;  %v2986_v12 = vrot.slane %v2985_v37, 4  ;;  %v2992_v19 = vsel %vm2277_vm1, %v1489_v57, -inf  ;;  %v2999_v42 = vsel %vm2277_vm1, %v1490_v46, -inf }
 0x484   :  { %v5986_v47 = vrot.slane %v5985_v62, 1  ;;  %v5993_v9 = vrot.slane %v5992_v14, 1  ;;  %v5999_v52 = vmax.f32 %v5997_v6, %v5998_v29  ;;  %v2980_v20 = vmax.f32 %v2978_v60, %v2979_v13 }
 0x485   :  { %v2987_v34 = vmax.f32 %v2985_v37, %v2986_v12  ;;  %v2993_v17 = vrot.slane %v2992_v19, 4  ;;  %v3000_v55 = vrot.slane %v2999_v42, 4  ;;  %v918_v30 = vadd.f32 %v10134_v45, %v917_v5 }
 0x486   :  { %v10236_v56 = vmax.f32 %v10217_v43, %v3984_v44  ;;  %v10238_v33 = vmax.f32 %v4970_v58, %v4971_v18  ;;  %v10240_v7 = vmax.f32 %v4977_v49, %v4978_v39  ;;  %v2981_v51 = vrot.slane %v2980_v20, 2 }
 0x487   :  { %v2988_v48 = vrot.slane %v2987_v34, 2  ;;  %v2994_v4 = vmax.f32 %v2992_v19, %v2993_v17  ;;  %v3001_v23 = vmax.f32 %v2999_v42, %v3000_v55  ;;  %v1186_v40 = vmax.f32 %v918_v30, 0.0 }
 0x488   :  { %v10242_v61 = vmax.f32 %v4984_v2, %v4985_v3  ;;  %v10244_v31 = vmax.f32 %v4991_v59, %v4992_v11  ;;  %v10246_v41 = vmax.f32 %v5978_v32, %v5979_v1  ;;  %v6000_v54 = vrot.slane %v5999_v52, 1  ;;  %v830_v2 = vpop.f32.mrf.mxu0 }
 0x489   :  { %v10248_v63 = vmax.f32 %v5985_v62, %v5986_v47  ;;  %v10250_v43 = vmax.f32 %v5992_v14, %v5993_v9  ;;  %v2982_v58 = vmax.f32 %v2980_v20, %v2981_v51  ;;  %v1596_v49 = vrot.slane %v1186_v40, 2 }
 0x48a   :  { %v1597_v28 = vrot.slane %v1186_v40, 4  ;;  %v1598_v10 = vrot.slane %v1186_v40, 6  ;;  %v3986_v27 = vsel %vm2277_vm1, %v1186_v40, -inf  ;;  %v1008_v44 = vadd.f32 %v10134_v45, %v1007_v15 }
 0x48b   :  { %v2989_v0 = vmax.f32 %v2987_v34, %v2988_v48  ;;  %v2995_v59 = vrot.slane %v2994_v4, 2  ;;  %v3002_v25 = vrot.slane %v3001_v23, 2  ;;  %v3987_v6 = vrot.slane %v3986_v27, 4 }
 0x48c   :  { %v10254_v35 = vmax.f32 %v5999_v52, %v6000_v54  ;;  %v3993_v18 = vsel %vm2277_vm1, %v1596_v49, -inf  ;;  %v4000_v39 = vsel %vm2277_vm1, %v1597_v28, -inf  ;;  %v4007_v32 = vsel %vm2277_vm1, %v1598_v10, -inf }
 0x48d   :  { %v2983_v22 = vrot.slane %v2982_v58, 1  ;;  %v3988_v53 = vmax.f32 %v3986_v27, %v3987_v6  ;;  %v1098_v29 = vadd.f32 %v10134_v45, %v1097_v24  ;;  %v10261_v57 = vadd.f32 %v10134_v45, %v830_v2 }
 0x48e   :  { %v3994_v3 = vrot.slane %v3993_v18, 4  ;;  %v4001_v46 = vrot.slane %v4000_v39, 4  ;;  %v4008_v60 = vrot.slane %v4007_v32, 4  ;;  %v1222_v37 = vmax.f32 %v1008_v44, 0.0 }
 0x48f   :  { %v2990_v11 = vrot.slane %v2989_v0, 1  ;;  %v2996_v62 = vmax.f32 %v2994_v4, %v2995_v59  ;;  %v3003_v14 = vmax.f32 %v3001_v23, %v3002_v25  ;;  %v3989_v13 = vrot.slane %v3988_v53, 2 }
 0x490   :  { %v3995_v5 = vmax.f32 %v3993_v18, %v3994_v3  ;;  %v4002_v1 = vmax.f32 %v4000_v39, %v4001_v46  ;;  %v4009_v12 = vmax.f32 %v4007_v32, %v4008_v60  ;;  %v1704_v19 = vrot.slane %v1222_v37, 2 }
 0x491   :  { %v3990_v42 = vmax.f32 %v3988_v53, %v3989_v13  ;;  %v1705_v47 = vrot.slane %v1222_v37, 4  ;;  %v1706_v9 = vrot.slane %v1222_v37, 6  ;;  %v4994_v52 = vsel %vm2277_vm1, %v1222_v37, -inf }
 0x492   :  { %v3996_v20 = vrot.slane %v3995_v5, 2  ;;  %v4003_v34 = vrot.slane %v4002_v1, 2  ;;  %v4010_v17 = vrot.slane %v4009_v12, 2  ;;  %v4995_v55 = vrot.slane %v4994_v52, 4 }
 0x493   :  { %v5001_v30 = vsel %vm2277_vm1, %v1704_v19, -inf  ;;  %v5008_v51 = vsel %vm2277_vm1, %v1705_v47, -inf  ;;  %v5015_v48 = vsel %vm2277_vm1, %v1706_v9, -inf  ;;  %v1258_v4 = vmax.f32 %v1098_v29, 0.0 }
 0x494   :  { %v2997_v23 = vrot.slane %v2996_v62, 1  ;;  %v3004_v40 = vrot.slane %v3003_v14, 1  ;;  %v3997_v15 = vmax.f32 %v3995_v5, %v3996_v20  ;;  %v4996_v54 = vmax.f32 %v4994_v52, %v4995_v55 }
 0x495   :  { %v4004_v49 = vmax.f32 %v4002_v1, %v4003_v34  ;;  %v5002_v28 = vrot.slane %v5001_v30, 4  ;;  %v5009_v10 = vrot.slane %v5008_v51, 4  ;;  %v5016_v27 = vrot.slane %v5015_v48, 4 }
 0x496   :  { %v10267_v44 = vmax.f32 %v2982_v58, %v2983_v22  ;;  %v3991_v24 = vrot.slane %v3990_v42, 1  ;;  %v4011_v2 = vmax.f32 %v4009_v12, %v4010_v17  ;;  %v4997_v59 = vrot.slane %v4996_v54, 2 }
 0x497   :  { %v5003_v25 = vmax.f32 %v5001_v30, %v5002_v28  ;;  %v5010_v6 = vmax.f32 %v5008_v51, %v5009_v10  ;;  %v5017_v18 = vmax.f32 %v5015_v48, %v5016_v27  ;;  %v1812_v39 = vrot.slane %v1258_v4, 2 }
 0x498   :  { %v10269_v32 = vmax.f32 %v2989_v0, %v2990_v11  ;;  %v10271_v53 = vmax.f32 %v2996_v62, %v2997_v23  ;;  %v10273_v29 = vmax.f32 %v3003_v14, %v3004_v40  ;;  %v3998_v3 = vrot.slane %v3997_v15, 1 }
 0x499   :  { %v4005_v46 = vrot.slane %v4004_v49, 1  ;;  %v5004_v60 = vrot.slane %v5003_v25, 2  ;;  %v5011_v37 = vrot.slane %v5010_v6, 2  ;;  %v1813_v13 = vrot.slane %v1258_v4, 4 }
 0x49a   :  { %v10275_v58 = vmax.f32 %v3990_v42, %v3991_v24  ;;  %v1814_v22 = vrot.slane %v1258_v4, 6  ;;  %v6002_v5 = vsel %vm2277_vm1, %v1258_v4, -inf  ;;  %v6009_v1 = vsel %vm2277_vm1, %v1812_v39, -inf }
 0x49b   :  { %v4012_v12 = vrot.slane %v4011_v2, 1  ;;  %v4998_v19 = vmax.f32 %v4996_v54, %v4997_v59  ;;  %v5018_v0 = vrot.slane %v5017_v18, 2  ;;  %v6003_v11 = vrot.slane %v6002_v5, 4 }
 0x49c   :  { %11187 = vst [vmem:[#allocation16_spill] sm:$0xff] %v10275_v58  ;;  %v10279_v62 = vmax.f32 %v3997_v15, %v3998_v3  ;;  %v6010_v14 = vrot.slane %v6009_v1, 4  ;;  %v6016_v47 = vsel %vm2277_vm1, %v1813_v13, -inf  ;;  %v6023_v9 = vsel %vm2277_vm1, %v1814_v22, -inf  ;;  %v832_v58 = vpop.f32.mrf.mxu0 }
 0x49d   :  { %v10283_v52 = vmax.f32 %v4004_v49, %v4005_v46  ;;  %v5005_v42 = vmax.f32 %v5003_v25, %v5004_v60  ;;  %v5012_v20 = vmax.f32 %v5010_v6, %v5011_v37  ;;  %v6004_v34 = vmax.f32 %v6002_v5, %v6003_v11  ;;  %v920_v5 = vpop.f32.mrf.mxu1 }
 0x49e   :  { %11188 = vst [vmem:[#allocation17_spill] sm:$0xff] %v10279_v62  ;;  %v6011_v17 = vmax.f32 %v6009_v1, %v6010_v14  ;;  %v6017_v55 = vrot.slane %v6016_v47, 4  ;;  %v6024_v30 = vrot.slane %v6023_v9, 4  ;;  %v1151_v51 = vmax.f32 %v10261_v57, 0.0  ;;  %v1010_v14 = vpop.f32.mrf.mxu2 }
 0x49f   :  { %11189 = vst [vmem:[#allocation18_spill] sm:$0xff] %v10283_v52  ;;  %v10286_v48 = vmax.f32 %v4011_v2, %v4012_v12  ;;  %v4999_v4 = vrot.slane %v4998_v19, 1  ;;  %v5019_v23 = vmax.f32 %v5017_v18, %v5018_v0  ;;  %v6005_v40 = vrot.slane %v6004_v34, 2 }
 0x4a0   :  { %v6012_v15 = vrot.slane %v6011_v17, 2  ;;  %v6018_v54 = vmax.f32 %v6016_v47, %v6017_v55  ;;  %v6025_v28 = vmax.f32 %v6023_v9, %v6024_v30  ;;  %v1491_v10 = vrot.slane %v1151_v51, 2 }
 0x4a1   :  { %11190 = vst [vmem:[#allocation19_spill] sm:$0xff] %v10286_v48  ;;  %v5006_v27 = vrot.slane %v5005_v42, 1  ;;  %v1492_v49 = vrot.slane %v1151_v51, 4  ;;  %v1493_v24 = vrot.slane %v1151_v51, 6  ;;  %v3006_v59 = vsel %vm2277_vm1, %v1151_v51, -inf }
 0x4a2   :  { %v5013_v25 = vrot.slane %v5012_v20, 1  ;;  %v6006_v6 = vmax.f32 %v6004_v34, %v6005_v40  ;;  %v6013_v39 = vmax.f32 %v6011_v17, %v6012_v15  ;;  %v3007_v3 = vrot.slane %v3006_v59, 4 }
 0x4a3   :  { %v10289_v46 = vmax.f32 %v4998_v19, %v4999_v4  ;;  %v3013_v57 = vsel %vm2277_vm1, %v1491_v10, -inf  ;;  %v3020_v2 = vsel %vm2277_vm1, %v1492_v49, -inf  ;;  %v3027_v18 = vsel %vm2277_vm1, %v1493_v24, -inf }
 0x4a4   :  { %v5020_v60 = vrot.slane %v5019_v23, 1  ;;  %v6019_v37 = vrot.slane %v6018_v54, 2  ;;  %v6026_v13 = vrot.slane %v6025_v28, 2  ;;  %v3008_v22 = vmax.f32 %v3006_v59, %v3007_v3 }
 0x4a5   :  { %11191 = vst [vmem:[#allocation20_spill] sm:$0xff] %v10289_v46  ;;  %v10294_v1 = vmax.f32 %v5005_v42, %v5006_v27  ;;  %v3014_v12 = vrot.slane %v3013_v57, 4  ;;  %v3021_v0 = vrot.slane %v3020_v2, 4  ;;  %v3028_v11 = vrot.slane %v3027_v18, 4 }
 0x4a6   :  { %v10296_v47 = vmax.f32 %v5012_v20, %v5013_v25  ;;  %v6007_v19 = vrot.slane %v6006_v6, 1  ;;  %v6014_v9 = vrot.slane %v6013_v39, 1  ;;  %v3009_v34 = vrot.slane %v3008_v22, 2 }
 0x4a7   :  { %11192 = vst [vmem:[#allocation21_spill] sm:$0xff] %v10294_v1  ;;  %v3015_v17 = vmax.f32 %v3013_v57, %v3014_v12  ;;  %v3022_v55 = vmax.f32 %v3020_v2, %v3021_v0  ;;  %v3029_v30 = vmax.f32 %v3027_v18, %v3028_v11  ;;  %v921_v51 = vadd.f32 %v10134_v45, %v920_v5  ;;  %v1100_v57 = vpop.f32.mrf.mxu3 }
 0x4a8   :  { %11193 = vst [vmem:[#allocation2_spill] sm:$0xff] %v10296_v47  ;;  %v6020_v4 = vmax.f32 %v6018_v54, %v6019_v37  ;;  %v10299_v40 = vmax.f32 %v6025_v28, %v6026_v13  ;;  %v10301_v15 = vmax.f32 %v3008_v22, %v3009_v34  ;;  %v1011_v42 = vadd.f32 %v10134_v45, %v1010_v14 }
 0x4a9   :  { %v3016_v10 = vrot.slane %v3015_v17, 2  ;;  %v3023_v27 = vrot.slane %v3022_v55, 2  ;;  %v3030_v49 = vrot.slane %v3029_v30, 2  ;;  %v1187_v20 = vmax.f32 %v921_v51, 0.0 }
 0x4aa   :  { %v10304_v24 = vmax.f32 %v5019_v23, %v5020_v60  ;;  %v10306_v59 = vmax.f32 %v6006_v6, %v6007_v19  ;;  %v10308_v25 = vmax.f32 %v6013_v39, %v6014_v9  ;;  %v1223_v3 = vmax.f32 %v1011_v42, 0.0 }
 0x4ab   :  { %v3017_v2 = vmax.f32 %v3015_v17, %v3016_v10  ;;  %v3024_v54 = vmax.f32 %v3022_v55, %v3023_v27  ;;  %v3031_v28 = vmax.f32 %v3029_v30, %v3030_v49  ;;  %v1599_v18 = vrot.slane %v1187_v20, 2 }
 0x4ac   :  { %11194 = vst [vmem:[#allocation3_spill] sm:$0xff] %v10304_v24  ;;  %v6021_v37 = vrot.slane %v6020_v4, 1  ;;  %v1600_v13 = vrot.slane %v1187_v20, 4  ;;  %v1601_v22 = vrot.slane %v1187_v20, 6  ;;  %v4014_v5 = vsel %vm2277_vm1, %v1187_v20, -inf }
 0x4ad   :  { %11195 = vst [vmem:[#allocation4_spill] sm:$0xff] %v10306_v59  ;;  %v6028_v12 = vrot.slane %v10299_v40, 1  ;;  %v3011_v23 = vrot.slane %v10301_v15, 1  ;;  %v4015_v60 = vrot.slane %v4014_v5, 4  ;;  %v1101_v6 = vadd.f32 %v10134_v45, %v1100_v57 }
 0x4ae   :  { %11196 = vst [vmem:[#allocation5_spill] sm:$0xff] %v10308_v25  ;;  %v4021_v39 = vsel %vm2277_vm1, %v1599_v18, -inf  ;;  %v4028_v0 = vsel %vm2277_vm1, %v1600_v13, -inf  ;;  %v4035_v11 = vsel %vm2277_vm1, %v1601_v22, -inf  ;;  %v1707_v14 = vrot.slane %v1223_v3, 2 }
 0x4af   :  { %v3018_v19 = vrot.slane %v3017_v2, 1  ;;  %v3025_v9 = vrot.slane %v3024_v54, 1  ;;  %v3032_v34 = vrot.slane %v3031_v28, 1  ;;  %v4016_v17 = vmax.f32 %v4014_v5, %v4015_v60 }
 0x4b0   :  { %v4022_v55 = vrot.slane %v4021_v39, 4  ;;  %v4029_v30 = vrot.slane %v4028_v0, 4  ;;  %v4036_v51 = vrot.slane %v4035_v11, 4  ;;  %v1708_v42 = vrot.slane %v1223_v3, 4 }
 0x4b1   :  { %v4017_v10 = vrot.slane %v4016_v17, 2  ;;  %v1709_v27 = vrot.slane %v1223_v3, 6  ;;  %v5022_v49 = vsel %vm2277_vm1, %v1223_v3, -inf  ;;  %v5029_v20 = vsel %vm2277_vm1, %v1707_v14, -inf }
 0x4b2   :  { %v4023_v57 = vmax.f32 %v4021_v39, %v4022_v55  ;;  %v4030_v18 = vmax.f32 %v4028_v0, %v4029_v30  ;;  %v4037_v13 = vmax.f32 %v4035_v11, %v4036_v51  ;;  %v5023_v25 = vrot.slane %v5022_v49, 4 }
 0x4b3   :  { %v4018_v22 = vmax.f32 %v4016_v17, %v4017_v10  ;;  %v5030_v59 = vrot.slane %v5029_v20, 4  ;;  %v5036_v24 = vsel %vm2277_vm1, %v1708_v42, -inf  ;;  %v5043_v5 = vsel %vm2277_vm1, %v1709_v27, -inf }
 0x4b4   :  { %v4024_v60 = vrot.slane %v4023_v57, 2  ;;  %v4031_v47 = vrot.slane %v4030_v18, 2  ;;  %v4038_v1 = vrot.slane %v4037_v13, 2  ;;  %v5024_v46 = vmax.f32 %v5022_v49, %v5023_v25 }
 0x4b5   :  { %v4019_v48 = vrot.slane %v4018_v22, 1  ;;  %v5031_v52 = vmax.f32 %v5029_v20, %v5030_v59  ;;  %v5037_v62 = vrot.slane %v5036_v24, 4  ;;  %v5044_v3 = vrot.slane %v5043_v5, 4 }
 0x4b6   :  { %v4025_v14 = vmax.f32 %v4023_v57, %v4024_v60  ;;  %v4032_v39 = vmax.f32 %v4030_v18, %v4031_v47  ;;  %v4039_v0 = vmax.f32 %v4037_v13, %v4038_v1  ;;  %v5025_v11 = vrot.slane %v5024_v46, 2 }
 0x4b7   :  { %v10321_v55 = vmax.f32 %v6020_v4, %v6021_v37  ;;  %v5032_v17 = vrot.slane %v5031_v52, 2  ;;  %v5038_v30 = vmax.f32 %v5036_v24, %v5037_v62  ;;  %v5045_v51 = vmax.f32 %v5043_v5, %v5044_v3 }
 0x4b8   :  { %v10324_v42 = vmax.f32 %v10299_v40, %v6028_v12  ;;  %v10327_v10 = vmax.f32 %v10301_v15, %v3011_v23  ;;  %v4026_v25 = vrot.slane %v4025_v14, 1  ;;  %v833_v59 = vadd.f32 %v10134_v45, %v832_v58 }
 0x4b9   :  { %v4033_v27 = vrot.slane %v4032_v39, 1  ;;  %v4040_v49 = vrot.slane %v4039_v0, 1  ;;  %v5026_v20 = vmax.f32 %v5024_v46, %v5025_v11  ;;  %v1259_v47 = vmax.f32 %v1101_v6, 0.0 }
 0x4ba   :  { %v10330_v1 = vmax.f32 %v3017_v2, %v3018_v19  ;;  %v10332_v4 = vmax.f32 %v3024_v54, %v3025_v9  ;;  %v10334_v37 = vmax.f32 %v3031_v28, %v3032_v34  ;;  %v10336_v62 = vmax.f32 %v4018_v22, %v4019_v48 }
 0x4bb   :  { %v5033_v40 = vmax.f32 %v5031_v52, %v5032_v17  ;;  %v5039_v24 = vrot.slane %v5038_v30, 2  ;;  %v5046_v12 = vrot.slane %v5045_v51, 2  ;;  %v1815_v15 = vrot.slane %v1259_v47, 2 }
 0x4bc   :  { %v10338_v23 = vmax.f32 %v4025_v14, %v4026_v25  ;;  %v1816_v57 = vrot.slane %v1259_v47, 4  ;;  %v1817_v45 = vrot.slane %v1259_v47, 6  ;;  %v6030_v58 = vsel %vm2277_vm1, %v1259_v47, -inf }
 0x4bd   :  { %v10341_v46 = vmax.f32 %v4032_v39, %v4033_v27  ;;  %v10343_v2 = vmax.f32 %v4039_v0, %v4040_v49  ;;  %v5027_v54 = vrot.slane %v5026_v20, 1  ;;  %v6031_v6 = vrot.slane %v6030_v58, 4 }
 0x4be   :  { %v6037_v28 = vsel %vm2277_vm1, %v1815_v15, -inf  ;;  %v6044_v48 = vsel %vm2277_vm1, %v1816_v57, -inf  ;;  %v6051_v52 = vsel %vm2277_vm1, %v1817_v45, -inf  ;;  %v1152_v19 = vmax.f32 %v833_v59, 0.0 }
 0x4bf   :  { %v5040_v9 = vmax.f32 %v5038_v30, %v5039_v24  ;;  %v5047_v34 = vmax.f32 %v5045_v51, %v5046_v12  ;;  %v6032_v18 = vmax.f32 %v6030_v58, %v6031_v6  ;;  %v6038_v13 = vrot.slane %v6037_v28, 4 }
 0x4c0   :  { %v6045_v22 = vrot.slane %v6044_v48, 4  ;;  %v6052_v5 = vrot.slane %v6051_v52, 4  ;;  %v1494_v60 = vrot.slane %v1152_v19, 2  ;;  %v1495_v3 = vrot.slane %v1152_v19, 4 }
 0x4c1   :  { %v6033_v14 = vrot.slane %v6032_v18, 2  ;;  %v6039_v39 = vmax.f32 %v6037_v28, %v6038_v13  ;;  %v1496_v0 = vrot.slane %v1152_v19, 6  ;;  %v3034_v11 = vsel %vm2277_vm1, %v1152_v19, -inf }
 0x4c2   :  { %v6046_v17 = vmax.f32 %v6044_v48, %v6045_v22  ;;  %v6053_v25 = vmax.f32 %v6051_v52, %v6052_v5  ;;  %v3035_v27 = vrot.slane %v3034_v11, 4  ;;  %v3041_v49 = vsel %vm2277_vm1, %v1494_v60, -inf  ;;  %v922_v22 = vpop.f32.mrf.mxu1 }
 0x4c3   :  { %v5034_v47 = vrot.slane %v5033_v40, 1  ;;  %v6034_v59 = vmax.f32 %v6032_v18, %v6033_v14  ;;  %v3042_v30 = vrot.slane %v3041_v49, 4  ;;  %v3048_v51 = vsel %vm2277_vm1, %v1495_v3, -inf }
 0x4c4   :  { %v5041_v24 = vrot.slane %v5040_v9, 1  ;;  %v5048_v12 = vrot.slane %v5047_v34, 1  ;;  %v3036_v15 = vmax.f32 %v3034_v11, %v3035_v27  ;;  %v3049_v57 = vrot.slane %v3048_v51, 4 }
 0x4c5   :  { %v10351_v45 = vmax.f32 %v5026_v20, %v5027_v54  ;;  %v6040_v58 = vrot.slane %v6039_v39, 2  ;;  %v3043_v6 = vmax.f32 %v3041_v49, %v3042_v30  ;;  %v3055_v28 = vsel %vm2277_vm1, %v1496_v0, -inf  ;;  %v10365_v30 = vld [vmem:[%s11046_s2] ss:$0 sm:$0xff] }
 0x4c6   :  { %v6047_v48 = vrot.slane %v6046_v17, 2  ;;  %v6054_v52 = vrot.slane %v6053_v25, 2  ;;  %v3037_v19 = vrot.slane %v3036_v15, 2  ;;  %v3050_v13 = vmax.f32 %v3048_v51, %v3049_v57  ;;  %v1102_v51 = vpop.f32.mrf.mxu3 }
 0x4c7   :  { %v10354_v5 = vmax.f32 %v5033_v40, %v5034_v47  ;;  %v6035_v18 = vrot.slane %v6034_v59, 1  ;;  %v3044_v60 = vrot.slane %v3043_v6, 2  ;;  %v3056_v3 = vrot.slane %v3055_v28, 4  ;;  %v1012_v47 = vpop.f32.mrf.mxu2 }
 0x4c8   :  { %v10356_v14 = vmax.f32 %v5040_v9, %v5041_v24  ;;  %v10358_v11 = vmax.f32 %v5047_v34, %v5048_v12  ;;  %v3038_v20 = vmax.f32 %v3036_v15, %v3037_v19  ;;  %v3051_v54 = vrot.slane %v3050_v13, 2 }
 0x4c9   :  { %v10360_v27 = vmax.f32 %v6039_v39, %v6040_v58  ;;  %v3045_v49 = vmax.f32 %v3043_v6, %v3044_v60  ;;  %v3057_v0 = vmax.f32 %v3055_v28, %v3056_v3  ;;  %v923_v40 = vadd.f32 %v10365_v30, %v922_v22 }
 0x4ca   :  { %11197 = vst [vmem:[#allocation6_spill] sm:$0xff] %v10356_v14  ;;  %v10368_v57 = vmax.f32 %v6046_v17, %v6047_v48  ;;  %v10370_v9 = vmax.f32 %v6053_v25, %v6054_v52  ;;  %v3039_v34 = vrot.slane %v3038_v20, 1  ;;  %v3052_v24 = vmax.f32 %v3050_v13, %v3051_v54 }
 0x4cb   :  { %11198 = vst [vmem:[#allocation7_spill] sm:$0xff] %v10358_v11  ;;  %v10372_v12 = vmax.f32 %v6034_v59, %v6035_v18  ;;  %v3046_v39 = vrot.slane %v3045_v49, 1  ;;  %v3058_v15 = vrot.slane %v3057_v0, 2  ;;  %v1188_v58 = vmax.f32 %v923_v40, 0.0  ;;  %v835_v11 = vpop.f32.mrf.mxu0 }
 0x4cc   :  { %v3040_v6 = vmax.f32 %v3038_v20, %v3039_v34  ;;  %v3053_v28 = vrot.slane %v3052_v24, 1  ;;  %v1013_v19 = vadd.f32 %v10365_v30, %v1012_v47  ;;  %v10376_v60 = vadd.f32 %v10365_v30, %v1102_v51 }
 0x4cd   :  { %11199 = vst [vmem:[#allocation8_spill] sm:$0xff] %v10372_v12  ;;  %v3047_v22 = vmax.f32 %v3045_v49, %v3046_v39  ;;  %v3059_v3 = vmax.f32 %v3057_v0, %v3058_v15  ;;  %v1602_v17 = vrot.slane %v1188_v58, 2  ;;  %v1603_v48 = vrot.slane %v1188_v58, 4 }
 0x4ce   :  { %v3054_v25 = vmax.f32 %v3052_v24, %v3053_v28  ;;  %v6358_v52 = vmax.f32 %v10203_v8, %v3040_v6  ;;  %v1604_v13 = vrot.slane %v1188_v58, 6  ;;  %v4042_v59 = vsel %vm2277_vm1, %v1188_v58, -inf }
 0x4cf   :  { %v3060_v18 = vrot.slane %v3059_v3, 1  ;;  %v6359_v54 = vmax.f32 %v10205_v26, %v3047_v22  ;;  %v4043_v20 = vrot.slane %v4042_v59, 4  ;;  %v4049_v40 = vsel %vm2277_vm1, %v1602_v17, -inf }
 0x4d0   :  { %v6360_v47 = vmax.f32 %v10209_v38, %v3054_v25  ;;  %v6646_v51 = vpack.c.bf16 %v6358_v52, %v6358_v52  ;;  %v4050_v34 = vrot.slane %v4049_v40, 4  ;;  %v4056_v49 = vsel %vm2277_vm1, %v1603_v48, -inf }
 0x4d1   :  { %v3061_v0 = vmax.f32 %v3059_v3, %v3060_v18  ;;  %v6647_v39 = vpack.c.bf16 %v6359_v54, %v6359_v54  ;;  %v4044_v24 = vmax.f32 %v4042_v59, %v4043_v20  ;;  %v4057_v15 = vrot.slane %v4056_v49, 4 }
 0x4d2   :  { %v6648_v8 = vpack.c.bf16 %v6360_v47, %v6360_v47  ;;  %v7222_v6 = vunpack.c.l.b16 %v6646_v51  ;;  %v4051_v28 = vmax.f32 %v4049_v40, %v4050_v34  ;;  %v4063_v58 = vsel %vm2277_vm1, %v1604_v13, -inf }
 0x4d3   :  { %v6361_v26 = vmax.f32 %v10214_v36, %v3061_v0  ;;  %v7223_v22 = vunpack.c.l.b16 %v6647_v39  ;;  %v4045_v12 = vrot.slane %v4044_v24, 2  ;;  %v4058_v17 = vmax.f32 %v4056_v49, %v4057_v15 }
 0x4d4   :  { %v7224_v38 = vunpack.c.l.b16 %v6648_v8  ;;  %v4052_v25 = vrot.slane %v4051_v28, 2  ;;  %v4064_v52 = vrot.slane %v4063_v58, 4  ;;  %v1224_v14 = vmax.f32 %v1013_v19, 0.0 }
 0x4d5   :  { %v6649_v48 = vpack.c.bf16 %v6361_v26, %v6361_v26  ;;  %v7511_v3 = vsel %vm7462_vm2, %v7223_v22, %v7222_v6  ;;  %v4046_v59 = vmax.f32 %v4044_v24, %v4045_v12  ;;  %v4059_v18 = vrot.slane %v4058_v17, 2 }
 0x4d6   :  { %v4053_v54 = vmax.f32 %v4051_v28, %v4052_v25  ;;  %v4065_v20 = vmax.f32 %v4063_v58, %v4064_v52  ;;  %v1710_v40 = vrot.slane %v1224_v14, 2  ;;  %v10388_v13 = vadd.f32 %v10365_v30, %v835_v11 }
 0x4d7   :  { %v7512_v36 = vsel %vm7464_vm3, %v7224_v38, %v7511_v3  ;;  %v4047_v47 = vrot.slane %v4046_v59, 1  ;;  %v4060_v51 = vmax.f32 %v4058_v17, %v4059_v18  ;;  %v1711_v34 = vrot.slane %v1224_v14, 4 }
 0x4d8   :  { %v4054_v49 = vrot.slane %v4053_v54, 1  ;;  %v4066_v0 = vrot.slane %v4065_v20, 2  ;;  %v1712_v39 = vrot.slane %v1224_v14, 6  ;;  %v5050_v19 = vsel %vm2277_vm1, %v1224_v14, -inf }
 0x4d9   :  { %v7225_v15 = vunpack.c.l.b16 %v6649_v48  ;;  %v4048_v8 = vmax.f32 %v4046_v59, %v4047_v47  ;;  %v4061_v12 = vrot.slane %v4060_v51, 1  ;;  %v5051_v24 = vrot.slane %v5050_v19, 4 }
 0x4da   :  { %v4055_v6 = vmax.f32 %v4053_v54, %v4054_v49  ;;  %v4067_v28 = vmax.f32 %v4065_v20, %v4066_v0  ;;  %v5057_v58 = vsel %vm2277_vm1, %v1710_v40, -inf  ;;  %v5064_v11 = vsel %vm2277_vm1, %v1711_v34, -inf }
 0x4db   :  { %v4062_v26 = vmax.f32 %v4060_v51, %v4061_v12  ;;  %v6430_v22 = vmax.f32 %v10219_v21, %v4048_v8  ;;  %v5052_v17 = vmax.f32 %v5050_v19, %v5051_v24  ;;  %v5058_v38 = vrot.slane %v5057_v58, 4 }
 0x4dc   :  { %v4068_v25 = vrot.slane %v4067_v28, 1  ;;  %v6431_v52 = vmax.f32 %v10225_v50, %v4055_v6  ;;  %v5065_v3 = vrot.slane %v5064_v11, 4  ;;  %v5071_v14 = vsel %vm2277_vm1, %v1712_v39, -inf }
 0x4dd   :  { %v6432_v48 = vmax.f32 %v10228_v16, %v4062_v26  ;;  %v6718_v59 = vpack.c.bf16 %v6430_v22, %v6430_v22  ;;  %v5053_v18 = vrot.slane %v5052_v17, 2  ;;  %v5059_v54 = vmax.f32 %v5057_v58, %v5058_v38 }
 0x4de   :  { %v4069_v20 = vmax.f32 %v4067_v28, %v4068_v25  ;;  %v6719_v40 = vpack.c.bf16 %v6431_v52, %v6431_v52  ;;  %v5066_v47 = vmax.f32 %v5064_v11, %v5065_v3  ;;  %v5072_v34 = vrot.slane %v5071_v14, 4 }
 0x4df   :  { %v6720_v51 = vpack.c.bf16 %v6432_v48, %v6432_v48  ;;  %v7294_v49 = vunpack.c.l.b16 %v6718_v59  ;;  %v5054_v21 = vmax.f32 %v5052_v17, %v5053_v18  ;;  %v5060_v0 = vrot.slane %v5059_v54, 2 }
 0x4e0   :  { %v6433_v19 = vmax.f32 %v10236_v56, %v4069_v20  ;;  %v7295_v8 = vunpack.c.l.b16 %v6719_v40  ;;  %v5067_v50 = vrot.slane %v5066_v47, 2  ;;  %v5073_v12 = vmax.f32 %v5071_v14, %v5072_v34 }
 0x4e1   :  { %v7296_v24 = vunpack.c.l.b16 %v6720_v51  ;;  %v5055_v39 = vrot.slane %v5054_v21, 1  ;;  %v5061_v6 = vmax.f32 %v5059_v54, %v5060_v0  ;;  %v1260_v16 = vmax.f32 %v10376_v60, 0.0 }
 0x4e2   :  { %v6721_v26 = vpack.c.bf16 %v6433_v19, %v6433_v19  ;;  %v7574_v28 = vsel %vm7462_vm2, %v7295_v8, %v7294_v49  ;;  %v5068_v58 = vmax.f32 %v5066_v47, %v5067_v50  ;;  %v5074_v11 = vrot.slane %v5073_v12, 2 }
 0x4e3   :  { %v10402_v22 = vsel %vm7466_vm4, %v7225_v15, %v7512_v36  ;;  %v5056_v17 = vmax.f32 %v5054_v21, %v5055_v39  ;;  %v5062_v38 = vrot.slane %v5061_v6, 1  ;;  %v1818_v25 = vrot.slane %v1260_v16, 2 }
 0x4e4   :  { %v7575_v56 = vsel %vm7464_vm3, %v7296_v24, %v7574_v28  ;;  %v5069_v52 = vrot.slane %v5068_v58, 1  ;;  %v5075_v3 = vmax.f32 %v5073_v12, %v5074_v11  ;;  %v1819_v14 = vrot.slane %v1260_v16, 4 }
 0x4e5   :  { %v5063_v48 = vmax.f32 %v5061_v6, %v5062_v38  ;;  %v6502_v59 = vmax.f32 %v10238_v33, %v5056_v17  ;;  %v1820_v60 = vrot.slane %v1260_v16, 6  ;;  %v6058_v18 = vsel %vm2277_vm1, %v1260_v16, -inf }
 0x4e6   :  { %v7297_v54 = vunpack.c.l.b16 %v6721_v26  ;;  %v5070_v20 = vmax.f32 %v5068_v58, %v5069_v52  ;;  %v5076_v40 = vrot.slane %v5075_v3, 1  ;;  %v6059_v47 = vrot.slane %v6058_v18, 4 }
 0x4e7   :  { %v6503_v36 = vmax.f32 %v10240_v7, %v5063_v48  ;;  %v6790_v15 = vpack.c.bf16 %v6502_v59, %v6502_v59  ;;  %v6065_v34 = vsel %vm2277_vm1, %v1818_v25, -inf  ;;  %v6072_v51 = vsel %vm2277_vm1, %v1819_v14, -inf }
 0x4e8   :  { %v5077_v49 = vmax.f32 %v5075_v3, %v5076_v40  ;;  %v6504_v21 = vmax.f32 %v10242_v61, %v5070_v20  ;;  %v6060_v0 = vmax.f32 %v6058_v18, %v6059_v47  ;;  %v6066_v19 = vrot.slane %v6065_v34, 4 }
 0x4e9   :  { %v6791_v33 = vpack.c.bf16 %v6503_v36, %v6503_v36  ;;  %v7366_v8 = vunpack.c.l.b16 %v6790_v15  ;;  %v6073_v50 = vrot.slane %v6072_v51, 4  ;;  %v6079_v12 = vsel %vm2277_vm1, %v1820_v60, -inf }
 0x4ea   :  { %v6505_v24 = vmax.f32 %v10244_v31, %v5077_v49  ;;  %v6792_v39 = vpack.c.bf16 %v6504_v21, %v6504_v21  ;;  %v6061_v6 = vrot.slane %v6060_v0, 2  ;;  %v6067_v7 = vmax.f32 %v6065_v34, %v6066_v19 }
 0x4eb   :  { %v7367_v16 = vunpack.c.l.b16 %v6791_v33  ;;  %v6074_v26 = vmax.f32 %v6072_v51, %v6073_v50  ;;  %v6080_v28 = vrot.slane %v6079_v12, 4  ;;  %v1153_v58 = vmax.f32 %v10388_v13, 0.0 }
 0x4ec   :  { %v6793_v11 = vpack.c.bf16 %v6505_v24, %v6505_v24  ;;  %v7368_v17 = vunpack.c.l.b16 %v6792_v39  ;;  %v6062_v61 = vmax.f32 %v6060_v0, %v6061_v6  ;;  %v6068_v38 = vrot.slane %v6067_v7, 2 }
 0x4ed   :  { %v7637_v25 = vsel %vm7462_vm2, %v7367_v16, %v7366_v8  ;;  %v6075_v52 = vrot.slane %v6074_v26, 2  ;;  %v6081_v3 = vmax.f32 %v6079_v12, %v6080_v28  ;;  %v1497_v14 = vrot.slane %v1153_v58, 2 }
 0x4ee   :  { %v10416_v48 = vsel %vm7466_vm4, %v7297_v54, %v7575_v56  ;;  %v7369_v31 = vunpack.c.l.b16 %v6793_v11  ;;  %v6063_v59 = vrot.slane %v6062_v61, 1  ;;  %v6069_v60 = vmax.f32 %v6067_v7, %v6068_v38 }
 0x4ef   :  { %v7638_v18 = vsel %vm7464_vm3, %v7368_v17, %v7637_v25  ;;  %v6076_v20 = vmax.f32 %v6074_v26, %v6075_v52  ;;  %v6082_v40 = vrot.slane %v6081_v3, 2  ;;  %v1498_v13 = vrot.slane %v1153_v58, 4  ;;  %v925_v17 = vpop.f32.mrf.mxu1 }
 0x4f0   :  { %v6064_v47 = vmax.f32 %v6062_v61, %v6063_v59  ;;  %v6070_v36 = vrot.slane %v6069_v60, 1  ;;  %v1499_v15 = vrot.slane %v1153_v58, 6  ;;  %v3062_v34 = vsel %vm2277_vm1, %v1153_v58, -inf }
 0x4f1   :  { %v6077_v51 = vrot.slane %v6076_v20, 1  ;;  %v6083_v49 = vmax.f32 %v6081_v3, %v6082_v40  ;;  %v3063_v21 = vrot.slane %v3062_v34, 4  ;;  %v3069_v0 = vsel %vm2277_vm1, %v1497_v14, -inf }
 0x4f2   :  { %v6071_v56 = vmax.f32 %v6069_v60, %v6070_v36  ;;  %v6574_v54 = vmax.f32 %v10246_v41, %v6064_v47  ;;  %v3070_v19 = vrot.slane %v3069_v0, 4  ;;  %v3076_v33 = vsel %vm2277_vm1, %v1498_v13, -inf }
 0x4f3   :  { %v6078_v8 = vmax.f32 %v6076_v20, %v6077_v51  ;;  %v6084_v50 = vrot.slane %v6083_v49, 1  ;;  %v3064_v12 = vmax.f32 %v3062_v34, %v3063_v21  ;;  %v3077_v24 = vrot.slane %v3076_v33, 4 }
 0x4f4   :  { %v6575_v39 = vmax.f32 %v10248_v63, %v6071_v56  ;;  %v6862_v6 = vpack.c.bf16 %v6574_v54, %v6574_v54  ;;  %v3071_v7 = vmax.f32 %v3069_v0, %v3070_v19  ;;  %v3083_v16 = vsel %vm2277_vm1, %v1499_v15, -inf }
 0x4f5   :  { %v6085_v26 = vmax.f32 %v6083_v49, %v6084_v50  ;;  %v6576_v28 = vmax.f32 %v10250_v43, %v6078_v8  ;;  %v3065_v58 = vrot.slane %v3064_v12, 2  ;;  %v3078_v11 = vmax.f32 %v3076_v33, %v3077_v24 }
 0x4f6   :  { %v6863_v41 = vpack.c.bf16 %v6575_v39, %v6575_v39  ;;  %v7438_v61 = vunpack.c.l.b16 %v6862_v6  ;;  %v3072_v38 = vrot.slane %v3071_v7, 2  ;;  %v3084_v25 = vrot.slane %v3083_v16, 4 }
 0x4f7   :  { %v6577_v52 = vmax.f32 %v10254_v35, %v6085_v26  ;;  %v6864_v3 = vpack.c.bf16 %v6576_v28, %v6576_v28  ;;  %v3066_v14 = vmax.f32 %v3064_v12, %v3065_v58  ;;  %v3079_v59 = vrot.slane %v3078_v11, 2 }
 0x4f8   :  { %v7439_v63 = vunpack.c.l.b16 %v6863_v41  ;;  %v3073_v60 = vmax.f32 %v3071_v7, %v3072_v38  ;;  %v3085_v20 = vmax.f32 %v3083_v16, %v3084_v25  ;;  %v926_v40 = vadd.f32 %v10365_v30, %v925_v17 }
 0x4f9   :  { %v6865_v13 = vpack.c.bf16 %v6577_v52, %v6577_v52  ;;  %v7440_v47 = vunpack.c.l.b16 %v6864_v3  ;;  %v3067_v43 = vrot.slane %v3066_v14, 1  ;;  %v3080_v36 = vmax.f32 %v3078_v11, %v3079_v59 }
 0x4fa   :  { %v7700_v15 = vsel %vm7462_vm2, %v7439_v63, %v7438_v61  ;;  %v3074_v34 = vrot.slane %v3073_v60, 1  ;;  %v3086_v51 = vrot.slane %v3085_v20, 2  ;;  %v1189_v49 = vmax.f32 %v926_v40, 0.0  ;;  %v1015_v63 = vpop.f32.mrf.mxu2 }
 0x4fb   :  { %v10430_v21 = vsel %vm7466_vm4, %v7369_v31, %v7638_v18  ;;  %v10432_v35 = vunpack.c.l.b16 %v6865_v13  ;;  %v3068_v0 = vmax.f32 %v3066_v14, %v3067_v43  ;;  %v3081_v56 = vrot.slane %v3080_v36, 1  ;;  %v1105_v13 = vpop.f32.mrf.mxu3 }
 0x4fc   :  { %v3075_v54 = vmax.f32 %v3073_v60, %v3074_v34  ;;  %v3087_v19 = vmax.f32 %v3085_v20, %v3086_v51  ;;  %v1605_v33 = vrot.slane %v1189_v49, 2  ;;  %v1606_v8 = vrot.slane %v1189_v49, 4  ;;  %v837_v34 = vpop.f32.mrf.mxu0 }
 0x4fd   :  { %v10435_v50 = vsel %vm7464_vm3, %v7440_v47, %v7700_v15  ;;  %v3082_v12 = vmax.f32 %v3080_v36, %v3081_v56  ;;  %v6362_v24 = vmax.f32 %v10267_v44, %v3068_v0  ;;  %v1607_v39 = vrot.slane %v1189_v49, 6 }
 0x4fe   :  { %v3088_v6 = vrot.slane %v3087_v19, 1  ;;  %v6363_v7 = vmax.f32 %v10269_v32, %v3075_v54  ;;  %v4070_v31 = vsel %vm2277_vm1, %v1189_v49, -inf  ;;  %v4077_v18 = vsel %vm2277_vm1, %v1605_v33, -inf }
 0x4ff   :  { %v6364_v16 = vmax.f32 %v10271_v53, %v3082_v12  ;;  %v6650_v26 = vpack.c.bf16 %v6362_v24, %v6362_v24  ;;  %v4071_v28 = vrot.slane %v4070_v31, 4  ;;  %v4078_v58 = vrot.slane %v4077_v18, 4 }
 0x500   :  { %v3089_v11 = vmax.f32 %v3087_v19, %v3088_v6  ;;  %v6651_v17 = vpack.c.bf16 %v6363_v7, %v6363_v7  ;;  %v4084_v41 = vsel %vm2277_vm1, %v1606_v8, -inf  ;;  %v4091_v61 = vsel %vm2277_vm1, %v1607_v39, -inf }
 0x501   :  { %v6652_v44 = vpack.c.bf16 %v6364_v16, %v6364_v16  ;;  %v7226_v38 = vunpack.c.l.b16 %v6650_v26  ;;  %v4072_v25 = vmax.f32 %v4070_v31, %v4071_v28  ;;  %v4079_v52 = vmax.f32 %v4077_v18, %v4078_v58 }
 0x502   :  { %v6365_v32 = vmax.f32 %v10273_v29, %v3089_v11  ;;  %v7227_v3 = vunpack.c.l.b16 %v6651_v17  ;;  %v4085_v14 = vrot.slane %v4084_v41, 4  ;;  %v4092_v59 = vrot.slane %v4091_v61, 4 }
 0x503   :  { %v7228_v53 = vunpack.c.l.b16 %v6652_v44  ;;  %v7514_v60 = vsel %vm7468_vm5, %v7226_v38, %v10402_v22  ;;  %v4073_v20 = vrot.slane %v4072_v25, 2  ;;  %v4080_v40 = vrot.slane %v4079_v52, 2  ;;  %v11201_v38 = vld [vmem:[#allocation17_spill] sm:$0xff] }
 0x504   :  { %v6653_v47 = vpack.c.bf16 %v6365_v32, %v6365_v32  ;;  %v7515_v43 = vsel %vm7470_vm6, %v7227_v3, %v7514_v60  ;;  %v4086_v36 = vmax.f32 %v4084_v41, %v4085_v14  ;;  %v4093_v15 = vmax.f32 %v4091_v61, %v4092_v59  ;;  %v11200_v61 = vld [vmem:[#allocation16_spill] sm:$0xff] }
 0x505   :  { %v7516_v51 = vsel %vm7472_vm7, %v7228_v53, %v7515_v43  ;;  %v4074_v29 = vmax.f32 %v4072_v25, %v4073_v20  ;;  %v4081_v49 = vmax.f32 %v4079_v52, %v4080_v40  ;;  %v1016_v0 = vadd.f32 %v10365_v30, %v1015_v63  ;;  %v11203_v43 = vld [vmem:[#allocation19_spill] sm:$0xff] }
 0x506   :  { %v7229_v56 = vunpack.c.l.b16 %v6653_v47  ;;  %v4087_v54 = vrot.slane %v4086_v36, 2  ;;  %v4094_v19 = vrot.slane %v4093_v15, 2  ;;  %v1106_v22 = vadd.f32 %v10365_v30, %v1105_v13  ;;  %v11202_v13 = vld [vmem:[#allocation18_spill] sm:$0xff] }
 0x507   :  { %v4075_v33 = vrot.slane %v4074_v29, 1  ;;  %v4082_v8 = vrot.slane %v4081_v49, 1  ;;  %v1225_v12 = vmax.f32 %v1016_v0, 0.0  ;;  %v10452_v24 = vadd.f32 %v10365_v30, %v837_v34 }
 0x508   :  { %v7517_v39 = vsel %vm7474_vm8, %v7229_v56, %v7516_v51  ;;  %v4088_v6 = vmax.f32 %v4086_v36, %v4087_v54  ;;  %v4095_v7 = vmax.f32 %v4093_v15, %v4094_v19  ;;  %v10455_v31 = vmax.f32 %v1106_v22, 0.0 }
 0x509   :  { %v7727_v18 = vpack.c.b16 %v7517_v39, %v7517_v39  ;;  %v4076_v16 = vmax.f32 %v4074_v29, %v4075_v33  ;;  %v4083_v26 = vmax.f32 %v4081_v49, %v4082_v8  ;;  %v1713_v28 = vrot.slane %v1225_v12, 2 }
 0x50a   :  { %v4089_v58 = vrot.slane %v4088_v6, 1  ;;  %v4096_v11 = vrot.slane %v4095_v7, 1  ;;  %v1714_v17 = vrot.slane %v1225_v12, 4  ;;  %v1715_v41 = vrot.slane %v1225_v12, 6 }
 0x50b   :  { %7799 = vst [vmem:[%s11047_s3 + $0x18] sm:$0xf] %v7727_v18  ;;  %v6434_v44 = vmax.f32 %v11200_v61, %v4076_v16  ;;  %v6435_v25 = vmax.f32 %v11201_v38, %v4083_v26  ;;  %v5078_v52 = vsel %vm2277_vm1, %v1225_v12, -inf  ;;  %v5085_v32 = vsel %vm2277_vm1, %v1713_v28, -inf }
 0x50c   :  { %v4090_v3 = vmax.f32 %v4088_v6, %v4089_v58  ;;  %v4097_v14 = vmax.f32 %v4095_v7, %v4096_v11  ;;  %v5079_v59 = vrot.slane %v5078_v52, 4  ;;  %v5086_v63 = vrot.slane %v5085_v32, 4 }
 0x50d   :  { %v6722_v53 = vpack.c.bf16 %v6434_v44, %v6434_v44  ;;  %v6723_v60 = vpack.c.bf16 %v6435_v25, %v6435_v25  ;;  %v5092_v20 = vsel %vm2277_vm1, %v1714_v17, -inf  ;;  %v5099_v40 = vsel %vm2277_vm1, %v1715_v41, -inf }
 0x50e   :  { %v6436_v47 = vmax.f32 %v11202_v13, %v4090_v3  ;;  %v6437_v36 = vmax.f32 %v11203_v43, %v4097_v14  ;;  %v5080_v15 = vmax.f32 %v5078_v52, %v5079_v59  ;;  %v5087_v34 = vmax.f32 %v5085_v32, %v5086_v63 }
 0x50f   :  { %v7298_v51 = vunpack.c.l.b16 %v6722_v53  ;;  %v7299_v29 = vunpack.c.l.b16 %v6723_v60  ;;  %v5093_v49 = vrot.slane %v5092_v20, 4  ;;  %v5100_v0 = vrot.slane %v5099_v40, 4 }
 0x510   :  { %v6724_v56 = vpack.c.bf16 %v6436_v47, %v6436_v47  ;;  %v6725_v54 = vpack.c.bf16 %v6437_v36, %v6437_v36  ;;  %v5081_v19 = vrot.slane %v5080_v15, 2  ;;  %v5088_v22 = vrot.slane %v5087_v34, 2 }
 0x511   :  { %v7577_v33 = vsel %vm7468_vm5, %v7298_v51, %v10416_v48  ;;  %v5094_v8 = vmax.f32 %v5092_v20, %v5093_v49  ;;  %v5101_v12 = vmax.f32 %v5099_v40, %v5100_v0  ;;  %v1821_v39 = vrot.slane %v10455_v31, 2  ;;  %v11204_v40 = vld [vmem:[#allocation20_spill] sm:$0xff] }
 0x512   :  { %v7300_v6 = vunpack.c.l.b16 %v6724_v56  ;;  %v7301_v7 = vunpack.c.l.b16 %v6725_v54  ;;  %v7578_v18 = vsel %vm7470_vm6, %v7299_v29, %v7577_v33  ;;  %v5082_v16 = vmax.f32 %v5080_v15, %v5081_v19  ;;  %v11206_v19 = vld [vmem:[#allocation2_spill] sm:$0xff]  ;;  %v11207_v33 = vld [vmem:[#allocation3_spill] sm:$0xff] }
 0x513   :  { %v5089_v26 = vmax.f32 %v5087_v34, %v5088_v22  ;;  %v5095_v28 = vrot.slane %v5094_v8, 2  ;;  %v5102_v58 = vrot.slane %v5101_v12, 2  ;;  %v1822_v11 = vrot.slane %v10455_v31, 4  ;;  %v11205_v34 = vld [vmem:[#allocation21_spill] sm:$0xff] }
 0x514   :  { %v7579_v17 = vsel %vm7472_vm7, %v7300_v6, %v7578_v18  ;;  %v5083_v41 = vrot.slane %v5082_v16, 1  ;;  %v1823_v61 = vrot.slane %v10455_v31, 6  ;;  %v6086_v48 = vsel %vm2277_vm1, %v10455_v31, -inf }
 0x515   :  { %v7580_v44 = vsel %vm7474_vm8, %v7301_v7, %v7579_v17  ;;  %v5090_v38 = vrot.slane %v5089_v26, 1  ;;  %v5096_v25 = vmax.f32 %v5094_v8, %v5095_v28  ;;  %v5103_v52 = vmax.f32 %v5101_v12, %v5102_v58 }
 0x516   :  { %v7736_v32 = vpack.c.b16 %v7580_v44, %v7580_v44  ;;  %v5084_v3 = vmax.f32 %v5082_v16, %v5083_v41  ;;  %v6087_v14 = vrot.slane %v6086_v48, 4  ;;  %v6093_v59 = vsel %vm2277_vm1, %v1821_v39, -inf  ;;  %v927_v44 = vpop.f32.mrf.mxu1 }
 0x517   :  { %v5091_v63 = vmax.f32 %v5089_v26, %v5090_v38  ;;  %v5097_v53 = vrot.slane %v5096_v25, 1  ;;  %v5104_v60 = vrot.slane %v5103_v52, 1  ;;  %v6094_v20 = vrot.slane %v6093_v59, 4 }
 0x518   :  { %7808 = vst [vmem:[%s11047_s3 + $0x3c] sm:$0xf] %v7736_v32  ;;  %v6506_v31 = vmax.f32 %v11204_v40, %v5084_v3  ;;  %v6088_v13 = vmax.f32 %v6086_v48, %v6087_v14  ;;  %v6100_v47 = vsel %vm2277_vm1, %v1822_v11, -inf  ;;  %v6107_v43 = vsel %vm2277_vm1, %v1823_v61, -inf }
 0x519   :  { %v5098_v36 = vmax.f32 %v5096_v25, %v5097_v53  ;;  %v5105_v15 = vmax.f32 %v5103_v52, %v5104_v60  ;;  %v6507_v51 = vmax.f32 %v11205_v34, %v5091_v63  ;;  %v6095_v29 = vmax.f32 %v6093_v59, %v6094_v20 }
 0x51a   :  { %v6794_v49 = vpack.c.bf16 %v6506_v31, %v6506_v31  ;;  %v6089_v0 = vrot.slane %v6088_v13, 2  ;;  %v6101_v56 = vrot.slane %v6100_v47, 4  ;;  %v6108_v54 = vrot.slane %v6107_v43, 4 }
 0x51b   :  { %v6508_v22 = vmax.f32 %v11206_v19, %v5098_v36  ;;  %v6509_v8 = vmax.f32 %v11207_v33, %v5105_v15  ;;  %v6795_v12 = vpack.c.bf16 %v6507_v51, %v6507_v51  ;;  %v6096_v39 = vrot.slane %v6095_v29, 2  ;;  %v11209_v15 = vld [vmem:[#allocation5_spill] sm:$0xff] }
 0x51c   :  { %v7370_v6 = vunpack.c.l.b16 %v6794_v49  ;;  %v6090_v7 = vmax.f32 %v6088_v13, %v6089_v0  ;;  %v6102_v18 = vmax.f32 %v6100_v47, %v6101_v56  ;;  %v6109_v16 = vmax.f32 %v6107_v43, %v6108_v54  ;;  %v11208_v47 = vld [vmem:[#allocation4_spill] sm:$0xff] }
 0x51d   :  { %v6796_v26 = vpack.c.bf16 %v6508_v22, %v6508_v22  ;;  %v6797_v28 = vpack.c.bf16 %v6509_v8, %v6509_v8  ;;  %v7371_v58 = vunpack.c.l.b16 %v6795_v12  ;;  %v6097_v11 = vmax.f32 %v6095_v29, %v6096_v39 }
 0x51e   :  { %v7640_v17 = vsel %vm7468_vm5, %v7370_v6, %v10430_v21  ;;  %v6091_v41 = vrot.slane %v6090_v7, 1  ;;  %v6103_v61 = vrot.slane %v6102_v18, 2  ;;  %v6110_v48 = vrot.slane %v6109_v16, 2 }
 0x51f   :  { %v7372_v38 = vunpack.c.l.b16 %v6796_v26  ;;  %v7373_v25 = vunpack.c.l.b16 %v6797_v28  ;;  %v7641_v52 = vsel %vm7470_vm6, %v7371_v58, %v7640_v17  ;;  %v6098_v32 = vrot.slane %v6097_v11, 1 }
 0x520   :  { %v6092_v3 = vmax.f32 %v6090_v7, %v6091_v41  ;;  %v6104_v14 = vmax.f32 %v6102_v18, %v6103_v61  ;;  %v6111_v59 = vmax.f32 %v6109_v16, %v6110_v48  ;;  %v1154_v63 = vmax.f32 %v10452_v24, 0.0  ;;  %v1017_v16 = vpop.f32.mrf.mxu2 }
 0x521   :  { %v7702_v53 = vsel %vm7466_vm4, %v10432_v35, %v10435_v50  ;;  %v7642_v21 = vsel %vm7472_vm7, %v7372_v38, %v7641_v52  ;;  %v6099_v60 = vmax.f32 %v6097_v11, %v6098_v32  ;;  %v928_v20 = vadd.f32 %v10365_v30, %v927_v44 }
 0x522   :  { %v7643_v40 = vsel %vm7474_vm8, %v7373_v25, %v7642_v21  ;;  %v6105_v31 = vrot.slane %v6104_v14, 1  ;;  %v6112_v13 = vrot.slane %v6111_v59, 1  ;;  %v6578_v43 = vmax.f32 %v11208_v47, %v6092_v3 }
 0x523   :  { %v7745_v36 = vpack.c.b16 %v7643_v40, %v7643_v40  ;;  %v6579_v34 = vmax.f32 %v11209_v15, %v6099_v60  ;;  %v1500_v51 = vrot.slane %v1154_v63, 2  ;;  %v1501_v24 = vrot.slane %v1154_v63, 4 }
 0x524   :  { %v6106_v29 = vmax.f32 %v6104_v14, %v6105_v31  ;;  %v6113_v49 = vmax.f32 %v6111_v59, %v6112_v13  ;;  %v6866_v0 = vpack.c.bf16 %v6578_v43, %v6578_v43  ;;  %v1502_v35 = vrot.slane %v1154_v63, 6 }
 0x525   :  { %7817 = vst [vmem:[%s11047_s3 + $0x60] sm:$0xf] %v7745_v36  ;;  %v6867_v50 = vpack.c.bf16 %v6579_v34, %v6579_v34  ;;  %v3090_v56 = vsel %vm2277_vm1, %v1154_v63, -inf  ;;  %v3097_v54 = vsel %vm2277_vm1, %v1500_v51, -inf  ;;  %v3104_v19 = vsel %vm2277_vm1, %v1501_v24, -inf }
 0x526   :  { %v6580_v22 = vmax.f32 %v10321_v55, %v6106_v29  ;;  %v6581_v33 = vmax.f32 %v10324_v42, %v6113_v49  ;;  %v7442_v8 = vunpack.c.l.b16 %v6866_v0  ;;  %v3091_v12 = vrot.slane %v3090_v56, 4 }
 0x527   :  { %v7443_v39 = vunpack.c.l.b16 %v6867_v50  ;;  %v3098_v6 = vrot.slane %v3097_v54, 4  ;;  %v3105_v7 = vrot.slane %v3104_v19, 4  ;;  %v3111_v18 = vsel %vm2277_vm1, %v1502_v35, -inf }
 0x528   :  { %v6868_v26 = vpack.c.bf16 %v6580_v22, %v6580_v22  ;;  %v6869_v28 = vpack.c.bf16 %v6581_v33, %v6581_v33  ;;  %v7703_v58 = vsel %vm7468_vm5, %v7442_v8, %v7702_v53  ;;  %v3092_v11 = vmax.f32 %v3090_v56, %v3091_v12 }
 0x529   :  { %v7704_v17 = vsel %vm7470_vm6, %v7443_v39, %v7703_v58  ;;  %v3099_v41 = vmax.f32 %v3097_v54, %v3098_v6  ;;  %v3106_v61 = vmax.f32 %v3104_v19, %v3105_v7  ;;  %v3112_v55 = vrot.slane %v3111_v18, 4 }
 0x52a   :  { %v7444_v48 = vunpack.c.l.b16 %v6868_v26  ;;  %v3093_v42 = vrot.slane %v3092_v11, 2  ;;  %v1190_v44 = vmax.f32 %v928_v20, 0.0  ;;  %v1018_v38 = vadd.f32 %v10365_v30, %v1017_v16 }
 0x52b   :  { %v7445_v25 = vunpack.c.l.b16 %v6869_v28  ;;  %v3100_v52 = vrot.slane %v3099_v41, 2  ;;  %v3107_v32 = vrot.slane %v3106_v61, 2  ;;  %v3113_v3 = vmax.f32 %v3111_v18, %v3112_v55 }
 0x52c   :  { %v7705_v14 = vsel %vm7472_vm7, %v7444_v48, %v7704_v17  ;;  %v3094_v59 = vmax.f32 %v3092_v11, %v3093_v42  ;;  %v1608_v63 = vrot.slane %v1190_v44, 2  ;;  %v1609_v53 = vrot.slane %v1190_v44, 4 }
 0x52d   :  { %v7706_v21 = vsel %vm7474_vm8, %v7445_v25, %v7705_v14  ;;  %v3101_v60 = vmax.f32 %v3099_v41, %v3100_v52  ;;  %v3108_v40 = vmax.f32 %v3106_v61, %v3107_v32  ;;  %v3114_v31 = vrot.slane %v3113_v3, 2 }
 0x52e   :  { %v7754_v13 = vpack.c.b16 %v7706_v21, %v7706_v21  ;;  %v3095_v47 = vrot.slane %v3094_v59, 1  ;;  %v1610_v43 = vrot.slane %v1190_v44, 6  ;;  %v4098_v20 = vsel %vm2277_vm1, %v1190_v44, -inf }
 0x52f   :  { %v3102_v36 = vrot.slane %v3101_v60, 1  ;;  %v3109_v15 = vrot.slane %v3108_v40, 1  ;;  %v3115_v34 = vmax.f32 %v3113_v3, %v3114_v31  ;;  %v4099_v51 = vrot.slane %v4098_v20, 4 }
 0x530   :  { %7826 = vst [vmem:[%s11047_s3 + $0x84] sm:$0xf] %v7754_v13  ;;  %v3096_v24 = vmax.f32 %v3094_v59, %v3095_v47  ;;  %v4105_v29 = vsel %vm2277_vm1, %v1608_v63, -inf  ;;  %v4112_v49 = vsel %vm2277_vm1, %v1609_v53, -inf  ;;  %v4119_v0 = vsel %vm2277_vm1, %v1610_v43, -inf }
 0x531   :  { %v3103_v35 = vmax.f32 %v3101_v60, %v3102_v36  ;;  %v3110_v50 = vmax.f32 %v3108_v40, %v3109_v15  ;;  %v3116_v56 = vrot.slane %v3115_v34, 1  ;;  %v4100_v54 = vmax.f32 %v4098_v20, %v4099_v51 }
 0x532   :  { %v6366_v19 = vmax.f32 %v10327_v10, %v3096_v24  ;;  %v4106_v22 = vrot.slane %v4105_v29, 4  ;;  %v4113_v33 = vrot.slane %v4112_v49, 4  ;;  %v4120_v8 = vrot.slane %v4119_v0, 4 }
 0x533   :  { %v6042_v12 = vrot.slane %v10360_v27, 1  ;;  %v6049_v39 = vrot.slane %v10368_v57, 1  ;;  %v6367_v6 = vmax.f32 %v10330_v1, %v3103_v35  ;;  %v4101_v7 = vrot.slane %v4100_v54, 2 }
 0x534   :  { %v3117_v18 = vmax.f32 %v3115_v34, %v3116_v56  ;;  %v4107_v16 = vmax.f32 %v4105_v29, %v4106_v22  ;;  %v4114_v26 = vmax.f32 %v4112_v49, %v4113_v33  ;;  %v4121_v28 = vmax.f32 %v4119_v0, %v4120_v8  ;;  %v1107_v0 = vpop.f32.mrf.mxu3 }
 0x535   :  { %v6056_v58 = vrot.slane %v10370_v9, 1  ;;  %v6368_v11 = vmax.f32 %v10332_v4, %v3110_v50  ;;  %v4102_v17 = vmax.f32 %v4100_v54, %v4101_v7  ;;  %v1226_v10 = vmax.f32 %v1018_v38, 0.0 }
 0x536   :  { %v6654_v41 = vpack.c.bf16 %v6366_v19, %v6366_v19  ;;  %v4108_v61 = vrot.slane %v4107_v16, 2  ;;  %v4115_v55 = vrot.slane %v4114_v26, 2  ;;  %v4122_v48 = vrot.slane %v4121_v28, 2 }
 0x537   :  { %v10528_v42 = vmax.f32 %v10360_v27, %v6042_v12  ;;  %v10531_v1 = vmax.f32 %v10368_v57, %v6049_v39  ;;  %v6655_v44 = vpack.c.bf16 %v6367_v6, %v6367_v6  ;;  %v4103_v25 = vrot.slane %v4102_v17, 1 }
 0x538   :  { %v6369_v52 = vmax.f32 %v10334_v37, %v3117_v18  ;;  %v4109_v32 = vmax.f32 %v4107_v16, %v4108_v61  ;;  %v4116_v3 = vmax.f32 %v4114_v26, %v4115_v55  ;;  %v4123_v14 = vmax.f32 %v4121_v28, %v4122_v48 }
 0x539   :  { %v6656_v4 = vpack.c.bf16 %v6368_v11, %v6368_v11  ;;  %v4104_v59 = vmax.f32 %v4102_v17, %v4103_v25  ;;  %v1716_v38 = vrot.slane %v1226_v10, 2  ;;  %v1717_v63 = vrot.slane %v1226_v10, 4 }
 0x53a   :  { %v7230_v53 = vunpack.c.l.b16 %v6654_v41  ;;  %v4110_v21 = vrot.slane %v4109_v32, 1  ;;  %v4117_v60 = vrot.slane %v4116_v3, 1  ;;  %v4124_v40 = vrot.slane %v4123_v14, 1 }
 0x53b   :  { %v7231_v27 = vunpack.c.l.b16 %v6655_v44  ;;  %v6438_v31 = vmax.f32 %v10336_v62, %v4104_v59  ;;  %v1718_v57 = vrot.slane %v1226_v10, 6  ;;  %v5106_v13 = vsel %vm2277_vm1, %v1226_v10, -inf  ;;  %v840_v59 = vpop.f32.mrf.mxu0 }
 0x53c   :  { %v4111_v47 = vmax.f32 %v4109_v32, %v4110_v21  ;;  %v4118_v43 = vmax.f32 %v4116_v3, %v4117_v60  ;;  %v4125_v37 = vmax.f32 %v4123_v14, %v4124_v40  ;;  %v5107_v20 = vrot.slane %v5106_v13, 4 }
 0x53d   :  { %v6657_v36 = vpack.c.bf16 %v6369_v52, %v6369_v52  ;;  %v5113_v15 = vsel %vm2277_vm1, %v1716_v38, -inf  ;;  %v5120_v34 = vsel %vm2277_vm1, %v1717_v63, -inf  ;;  %v5127_v51 = vsel %vm2277_vm1, %v1718_v57, -inf }
 0x53e   :  { %v7232_v24 = vunpack.c.l.b16 %v6656_v4  ;;  %v6439_v29 = vmax.f32 %v10338_v23, %v4111_v47  ;;  %v6440_v49 = vmax.f32 %v10341_v46, %v4118_v43  ;;  %v5108_v62 = vmax.f32 %v5106_v13, %v5107_v20  ;;  %v10566_v43 = vld [vmem:[%s11046_s2] ss:$0 sm:$0xff] }
 0x53f   :  { %v7518_v35 = vsel %vm7462_vm2, %v7231_v27, %v7230_v53  ;;  %v5114_v50 = vrot.slane %v5113_v15, 4  ;;  %v5121_v56 = vrot.slane %v5120_v34, 4  ;;  %v5128_v54 = vrot.slane %v5127_v51, 4  ;;  %v11210_v20 = vld [vmem:[#allocation6_spill] sm:$0xff] }
 0x540   :  { %v10543_v19 = vmax.f32 %v10343_v2, %v4125_v37  ;;  %v6726_v22 = vpack.c.bf16 %v6438_v31, %v6438_v31  ;;  %v6727_v33 = vpack.c.bf16 %v6439_v29, %v6439_v29  ;;  %v5109_v8 = vrot.slane %v5108_v62, 2 }
 0x541   :  { %v5115_v12 = vmax.f32 %v5113_v15, %v5114_v50  ;;  %v5122_v39 = vmax.f32 %v5120_v34, %v5121_v56  ;;  %v5129_v6 = vmax.f32 %v5127_v51, %v5128_v54  ;;  %v1108_v23 = vadd.f32 %v10365_v30, %v1107_v0  ;;  %v11211_v0 = vld [vmem:[#allocation7_spill] sm:$0xff] }
 0x542   :  { %v10547_v46 = vmax.f32 %v10370_v9, %v6056_v58  ;;  %v10549_v7 = vunpack.c.l.b16 %v6657_v36  ;;  %v6728_v18 = vpack.c.bf16 %v6440_v49, %v6440_v49  ;;  %v5110_v16 = vmax.f32 %v5108_v62, %v5109_v8  ;;  %v930_v62 = vpop.f32.mrf.mxu1 }
 0x543   :  { %v5116_v26 = vrot.slane %v5115_v12, 2  ;;  %v5123_v28 = vrot.slane %v5122_v39, 2  ;;  %v5130_v11 = vrot.slane %v5129_v6, 2  ;;  %v1262_v2 = vmax.f32 %v1108_v23, 0.0 }
 0x544   :  { %v10552_v17 = vsel %vm7464_vm3, %v7232_v24, %v7518_v35  ;;  %v6729_v10 = vpack.c.bf16 %v10543_v19, %v10543_v19  ;;  %v7302_v41 = vunpack.c.l.b16 %v6726_v22  ;;  %v5111_v61 = vrot.slane %v5110_v16, 1 }
 0x545   :  { %v7303_v30 = vunpack.c.l.b16 %v6727_v33  ;;  %v5117_v55 = vmax.f32 %v5115_v12, %v5116_v26  ;;  %v5124_v9 = vmax.f32 %v5122_v39, %v5123_v28  ;;  %v5131_v58 = vmax.f32 %v5129_v6, %v5130_v11 }
 0x546   :  { %v10556_v48 = vunpack.c.l.b16 %v6728_v18  ;;  %v5112_v44 = vmax.f32 %v5110_v16, %v5111_v61  ;;  %v1824_v25 = vrot.slane %v1262_v2, 2  ;;  %v1825_v52 = vrot.slane %v1262_v2, 4 }
 0x547   :  { %v5118_v32 = vrot.slane %v5117_v55, 1  ;;  %v5125_v3 = vrot.slane %v5124_v9, 1  ;;  %v5132_v14 = vrot.slane %v5131_v58, 1  ;;  %v1826_v4 = vrot.slane %v1262_v2, 6 }
 0x548   :  { %v6510_v38 = vmax.f32 %v10351_v45, %v5112_v44  ;;  %v6114_v63 = vsel %vm2277_vm1, %v1262_v2, -inf  ;;  %v6121_v53 = vsel %vm2277_vm1, %v1824_v25, -inf  ;;  %v6128_v21 = vsel %vm2277_vm1, %v1825_v52, -inf }
 0x549   :  { %v5119_v60 = vmax.f32 %v5117_v55, %v5118_v32  ;;  %v5126_v40 = vmax.f32 %v5124_v9, %v5125_v3  ;;  %v5133_v27 = vmax.f32 %v5131_v58, %v5132_v14  ;;  %v6115_v31 = vrot.slane %v6114_v63, 4 }
 0x54a   :  { %v6122_v57 = vrot.slane %v6121_v53, 4  ;;  %v6129_v13 = vrot.slane %v6128_v21, 4  ;;  %v6135_v47 = vsel %vm2277_vm1, %v1826_v4, -inf  ;;  %v841_v45 = vadd.f32 %v10566_v43, %v840_v59 }
 0x54b   :  { %v6511_v37 = vmax.f32 %v10354_v5, %v5119_v60  ;;  %v6512_v36 = vmax.f32 %v11210_v20, %v5126_v40  ;;  %v6798_v15 = vpack.c.bf16 %v6510_v38, %v6510_v38  ;;  %v6116_v34 = vmax.f32 %v6114_v63, %v6115_v31  ;;  %v11212_v38 = vld [vmem:[#allocation8_spill] sm:$0xff] }
 0x54c   :  { %v7581_v51 = vsel %vm7462_vm2, %v7303_v30, %v7302_v41  ;;  %v6123_v24 = vmax.f32 %v6121_v53, %v6122_v57  ;;  %v6130_v29 = vmax.f32 %v6128_v21, %v6129_v13  ;;  %v6136_v49 = vrot.slane %v6135_v47, 4 }
 0x54d   :  { %v6513_v35 = vmax.f32 %v11211_v0, %v5133_v27  ;;  %v6799_v50 = vpack.c.bf16 %v6511_v37, %v6511_v37  ;;  %v6800_v56 = vpack.c.bf16 %v6512_v36, %v6512_v36  ;;  %v6117_v54 = vrot.slane %v6116_v34, 2 }
 0x54e   :  { %v6124_v22 = vrot.slane %v6123_v24, 2  ;;  %v6131_v33 = vrot.slane %v6130_v29, 2  ;;  %v6137_v8 = vmax.f32 %v6135_v47, %v6136_v49  ;;  %v1155_v12 = vmax.f32 %v841_v45, 0.0 }
 0x54f   :  { %v7374_v5 = vunpack.c.l.b16 %v6798_v15  ;;  %v7375_v39 = vunpack.c.l.b16 %v6799_v50  ;;  %v6118_v6 = vmax.f32 %v6116_v34, %v6117_v54  ;;  %v931_v23 = vadd.f32 %v10566_v43, %v930_v62 }
 0x550   :  { %v6125_v18 = vmax.f32 %v6123_v24, %v6124_v22  ;;  %v6132_v16 = vmax.f32 %v6130_v29, %v6131_v33  ;;  %v6138_v26 = vrot.slane %v6137_v8, 2  ;;  %v1503_v28 = vrot.slane %v1155_v12, 2 }
 0x551   :  { %v6801_v11 = vpack.c.bf16 %v6513_v35, %v6513_v35  ;;  %v6119_v2 = vrot.slane %v6118_v6, 1  ;;  %v1504_v41 = vrot.slane %v1155_v12, 4  ;;  %v1505_v61 = vrot.slane %v1155_v12, 6 }
 0x552   :  { %v7376_v30 = vunpack.c.l.b16 %v6800_v56  ;;  %v6126_v55 = vrot.slane %v6125_v18, 1  ;;  %v6133_v9 = vrot.slane %v6132_v16, 1  ;;  %v6139_v58 = vmax.f32 %v6137_v8, %v6138_v26 }
 0x553   :  { %v7644_v44 = vsel %vm7462_vm2, %v7375_v39, %v7374_v5  ;;  %v6120_v25 = vmax.f32 %v6118_v6, %v6119_v2  ;;  %v3118_v52 = vsel %vm2277_vm1, %v1155_v12, -inf  ;;  %v3125_v32 = vsel %vm2277_vm1, %v1503_v28, -inf }
 0x554   :  { %v6127_v3 = vmax.f32 %v6125_v18, %v6126_v55  ;;  %v6134_v14 = vmax.f32 %v6132_v16, %v6133_v9  ;;  %v6140_v4 = vrot.slane %v6139_v58, 1  ;;  %v3119_v59 = vrot.slane %v3118_v52, 4 }
 0x555   :  { %v6582_v63 = vmax.f32 %v11212_v38, %v6120_v25  ;;  %v3126_v53 = vrot.slane %v3125_v32, 4  ;;  %v3132_v21 = vsel %vm2277_vm1, %v1504_v41, -inf  ;;  %v3139_v60 = vsel %vm2277_vm1, %v1505_v61, -inf }
 0x556   :  { %v6141_v40 = vmax.f32 %v6139_v58, %v6140_v4  ;;  %v6583_v27 = vmax.f32 %v10528_v42, %v6127_v3  ;;  %v6584_v31 = vmax.f32 %v10531_v1, %v6134_v14  ;;  %v3120_v57 = vmax.f32 %v3118_v52, %v3119_v59  ;;  %v1020_v1 = vpop.f32.mrf.mxu2 }
 0x557   :  { %v6870_v13 = vpack.c.bf16 %v6582_v63, %v6582_v63  ;;  %v3127_v47 = vmax.f32 %v3125_v32, %v3126_v53  ;;  %v3133_v45 = vrot.slane %v3132_v21, 4  ;;  %v3140_v37 = vrot.slane %v3139_v60, 4 }
 0x558   :  { %v6585_v20 = vmax.f32 %v10547_v46, %v6141_v40  ;;  %v6871_v36 = vpack.c.bf16 %v6583_v27, %v6583_v27  ;;  %v6872_v15 = vpack.c.bf16 %v6584_v31, %v6584_v31  ;;  %v3121_v34 = vrot.slane %v3120_v57, 2 }
 0x559   :  { %v7305_v24 = vunpack.c.l.b16 %v6729_v10  ;;  %v7582_v29 = vsel %vm7464_vm3, %v10556_v48, %v7581_v51  ;;  %v3134_v42 = vmax.f32 %v3132_v21, %v3133_v45  ;;  %v3141_v49 = vmax.f32 %v3139_v60, %v3140_v37 }
 0x55a   :  { %v7645_v62 = vsel %vm7464_vm3, %v7376_v30, %v7644_v44  ;;  %v7446_v0 = vunpack.c.l.b16 %v6870_v13  ;;  %v7447_v35 = vunpack.c.l.b16 %v6871_v36  ;;  %v3128_v50 = vrot.slane %v3127_v47, 2 }
 0x55b   :  { %v6873_v56 = vpack.c.bf16 %v6585_v20, %v6585_v20  ;;  %v7448_v46 = vunpack.c.l.b16 %v6872_v15  ;;  %v10589_v54 = vmax.f32 %v3120_v57, %v3121_v34  ;;  %v1191_v22 = vmax.f32 %v931_v23, 0.0 }
 0x55c   :  { %v7377_v33 = vunpack.c.l.b16 %v6801_v11  ;;  %v7707_v19 = vsel %vm7462_vm2, %v7447_v35, %v7446_v0  ;;  %v1021_v10 = vadd.f32 %v10566_v43, %v1020_v1  ;;  %v10596_v48 = vsel %vm7466_vm4, %v10549_v7, %v10552_v17 }
 0x55d   :  { %v10599_v51 = vsel %vm7466_vm4, %v7305_v24, %v7582_v29  ;;  %v3135_v8 = vrot.slane %v3134_v42, 2  ;;  %v3142_v12 = vrot.slane %v3141_v49, 2  ;;  %v3129_v39 = vmax.f32 %v3127_v47, %v3128_v50 }
 0x55e   :  { %v10602_v5 = vsel %vm7466_vm4, %v7377_v33, %v7645_v62  ;;  %v1611_v6 = vrot.slane %v1191_v22, 2  ;;  %v1612_v23 = vrot.slane %v1191_v22, 4  ;;  %v7449_v18 = vunpack.c.l.b16 %v6873_v56  ;;  %v1110_v56 = vpop.f32.mrf.mxu3 }
 0x55f   :  { %v7708_v16 = vsel %vm7464_vm3, %v7448_v46, %v7707_v19  ;;  %v3123_v26 = vrot.slane %v10589_v54, 1  ;;  %v1613_v28 = vrot.slane %v1191_v22, 6  ;;  %v4126_v7 = vsel %vm2277_vm1, %v1191_v22, -inf  ;;  %v842_v46 = vpop.f32.mrf.mxu0 }
 0x560   :  { %v4133_v17 = vsel %vm2277_vm1, %v1611_v6, -inf  ;;  %v4140_v11 = vsel %vm2277_vm1, %v1612_v23, -inf  ;;  %v1227_v2 = vmax.f32 %v1021_v10, 0.0  ;;  %v3136_v41 = vmax.f32 %v3134_v42, %v3135_v8 }
 0x561   :  { %v3143_v61 = vmax.f32 %v3141_v49, %v3142_v12  ;;  %v4127_v30 = vrot.slane %v4126_v7, 4  ;;  %v4134_v55 = vrot.slane %v4133_v17, 4  ;;  %v4141_v9 = vrot.slane %v4140_v11, 4 }
 0x562   :  { %v4147_v58 = vsel %vm2277_vm1, %v1613_v28, -inf  ;;  %v1719_v44 = vrot.slane %v1227_v2, 2  ;;  %v1720_v25 = vrot.slane %v1227_v2, 4  ;;  %v1721_v14 = vrot.slane %v1227_v2, 6 }
 0x563   :  { %v4128_v52 = vmax.f32 %v4126_v7, %v4127_v30  ;;  %v4135_v32 = vmax.f32 %v4133_v17, %v4134_v55  ;;  %v4148_v3 = vrot.slane %v4147_v58, 4  ;;  %v4142_v4 = vmax.f32 %v4140_v11, %v4141_v9 }
 0x564   :  { %v5134_v59 = vsel %vm2277_vm1, %v1227_v2, -inf  ;;  %v5141_v38 = vsel %vm2277_vm1, %v1719_v44, -inf  ;;  %v5148_v63 = vsel %vm2277_vm1, %v1720_v25, -inf  ;;  %v5155_v13 = vsel %vm2277_vm1, %v1721_v14, -inf }
 0x565   :  { %v4129_v53 = vrot.slane %v4128_v52, 2  ;;  %v4136_v21 = vrot.slane %v4135_v32, 2  ;;  %v4149_v60 = vmax.f32 %v4147_v58, %v4148_v3  ;;  %v5135_v40 = vrot.slane %v5134_v59, 4 }
 0x566   :  { %v4143_v27 = vrot.slane %v4142_v4, 2  ;;  %v5142_v31 = vrot.slane %v5141_v38, 4  ;;  %v5149_v57 = vrot.slane %v5148_v63, 4  ;;  %v3130_v36 = vrot.slane %v3129_v39, 1 }
 0x567   :  { %v4130_v47 = vmax.f32 %v4128_v52, %v4129_v53  ;;  %v4137_v45 = vmax.f32 %v4135_v32, %v4136_v21  ;;  %v4150_v37 = vrot.slane %v4149_v60, 2  ;;  %v5136_v20 = vmax.f32 %v5134_v59, %v5135_v40 }
 0x568   :  { %v5143_v15 = vmax.f32 %v5141_v38, %v5142_v31  ;;  %v5150_v34 = vmax.f32 %v5148_v63, %v5149_v57  ;;  %v5156_v24 = vrot.slane %v5155_v13, 4  ;;  %v3137_v29 = vrot.slane %v3136_v41, 1 }
 0x569   :  { %v3144_v42 = vrot.slane %v3143_v61, 1  ;;  %v10614_v49 = vmax.f32 %v4142_v4, %v4143_v27  ;;  %v5137_v1 = vrot.slane %v5136_v20, 2  ;;  %v4131_v62 = vrot.slane %v4130_v47, 1 }
 0x56a   :  { %v5144_v0 = vrot.slane %v5143_v15, 2  ;;  %v5151_v35 = vrot.slane %v5150_v34, 2  ;;  %v5157_v50 = vmax.f32 %v5155_v13, %v5156_v24  ;;  %v10617_v22 = vsel %vm7466_vm4, %v7449_v18, %v7708_v16 }
 0x56b   :  { %v10620_v33 = vmax.f32 %v10589_v54, %v3123_v26  ;;  %v4138_v19 = vrot.slane %v4137_v45, 1  ;;  %v10622_v10 = vmax.f32 %v4149_v60, %v4150_v37  ;;  %v10624_v8 = vmax.f32 %v5136_v20, %v5137_v1  ;;  %v932_v54 = vpop.f32.mrf.mxu1 }
 0x56c   :  { %v10626_v12 = vmax.f32 %v5143_v15, %v5144_v0  ;;  %v10628_v6 = vmax.f32 %v5150_v34, %v5151_v35  ;;  %v5158_v23 = vrot.slane %v5157_v50, 2  ;;  %v10630_v28 = vmax.f32 %v3129_v39, %v3130_v36 }
 0x56d   :  { %v10632_v7 = vmax.f32 %v3136_v41, %v3137_v29  ;;  %v1111_v18 = vadd.f32 %v10566_v43, %v1110_v56  ;;  %v843_v16 = vadd.f32 %v10566_v43, %v842_v46  ;;  %v10636_v26 = vmax.f32 %v3143_v61, %v3144_v42 }
 0x56e   :  { %v10638_v17 = vmax.f32 %v4130_v47, %v4131_v62  ;;  %v4145_v11 = vrot.slane %v10614_v49, 1  ;;  %v10641_v2 = vmax.f32 %v5157_v50, %v5158_v23  ;;  %v10643_v30 = vmax.f32 %v4137_v45, %v4138_v19 }
 0x56f   :  { %v4152_v39 = vrot.slane %v10622_v10, 1  ;;  %v1263_v55 = vmax.f32 %v1111_v18, 0.0  ;;  %v1156_v41 = vmax.f32 %v843_v16, 0.0  ;;  %v5139_v9 = vrot.slane %v10624_v8, 1  ;;  %v1022_v18 = vpop.f32.mrf.mxu2 }
 0x570   :  { %v5146_v58 = vrot.slane %v10626_v12, 1  ;;  %v5153_v44 = vrot.slane %v10628_v6, 1  ;;  %v933_v61 = vadd.f32 %v10566_v43, %v932_v54  ;;  %v5160_v14 = vrot.slane %v10641_v2, 1 }
 0x571   :  { %v1827_v25 = vrot.slane %v1263_v55, 2  ;;  %v1828_v52 = vrot.slane %v1263_v55, 4  ;;  %v1829_v32 = vrot.slane %v1263_v55, 6  ;;  %v6142_v3 = vsel %vm2277_vm1, %v1263_v55, -inf }
 0x572   :  { %v6143_v4 = vrot.slane %v6142_v3, 4  ;;  %v1506_v59 = vrot.slane %v1156_v41, 2  ;;  %v1507_v38 = vrot.slane %v1156_v41, 4  ;;  %v1508_v60 = vrot.slane %v1156_v41, 6 }
 0x573   :  { %v6149_v63 = vsel %vm2277_vm1, %v1827_v25, -inf  ;;  %v6156_v53 = vsel %vm2277_vm1, %v1828_v52, -inf  ;;  %v6163_v21 = vsel %vm2277_vm1, %v1829_v32, -inf  ;;  %v3146_v13 = vsel %vm2277_vm1, %v1156_v41, -inf }
 0x574   :  { %v6144_v40 = vmax.f32 %v6142_v3, %v6143_v4  ;;  %v6150_v27 = vrot.slane %v6149_v63, 4  ;;  %v6157_v31 = vrot.slane %v6156_v53, 4  ;;  %v6164_v57 = vrot.slane %v6163_v21, 4 }
 0x575   :  { %v3153_v47 = vsel %vm2277_vm1, %v1506_v59, -inf  ;;  %v3160_v45 = vsel %vm2277_vm1, %v1507_v38, -inf  ;;  %v3167_v37 = vsel %vm2277_vm1, %v1508_v60, -inf  ;;  %v3147_v24 = vrot.slane %v3146_v13, 4 }
 0x576   :  { %v6145_v20 = vrot.slane %v6144_v40, 2  ;;  %v6151_v36 = vmax.f32 %v6149_v63, %v6150_v27  ;;  %v6158_v15 = vmax.f32 %v6156_v53, %v6157_v31  ;;  %v6165_v34 = vmax.f32 %v6163_v21, %v6164_v57 }
 0x577   :  { %v3154_v29 = vrot.slane %v3153_v47, 4  ;;  %v3161_v42 = vrot.slane %v3160_v45, 4  ;;  %v3168_v1 = vrot.slane %v3167_v37, 4  ;;  %v3148_v56 = vmax.f32 %v3146_v13, %v3147_v24 }
 0x578   :  { %v6146_v62 = vmax.f32 %v6144_v40, %v6145_v20  ;;  %v6152_v0 = vrot.slane %v6151_v36, 2  ;;  %v6159_v35 = vrot.slane %v6158_v15, 2  ;;  %v6166_v50 = vrot.slane %v6165_v34, 2 }
 0x579   :  { %v3155_v46 = vmax.f32 %v3153_v47, %v3154_v29  ;;  %v3162_v19 = vmax.f32 %v3160_v45, %v3161_v42  ;;  %v3169_v23 = vmax.f32 %v3167_v37, %v3168_v1  ;;  %v1192_v41 = vmax.f32 %v933_v61, 0.0 }
 0x57a   :  { %v6153_v16 = vmax.f32 %v6151_v36, %v6152_v0  ;;  %v6160_v54 = vmax.f32 %v6158_v15, %v6159_v35  ;;  %v6167_v55 = vmax.f32 %v6165_v34, %v6166_v50  ;;  %v6147_v25 = vrot.slane %v6146_v62, 1 }
 0x57b   :  { %v3149_v52 = vrot.slane %v3148_v56, 2  ;;  %v3156_v32 = vrot.slane %v3155_v46, 2  ;;  %v3163_v3 = vrot.slane %v3162_v19, 2  ;;  %v10660_v4 = vmax.f32 %v10614_v49, %v4145_v11 }
 0x57c   :  { %v10663_v59 = vmax.f32 %v10622_v10, %v4152_v39  ;;  %v10666_v38 = vmax.f32 %v10624_v8, %v5139_v9  ;;  %v1023_v63 = vadd.f32 %v10566_v43, %v1022_v18  ;;  %v6154_v53 = vrot.slane %v6153_v16, 1 }
 0x57d   :  { %v6161_v21 = vrot.slane %v6160_v54, 1  ;;  %v6168_v60 = vrot.slane %v6167_v55, 1  ;;  %v3170_v40 = vrot.slane %v3169_v23, 2  ;;  %v10670_v61 = vmax.f32 %v10626_v12, %v5146_v58 }
 0x57e   :  { %v10673_v27 = vmax.f32 %v10628_v6, %v5153_v44  ;;  %v10676_v49 = vmax.f32 %v10641_v2, %v5160_v14  ;;  %v1614_v10 = vrot.slane %v1192_v41, 2  ;;  %v10678_v11 = vmax.f32 %v6146_v62, %v6147_v25 }
 0x57f   :  { %v3150_v8 = vmax.f32 %v3148_v56, %v3149_v52  ;;  %v3157_v39 = vmax.f32 %v3155_v46, %v3156_v32  ;;  %v3164_v9 = vmax.f32 %v3162_v19, %v3163_v3  ;;  %v1615_v31 = vrot.slane %v1192_v41, 4 }
 0x580   :  { %v1616_v57 = vrot.slane %v1192_v41, 6  ;;  %v4154_v13 = vsel %vm2277_vm1, %v1192_v41, -inf  ;;  %v4161_v47 = vsel %vm2277_vm1, %v1614_v10, -inf  ;;  %v10682_v12 = vmax.f32 %v6153_v16, %v6154_v53  ;;  %v1112_v41 = vpop.f32.mrf.mxu3 }
 0x581   :  { %v10684_v58 = vmax.f32 %v6160_v54, %v6161_v21  ;;  %v10686_v6 = vmax.f32 %v6167_v55, %v6168_v60  ;;  %v3171_v2 = vmax.f32 %v3169_v23, %v3170_v40  ;;  %v4155_v44 = vrot.slane %v4154_v13, 4 }
 0x582   :  { %v4162_v14 = vrot.slane %v4161_v47, 4  ;;  %v4168_v45 = vsel %vm2277_vm1, %v1615_v31, -inf  ;;  %v4175_v37 = vsel %vm2277_vm1, %v1616_v57, -inf  ;;  %v3151_v20 = vrot.slane %v3150_v8, 1 }
 0x583   :  { %v4169_v36 = vrot.slane %v4168_v45, 4  ;;  %v4176_v15 = vrot.slane %v4175_v37, 4  ;;  %v1228_v34 = vmax.f32 %v1023_v63, 0.0  ;;  %v3158_v24 = vrot.slane %v3157_v39, 1 }
 0x584   :  { %v3165_v29 = vrot.slane %v3164_v9, 1  ;;  %v4156_v42 = vmax.f32 %v4154_v13, %v4155_v44  ;;  %v4163_v1 = vmax.f32 %v4161_v47, %v4162_v14  ;;  %v3172_v40 = vrot.slane %v3171_v2, 1  ;;  %v845_v13 = vpop.f32.mrf.mxu0 }
 0x585   :  { %v4170_v62 = vmax.f32 %v4168_v45, %v4169_v36  ;;  %v4177_v0 = vmax.f32 %v4175_v37, %v4176_v15  ;;  %v1722_v35 = vrot.slane %v1228_v34, 2  ;;  %v1723_v50 = vrot.slane %v1228_v34, 4 }
 0x586   :  { %v4157_v56 = vrot.slane %v4156_v42, 2  ;;  %v4164_v46 = vrot.slane %v4163_v1, 2  ;;  %v1724_v19 = vrot.slane %v1228_v34, 6  ;;  %v5162_v23 = vsel %vm2277_vm1, %v1228_v34, -inf }
 0x587   :  { %v4171_v18 = vrot.slane %v4170_v62, 2  ;;  %v4178_v16 = vrot.slane %v4177_v0, 2  ;;  %v5163_v54 = vrot.slane %v5162_v23, 4  ;;  %v5169_v55 = vsel %vm2277_vm1, %v1722_v35, -inf }
 0x588   :  { %v4158_v25 = vmax.f32 %v4156_v42, %v4157_v56  ;;  %v4165_v52 = vmax.f32 %v4163_v1, %v4164_v46  ;;  %v5170_v32 = vrot.slane %v5169_v55, 4  ;;  %v5176_v3 = vsel %vm2277_vm1, %v1723_v50, -inf  ;;  %v935_v42 = vpop.f32.mrf.mxu1 }
 0x589   :  { %v4172_v63 = vmax.f32 %v4170_v62, %v4171_v18  ;;  %v4179_v53 = vmax.f32 %v4177_v0, %v4178_v16  ;;  %v5164_v21 = vmax.f32 %v5162_v23, %v5163_v54  ;;  %v5177_v60 = vrot.slane %v5176_v3, 4 }
 0x58a   :  { %v5171_v10 = vmax.f32 %v5169_v55, %v5170_v32  ;;  %v5183_v31 = vsel %vm2277_vm1, %v1724_v19, -inf  ;;  %v1113_v57 = vadd.f32 %v10566_v43, %v1112_v41  ;;  %v4159_v47 = vrot.slane %v4158_v25, 1 }
 0x58b   :  { %v4166_v44 = vrot.slane %v4165_v52, 1  ;;  %v5165_v14 = vrot.slane %v5164_v21, 2  ;;  %v5178_v45 = vmax.f32 %v5176_v3, %v5177_v60  ;;  %v10695_v37 = vmax.f32 %v3150_v8, %v3151_v20 }
 0x58c   :  { %v4173_v36 = vrot.slane %v4172_v63, 1  ;;  %v4180_v15 = vrot.slane %v4179_v53, 1  ;;  %v5184_v34 = vrot.slane %v5183_v31, 4  ;;  %v10697_v1 = vmax.f32 %v3157_v39, %v3158_v24 }
 0x58d   :  { %v10699_v62 = vmax.f32 %v3164_v9, %v3165_v29  ;;  %v5172_v0 = vrot.slane %v5171_v10, 2  ;;  %v846_v35 = vadd.f32 %v10566_v43, %v845_v13  ;;  %v10702_v50 = vmax.f32 %v3171_v2, %v3172_v40 }
 0x58e   :  { %v5166_v56 = vmax.f32 %v5164_v21, %v5165_v14  ;;  %v5185_v46 = vmax.f32 %v5183_v31, %v5184_v34  ;;  %v1264_v19 = vmax.f32 %v1113_v57, 0.0  ;;  %v10704_v23 = vmax.f32 %v4158_v25, %v4159_v47 }
 0x58f   :  { %11213 = vst [vmem:[#allocation9_spill] sm:$0xff] %v10702_v50  ;;  %v10706_v8 = vmax.f32 %v4165_v52, %v4166_v44  ;;  %v5179_v20 = vrot.slane %v5178_v45, 2  ;;  %v936_v18 = vadd.f32 %v10566_v43, %v935_v42  ;;  %v10709_v16 = vmax.f32 %v4172_v63, %v4173_v36 }
 0x590   :  { %11214 = vst [vmem:[#allocation10_spill] sm:$0xff] %v10704_v23  ;;  %v10711_v39 = vmax.f32 %v4179_v53, %v4180_v15  ;;  %v1830_v9 = vrot.slane %v1264_v19, 2  ;;  %v1831_v24 = vrot.slane %v1264_v19, 4  ;;  %v5173_v29 = vmax.f32 %v5171_v10, %v5172_v0 }
 0x591   :  { %11215 = vst [vmem:[#allocation11_spill] sm:$0xff] %v10706_v8  ;;  %v1832_v54 = vrot.slane %v1264_v19, 6  ;;  %v6170_v2 = vsel %vm2277_vm1, %v1264_v19, -inf  ;;  %v1157_v55 = vmax.f32 %v846_v35, 0.0  ;;  %v5167_v41 = vrot.slane %v5166_v56, 1 }
 0x592   :  { %11216 = vst [vmem:[#allocation12_spill] sm:$0xff] %v10709_v16  ;;  %v5186_v32 = vrot.slane %v5185_v46, 2  ;;  %v6171_v25 = vrot.slane %v6170_v2, 4  ;;  %v6177_v52 = vsel %vm2277_vm1, %v1830_v9, -inf  ;;  %v5180_v3 = vmax.f32 %v5178_v45, %v5179_v20 }
 0x593   :  { %11217 = vst [vmem:[#allocation13_spill] sm:$0xff] %v10711_v39  ;;  %v6178_v21 = vrot.slane %v6177_v52, 4  ;;  %v6184_v60 = vsel %vm2277_vm1, %v1831_v24, -inf  ;;  %v6191_v63 = vsel %vm2277_vm1, %v1832_v54, -inf  ;;  %v1193_v57 = vmax.f32 %v936_v18, 0.0 }
 0x594   :  { %v6172_v53 = vmax.f32 %v6170_v2, %v6171_v25  ;;  %v6185_v40 = vrot.slane %v6184_v60, 4  ;;  %v6192_v31 = vrot.slane %v6191_v63, 4  ;;  %v1509_v13 = vrot.slane %v1157_v55, 2 }
 0x595   :  { %v6179_v10 = vmax.f32 %v6177_v52, %v6178_v21  ;;  %v1510_v47 = vrot.slane %v1157_v55, 4  ;;  %v1511_v44 = vrot.slane %v1157_v55, 6  ;;  %v5187_v14 = vmax.f32 %v5185_v46, %v5186_v32  ;;  %v1025_v46 = vpop.f32.mrf.mxu2 }
 0x596   :  { %v6173_v36 = vrot.slane %v6172_v53, 2  ;;  %v6186_v15 = vmax.f32 %v6184_v60, %v6185_v40  ;;  %v6193_v34 = vmax.f32 %v6191_v63, %v6192_v31  ;;  %v3174_v45 = vsel %vm2277_vm1, %v1157_v55, -inf }
 0x597   :  { %v6180_v42 = vrot.slane %v6179_v10, 2  ;;  %v3181_v0 = vsel %vm2277_vm1, %v1509_v13, -inf  ;;  %v3188_v35 = vsel %vm2277_vm1, %v1510_v47, -inf  ;;  %v5174_v19 = vrot.slane %v5173_v29, 1 }
 0x598   :  { %v6174_v20 = vmax.f32 %v6172_v53, %v6173_v36  ;;  %v6187_v9 = vrot.slane %v6186_v15, 2  ;;  %v3175_v24 = vrot.slane %v3174_v45, 4  ;;  %v6194_v18 = vrot.slane %v6193_v34, 2 }
 0x599   :  { %v3182_v54 = vrot.slane %v3181_v0, 4  ;;  %v3189_v2 = vrot.slane %v3188_v35, 4  ;;  %v3195_v25 = vsel %vm2277_vm1, %v1511_v44, -inf  ;;  %v5181_v32 = vrot.slane %v5180_v3, 1 }
 0x59a   :  { %v5188_v52 = vrot.slane %v5187_v14, 1  ;;  %v6181_v21 = vmax.f32 %v6179_v10, %v6180_v42  ;;  %v3176_v60 = vmax.f32 %v3174_v45, %v3175_v24  ;;  %v6188_v63 = vmax.f32 %v6186_v15, %v6187_v9 }
 0x59b   :  { %v3183_v55 = vmax.f32 %v3181_v0, %v3182_v54  ;;  %v3190_v40 = vmax.f32 %v3188_v35, %v3189_v2  ;;  %v3196_v31 = vrot.slane %v3195_v25, 4  ;;  %v10721_v13 = vmax.f32 %v5166_v56, %v5167_v41 }
 0x59c   :  { %v6175_v47 = vrot.slane %v6174_v20, 1  ;;  %v3177_v53 = vrot.slane %v3176_v60, 2  ;;  %v1026_v36 = vadd.f32 %v10566_v43, %v1025_v46  ;;  %v10724_v39 = vmax.f32 %v5173_v29, %v5174_v19 }
 0x59d   :  { %v6195_v16 = vmax.f32 %v6193_v34, %v6194_v18  ;;  %v3184_v8 = vrot.slane %v3183_v55, 2  ;;  %v3197_v44 = vmax.f32 %v3195_v25, %v3196_v31  ;;  %v10726_v23 = vmax.f32 %v5180_v3, %v5181_v32 }
 0x59e   :  { %v10728_v50 = vmax.f32 %v5187_v14, %v5188_v52  ;;  %v6182_v10 = vrot.slane %v6181_v21, 1  ;;  %v1617_v15 = vrot.slane %v1193_v57, 2  ;;  %v6189_v42 = vrot.slane %v6188_v63, 1 }
 0x59f   :  { %11218 = vst [vmem:[#allocation14_spill] sm:$0xff] %v10726_v23  ;;  %v3178_v45 = vmax.f32 %v3176_v60, %v3177_v53  ;;  %v3191_v0 = vrot.slane %v3190_v40, 2  ;;  %v1618_v56 = vrot.slane %v1193_v57, 4  ;;  %v10730_v41 = vmax.f32 %v6174_v20, %v6175_v47 }
 0x5a0   :  { %11219 = vst [vmem:[#allocation15_spill] sm:$0xff] %v10728_v50  ;;  %v1619_v35 = vrot.slane %v1193_v57, 6  ;;  %v4182_v9 = vsel %vm2277_vm1, %v1193_v57, -inf  ;;  %v4189_v29 = vsel %vm2277_vm1, %v1617_v15, -inf  ;;  %v6196_v34 = vrot.slane %v6195_v16, 1 }
 0x5a1   :  { %11220 = vst [vmem:[#allocation16_spill] sm:$0xff] %v10730_v41  ;;  %v3185_v19 = vmax.f32 %v3183_v55, %v3184_v8  ;;  %v3198_v24 = vrot.slane %v3197_v44, 2  ;;  %v4183_v3 = vrot.slane %v4182_v9, 4  ;;  %v10734_v18 = vmax.f32 %v6181_v21, %v6182_v10 }
 0x5a2   :  { %v4190_v14 = vrot.slane %v4189_v29, 4  ;;  %v4196_v54 = vsel %vm2277_vm1, %v1618_v56, -inf  ;;  %v4203_v2 = vsel %vm2277_vm1, %v1619_v35, -inf  ;;  %v10738_v25 = vmax.f32 %v6188_v63, %v6189_v42 }
 0x5a3   :  { %11221 = vst [vmem:[#allocation17_spill] sm:$0xff] %v10734_v18  ;;  %v3179_v20 = vrot.slane %v3178_v45, 1  ;;  %v3192_v46 = vmax.f32 %v3190_v40, %v3191_v0  ;;  %v4184_v32 = vmax.f32 %v4182_v9, %v4183_v3  ;;  %v4197_v57 = vrot.slane %v4196_v54, 4  ;;  %v1115_v18 = vpop.f32.mrf.mxu3  ;;  %v847_v3 = vpop.f32.mrf.mxu0 }
 0x5a4   :  { %11222 = vst [vmem:[#allocation18_spill] sm:$0xff] %v10738_v25  ;;  %v4191_v52 = vmax.f32 %v4189_v29, %v4190_v14  ;;  %v4204_v60 = vrot.slane %v4203_v2, 4  ;;  %v1229_v31 = vmax.f32 %v1026_v36, 0.0  ;;  %v10740_v47 = vmax.f32 %v6195_v16, %v6196_v34 }
 0x5a5   :  { %v3186_v8 = vrot.slane %v3185_v19, 1  ;;  %v3199_v55 = vmax.f32 %v3197_v44, %v3198_v24  ;;  %v4185_v21 = vrot.slane %v4184_v32, 2  ;;  %v4198_v10 = vmax.f32 %v4196_v54, %v4197_v57 }
 0x5a6   :  { %11223 = vst [vmem:[#allocation19_spill] sm:$0xff] %v10740_v47  ;;  %v4192_v53 = vrot.slane %v4191_v52, 2  ;;  %v4205_v15 = vmax.f32 %v4203_v2, %v4204_v60  ;;  %v1725_v56 = vrot.slane %v1229_v31, 2  ;;  %v3193_v35 = vrot.slane %v3192_v46, 1 }
 0x5a7   :  { %v1726_v63 = vrot.slane %v1229_v31, 4  ;;  %v1727_v42 = vrot.slane %v1229_v31, 6  ;;  %v5190_v40 = vsel %vm2277_vm1, %v1229_v31, -inf  ;;  %v10743_v0 = vmax.f32 %v3178_v45, %v3179_v20 }
 0x5a8   :  { %v4199_v9 = vrot.slane %v4198_v10, 2  ;;  %v4206_v29 = vrot.slane %v4205_v15, 2  ;;  %v5191_v36 = vrot.slane %v5190_v40, 4  ;;  %v5197_v16 = vsel %vm2277_vm1, %v1725_v56, -inf }
 0x5a9   :  { %11224 = vst [vmem:[#allocation20_spill] sm:$0xff] %v10743_v0  ;;  %v5204_v44 = vsel %vm2277_vm1, %v1726_v63, -inf  ;;  %v5211_v34 = vsel %vm2277_vm1, %v1727_v42, -inf  ;;  %v1116_v24 = vadd.f32 %v10566_v43, %v1115_v18  ;;  %v3200_v14 = vrot.slane %v3199_v55, 1 }
 0x5aa   :  { %v4186_v54 = vmax.f32 %v4184_v32, %v4185_v21  ;;  %v4193_v2 = vmax.f32 %v4191_v52, %v4192_v53  ;;  %v5192_v57 = vmax.f32 %v5190_v40, %v5191_v36  ;;  %v10749_v60 = vmax.f32 %v3185_v19, %v3186_v8 }
 0x5ab   :  { %v5198_v45 = vrot.slane %v5197_v16, 4  ;;  %v5205_v20 = vrot.slane %v5204_v44, 4  ;;  %v5212_v31 = vrot.slane %v5211_v34, 4  ;;  %v4200_v0 = vmax.f32 %v4198_v10, %v4199_v9 }
 0x5ac   :  { %v4207_v47 = vmax.f32 %v4205_v15, %v4206_v29  ;;  %v5193_v25 = vrot.slane %v5192_v57, 2  ;;  %v848_v56 = vadd.f32 %v10566_v43, %v847_v3  ;;  %v1265_v50 = vmax.f32 %v1116_v24, 0.0 }
 0x5ad   :  { %v5199_v63 = vmax.f32 %v5197_v16, %v5198_v45  ;;  %v5206_v41 = vmax.f32 %v5204_v44, %v5205_v20  ;;  %v5213_v42 = vmax.f32 %v5211_v34, %v5212_v31  ;;  %v10752_v18 = vmax.f32 %v3192_v46, %v3193_v35 }
 0x5ae   :  { %v10754_v23 = vmax.f32 %v3199_v55, %v3200_v14  ;;  %v4187_v32 = vrot.slane %v4186_v54, 1  ;;  %v4194_v52 = vrot.slane %v4193_v2, 1  ;;  %v1833_v53 = vrot.slane %v1265_v50, 2 }
 0x5af   :  { %v5200_v19 = vrot.slane %v5199_v63, 2  ;;  %v5207_v8 = vrot.slane %v5206_v41, 2  ;;  %v5214_v21 = vrot.slane %v5213_v42, 2  ;;  %v1834_v40 = vrot.slane %v1265_v50, 4 }
 0x5b0   :  { %11225 = vst [vmem:[#allocation21_spill] sm:$0xff] %v10754_v23  ;;  %v1835_v10 = vrot.slane %v1265_v50, 6  ;;  %v6198_v15 = vsel %vm2277_vm1, %v1265_v50, -inf  ;;  %v1158_v9 = vmax.f32 %v848_v56, 0.0  ;;  %v4201_v29 = vrot.slane %v4200_v0, 1 }
 0x5b1   :  { %v4208_v36 = vrot.slane %v4207_v47, 1  ;;  %v5194_v16 = vmax.f32 %v5192_v57, %v5193_v25  ;;  %v6199_v44 = vrot.slane %v6198_v15, 4  ;;  %v10757_v34 = vmax.f32 %v4186_v54, %v4187_v32 }
 0x5b2   :  { %v6205_v46 = vsel %vm2277_vm1, %v1833_v53, -inf  ;;  %v6212_v55 = vsel %vm2277_vm1, %v1834_v40, -inf  ;;  %v6219_v35 = vsel %vm2277_vm1, %v1835_v10, -inf  ;;  %v5201_v24 = vmax.f32 %v5199_v63, %v5200_v19 }
 0x5b3   :  { %11226 = vst [vmem:[#allocation2_spill] sm:$0xff] %v10757_v34  ;;  %v5208_v3 = vmax.f32 %v5206_v41, %v5207_v8  ;;  %v5215_v14 = vmax.f32 %v5213_v42, %v5214_v21  ;;  %v6200_v45 = vmax.f32 %v6198_v15, %v6199_v44  ;;  %v6206_v20 = vrot.slane %v6205_v46, 4 }
 0x5b4   :  { %v6213_v31 = vrot.slane %v6212_v55, 4  ;;  %v6220_v50 = vrot.slane %v6219_v35, 4  ;;  %v1512_v56 = vrot.slane %v1158_v9, 2  ;;  %v10762_v23 = vmax.f32 %v4193_v2, %v4194_v52 }
 0x5b5   :  { %v10764_v25 = vmax.f32 %v4200_v0, %v4201_v29  ;;  %v10766_v54 = vmax.f32 %v4207_v47, %v4208_v36  ;;  %v5195_v57 = vrot.slane %v5194_v16, 1  ;;  %v6201_v32 = vrot.slane %v6200_v45, 2 }
 0x5b6   :  { %v6207_v53 = vmax.f32 %v6205_v46, %v6206_v20  ;;  %v6214_v40 = vmax.f32 %v6212_v55, %v6213_v31  ;;  %v1513_v34 = vrot.slane %v1158_v9, 4  ;;  %v5202_v10 = vrot.slane %v5201_v24, 1 }
 0x5b7   :  { %v1514_v63 = vrot.slane %v1158_v9, 6  ;;  %v3202_v41 = vsel %vm2277_vm1, %v1158_v9, -inf  ;;  %v3209_v42 = vsel %vm2277_vm1, %v1512_v56, -inf  ;;  %v5209_v19 = vrot.slane %v5208_v3, 1  ;;  %v937_v9 = vpop.f32.mrf.mxu1 }
 0x5b8   :  { %v5216_v8 = vrot.slane %v5215_v14, 1  ;;  %v10770_v21 = vmax.f32 %v6219_v35, %v6220_v50  ;;  %v3203_v2 = vrot.slane %v3202_v41, 4  ;;  %v10772_v0 = vmax.f32 %v5194_v16, %v5195_v57  ;;  %v1027_v57 = vpop.f32.mrf.mxu2 }
 0x5b9   :  { %v3210_v47 = vrot.slane %v3209_v42, 4  ;;  %v3216_v52 = vsel %vm2277_vm1, %v1513_v34, -inf  ;;  %v3223_v15 = vsel %vm2277_vm1, %v1514_v63, -inf  ;;  %v10776_v29 = vmax.f32 %v6200_v45, %v6201_v32 }
 0x5ba   :  { %11227 = vst [vmem:[#allocation3_spill] sm:$0xff] %v10772_v0  ;;  %v6208_v36 = vrot.slane %v6207_v53, 2  ;;  %v6215_v44 = vrot.slane %v6214_v40, 2  ;;  %v3204_v46 = vmax.f32 %v3202_v41, %v3203_v2  ;;  %v10778_v55 = vmax.f32 %v5201_v24, %v5202_v10  ;;  %v1117_v41 = vpop.f32.mrf.mxu3  ;;  %v850_v2 = vpop.f32.mrf.mxu0 }
 0x5bb   :  { %v3211_v20 = vmax.f32 %v3209_v42, %v3210_v47  ;;  %v3217_v31 = vrot.slane %v3216_v52, 4  ;;  %v3224_v35 = vrot.slane %v3223_v15, 4  ;;  %v10780_v50 = vmax.f32 %v5208_v3, %v5209_v19 }
 0x5bc   :  { %11228 = vst [vmem:[#allocation4_spill] sm:$0xff] %v10778_v55  ;;  %v10782_v16 = vmax.f32 %v5215_v14, %v5216_v8  ;;  %v3205_v34 = vrot.slane %v3204_v46, 2  ;;  %v938_v0 = vadd.f32 %v10566_v43, %v937_v9  ;;  %v10787_v10 = vmax.f32 %v6207_v53, %v6208_v36 }
 0x5bd   :  { %11229 = vst [vmem:[#allocation5_spill] sm:$0xff] %v10780_v50  ;;  %v3212_v63 = vrot.slane %v3211_v20, 2  ;;  %v3218_v45 = vmax.f32 %v3216_v52, %v3217_v31  ;;  %v3225_v32 = vmax.f32 %v3223_v15, %v3224_v35  ;;  %v10789_v42 = vmax.f32 %v6214_v40, %v6215_v44 }
 0x5be   :  { %11230 = vst [vmem:[#allocation6_spill] sm:$0xff] %v10782_v16  ;;  %v3206_v3 = vmax.f32 %v3204_v46, %v3205_v34  ;;  %v1194_v47 = vmax.f32 %v938_v0, 0.0  ;;  %v1028_v16 = vadd.f32 %v10566_v43, %v1027_v57  ;;  %v1118_v52 = vadd.f32 %v10566_v43, %v1117_v41 }
 0x5bf   :  { %v3213_v14 = vmax.f32 %v3211_v20, %v3212_v63  ;;  %v3219_v19 = vrot.slane %v3218_v45, 2  ;;  %v3226_v8 = vrot.slane %v3225_v32, 2  ;;  %v851_v15 = vadd.f32 %v10566_v43, %v850_v2 }
 0x5c0   :  { %v3207_v56 = vrot.slane %v3206_v3, 1  ;;  %v1620_v24 = vrot.slane %v1194_v47, 2  ;;  %v1621_v36 = vrot.slane %v1194_v47, 4  ;;  %v1622_v40 = vrot.slane %v1194_v47, 6 }
 0x5c1   :  { %v3214_v9 = vrot.slane %v3213_v14, 1  ;;  %v3220_v31 = vmax.f32 %v3218_v45, %v3219_v19  ;;  %v3227_v35 = vmax.f32 %v3225_v32, %v3226_v8  ;;  %v4210_v44 = vsel %vm2277_vm1, %v1194_v47, -inf }
 0x5c2   :  { %v3208_v53 = vmax.f32 %v3206_v3, %v3207_v56  ;;  %v4211_v0 = vrot.slane %v4210_v44, 4  ;;  %v4217_v57 = vsel %vm2277_vm1, %v1620_v24, -inf  ;;  %v4224_v41 = vsel %vm2277_vm1, %v1621_v36, -inf }
 0x5c3   :  { %v3215_v46 = vmax.f32 %v3213_v14, %v3214_v9  ;;  %v3221_v20 = vrot.slane %v3220_v31, 1  ;;  %v3228_v34 = vrot.slane %v3227_v35, 1  ;;  %v4231_v43 = vsel %vm2277_vm1, %v1622_v40, -inf }
 0x5c4   :  { %v6370_v63 = vmax.f32 %v10620_v33, %v3208_v53  ;;  %v4212_v2 = vmax.f32 %v4210_v44, %v4211_v0  ;;  %v4218_v19 = vrot.slane %v4217_v57, 4  ;;  %v4225_v8 = vrot.slane %v4224_v41, 4 }
 0x5c5   :  { %v3222_v45 = vmax.f32 %v3220_v31, %v3221_v20  ;;  %v3229_v32 = vmax.f32 %v3227_v35, %v3228_v34  ;;  %v6371_v56 = vmax.f32 %v10630_v28, %v3215_v46  ;;  %v4232_v14 = vrot.slane %v4231_v43, 4 }
 0x5c6   :  { %v6658_v3 = vpack.c.bf16 %v6370_v63, %v6370_v63  ;;  %v4213_v53 = vrot.slane %v4212_v2, 2  ;;  %v4219_v50 = vmax.f32 %v4217_v57, %v4218_v19  ;;  %v4226_v36 = vmax.f32 %v4224_v41, %v4225_v8 }
 0x5c7   :  { %v6372_v47 = vmax.f32 %v10632_v7, %v3222_v45  ;;  %v6373_v9 = vmax.f32 %v10636_v26, %v3229_v32  ;;  %v6659_v33 = vpack.c.bf16 %v6371_v56, %v6371_v56  ;;  %v4233_v55 = vmax.f32 %v4231_v43, %v4232_v14 }
 0x5c8   :  { %v7234_v24 = vunpack.c.l.b16 %v6658_v3  ;;  %v4214_v20 = vmax.f32 %v4212_v2, %v4213_v53  ;;  %v4220_v44 = vrot.slane %v4219_v50, 2  ;;  %v4227_v46 = vrot.slane %v4226_v36, 2 }
 0x5c9   :  { %v6660_v40 = vpack.c.bf16 %v6372_v47, %v6372_v47  ;;  %v6661_v31 = vpack.c.bf16 %v6373_v9, %v6373_v9  ;;  %v7235_v35 = vunpack.c.l.b16 %v6659_v33  ;;  %v4234_v34 = vrot.slane %v4233_v55, 2 }
 0x5ca   :  { %v7521_v28 = vsel %vm7468_vm5, %v7234_v24, %v10596_v48  ;;  %v4215_v63 = vrot.slane %v4214_v20, 1  ;;  %v4221_v45 = vmax.f32 %v4219_v50, %v4220_v44  ;;  %v4228_v32 = vmax.f32 %v4226_v36, %v4227_v46 }
 0x5cb   :  { %v7236_v0 = vunpack.c.l.b16 %v6660_v40  ;;  %v7237_v7 = vunpack.c.l.b16 %v6661_v31  ;;  %v7522_v26 = vsel %vm7470_vm6, %v7235_v35, %v7521_v28  ;;  %v4235_v57 = vmax.f32 %v4233_v55, %v4234_v34 }
 0x5cc   :  { %v1230_v41 = vmax.f32 %v1028_v16, 0.0  ;;  %v4216_v56 = vmax.f32 %v4214_v20, %v4215_v63  ;;  %v10806_v3 = vmax.f32 %v1118_v52, 0.0  ;;  %v10808_v2 = vmax.f32 %v851_v15, 0.0 }
 0x5cd   :  { %v7523_v43 = vsel %vm7472_vm7, %v7236_v0, %v7522_v26  ;;  %v4222_v19 = vrot.slane %v4221_v45, 1  ;;  %v4229_v8 = vrot.slane %v4228_v32, 1  ;;  %v4236_v14 = vrot.slane %v4235_v57, 1 }
 0x5ce   :  { %v7524_v48 = vsel %vm7474_vm8, %v7237_v7, %v7523_v43  ;;  %v6442_v9 = vmax.f32 %v10638_v17, %v4216_v56  ;;  %v1728_v33 = vrot.slane %v1230_v41, 2  ;;  %v1729_v50 = vrot.slane %v1230_v41, 4 }
 0x5cf   :  { %v7728_v47 = vpack.c.b16 %v7524_v48, %v7524_v48  ;;  %v4223_v53 = vmax.f32 %v4221_v45, %v4222_v19  ;;  %v4230_v55 = vmax.f32 %v4228_v32, %v4229_v8  ;;  %v4237_v16 = vmax.f32 %v4235_v57, %v4236_v14 }
 0x5d0   :  { %v1730_v24 = vrot.slane %v1230_v41, 6  ;;  %v6730_v52 = vpack.c.bf16 %v6442_v9, %v6442_v9  ;;  %v5218_v15 = vsel %vm2277_vm1, %v1230_v41, -inf  ;;  %v5225_v36 = vsel %vm2277_vm1, %v1728_v33, -inf }
 0x5d1   :  { %7800 = vst [vmem:[%s11047_s3 + $0x1c] sm:$0xf] %v7728_v47  ;;  %v5232_v40 = vsel %vm2277_vm1, %v1729_v50, -inf  ;;  %v6443_v31 = vmax.f32 %v10643_v30, %v4223_v53  ;;  %v6444_v17 = vmax.f32 %v10660_v4, %v4230_v55  ;;  %v6445_v35 = vmax.f32 %v10663_v59, %v4237_v16 }
 0x5d2   :  { %v5219_v20 = vrot.slane %v5218_v15, 4  ;;  %v7306_v28 = vunpack.c.l.b16 %v6730_v52  ;;  %v5226_v44 = vrot.slane %v5225_v36, 4  ;;  %v5233_v46 = vrot.slane %v5232_v40, 4 }
 0x5d3   :  { %v5239_v34 = vsel %vm2277_vm1, %v1730_v24, -inf  ;;  %v6731_v0 = vpack.c.bf16 %v6443_v31, %v6443_v31  ;;  %v6732_v7 = vpack.c.bf16 %v6444_v17, %v6444_v17  ;;  %v6733_v26 = vpack.c.bf16 %v6445_v35, %v6445_v35 }
 0x5d4   :  { %v5220_v63 = vmax.f32 %v5218_v15, %v5219_v20  ;;  %v7584_v45 = vsel %vm7468_vm5, %v7306_v28, %v10599_v51  ;;  %v5227_v32 = vmax.f32 %v5225_v36, %v5226_v44  ;;  %v5234_v57 = vmax.f32 %v5232_v40, %v5233_v46 }
 0x5d5   :  { %v5240_v30 = vrot.slane %v5239_v34, 4  ;;  %v7307_v41 = vunpack.c.l.b16 %v6731_v0  ;;  %v7308_v4 = vunpack.c.l.b16 %v6732_v7  ;;  %v7309_v43 = vunpack.c.l.b16 %v6733_v26 }
 0x5d6   :  { %v5221_v59 = vrot.slane %v5220_v63, 2  ;;  %v5228_v56 = vrot.slane %v5227_v32, 2  ;;  %v5235_v48 = vrot.slane %v5234_v57, 2  ;;  %v1836_v8 = vrot.slane %v10806_v3, 2 }
 0x5d7   :  { %v5241_v19 = vmax.f32 %v5239_v34, %v5240_v30  ;;  %v7585_v14 = vsel %vm7470_vm6, %v7307_v41, %v7584_v45  ;;  %v1837_v9 = vrot.slane %v10806_v3, 4  ;;  %v1838_v33 = vrot.slane %v10806_v3, 6 }
 0x5d8   :  { %v5222_v47 = vmax.f32 %v5220_v63, %v5221_v59  ;;  %v7586_v51 = vsel %vm7472_vm7, %v7308_v4, %v7585_v14  ;;  %v5229_v50 = vmax.f32 %v5227_v32, %v5228_v56  ;;  %v5236_v53 = vmax.f32 %v5234_v57, %v5235_v48 }
 0x5d9   :  { %v5242_v55 = vrot.slane %v5241_v19, 2  ;;  %v7587_v16 = vsel %vm7474_vm8, %v7309_v43, %v7586_v51  ;;  %v6226_v52 = vsel %vm2277_vm1, %v10806_v3, -inf  ;;  %v6233_v15 = vsel %vm2277_vm1, %v1836_v8, -inf }
 0x5da   :  { %v5223_v24 = vrot.slane %v5222_v47, 1  ;;  %v7737_v36 = vpack.c.b16 %v7587_v16, %v7587_v16  ;;  %v5230_v40 = vrot.slane %v5229_v50, 1  ;;  %v5237_v31 = vrot.slane %v5236_v53, 1 }
 0x5db   :  { %v5243_v17 = vmax.f32 %v5241_v19, %v5242_v55  ;;  %v6227_v20 = vrot.slane %v6226_v52, 4  ;;  %v6234_v28 = vrot.slane %v6233_v15, 4  ;;  %v6240_v44 = vsel %vm2277_vm1, %v1837_v9, -inf }
 0x5dc   :  { %v5224_v35 = vmax.f32 %v5222_v47, %v5223_v24  ;;  %7809 = vst [vmem:[%s11047_s3 + $0x40] sm:$0xf] %v7737_v36  ;;  %v5231_v46 = vmax.f32 %v5229_v50, %v5230_v40  ;;  %v5238_v34 = vmax.f32 %v5236_v53, %v5237_v31  ;;  %v6241_v7 = vrot.slane %v6240_v44, 4 }
 0x5dd   :  { %v5244_v0 = vrot.slane %v5243_v17, 1  ;;  %v6228_v26 = vmax.f32 %v6226_v52, %v6227_v20  ;;  %v6235_v63 = vmax.f32 %v6233_v15, %v6234_v28  ;;  %v6247_v45 = vsel %vm2277_vm1, %v1838_v33, -inf }
 0x5de   :  { %v6514_v3 = vmax.f32 %v10666_v38, %v5224_v35  ;;  %v6515_v57 = vmax.f32 %v10670_v61, %v5231_v46  ;;  %v6516_v30 = vmax.f32 %v10673_v27, %v5238_v34  ;;  %v6242_v41 = vmax.f32 %v6240_v44, %v6241_v7 }
 0x5df   :  { %v5245_v32 = vmax.f32 %v5243_v17, %v5244_v0  ;;  %v6229_v43 = vrot.slane %v6228_v26, 2  ;;  %v6236_v59 = vrot.slane %v6235_v63, 2  ;;  %v6248_v56 = vrot.slane %v6247_v45, 4 }
 0x5e0   :  { %v6802_v4 = vpack.c.bf16 %v6514_v3, %v6514_v3  ;;  %v6803_v19 = vpack.c.bf16 %v6515_v57, %v6515_v57  ;;  %v6804_v8 = vpack.c.bf16 %v6516_v30, %v6516_v30  ;;  %v6243_v14 = vrot.slane %v6242_v41, 2 }
 0x5e1   :  { %v6517_v48 = vmax.f32 %v10676_v49, %v5245_v32  ;;  %v6230_v47 = vmax.f32 %v6228_v26, %v6229_v43  ;;  %v6237_v9 = vmax.f32 %v6235_v63, %v6236_v59  ;;  %v6249_v51 = vmax.f32 %v6247_v45, %v6248_v56  ;;  %v940_v43 = vpop.f32.mrf.mxu1 }
 0x5e2   :  { %v7378_v38 = vunpack.c.l.b16 %v6802_v4  ;;  %v7379_v50 = vunpack.c.l.b16 %v6803_v19  ;;  %v7380_v53 = vunpack.c.l.b16 %v6804_v8  ;;  %v6244_v61 = vmax.f32 %v6242_v41, %v6243_v14 }
 0x5e3   :  { %v6805_v33 = vpack.c.bf16 %v6517_v48, %v6517_v48  ;;  %v6231_v55 = vrot.slane %v6230_v47, 1  ;;  %v6238_v16 = vrot.slane %v6237_v9, 1  ;;  %v6250_v24 = vrot.slane %v6249_v51, 2 }
 0x5e4   :  { %v7647_v27 = vsel %vm7468_vm5, %v7378_v38, %v10602_v5  ;;  %v6245_v15 = vrot.slane %v6244_v61, 1  ;;  %v1515_v36 = vrot.slane %v10808_v2, 2  ;;  %v1516_v44 = vrot.slane %v10808_v2, 4 }
 0x5e5   :  { %v7381_v52 = vunpack.c.l.b16 %v6805_v33  ;;  %v7648_v49 = vsel %vm7470_vm6, %v7379_v50, %v7647_v27  ;;  %v6232_v31 = vmax.f32 %v6230_v47, %v6231_v55  ;;  %v6239_v17 = vmax.f32 %v6237_v9, %v6238_v16  ;;  %v10867_v33 = vld [vmem:[%s11046_s2] ss:$0 sm:$0xff] }
 0x5e6   :  { %v7649_v40 = vsel %vm7472_vm7, %v7380_v53, %v7648_v49  ;;  %v6251_v35 = vmax.f32 %v6249_v51, %v6250_v24  ;;  %v6246_v28 = vmax.f32 %v6244_v61, %v6245_v15  ;;  %v1517_v5 = vrot.slane %v10808_v2, 6 }
 0x5e7   :  { %v7650_v20 = vsel %vm7474_vm8, %v7381_v52, %v7649_v40  ;;  %v6586_v0 = vmax.f32 %v10678_v11, %v6232_v31  ;;  %v6587_v7 = vmax.f32 %v10682_v12, %v6239_v17  ;;  %v3230_v26 = vsel %vm2277_vm1, %v10808_v2, -inf }
 0x5e8   :  { %v7746_v46 = vpack.c.b16 %v7650_v20, %v7650_v20  ;;  %v6252_v34 = vrot.slane %v6251_v35, 1  ;;  %v6588_v3 = vmax.f32 %v10684_v58, %v6246_v28  ;;  %v3237_v63 = vsel %vm2277_vm1, %v1515_v36, -inf }
 0x5e9   :  { %v3244_v45 = vsel %vm2277_vm1, %v1516_v44, -inf  ;;  %v6874_v57 = vpack.c.bf16 %v6586_v0, %v6586_v0  ;;  %v6875_v30 = vpack.c.bf16 %v6587_v7, %v6587_v7  ;;  %v3231_v41 = vrot.slane %v3230_v26, 4 }
 0x5ea   :  { %7818 = vst [vmem:[%s11047_s3 + $0x64] sm:$0xf] %v7746_v46  ;;  %v6253_v32 = vmax.f32 %v6251_v35, %v6252_v34  ;;  %v6876_v11 = vpack.c.bf16 %v6588_v3, %v6588_v3  ;;  %v3238_v4 = vrot.slane %v3237_v63, 4  ;;  %v3245_v12 = vrot.slane %v3244_v45, 4 }
 0x5eb   :  { %v3251_v58 = vsel %vm2277_vm1, %v1517_v5, -inf  ;;  %v7450_v59 = vunpack.c.l.b16 %v6874_v57  ;;  %v7451_v56 = vunpack.c.l.b16 %v6875_v30  ;;  %v3232_v48 = vmax.f32 %v3230_v26, %v3231_v41 }
 0x5ec   :  { %v6589_v2 = vmax.f32 %v10686_v6, %v6253_v32  ;;  %v7452_v19 = vunpack.c.l.b16 %v6876_v11  ;;  %v3239_v8 = vmax.f32 %v3237_v63, %v3238_v4  ;;  %v3246_v14 = vmax.f32 %v3244_v45, %v3245_v12  ;;  %v1030_v32 = vpop.f32.mrf.mxu2 }
 0x5ed   :  { %v3252_v38 = vrot.slane %v3251_v58, 4  ;;  %v7710_v9 = vsel %vm7468_vm5, %v7450_v59, %v10617_v22  ;;  %v3233_v51 = vrot.slane %v3232_v48, 2  ;;  %v941_v50 = vadd.f32 %v10867_v33, %v940_v43 }
 0x5ee   :  { %v6877_v47 = vpack.c.bf16 %v6589_v2, %v6589_v2  ;;  %v7711_v6 = vsel %vm7470_vm6, %v7451_v56, %v7710_v9  ;;  %v3240_v53 = vrot.slane %v3239_v8, 2  ;;  %v3247_v61 = vrot.slane %v3246_v14, 2 }
 0x5ef   :  { %v3253_v27 = vmax.f32 %v3251_v58, %v3252_v38  ;;  %v7712_v16 = vsel %vm7472_vm7, %v7452_v19, %v7711_v6  ;;  %v3234_v24 = vmax.f32 %v3232_v48, %v3233_v51  ;;  %v1195_v52 = vmax.f32 %v941_v50, 0.0 }
 0x5f0   :  { %v7453_v55 = vunpack.c.l.b16 %v6877_v47  ;;  %v11231_v22 = vrot.slane %v10770_v21, 2  ;;  %v3241_v15 = vmax.f32 %v3239_v8, %v3240_v53  ;;  %v3248_v36 = vmax.f32 %v3246_v14, %v3247_v61  ;;  %v11233_v47 = vld [vmem:[#allocation9_spill] sm:$0xff] }
 0x5f1   :  { %v3254_v40 = vrot.slane %v3253_v27, 2  ;;  %v3235_v17 = vrot.slane %v3234_v24, 1  ;;  %v1623_v35 = vrot.slane %v1195_v52, 2  ;;  %v1624_v20 = vrot.slane %v1195_v52, 4 }
 0x5f2   :  { %v10875_v49 = vmax.f32 %v10770_v21, %v11231_v22  ;;  %v7713_v31 = vsel %vm7474_vm8, %v7453_v55, %v7712_v16  ;;  %v3242_v44 = vrot.slane %v3241_v15, 1  ;;  %v3249_v5 = vrot.slane %v3248_v36, 1 }
 0x5f3   :  { %v7755_v28 = vpack.c.b16 %v7713_v31, %v7713_v31  ;;  %v3255_v46 = vmax.f32 %v3253_v27, %v3254_v40  ;;  %v3236_v34 = vmax.f32 %v3234_v24, %v3235_v17  ;;  %v1625_v0 = vrot.slane %v1195_v52, 6 }
 0x5f4   :  { %v4238_v7 = vsel %vm2277_vm1, %v1195_v52, -inf  ;;  %v4245_v3 = vsel %vm2277_vm1, %v1623_v35, -inf  ;;  %v3243_v21 = vmax.f32 %v3241_v15, %v3242_v44  ;;  %v3250_v26 = vmax.f32 %v3248_v36, %v3249_v5 }
 0x5f5   :  { %7827 = vst [vmem:[%s11047_s3 + $0x88] sm:$0xf] %v7755_v28  ;;  %v3256_v63 = vrot.slane %v3255_v46, 1  ;;  %v4239_v45 = vrot.slane %v4238_v7, 4  ;;  %v6374_v57 = vmax.f32 %v10695_v37, %v3236_v34  ;;  %v4246_v30 = vrot.slane %v4245_v3, 4 }
 0x5f6   :  { %v4252_v41 = vsel %vm2277_vm1, %v1624_v20, -inf  ;;  %v4259_v11 = vsel %vm2277_vm1, %v1625_v0, -inf  ;;  %v11232_v4 = vrot.slane %v10776_v29, 1  ;;  %v6375_v43 = vmax.f32 %v10697_v1, %v3243_v21 }
 0x5f7   :  { %v3257_v58 = vmax.f32 %v3255_v46, %v3256_v63  ;;  %v4240_v2 = vmax.f32 %v4238_v7, %v4239_v45  ;;  %v4247_v59 = vmax.f32 %v4245_v3, %v4246_v30  ;;  %v4253_v56 = vrot.slane %v4252_v41, 4  ;;  %v1120_v7 = vpop.f32.mrf.mxu3  ;;  %v11234_v3 = vld [vmem:[#allocation10_spill] sm:$0xff] }
 0x5f8   :  { %v10889_v12 = vmax.f32 %v10776_v29, %v11232_v4  ;;  %v4260_v48 = vrot.slane %v4259_v11, 4  ;;  %v1031_v19 = vadd.f32 %v10867_v33, %v1030_v32  ;;  %v6210_v37 = vrot.slane %v10787_v10, 1 }
 0x5f9   :  { %v6376_v8 = vmax.f32 %v10699_v62, %v3250_v26  ;;  %v6662_v14 = vpack.c.bf16 %v6374_v57, %v6374_v57  ;;  %v4241_v38 = vrot.slane %v4240_v2, 2  ;;  %v6377_v9 = vmax.f32 %v11233_v47, %v3257_v58  ;;  %v11235_v57 = vld [vmem:[#allocation11_spill] sm:$0xff] }
 0x5fa   :  { %v4248_v51 = vrot.slane %v4247_v59, 2  ;;  %v4254_v29 = vmax.f32 %v4252_v41, %v4253_v56  ;;  %v4261_v50 = vmax.f32 %v4259_v11, %v4260_v48  ;;  %v6217_v6 = vrot.slane %v10789_v42, 1 }
 0x5fb   :  { %v6224_v1 = vrot.slane %v10875_v49, 1  ;;  %v6663_v53 = vpack.c.bf16 %v6375_v43, %v6375_v43  ;;  %v4242_v61 = vmax.f32 %v4240_v2, %v4241_v38  ;;  %v1231_v24 = vmax.f32 %v1031_v19, 0.0 }
 0x5fc   :  { %v4249_v27 = vmax.f32 %v4247_v59, %v4248_v51  ;;  %v4255_v55 = vrot.slane %v4254_v29, 2  ;;  %v4262_v16 = vrot.slane %v4261_v50, 2  ;;  %v10899_v52 = vmax.f32 %v10787_v10, %v6210_v37  ;;  %v11236_v59 = vld [vmem:[#allocation12_spill] sm:$0xff] }
 0x5fd   :  { %v6664_v62 = vpack.c.bf16 %v6376_v8, %v6376_v8  ;;  %v7238_v22 = vunpack.c.l.b16 %v6662_v14  ;;  %v4243_v15 = vrot.slane %v4242_v61, 1  ;;  %v6665_v36 = vpack.c.bf16 %v6377_v9, %v6377_v9  ;;  %v11237_v9 = vld [vmem:[#allocation13_spill] sm:$0xff] }
 0x5fe   :  { %v4250_v40 = vrot.slane %v4249_v27, 1  ;;  %v4256_v31 = vmax.f32 %v4254_v29, %v4255_v55  ;;  %v4263_v17 = vmax.f32 %v4261_v50, %v4262_v16  ;;  %v7239_v35 = vunpack.c.l.b16 %v6663_v53 }
 0x5ff   :  { %v4244_v20 = vmax.f32 %v4242_v61, %v4243_v15  ;;  %v1731_v28 = vrot.slane %v1231_v24, 2  ;;  %v1732_v44 = vrot.slane %v1231_v24, 4  ;;  %v1733_v0 = vrot.slane %v1231_v24, 6 }
 0x600   :  { %v4251_v5 = vmax.f32 %v4249_v27, %v4250_v40  ;;  %v4257_v46 = vrot.slane %v4256_v31, 1  ;;  %v4264_v34 = vrot.slane %v4263_v17, 1  ;;  %v5246_v10 = vsel %vm2277_vm1, %v1231_v24, -inf }
 0x601   :  { %v6446_v21 = vmax.f32 %v11234_v3, %v4244_v20  ;;  %v5253_v26 = vsel %vm2277_vm1, %v1731_v28, -inf  ;;  %v5260_v63 = vsel %vm2277_vm1, %v1732_v44, -inf  ;;  %v5247_v41 = vrot.slane %v5246_v10, 4 }
 0x602   :  { %v4258_v45 = vmax.f32 %v4256_v31, %v4257_v46  ;;  %v4265_v32 = vmax.f32 %v4263_v17, %v4264_v34  ;;  %v6447_v30 = vmax.f32 %v11235_v57, %v4251_v5  ;;  %v5254_v11 = vrot.slane %v5253_v26, 4 }
 0x603   :  { %v5261_v4 = vrot.slane %v5260_v63, 4  ;;  %v5267_v58 = vsel %vm2277_vm1, %v1733_v0, -inf  ;;  %v1121_v43 = vadd.f32 %v10867_v33, %v1120_v7  ;;  %v7240_v2 = vunpack.c.l.b16 %v6664_v62 }
 0x604   :  { %v6448_v56 = vmax.f32 %v11236_v59, %v4258_v45  ;;  %v6734_v48 = vpack.c.bf16 %v6446_v21, %v6446_v21  ;;  %v5248_v19 = vmax.f32 %v5246_v10, %v5247_v41  ;;  %v7525_v37 = vsel %vm7462_vm2, %v7239_v35, %v7238_v22 }
 0x605   :  { %v5255_v8 = vmax.f32 %v5253_v26, %v5254_v11  ;;  %v5262_v14 = vmax.f32 %v5260_v63, %v5261_v4  ;;  %v5268_v38 = vrot.slane %v5267_v58, 4  ;;  %v7241_v47 = vunpack.c.l.b16 %v6665_v36 }
 0x606   :  { %v6449_v51 = vmax.f32 %v11237_v9, %v4265_v32  ;;  %v6735_v29 = vpack.c.bf16 %v6447_v30, %v6447_v30  ;;  %v5249_v50 = vrot.slane %v5248_v19, 2  ;;  %v1267_v55 = vmax.f32 %v1121_v43, 0.0 }
 0x607   :  { %v5256_v53 = vrot.slane %v5255_v8, 2  ;;  %v5263_v61 = vrot.slane %v5262_v14, 2  ;;  %v5269_v27 = vmax.f32 %v5267_v58, %v5268_v38  ;;  %v7526_v16 = vsel %vm7464_vm3, %v7240_v2, %v7525_v37  ;;  %v11238_v58 = vld [vmem:[#allocation14_spill] sm:$0xff] }
 0x608   :  { %v6736_v24 = vpack.c.bf16 %v6448_v56, %v6448_v56  ;;  %v7310_v62 = vunpack.c.l.b16 %v6734_v48  ;;  %v5250_v15 = vmax.f32 %v5248_v19, %v5249_v50  ;;  %v1839_v17 = vrot.slane %v1267_v55, 2 }
 0x609   :  { %v5257_v40 = vmax.f32 %v5255_v8, %v5256_v53  ;;  %v5264_v31 = vmax.f32 %v5262_v14, %v5263_v61  ;;  %v5270_v22 = vrot.slane %v5269_v27, 2  ;;  %v6737_v35 = vpack.c.bf16 %v6449_v51, %v6449_v51 }
 0x60a   :  { %v5251_v20 = vrot.slane %v5250_v15, 1  ;;  %v1840_v36 = vrot.slane %v1267_v55, 4  ;;  %v1841_v28 = vrot.slane %v1267_v55, 6  ;;  %v7311_v44 = vunpack.c.l.b16 %v6735_v29 }
 0x60b   :  { %v5258_v5 = vrot.slane %v5257_v40, 1  ;;  %v5265_v46 = vrot.slane %v5264_v31, 1  ;;  %v5271_v34 = vmax.f32 %v5269_v27, %v5270_v22  ;;  %v6254_v7 = vsel %vm2277_vm1, %v1267_v55, -inf }
 0x60c   :  { %v5252_v0 = vmax.f32 %v5250_v15, %v5251_v20  ;;  %v6261_v3 = vsel %vm2277_vm1, %v1839_v17, -inf  ;;  %v6268_v21 = vsel %vm2277_vm1, %v1840_v36, -inf  ;;  %v6255_v45 = vrot.slane %v6254_v7, 4  ;;  %v942_v36 = vpop.f32.mrf.mxu1 }
 0x60d   :  { %v5259_v10 = vmax.f32 %v5257_v40, %v5258_v5  ;;  %v5266_v26 = vmax.f32 %v5264_v31, %v5265_v46  ;;  %v5272_v63 = vrot.slane %v5271_v34, 1  ;;  %v6262_v57 = vrot.slane %v6261_v3, 4 }
 0x60e   :  { %v6518_v32 = vmax.f32 %v10721_v13, %v5252_v0  ;;  %v6269_v30 = vrot.slane %v6268_v21, 4  ;;  %v6275_v41 = vsel %vm2277_vm1, %v1841_v28, -inf  ;;  %v6256_v2 = vmax.f32 %v6254_v7, %v6255_v45  ;;  %v852_v13 = vpop.f32.mrf.mxu0 }
 0x60f   :  { %v5273_v11 = vmax.f32 %v5271_v34, %v5272_v63  ;;  %v6519_v4 = vmax.f32 %v10724_v39, %v5259_v10  ;;  %v6520_v43 = vmax.f32 %v11238_v58, %v5266_v26  ;;  %v7312_v59 = vunpack.c.l.b16 %v6736_v24  ;;  %v11239_v39 = vld [vmem:[#allocation15_spill] sm:$0xff] }
 0x610   :  { %v6263_v56 = vmax.f32 %v6261_v3, %v6262_v57  ;;  %v6270_v48 = vmax.f32 %v6268_v21, %v6269_v30  ;;  %v6276_v19 = vrot.slane %v6275_v41, 4  ;;  %v7588_v37 = vsel %vm7462_vm2, %v7311_v44, %v7310_v62 }
 0x611   :  { %v6806_v8 = vpack.c.bf16 %v6518_v32, %v6518_v32  ;;  %v6807_v14 = vpack.c.bf16 %v6519_v4, %v6519_v4  ;;  %v6257_v38 = vrot.slane %v6256_v2, 2  ;;  %v6808_v9 = vpack.c.bf16 %v6520_v43, %v6520_v43  ;;  %v11241_v4 = vld [vmem:[#allocation17_spill] sm:$0xff] }
 0x612   :  { %v6264_v51 = vrot.slane %v6263_v56, 2  ;;  %v6271_v29 = vrot.slane %v6270_v48, 2  ;;  %v6277_v50 = vmax.f32 %v6275_v41, %v6276_v19  ;;  %v10921_v53 = vsel %vm7466_vm4, %v7241_v47, %v7526_v16  ;;  %v11242_v19 = vld [vmem:[#allocation18_spill] sm:$0xff] }
 0x613   :  { %v6521_v61 = vmax.f32 %v11239_v39, %v5273_v11  ;;  %v7383_v27 = vunpack.c.l.b16 %v6807_v14  ;;  %v6258_v55 = vmax.f32 %v6256_v2, %v6257_v38  ;;  %v853_v62 = vadd.f32 %v10867_v33, %v852_v13 }
 0x614   :  { %v6265_v24 = vmax.f32 %v6263_v56, %v6264_v51  ;;  %v6272_v15 = vmax.f32 %v6270_v48, %v6271_v29  ;;  %v6278_v40 = vrot.slane %v6277_v50, 2  ;;  %v7313_v31 = vunpack.c.l.b16 %v6737_v35  ;;  %v11240_v35 = vld [vmem:[#allocation16_spill] sm:$0xff]  ;;  %v1032_v56 = vpop.f32.mrf.mxu2 }
 0x615   :  { %v7589_v22 = vsel %vm7464_vm3, %v7312_v59, %v7588_v37  ;;  %v7382_v17 = vunpack.c.l.b16 %v6806_v8  ;;  %v6259_v20 = vrot.slane %v6258_v55, 1  ;;  %v7384_v28 = vunpack.c.l.b16 %v6808_v9 }
 0x616   :  { %v6266_v44 = vrot.slane %v6265_v24, 1  ;;  %v6273_v5 = vrot.slane %v6272_v15, 1  ;;  %v6279_v47 = vmax.f32 %v6277_v50, %v6278_v40  ;;  %v6809_v16 = vpack.c.bf16 %v6521_v61, %v6521_v61  ;;  %v11243_v50 = vld [vmem:[#allocation19_spill] sm:$0xff] }
 0x617   :  { %v7651_v46 = vsel %vm7462_vm2, %v7383_v27, %v7382_v17  ;;  %v6260_v34 = vmax.f32 %v6258_v55, %v6259_v20  ;;  %v1160_v0 = vmax.f32 %v853_v62, 0.0  ;;  %v943_v10 = vadd.f32 %v10867_v33, %v942_v36 }
 0x618   :  { %v6267_v7 = vmax.f32 %v6265_v24, %v6266_v44  ;;  %v6274_v3 = vmax.f32 %v6272_v15, %v6273_v5  ;;  %v6280_v21 = vrot.slane %v6279_v47, 1  ;;  %v10930_v57 = vsel %vm7466_vm4, %v7313_v31, %v7589_v22 }
 0x619   :  { %v6590_v26 = vmax.f32 %v11240_v35, %v6260_v34  ;;  %v1518_v63 = vrot.slane %v1160_v0, 2  ;;  %v1519_v45 = vrot.slane %v1160_v0, 4  ;;  %v1520_v32 = vrot.slane %v1160_v0, 6 }
 0x61a   :  { %v7652_v30 = vsel %vm7464_vm3, %v7384_v28, %v7651_v46  ;;  %v6281_v41 = vmax.f32 %v6279_v47, %v6280_v21  ;;  %v3258_v11 = vsel %vm2277_vm1, %v1160_v0, -inf  ;;  %v10935_v58 = vmax.f32 %v11241_v4, %v6267_v7 }
 0x61b   :  { %v3259_v43 = vrot.slane %v3258_v11, 4  ;;  %v3265_v2 = vsel %vm2277_vm1, %v1518_v63, -inf  ;;  %v3272_v59 = vsel %vm2277_vm1, %v1519_v45, -inf  ;;  %v7385_v48 = vunpack.c.l.b16 %v6809_v16 }
 0x61c   :  { %v10940_v37 = vmax.f32 %v11242_v19, %v6274_v3  ;;  %v3266_v8 = vrot.slane %v3265_v2, 4  ;;  %v1196_v14 = vmax.f32 %v943_v10, 0.0  ;;  %v6878_v38 = vpack.c.bf16 %v6590_v26, %v6590_v26 }
 0x61d   :  { %v3260_v13 = vmax.f32 %v3258_v11, %v3259_v43  ;;  %v3273_v9 = vrot.slane %v3272_v59, 4  ;;  %v3279_v51 = vsel %vm2277_vm1, %v1520_v32, -inf  ;;  %v10944_v29 = vsel %vm7466_vm4, %v7385_v48, %v7652_v30 }
 0x61e   :  { %v10947_v39 = vmax.f32 %v11243_v50, %v6281_v41  ;;  %v3267_v61 = vmax.f32 %v3265_v2, %v3266_v8  ;;  %v10950_v27 = vadd.f32 %v10867_v33, %v1032_v56  ;;  %v6879_v55 = vpack.c.bf16 %v10935_v58, %v10935_v58  ;;  %v11244_v56 = vld [vmem:[#allocation20_spill] sm:$0xff] }
 0x61f   :  { %v3261_v24 = vrot.slane %v3260_v13, 2  ;;  %v3274_v15 = vmax.f32 %v3272_v59, %v3273_v9  ;;  %v3280_v40 = vrot.slane %v3279_v51, 4  ;;  %v6880_v62 = vpack.c.bf16 %v10940_v37, %v10940_v37 }
 0x620   :  { %v3268_v31 = vrot.slane %v3267_v61, 2  ;;  %v1626_v22 = vrot.slane %v1196_v14, 2  ;;  %v1627_v17 = vrot.slane %v1196_v14, 4  ;;  %v10956_v20 = vunpack.c.l.b16 %v6878_v38 }
 0x621   :  { %v3262_v36 = vmax.f32 %v3260_v13, %v3261_v24  ;;  %v3275_v28 = vrot.slane %v3274_v15, 2  ;;  %v3281_v44 = vmax.f32 %v3279_v51, %v3280_v40  ;;  %v6881_v5 = vpack.c.bf16 %v10947_v39, %v10947_v39 }
 0x622   :  { %v3269_v47 = vmax.f32 %v3267_v61, %v3268_v31  ;;  %v1628_v16 = vrot.slane %v1196_v14, 6  ;;  %v4266_v46 = vsel %vm2277_vm1, %v1196_v14, -inf  ;;  %v4273_v10 = vsel %vm2277_vm1, %v1626_v22, -inf  ;;  %v11245_v22 = vld [vmem:[#allocation21_spill] sm:$0xff] }
 0x623   :  { %v3263_v34 = vrot.slane %v3262_v36, 1  ;;  %v3276_v0 = vmax.f32 %v3274_v15, %v3275_v28  ;;  %v3282_v7 = vrot.slane %v3281_v44, 2  ;;  %v4267_v3 = vrot.slane %v4266_v46, 4 }
 0x624   :  { %v3270_v21 = vrot.slane %v3269_v47, 1  ;;  %v4280_v35 = vsel %vm2277_vm1, %v1627_v17, -inf  ;;  %v4287_v26 = vsel %vm2277_vm1, %v1628_v16, -inf  ;;  %v4274_v11 = vrot.slane %v4273_v10, 4 }
 0x625   :  { %v3264_v63 = vmax.f32 %v3262_v36, %v3263_v34  ;;  %v3277_v45 = vrot.slane %v3276_v0, 1  ;;  %v3283_v32 = vmax.f32 %v3281_v44, %v3282_v7  ;;  %v4268_v30 = vmax.f32 %v4266_v46, %v4267_v3  ;;  %v1122_v3 = vpop.f32.mrf.mxu3 }
 0x626   :  { %v3271_v41 = vmax.f32 %v3269_v47, %v3270_v21  ;;  %v4281_v4 = vrot.slane %v4280_v35, 4  ;;  %v4288_v43 = vrot.slane %v4287_v26, 4  ;;  %v4275_v14 = vmax.f32 %v4273_v10, %v4274_v11 }
 0x627   :  { %v3278_v2 = vmax.f32 %v3276_v0, %v3277_v45  ;;  %v3284_v59 = vrot.slane %v3283_v32, 1  ;;  %v6378_v48 = vmax.f32 %v11244_v56, %v3264_v63  ;;  %v4269_v19 = vrot.slane %v4268_v30, 2 }
 0x628   :  { %v6379_v8 = vmax.f32 %v10749_v60, %v3271_v41  ;;  %v4282_v38 = vmax.f32 %v4280_v35, %v4281_v4  ;;  %v4289_v13 = vmax.f32 %v4287_v26, %v4288_v43  ;;  %v4276_v15 = vrot.slane %v4275_v14, 2 }
 0x629   :  { %v3285_v9 = vmax.f32 %v3283_v32, %v3284_v59  ;;  %v6380_v51 = vmax.f32 %v10752_v18, %v3278_v2  ;;  %v6666_v50 = vpack.c.bf16 %v6378_v48, %v6378_v48  ;;  %v4270_v61 = vmax.f32 %v4268_v30, %v4269_v19  ;;  %v11246_v32 = vld [vmem:[#allocation2_spill] sm:$0xff] }
 0x62a   :  { %v6667_v24 = vpack.c.bf16 %v6379_v8, %v6379_v8  ;;  %v4283_v40 = vrot.slane %v4282_v38, 2  ;;  %v4290_v31 = vrot.slane %v4289_v13, 2  ;;  %v4277_v16 = vmax.f32 %v4275_v14, %v4276_v15 }
 0x62b   :  { %v6381_v17 = vmax.f32 %v11245_v22, %v3285_v9  ;;  %v6668_v36 = vpack.c.bf16 %v6380_v51, %v6380_v51  ;;  %v7242_v28 = vunpack.c.l.b16 %v6666_v50  ;;  %v4271_v44 = vrot.slane %v4270_v61, 1 }
 0x62c   :  { %v7243_v47 = vunpack.c.l.b16 %v6667_v24  ;;  %v4284_v60 = vmax.f32 %v4282_v38, %v4283_v40  ;;  %v4291_v46 = vmax.f32 %v4289_v13, %v4290_v31  ;;  %v4278_v10 = vrot.slane %v4277_v16, 1 }
 0x62d   :  { %v6669_v34 = vpack.c.bf16 %v6381_v17, %v6381_v17  ;;  %v7244_v0 = vunpack.c.l.b16 %v6668_v36  ;;  %v7528_v18 = vsel %vm7468_vm5, %v7242_v28, %v10921_v53  ;;  %v4272_v7 = vmax.f32 %v4270_v61, %v4271_v44 }
 0x62e   :  { %v7529_v21 = vsel %vm7470_vm6, %v7243_v47, %v7528_v18  ;;  %v4285_v35 = vrot.slane %v4284_v60, 1  ;;  %v4292_v26 = vrot.slane %v4291_v46, 1  ;;  %v1232_v41 = vmax.f32 %v10950_v27, 0.0 }
 0x62f   :  { %v7245_v63 = vunpack.c.l.b16 %v6669_v34  ;;  %v7530_v45 = vsel %vm7472_vm7, %v7244_v0, %v7529_v21  ;;  %v6450_v30 = vmax.f32 %v11246_v32, %v4272_v7  ;;  %v4279_v11 = vmax.f32 %v4277_v16, %v4278_v10 }
 0x630   :  { %v4286_v4 = vmax.f32 %v4284_v60, %v4285_v35  ;;  %v4293_v43 = vmax.f32 %v4291_v46, %v4292_v26  ;;  %v1123_v2 = vadd.f32 %v10867_v33, %v1122_v3  ;;  %v1734_v56 = vrot.slane %v1232_v41, 2 }
 0x631   :  { %v7531_v53 = vsel %vm7474_vm8, %v7245_v63, %v7530_v45  ;;  %v6738_v59 = vpack.c.bf16 %v6450_v30, %v6450_v30  ;;  %v1735_v48 = vrot.slane %v1232_v41, 4  ;;  %v6451_v8 = vmax.f32 %v10762_v23, %v4279_v11 }
 0x632   :  { %v7729_v19 = vpack.c.b16 %v7531_v53, %v7531_v53  ;;  %v6452_v14 = vmax.f32 %v10764_v25, %v4286_v4  ;;  %v6453_v38 = vmax.f32 %v10766_v54, %v4293_v43  ;;  %v1736_v9 = vrot.slane %v1232_v41, 6 }
 0x633   :  { %v7314_v13 = vunpack.c.l.b16 %v6738_v59  ;;  %v5274_v27 = vsel %vm2277_vm1, %v1232_v41, -inf  ;;  %v5281_v51 = vsel %vm2277_vm1, %v1734_v56, -inf  ;;  %v6739_v33 = vpack.c.bf16 %v6451_v8, %v6451_v8 }
 0x634   :  { %7801 = vst [vmem:[%s11047_s3 + $0x20] sm:$0xf] %v7729_v19  ;;  %v6740_v50 = vpack.c.bf16 %v6452_v14, %v6452_v14  ;;  %v6741_v61 = vpack.c.bf16 %v6453_v38, %v6453_v38  ;;  %v5275_v24 = vrot.slane %v5274_v27, 4  ;;  %v5282_v25 = vrot.slane %v5281_v51, 4  ;;  %v11247_v14 = vld [vmem:[#allocation3_spill] sm:$0xff] }
 0x635   :  { %v7591_v23 = vsel %vm7468_vm5, %v7314_v13, %v10930_v57  ;;  %v5288_v54 = vsel %vm2277_vm1, %v1735_v48, -inf  ;;  %v5295_v15 = vsel %vm2277_vm1, %v1736_v9, -inf  ;;  %v10991_v40 = vunpack.c.l.b16 %v6879_v55 }
 0x636   :  { %v7315_v31 = vunpack.c.l.b16 %v6739_v33  ;;  %v7316_v22 = vunpack.c.l.b16 %v6740_v50  ;;  %v5276_v17 = vmax.f32 %v5274_v27, %v5275_v24  ;;  %v5283_v36 = vmax.f32 %v5281_v51, %v5282_v25  ;;  %v11248_v50 = vld [vmem:[#allocation4_spill] sm:$0xff] }
 0x637   :  { %v5289_v28 = vrot.slane %v5288_v54, 4  ;;  %v5296_v44 = vrot.slane %v5295_v15, 4  ;;  %v1268_v47 = vmax.f32 %v1123_v2, 0.0  ;;  %v10996_v57 = vunpack.c.l.b16 %v6880_v62 }
 0x638   :  { %v7317_v16 = vunpack.c.l.b16 %v6741_v61  ;;  %v7592_v60 = vsel %vm7470_vm6, %v7315_v31, %v7591_v23  ;;  %v5277_v46 = vrot.slane %v5276_v17, 2  ;;  %v5284_v55 = vrot.slane %v5283_v36, 2  ;;  %v11249_v31 = vld [vmem:[#allocation5_spill] sm:$0xff] }
 0x639   :  { %v7593_v58 = vsel %vm7472_vm7, %v7316_v22, %v7592_v60  ;;  %v5290_v34 = vmax.f32 %v5288_v54, %v5289_v28  ;;  %v5297_v0 = vmax.f32 %v5295_v15, %v5296_v44  ;;  %v1842_v3 = vrot.slane %v1268_v47, 2 }
 0x63a   :  { %v7594_v18 = vsel %vm7474_vm8, %v7317_v16, %v7593_v58  ;;  %v5278_v7 = vmax.f32 %v5276_v17, %v5277_v46  ;;  %v1843_v21 = vrot.slane %v1268_v47, 4  ;;  %v5285_v35 = vmax.f32 %v5283_v36, %v5284_v55  ;;  %v11250_v17 = vld [vmem:[#allocation6_spill] sm:$0xff] }
 0x63b   :  { %v7738_v10 = vpack.c.b16 %v7594_v18, %v7594_v18  ;;  %v5291_v26 = vrot.slane %v5290_v34, 2  ;;  %v5298_v37 = vrot.slane %v5297_v0, 2  ;;  %v1844_v63 = vrot.slane %v1268_v47, 6 }
 0x63c   :  { %v5279_v62 = vrot.slane %v5278_v7, 1  ;;  %v6282_v45 = vsel %vm2277_vm1, %v1268_v47, -inf  ;;  %v6289_v32 = vsel %vm2277_vm1, %v1842_v3, -inf  ;;  %v5286_v30 = vrot.slane %v5285_v35, 1 }
 0x63d   :  { %7810 = vst [vmem:[%s11047_s3 + $0x44] sm:$0xf] %v7738_v10  ;;  %v5292_v41 = vmax.f32 %v5290_v34, %v5291_v26  ;;  %v5299_v11 = vmax.f32 %v5297_v0, %v5298_v37  ;;  %v6283_v4 = vrot.slane %v6282_v45, 4  ;;  %v6290_v2 = vrot.slane %v6289_v32, 4 }
 0x63e   :  { %v5280_v43 = vmax.f32 %v5278_v7, %v5279_v62  ;;  %v6296_v53 = vsel %vm2277_vm1, %v1843_v21, -inf  ;;  %v6303_v59 = vsel %vm2277_vm1, %v1844_v63, -inf  ;;  %v5287_v56 = vmax.f32 %v5285_v35, %v5286_v30 }
 0x63f   :  { %v5293_v48 = vrot.slane %v5292_v41, 1  ;;  %v5300_v19 = vrot.slane %v5299_v11, 1  ;;  %v6284_v8 = vmax.f32 %v6282_v45, %v6283_v4  ;;  %v6291_v13 = vmax.f32 %v6289_v32, %v6290_v2 }
 0x640   :  { %v6522_v38 = vmax.f32 %v11247_v14, %v5280_v43  ;;  %v6297_v9 = vrot.slane %v6296_v53, 4  ;;  %v6304_v27 = vrot.slane %v6303_v59, 4  ;;  %v6523_v61 = vmax.f32 %v11248_v50, %v5287_v56 }
 0x641   :  { %v5294_v51 = vmax.f32 %v5292_v41, %v5293_v48  ;;  %v5301_v33 = vmax.f32 %v5299_v11, %v5300_v19  ;;  %v6285_v24 = vrot.slane %v6284_v8, 2  ;;  %v6292_v25 = vrot.slane %v6291_v13, 2 }
 0x642   :  { %v6810_v23 = vpack.c.bf16 %v6522_v38, %v6522_v38  ;;  %v6298_v54 = vmax.f32 %v6296_v53, %v6297_v9  ;;  %v6305_v15 = vmax.f32 %v6303_v59, %v6304_v27  ;;  %v6811_v28 = vpack.c.bf16 %v6523_v61, %v6523_v61 }
 0x643   :  { %v6524_v22 = vmax.f32 %v11249_v31, %v5294_v51  ;;  %v6525_v36 = vmax.f32 %v11250_v17, %v5301_v33  ;;  %v6286_v44 = vmax.f32 %v6284_v8, %v6285_v24  ;;  %v6293_v16 = vmax.f32 %v6291_v13, %v6292_v25 }
 0x644   :  { %v7386_v47 = vunpack.c.l.b16 %v6810_v23  ;;  %v6299_v60 = vrot.slane %v6298_v54, 2  ;;  %v6306_v46 = vrot.slane %v6305_v15, 2  ;;  %v7387_v34 = vunpack.c.l.b16 %v6811_v28 }
 0x645   :  { %v6812_v58 = vpack.c.bf16 %v6524_v22, %v6524_v22  ;;  %v6813_v55 = vpack.c.bf16 %v6525_v36, %v6525_v36  ;;  %v6287_v0 = vrot.slane %v6286_v44, 1  ;;  %v6294_v7 = vrot.slane %v6293_v16, 1 }
 0x646   :  { %v7654_v18 = vsel %vm7468_vm5, %v7386_v47, %v10944_v29  ;;  %v6300_v3 = vmax.f32 %v6298_v54, %v6299_v60  ;;  %v6307_v21 = vmax.f32 %v6305_v15, %v6306_v46  ;;  %v7714_v10 = vsel %vm7462_vm2, %v10991_v40, %v10956_v20 }
 0x647   :  { %v7388_v35 = vunpack.c.l.b16 %v6812_v58  ;;  %v7655_v26 = vsel %vm7470_vm6, %v7387_v34, %v7654_v18  ;;  %v6288_v37 = vmax.f32 %v6286_v44, %v6287_v0  ;;  %v7389_v62 = vunpack.c.l.b16 %v6813_v55 }
 0x648   :  { %v6295_v63 = vmax.f32 %v6293_v16, %v6294_v7  ;;  %v6301_v45 = vrot.slane %v6300_v3, 1  ;;  %v6308_v32 = vrot.slane %v6307_v21, 1  ;;  %v6218_v30 = vmax.f32 %v10789_v42, %v6217_v6 }
 0x649   :  { %v6225_v29 = vmax.f32 %v10875_v49, %v6224_v1  ;;  %v7656_v41 = vsel %vm7472_vm7, %v7388_v35, %v7655_v26  ;;  %v6594_v20 = vmax.f32 %v10889_v12, %v6288_v37  ;;  %v7715_v2 = vsel %vm7464_vm3, %v10996_v57, %v7714_v10 }
 0x64a   :  { %v7657_v40 = vsel %vm7474_vm8, %v7389_v62, %v7656_v41  ;;  %v6302_v11 = vmax.f32 %v6300_v3, %v6301_v45  ;;  %v6309_v4 = vmax.f32 %v6307_v21, %v6308_v32  ;;  %v6595_v43 = vmax.f32 %v10899_v52, %v6295_v63 }
 0x64b   :  { %v7747_v53 = vpack.c.b16 %v7657_v40, %v7657_v40  ;;  %v6882_v59 = vpack.c.bf16 %v6594_v20, %v6594_v20  ;;  %v7457_v42 = vunpack.c.l.b16 %v6881_v5 }
 0x64c   :  { %v6596_v49 = vmax.f32 %v6218_v30, %v6302_v11  ;;  %v6597_v6 = vmax.f32 %v6225_v29, %v6309_v4  ;;  %v6883_v1 = vpack.c.bf16 %v6595_v43, %v6595_v43 }
 0x64d   :  { %7819 = vst [vmem:[%s11047_s3 + $0x68] sm:$0xf] %v7747_v53  ;;  %v7458_v12 = vunpack.c.l.b16 %v6882_v59  ;;  %v7716_v56 = vsel %vm7466_vm4, %v7457_v42, %v7715_v2 }
 0x64e   :  { %v6884_v52 = vpack.c.bf16 %v6596_v49, %v6596_v49  ;;  %v6885_v48 = vpack.c.bf16 %v6597_v6, %v6597_v6  ;;  %v7459_v19 = vunpack.c.l.b16 %v6883_v1 }
 0x64f   :  { %v7717_v57 = vsel %vm7468_vm5, %v7458_v12, %v7716_v56 }
 0x650   :  { %v7460_v8 = vunpack.c.l.b16 %v6884_v52  ;;  %v7718_v14 = vsel %vm7470_vm6, %v7459_v19, %v7717_v57  ;;  %v7461_v39 = vunpack.c.l.b16 %v6885_v48 }
 0x652   :  { %v7719_v5 = vsel %vm7472_vm7, %v7460_v8, %v7718_v14 }
 0x653   :  { %v7720_v38 = vsel %vm7474_vm8, %v7461_v39, %v7719_v5 }
 0x654   :  { %v7756_v13 = vpack.c.b16 %v7720_v38, %v7720_v38 }
 0x656   :  { %7828 = vst [vmem:[%s11047_s3 + $0x8c] sm:$0xf] %v7756_v13 }

// kernel: model_forward.5
= control target key start
LH: loop header
LB: loop body
LE: loop exit
PB: predicated region body
PF: predicated region fallthrough
CT: control target
= control target key end

     0   :  { %s2521_s0 = inlined_call_operand.vmem [shape: bf16[2,2048], index: 0, kind: input, shape index: {}]   ;;  %s2522_s1 = inlined_call_operand.vmem [shape: bf16[2048,128], index: 1, kind: input, shape index: {}]   ;;  %s2523_s2 = inlined_call_operand.vmem [shape: f32[1,128], index: 2, kind: input, shape index: {}]   ;;  %s2524_s3 = inlined_call_operand.vmem [shape: f32[128,128], index: 3, kind: input, shape index: {}]   ;;  %s2525_s4 = inlined_call_operand.vmem [shape: f32[1,128], index: 4, kind: input, shape index: {}]   ;;  %s2526_s5 = inlined_call_operand.hbm [shape: f32[2,128], index: 5, kind: output, shape index: {}]  }
   0x1   :  { %v1889_v0 = vld [vmem:[%s2522_s1 + $0x38] sm:$0xff]  ;;  %v1888_v4 = vld [vmem:[%s2522_s1 + $0x30] sm:$0xff]  ;;  %v1887_v8 = vld [vmem:[%s2522_s1 + $0x28] sm:$0xff] }
   0x2   :  { %v1897_v1 = vld [vmem:[%s2522_s1 + $0x78] sm:$0xff]  ;;  %1087 = vmatpush.bf16.msra.mxu0 %v1889_v0  ;;  %v1896_v5 = vld [vmem:[%s2522_s1 + $0x70] sm:$0xff]  ;;  %v1895_v9 = vld [vmem:[%s2522_s1 + $0x68] sm:$0xff] }
   0x3   :  { %v1905_v2 = vld [vmem:[%s2522_s1 + $0xb8] sm:$0xff]  ;;  %1100 = vmatpush.bf16.msra.mxu1 %v1897_v1  ;;  %v1904_v6 = vld [vmem:[%s2522_s1 + $0xb0] sm:$0xff]  ;;  %v1903_v10 = vld [vmem:[%s2522_s1 + $0xa8] sm:$0xff] }
   0x4   :  { %v1913_v3 = vld [vmem:[%s2522_s1 + $0xf8] sm:$0xff]  ;;  %1113 = vmatpush.bf16.msra.mxu2 %v1905_v2  ;;  %v1912_v7 = vld [vmem:[%s2522_s1 + $0xf0] sm:$0xff]  ;;  %v1911_v11 = vld [vmem:[%s2522_s1 + $0xe8] sm:$0xff] }
   0x5   :  { %1126 = vmatpush.bf16.msra.mxu3 %v1913_v3  ;;  %v1886_v12 = vld [vmem:[%s2522_s1 + $0x20] sm:$0xff]  ;;  %v1885_v16 = vld [vmem:[%s2522_s1 + $0x18] sm:$0xff]  ;;  %v1884_v20 = vld [vmem:[%s2522_s1 + $0x10] sm:$0xff] }
   0x6   :  { %1088 = vmatpush.bf16.msra.mxu0 %v1888_v4  ;;  %v1894_v13 = vld [vmem:[%s2522_s1 + $0x60] sm:$0xff]  ;;  %v1893_v17 = vld [vmem:[%s2522_s1 + $0x58] sm:$0xff]  ;;  %v1892_v21 = vld [vmem:[%s2522_s1 + $0x50] sm:$0xff] }
   0x7   :  { %1101 = vmatpush.bf16.msra.mxu1 %v1896_v5  ;;  %v1902_v14 = vld [vmem:[%s2522_s1 + $0xa0] sm:$0xff]  ;;  %v1901_v18 = vld [vmem:[%s2522_s1 + $0x98] sm:$0xff]  ;;  %v1900_v23 = vld [vmem:[%s2522_s1 + $0x90] sm:$0xff] }
   0x8   :  { %1114 = vmatpush.bf16.msra.mxu2 %v1904_v6  ;;  %v1910_v15 = vld [vmem:[%s2522_s1 + $0xe0] sm:$0xff]  ;;  %v1909_v19 = vld [vmem:[%s2522_s1 + $0xd8] sm:$0xff]  ;;  %v1908_v24 = vld [vmem:[%s2522_s1 + $0xd0] sm:$0xff] }
   0x9   :  { %1127 = vmatpush.bf16.msra.mxu3 %v1912_v7  ;;  %v21_v22 = vld [vmem:[%s2521_s0] sm:$0xff] }
   0xa   :  { %1089 = vmatpush.bf16.msra.mxu0 %v1887_v8  ;;  %284 = vst [vmem:[#allocation1] ss:$9 sm:$0xff] %v21_v22 }
   0xb   :  { %1102 = vmatpush.bf16.msra.mxu1 %v1895_v9 }
   0xc   :  { %1115 = vmatpush.bf16.msra.mxu2 %v1903_v10 }
   0xd   :  { %1128 = vmatpush.bf16.msra.mxu3 %v1911_v11 }
   0xe   :  { %1090 = vmatpush.bf16.msra.mxu0 %v1886_v12 }
   0xf   :  { %1103 = vmatpush.bf16.msra.mxu1 %v1894_v13 }
  0x10   :  { %1116 = vmatpush.bf16.msra.mxu2 %v1902_v14 }
  0x11   :  { %1129 = vmatpush.bf16.msra.mxu3 %v1910_v15 }
  0x12   :  { %1091 = vmatpush.bf16.msra.mxu0 %v1885_v16 }
  0x13   :  { %1104 = vmatpush.bf16.msra.mxu1 %v1893_v17 }
  0x14   :  { %1117 = vmatpush.bf16.msra.mxu2 %v1901_v18 }
  0x15   :  { %1130 = vmatpush.bf16.msra.mxu3 %v1909_v19 }
  0x16   :  { %10 = vsyncpa [#allocation3], 0  ;;  %1092 = vmatpush.bf16.msra.mxu0 %v1884_v20  ;;  %v1883_v25 = vld [vmem:[%s2522_s1 + $0x8] sm:$0xff]  ;;  %v1882_v29 = vld [vmem:[%s2522_s1] sm:$0xff]  ;;  %vm1340_vm1 = vcmask 1041408   ;;  %s2043_s26 = smov [#allocation2]  }
  0x17   :  { %1105 = vmatpush.bf16.msra.mxu1 %v1892_v21  ;;  %v1891_v26 = vld [vmem:[%s2522_s1 + $0x48] sm:$0xff]  ;;  %v1890_v30 = vld [vmem:[%s2522_s1 + $0x40] sm:$0xff]  ;;  %v1921_v33 = vld [vmem:[%s2522_s1 + $0x138] sm:$0xff]  ;;  %s1359_s27 = sshll.u32 %s2043_s26, 4  ;;  %s1361_s29 = sshll.u32 %s2526_s5, 4  ;;  %s1360_s27 = int_to_ptr.vmem [resolvable:$true] %s1359_s27  ;;  %s1362_s29 = int_to_ptr.hbm [resolvable:$true] %s1361_s29 }
  0x18   :  { %1118 = vmatpush.bf16.msra.mxu2 %v1900_v23  ;;  %v1899_v27 = vld [vmem:[%s2522_s1 + $0x88] sm:$0xff]  ;;  %v1898_v31 = vld [vmem:[%s2522_s1 + $0x80] sm:$0xff]  ;;  %v1929_v34 = vld [vmem:[%s2522_s1 + $0x178] sm:$0xff] }
  0x19   :  { %1131 = vmatpush.bf16.msra.mxu3 %v1908_v24  ;;  %v1907_v28 = vld [vmem:[%s2522_s1 + $0xc8] sm:$0xff]  ;;  %v1906_v32 = vld [vmem:[%s2522_s1 + $0xc0] sm:$0xff]  ;;  %v1937_v35 = vld [vmem:[%s2522_s1 + $0x1b8] sm:$0xff] }
  0x1a   :  { %1093 = vmatpush.bf16.msra.mxu0 %v1883_v25  ;;  %v1945_v36 = vld [vmem:[%s2522_s1 + $0x1f8] sm:$0xff]  ;;  %v1920_v37 = vld [vmem:[%s2522_s1 + $0x130] sm:$0xff]  ;;  %v285_v39 = vld [vmem:[#allocation1] sm:$0xff] }
  0x1b   :  { %1106 = vmatpush.bf16.msra.mxu1 %v1891_v26  ;;  %v287_v38 = vld [vmem:[#allocation1 + $0x12] sm:$0xff]  ;;  %v288_v41 = vld [vmem:[#allocation1 + $0x1b] sm:$0xff]  ;;  %v286_v42 = vld [vmem:[#allocation1 + $0x9] sm:$0xff] }
  0x1c   :  { %1119 = vmatpush.bf16.msra.mxu2 %v1899_v27  ;;  %v1928_v40 = vld [vmem:[%s2522_s1 + $0x170] sm:$0xff]  ;;  %v1919_v45 = vld [vmem:[%s2522_s1 + $0x128] sm:$0xff]  ;;  %v1918_v49 = vld [vmem:[%s2522_s1 + $0x120] sm:$0xff] }
  0x1d   :  { %1132 = vmatpush.bf16.msra.mxu3 %v1907_v28  ;;  %v1936_v43 = vld [vmem:[%s2522_s1 + $0x1b0] sm:$0xff]  ;;  %v1927_v46 = vld [vmem:[%s2522_s1 + $0x168] sm:$0xff]  ;;  %v1926_v50 = vld [vmem:[%s2522_s1 + $0x160] sm:$0xff] }
  0x1e   :  { %1094 = vmatpush.bf16.msra.mxu0 %v1882_v29  ;;  %v1944_v44 = vld [vmem:[%s2522_s1 + $0x1f0] sm:$0xff]  ;;  %v1935_v47 = vld [vmem:[%s2522_s1 + $0x1a8] sm:$0xff]  ;;  %v292_v54 = vld [vmem:[#allocation1 + $0x3f] sm:$0xff] }
  0x1f   :  { %1107 = vmatpush.bf16.msra.mxu1 %v1890_v30  ;;  %v1943_v48 = vld [vmem:[%s2522_s1 + $0x1e8] sm:$0xff]  ;;  %v291_v51 = vld [vmem:[#allocation1 + $0x36] sm:$0xff]  ;;  %v1934_v56 = vld [vmem:[%s2522_s1 + $0x1a0] sm:$0xff] }
  0x20   :  { %1120 = vmatpush.bf16.msra.mxu2 %v1898_v31  ;;  %v22_v52 = vld [vmem:[%s2521_s0 + $0x8] sm:$0xff]  ;;  %v1942_v57 = vld [vmem:[%s2522_s1 + $0x1e0] sm:$0xff]  ;;  %v1917_v58 = vld [vmem:[%s2522_s1 + $0x118] sm:$0xff] }
  0x21   :  { %1133 = vmatpush.bf16.msra.mxu3 %v1906_v32  ;;  %1095 = vmatmul.bf16.vlgmr.msra.gmra.mxu0 %v285_v39  ;;  %v289_v53 = vld [vmem:[#allocation1 + $0x24] sm:$0xff]  ;;  %v290_v55 = vld [vmem:[#allocation1 + $0x2d] sm:$0xff]  ;;  %v1925_v59 = vld [vmem:[%s2522_s1 + $0x158] sm:$0xff] }
  0x22   :  { %1139 = vmatpush.bf16.msrb.mxu0 %v1921_v33  ;;  %1108 = vmatmul.bf16.vlgmr.msra.gmra.mxu1 %v286_v42  ;;  %294 = vst [vmem:[#allocation1] ss:$9 sm:$0xff] %v22_v52  ;;  %v1933_v60 = vld [vmem:[%s2522_s1 + $0x198] sm:$0xff]  ;;  %v1916_v62 = vld [vmem:[%s2522_s1 + $0x110] sm:$0xff]  ;;  %v1915_v2 = vld [vmem:[%s2522_s1 + $0x108] sm:$0xff] }
  0x23   :  { %1152 = vmatpush.bf16.msrb.mxu1 %v1929_v34  ;;  %1121 = vmatmul.bf16.vlgmr.msra.gmra.mxu2 %v287_v38  ;;  %v1941_v61 = vld [vmem:[%s2522_s1 + $0x1d8] sm:$0xff]  ;;  %v1924_v63 = vld [vmem:[%s2522_s1 + $0x150] sm:$0xff]  ;;  %v1923_v3 = vld [vmem:[%s2522_s1 + $0x148] sm:$0xff] }
  0x24   :  { %1165 = vmatpush.bf16.msrb.mxu2 %v1937_v35  ;;  %1134 = vmatmul.bf16.vlgmr.msra.gmra.mxu3 %v288_v41  ;;  %v1932_v0 = vld [vmem:[%s2522_s1 + $0x190] sm:$0xff]  ;;  %v1931_v4 = vld [vmem:[%s2522_s1 + $0x188] sm:$0xff]  ;;  %v1914_v6 = vld [vmem:[%s2522_s1 + $0x100] sm:$0xff] }
  0x25   :  { %1178 = vmatpush.bf16.msrb.mxu3 %v1945_v36  ;;  %v1940_v1 = vld [vmem:[%s2522_s1 + $0x1d0] sm:$0xff]  ;;  %v1939_v5 = vld [vmem:[%s2522_s1 + $0x1c8] sm:$0xff]  ;;  %v1922_v7 = vld [vmem:[%s2522_s1 + $0x140] sm:$0xff] }
  0x26   :  { %1140 = vmatpush.bf16.msrb.mxu0 %v1920_v37  ;;  %v1930_v8 = vld [vmem:[%s2522_s1 + $0x180] sm:$0xff]  ;;  %v1953_v10 = vld [vmem:[%s2522_s1 + $0x238] sm:$0xff]  ;;  %v1952_v14 = vld [vmem:[%s2522_s1 + $0x230] sm:$0xff] }
  0x27   :  { %1153 = vmatpush.bf16.msrb.mxu1 %v1928_v40  ;;  %v1938_v9 = vld [vmem:[%s2522_s1 + $0x1c0] sm:$0xff]  ;;  %v1961_v11 = vld [vmem:[%s2522_s1 + $0x278] sm:$0xff]  ;;  %v1960_v15 = vld [vmem:[%s2522_s1 + $0x270] sm:$0xff] }
  0x28   :  { %1166 = vmatpush.bf16.msrb.mxu2 %v1936_v43  ;;  %v1969_v12 = vld [vmem:[%s2522_s1 + $0x2b8] sm:$0xff]  ;;  %v1968_v16 = vld [vmem:[%s2522_s1 + $0x2b0] sm:$0xff]  ;;  %v1951_v18 = vld [vmem:[%s2522_s1 + $0x228] sm:$0xff] }
  0x29   :  { %1179 = vmatpush.bf16.msrb.mxu3 %v1944_v44  ;;  %v1977_v13 = vld [vmem:[%s2522_s1 + $0x2f8] sm:$0xff]  ;;  %v1976_v17 = vld [vmem:[%s2522_s1 + $0x2f0] sm:$0xff]  ;;  %v1959_v19 = vld [vmem:[%s2522_s1 + $0x268] sm:$0xff] }
  0x2a   :  { %1141 = vmatpush.bf16.msrb.mxu0 %v1919_v45  ;;  %v1967_v20 = vld [vmem:[%s2522_s1 + $0x2a8] sm:$0xff]  ;;  %v1950_v22 = vld [vmem:[%s2522_s1 + $0x220] sm:$0xff]  ;;  %v1949_v26 = vld [vmem:[%s2522_s1 + $0x218] sm:$0xff] }
  0x2b   :  { %1154 = vmatpush.bf16.msrb.mxu1 %v1927_v46  ;;  %v1975_v21 = vld [vmem:[%s2522_s1 + $0x2e8] sm:$0xff]  ;;  %v1958_v23 = vld [vmem:[%s2522_s1 + $0x260] sm:$0xff]  ;;  %v1957_v27 = vld [vmem:[%s2522_s1 + $0x258] sm:$0xff] }
  0x2c   :  { %1167 = vmatpush.bf16.msrb.mxu2 %v1935_v47  ;;  %v1966_v24 = vld [vmem:[%s2522_s1 + $0x2a0] sm:$0xff]  ;;  %v1965_v28 = vld [vmem:[%s2522_s1 + $0x298] sm:$0xff]  ;;  %v1948_v30 = vld [vmem:[%s2522_s1 + $0x210] sm:$0xff] }
  0x2d   :  { %1180 = vmatpush.bf16.msrb.mxu3 %v1943_v48  ;;  %v1974_v25 = vld [vmem:[%s2522_s1 + $0x2e0] sm:$0xff]  ;;  %v1973_v29 = vld [vmem:[%s2522_s1 + $0x2d8] sm:$0xff]  ;;  %v1956_v31 = vld [vmem:[%s2522_s1 + $0x250] sm:$0xff] }
  0x2e   :  { %1142 = vmatpush.bf16.msrb.mxu0 %v1918_v49  ;;  %v1964_v32 = vld [vmem:[%s2522_s1 + $0x290] sm:$0xff]  ;;  %v1947_v34 = vld [vmem:[%s2522_s1 + $0x208] sm:$0xff]  ;;  %v1946_v38 = vld [vmem:[%s2522_s1 + $0x200] sm:$0xff] }
  0x2f   :  { %1155 = vmatpush.bf16.msrb.mxu1 %v1926_v50  ;;  %v1972_v33 = vld [vmem:[%s2522_s1 + $0x2d0] sm:$0xff]  ;;  %v1955_v35 = vld [vmem:[%s2522_s1 + $0x248] sm:$0xff]  ;;  %v1954_v39 = vld [vmem:[%s2522_s1 + $0x240] sm:$0xff] }
  0x30   :  { %1168 = vmatpush.bf16.msrb.mxu2 %v1934_v56  ;;  %v1963_v36 = vld [vmem:[%s2522_s1 + $0x288] sm:$0xff]  ;;  %v1962_v40 = vld [vmem:[%s2522_s1 + $0x280] sm:$0xff]  ;;  %v1985_v42 = vld [vmem:[%s2522_s1 + $0x338] sm:$0xff] }
  0x31   :  { %1181 = vmatpush.bf16.msrb.mxu3 %v1942_v57  ;;  %v1971_v37 = vld [vmem:[%s2522_s1 + $0x2c8] sm:$0xff]  ;;  %v1970_v41 = vld [vmem:[%s2522_s1 + $0x2c0] sm:$0xff]  ;;  %v1993_v43 = vld [vmem:[%s2522_s1 + $0x378] sm:$0xff] }
  0x32   :  { %1143 = vmatpush.bf16.msrb.mxu0 %v1917_v58  ;;  %v2001_v44 = vld [vmem:[%s2522_s1 + $0x3b8] sm:$0xff]  ;;  %v295_v46 = vld [vmem:[#allocation1] sm:$0xff]  ;;  %v296_v48 = vld [vmem:[#allocation1 + $0x9] sm:$0xff] }
  0x33   :  { %1156 = vmatpush.bf16.msrb.mxu1 %v1925_v59  ;;  %v2009_v45 = vld [vmem:[%s2522_s1 + $0x3f8] sm:$0xff]  ;;  %v1984_v50 = vld [vmem:[%s2522_s1 + $0x330] sm:$0xff]  ;;  %v1999_v56 = vld [vmem:[%s2522_s1 + $0x3a8] sm:$0xff] }
  0x34   :  { %1169 = vmatpush.bf16.msrb.mxu2 %v1933_v60  ;;  %v297_v47 = vld [vmem:[#allocation1 + $0x12] sm:$0xff]  ;;  %v298_v49 = vld [vmem:[#allocation1 + $0x1b] sm:$0xff]  ;;  %v2007_v57 = vld [vmem:[%s2522_s1 + $0x3e8] sm:$0xff] }
  0x35   :  { %1182 = vmatpush.bf16.msrb.mxu3 %v1941_v61  ;;  %v2000_v52 = vld [vmem:[%s2522_s1 + $0x3b0] sm:$0xff]  ;;  %v1982_v58 = vld [vmem:[%s2522_s1 + $0x320] sm:$0xff] }
  0x36   :  { %1144 = vmatpush.bf16.msrb.mxu0 %v1916_v62  ;;  %v1990_v59 = vld [vmem:[%s2522_s1 + $0x360] sm:$0xff]  ;;  %v1981_v62 = vld [vmem:[%s2522_s1 + $0x318] sm:$0xff] }
  0x37   :  { %1157 = vmatpush.bf16.msrb.mxu1 %v1924_v63  ;;  %v1998_v60 = vld [vmem:[%s2522_s1 + $0x3a0] sm:$0xff]  ;;  %v1989_v63 = vld [vmem:[%s2522_s1 + $0x358] sm:$0xff] }
  0x38   :  { %1170 = vmatpush.bf16.msrb.mxu2 %v1932_v0  ;;  %v2006_v61 = vld [vmem:[%s2522_s1 + $0x3e0] sm:$0xff]  ;;  %v1997_v0 = vld [vmem:[%s2522_s1 + $0x398] sm:$0xff] }
  0x39   :  { %1183 = vmatpush.bf16.msrb.mxu3 %v1940_v1  ;;  %v2005_v1 = vld [vmem:[%s2522_s1 + $0x3d8] sm:$0xff] }
  0x3a   :  { %1145 = vmatpush.bf16.msrb.mxu0 %v1915_v2  ;;  %v1980_v2 = vld [vmem:[%s2522_s1 + $0x310] sm:$0xff] }
  0x3b   :  { %1158 = vmatpush.bf16.msrb.mxu1 %v1923_v3  ;;  %v1988_v3 = vld [vmem:[%s2522_s1 + $0x350] sm:$0xff] }
  0x3c   :  { %1171 = vmatpush.bf16.msrb.mxu2 %v1931_v4  ;;  %v1996_v4 = vld [vmem:[%s2522_s1 + $0x390] sm:$0xff] }
  0x3d   :  { %1184 = vmatpush.bf16.msrb.mxu3 %v1939_v5  ;;  %v2004_v5 = vld [vmem:[%s2522_s1 + $0x3d0] sm:$0xff] }
  0x3e   :  { %1146 = vmatpush.bf16.msrb.mxu0 %v1914_v6  ;;  %v1979_v6 = vld [vmem:[%s2522_s1 + $0x308] sm:$0xff] }
  0x3f   :  { %1159 = vmatpush.bf16.msrb.mxu1 %v1922_v7  ;;  %v1987_v7 = vld [vmem:[%s2522_s1 + $0x348] sm:$0xff] }
  0x40   :  { %1172 = vmatpush.bf16.msrb.mxu2 %v1930_v8  ;;  %v1995_v8 = vld [vmem:[%s2522_s1 + $0x388] sm:$0xff] }
  0x41   :  { %1185 = vmatpush.bf16.msrb.mxu3 %v1938_v9  ;;  %1147 = vmatmul.bf16.vlgmr.msrb.gmra.mxu0 %v289_v53  ;;  %v2008_v53 = vld [vmem:[%s2522_s1 + $0x3f0] sm:$0xff]  ;;  %v2003_v9 = vld [vmem:[%s2522_s1 + $0x3c8] sm:$0xff] }
  0x42   :  { %1191 = vmatpush.bf16.msra.mxu0 %v1953_v10  ;;  %1160 = vmatmul.bf16.vlgmr.msrb.gmra.mxu1 %v290_v55  ;;  %v1991_v55 = vld [vmem:[%s2522_s1 + $0x368] sm:$0xff]  ;;  %v1978_v10 = vld [vmem:[%s2522_s1 + $0x300] sm:$0xff] }
  0x43   :  { %1204 = vmatpush.bf16.msra.mxu1 %v1961_v11  ;;  %1173 = vmatmul.bf16.vlgmr.msrb.gmra.mxu2 %v291_v51  ;;  %v1992_v51 = vld [vmem:[%s2522_s1 + $0x370] sm:$0xff]  ;;  %v1986_v11 = vld [vmem:[%s2522_s1 + $0x340] sm:$0xff] }
  0x44   :  { %1217 = vmatpush.bf16.msra.mxu2 %v1969_v12  ;;  %1186 = vmatmul.bf16.vlgmr.msrb.gmra.mxu3 %v292_v54  ;;  %v1983_v54 = vld [vmem:[%s2522_s1 + $0x328] sm:$0xff]  ;;  %v1994_v12 = vld [vmem:[%s2522_s1 + $0x380] sm:$0xff] }
  0x45   :  { %1230 = vmatpush.bf16.msra.mxu3 %v1977_v13  ;;  %v2002_v13 = vld [vmem:[%s2522_s1 + $0x3c0] sm:$0xff] }
  0x46   :  { %1192 = vmatpush.bf16.msra.mxu0 %v1952_v14  ;;  %v299_v14 = vld [vmem:[#allocation1 + $0x24] sm:$0xff] }
  0x47   :  { %1205 = vmatpush.bf16.msra.mxu1 %v1960_v15  ;;  %v300_v15 = vld [vmem:[#allocation1 + $0x2d] sm:$0xff] }
  0x48   :  { %1218 = vmatpush.bf16.msra.mxu2 %v1968_v16  ;;  %v301_v16 = vld [vmem:[#allocation1 + $0x36] sm:$0xff] }
  0x49   :  { %1231 = vmatpush.bf16.msra.mxu3 %v1976_v17  ;;  %v302_v17 = vld [vmem:[#allocation1 + $0x3f] sm:$0xff] }
  0x4a   :  { %1193 = vmatpush.bf16.msra.mxu0 %v1951_v18  ;;  %v2011_v18 = vld [vmem:[%s2523_s2] ss:$0 sm:$0xff] }
  0x4b   :  { %1206 = vmatpush.bf16.msra.mxu1 %v1959_v19 }
  0x4c   :  { %1219 = vmatpush.bf16.msra.mxu2 %v1967_v20 }
  0x4d   :  { %1232 = vmatpush.bf16.msra.mxu3 %v1975_v21 }
  0x4e   :  { %1194 = vmatpush.bf16.msra.mxu0 %v1950_v22 }
  0x4f   :  { %1207 = vmatpush.bf16.msra.mxu1 %v1958_v23 }
  0x50   :  { %1220 = vmatpush.bf16.msra.mxu2 %v1966_v24 }
  0x51   :  { %1233 = vmatpush.bf16.msra.mxu3 %v1974_v25 }
  0x52   :  { %1195 = vmatpush.bf16.msra.mxu0 %v1949_v26 }
  0x53   :  { %1208 = vmatpush.bf16.msra.mxu1 %v1957_v27 }
  0x54   :  { %1221 = vmatpush.bf16.msra.mxu2 %v1965_v28 }
  0x55   :  { %1234 = vmatpush.bf16.msra.mxu3 %v1973_v29 }
  0x56   :  { %1196 = vmatpush.bf16.msra.mxu0 %v1948_v30 }
  0x57   :  { %1209 = vmatpush.bf16.msra.mxu1 %v1956_v31 }
  0x58   :  { %1222 = vmatpush.bf16.msra.mxu2 %v1964_v32 }
  0x59   :  { %1235 = vmatpush.bf16.msra.mxu3 %v1972_v33 }
  0x5a   :  { %1197 = vmatpush.bf16.msra.mxu0 %v1947_v34 }
  0x5b   :  { %1210 = vmatpush.bf16.msra.mxu1 %v1955_v35  ;;  %v1311_v35 = vld [vmem:[%s2524_s3 + $0x78] sm:$0xff] }
  0x5c   :  { %1223 = vmatpush.bf16.msra.mxu2 %v1963_v36  ;;  %v1310_v36 = vld [vmem:[%s2524_s3 + $0x70] sm:$0xff] }
  0x5d   :  { %1236 = vmatpush.bf16.msra.mxu3 %v1971_v37 }
  0x5e   :  { %1198 = vmatpush.bf16.msra.mxu0 %v1946_v38 }
  0x5f   :  { %1211 = vmatpush.bf16.msra.mxu1 %v1954_v39  ;;  %v1309_v39 = vld [vmem:[%s2524_s3 + $0x68] sm:$0xff] }
  0x60   :  { %1224 = vmatpush.bf16.msra.mxu2 %v1962_v40  ;;  %v1308_v40 = vld [vmem:[%s2524_s3 + $0x60] sm:$0xff] }
  0x61   :  { %1237 = vmatpush.bf16.msra.mxu3 %v1970_v41  ;;  %1199 = vmatmul.bf16.vlgmr.msra.gmra.mxu0 %v295_v46  ;;  %v1307_v41 = vld [vmem:[%s2524_s3 + $0x58] sm:$0xff]  ;;  %v1304_v46 = vld [vmem:[%s2524_s3 + $0x40] sm:$0xff] }
  0x62   :  { %1243 = vmatpush.bf16.msrb.mxu0 %v1985_v42  ;;  %1212 = vmatmul.bf16.vlgmr.msra.gmra.mxu1 %v296_v48  ;;  %v1302_v48 = vld [vmem:[%s2524_s3 + $0x30] sm:$0xff] }
  0x63   :  { %1256 = vmatpush.bf16.msrb.mxu1 %v1993_v43  ;;  %1225 = vmatmul.bf16.vlgmr.msra.gmra.mxu2 %v297_v47  ;;  %v1303_v47 = vld [vmem:[%s2524_s3 + $0x38] sm:$0xff] }
  0x64   :  { %1269 = vmatpush.bf16.msrb.mxu2 %v2001_v44  ;;  %1238 = vmatmul.bf16.vlgmr.msra.gmra.mxu3 %v298_v49  ;;  %v1306_v44 = vld [vmem:[%s2524_s3 + $0x50] sm:$0xff]  ;;  %v1301_v49 = vld [vmem:[%s2524_s3 + $0x28] sm:$0xff] }
  0x65   :  { %1282 = vmatpush.bf16.msrb.mxu3 %v2009_v45  ;;  %v1305_v45 = vld [vmem:[%s2524_s3 + $0x48] sm:$0xff] }
  0x66   :  { %1244 = vmatpush.bf16.msrb.mxu0 %v1984_v50 }
  0x67   :  { %1257 = vmatpush.bf16.msrb.mxu1 %v1992_v51  ;;  %v1300_v51 = vld [vmem:[%s2524_s3 + $0x20] sm:$0xff] }
  0x68   :  { %1270 = vmatpush.bf16.msrb.mxu2 %v2000_v52 }
  0x69   :  { %1283 = vmatpush.bf16.msrb.mxu3 %v2008_v53  ;;  %v1299_v53 = vld [vmem:[%s2524_s3 + $0x18] sm:$0xff] }
  0x6a   :  { %1245 = vmatpush.bf16.msrb.mxu0 %v1983_v54 }
  0x6b   :  { %1258 = vmatpush.bf16.msrb.mxu1 %v1991_v55  ;;  %v1298_v55 = vld [vmem:[%s2524_s3 + $0x10] sm:$0xff] }
  0x6c   :  { %1271 = vmatpush.bf16.msrb.mxu2 %v1999_v56 }
  0x6d   :  { %1284 = vmatpush.bf16.msrb.mxu3 %v2007_v57 }
  0x6e   :  { %1246 = vmatpush.bf16.msrb.mxu0 %v1982_v58  ;;  %v1297_v58 = vld [vmem:[%s2524_s3 + $0x8] sm:$0xff] }
  0x6f   :  { %1259 = vmatpush.bf16.msrb.mxu1 %v1990_v59 }
  0x70   :  { %1272 = vmatpush.bf16.msrb.mxu2 %v1998_v60 }
  0x71   :  { %1285 = vmatpush.bf16.msrb.mxu3 %v2006_v61 }
  0x72   :  { %1247 = vmatpush.bf16.msrb.mxu0 %v1981_v62  ;;  %v1296_v62 = vld [vmem:[%s2524_s3] sm:$0xff] }
  0x73   :  { %1260 = vmatpush.bf16.msrb.mxu1 %v1989_v63 }
  0x74   :  { %1273 = vmatpush.bf16.msrb.mxu2 %v1997_v0 }
  0x75   :  { %1286 = vmatpush.bf16.msrb.mxu3 %v2005_v1 }
  0x76   :  { %1248 = vmatpush.bf16.msrb.mxu0 %v1980_v2 }
  0x77   :  { %1261 = vmatpush.bf16.msrb.mxu1 %v1988_v3 }
  0x78   :  { %1274 = vmatpush.bf16.msrb.mxu2 %v1996_v4 }
  0x79   :  { %1287 = vmatpush.bf16.msrb.mxu3 %v2004_v5 }
  0x7a   :  { %1249 = vmatpush.bf16.msrb.mxu0 %v1979_v6 }
  0x7b   :  { %1262 = vmatpush.bf16.msrb.mxu1 %v1987_v7 }
  0x7c   :  { %1275 = vmatpush.bf16.msrb.mxu2 %v1995_v8 }
  0x7d   :  { %1288 = vmatpush.bf16.msrb.mxu3 %v2003_v9 }
  0x7e   :  { %1250 = vmatpush.bf16.msrb.mxu0 %v1978_v10 }
  0x7f   :  { %1263 = vmatpush.bf16.msrb.mxu1 %v1986_v11 }
  0x80   :  { %1276 = vmatpush.bf16.msrb.mxu2 %v1994_v12 }
  0x81   :  { %1289 = vmatpush.bf16.msrb.mxu3 %v2002_v13  ;;  %1251 = vmatmul.bf16.vlgmr.msrb.gmra.mxu0 %v299_v14 }
  0x82   :  { %1264 = vmatmul.bf16.vlgmr.msrb.gmra.mxu1 %v300_v15  ;;  %1316 = vmatpush.msra.mxu0 %v1311_v35 }
  0x83   :  { %1277 = vmatmul.bf16.vlgmr.msrb.gmra.mxu2 %v301_v16 }
  0x84   :  { %1290 = vmatmul.bf16.vlgmr.msrb.gmra.mxu3 %v302_v17  ;;  %1317 = vmatpush.msra.mxu0 %v1310_v36 }
  0x86   :  { %1318 = vmatpush.msra.mxu0 %v1309_v39 }
  0x88   :  { %1319 = vmatpush.msra.mxu0 %v1308_v40 }
  0x8a   :  { %1320 = vmatpush.msra.mxu0 %v1307_v41 }
  0x8c   :  { %1321 = vmatpush.msra.mxu0 %v1306_v44 }
  0x8e   :  { %1322 = vmatpush.msra.mxu0 %v1305_v45 }
  0x90   :  { %1323 = vmatpush.msra.mxu0 %v1304_v46 }
  0x92   :  { %1324 = vmatpush.msra.mxu0 %v1303_v47 }
  0x94   :  { %1325 = vmatpush.msra.mxu0 %v1302_v48 }
  0x96   :  { %1326 = vmatpush.msra.mxu0 %v1301_v49 }
  0x98   :  { %1327 = vmatpush.msra.mxu0 %v1300_v51 }
  0x9a   :  { %1328 = vmatpush.msra.mxu0 %v1299_v53 }
  0x9c   :  { %1329 = vmatpush.msra.mxu0 %v1298_v55 }
  0x9e   :  { %v1096_v19 = vpop.f32.mrf.mxu0  ;;  %1330 = vmatpush.msra.mxu0 %v1297_v58 }
  0x9f   :  { %v1097_v20 = vadd.f32 %v2011_v18, %v1096_v19  ;;  %v1109_v21 = vpop.f32.mrf.mxu1 }
  0xa0   :  { %1331 = vmatpush.msra.mxu0 %v1296_v62 }
  0xa1   :  { %v1110_v22 = vadd.f32 %v1109_v21, %v1097_v20  ;;  %v1336_v20 = vlaneseq }
  0xa3   :  { %v1337_v21 = vand.u32 127, %v1336_v20 }
  0xa5   :  { %vm1338_vm0 = vcmp.lt.s32.totalorder %v1337_v21, 10 }
  0xa6   :  { %v1122_v23 = vpop.f32.mrf.mxu2  ;;  %v1098_v26 = vpop.f32.mrf.mxu0 }
  0xa7   :  { %v1123_v24 = vadd.f32 %v1122_v23, %v1110_v22  ;;  %v1135_v25 = vpop.f32.mrf.mxu3  ;;  %v1111_v28 = vpop.f32.mrf.mxu1  ;;  %v2012_v22 = vld [vmem:[%s2525_s4] ss:$0 sm:$0xff] }
  0xa9   :  { %v1136_v27 = vadd.f32 %v1135_v25, %v1123_v24 }
  0xae   :  { %v1124_v29 = vpop.f32.mrf.mxu2 }
  0xaf   :  { %v1137_v30 = vpop.f32.mrf.mxu3 }
  0xbe   :  { %v1148_v31 = vpop.f32.mrf.mxu0 }
  0xbf   :  { %v1161_v32 = vpop.f32.mrf.mxu1  ;;  %v1149_v54 = vadd.f32 %v1148_v31, %v1136_v27 }
  0xc1   :  { %v1162_v60 = vadd.f32 %v1161_v32, %v1149_v54 }
  0xc6   :  { %v1174_v33 = vpop.f32.mrf.mxu2  ;;  %v1150_v37 = vpop.f32.mrf.mxu0 }
  0xc7   :  { %v1187_v34 = vpop.f32.mrf.mxu3  ;;  %v1163_v38 = vpop.f32.mrf.mxu1  ;;  %v1175_v63 = vadd.f32 %v1174_v33, %v1162_v60 }
  0xc9   :  { %v1188_v2 = vadd.f32 %v1187_v34, %v1175_v63 }
  0xce   :  { %v1176_v42 = vpop.f32.mrf.mxu2 }
  0xcf   :  { %v1189_v43 = vpop.f32.mrf.mxu3 }
  0xde   :  { %v1200_v50 = vpop.f32.mrf.mxu0 }
  0xdf   :  { %v1213_v52 = vpop.f32.mrf.mxu1  ;;  %v1201_v3 = vadd.f32 %v1200_v50, %v1188_v2 }
  0xe1   :  { %v1214_v4 = vadd.f32 %v1213_v52, %v1201_v3 }
  0xe6   :  { %v1226_v56 = vpop.f32.mrf.mxu2  ;;  %v1202_v59 = vpop.f32.mrf.mxu0 }
  0xe7   :  { %v1239_v57 = vpop.f32.mrf.mxu3  ;;  %v1215_v61 = vpop.f32.mrf.mxu1  ;;  %v1227_v5 = vadd.f32 %v1226_v56, %v1214_v4 }
  0xe9   :  { %v1240_v6 = vadd.f32 %v1239_v57, %v1227_v5 }
  0xee   :  { %v1228_v0 = vpop.f32.mrf.mxu2 }
  0xef   :  { %v1241_v1 = vpop.f32.mrf.mxu3 }
  0xfe   :  { %v1252_v7 = vpop.f32.mrf.mxu0 }
  0xff   :  { %v1265_v8 = vpop.f32.mrf.mxu1  ;;  %v1253_v9 = vadd.f32 %v1252_v7, %v1240_v6 }
 0x101   :  { %v1266_v10 = vadd.f32 %v1265_v8, %v1253_v9 }
 0x106   :  { %v1278_v11 = vpop.f32.mrf.mxu2  ;;  %v1254_v14 = vpop.f32.mrf.mxu0 }
 0x107   :  { %v1291_v12 = vpop.f32.mrf.mxu3  ;;  %v1279_v13 = vadd.f32 %v1278_v11, %v1266_v10  ;;  %v1267_v15 = vpop.f32.mrf.mxu1 }
 0x109   :  { %v1292_v16 = vadd.f32 %v1291_v12, %v1279_v13 }
 0x10b   :  { %v1295_v17 = vmax.f32 %v1292_v16, 0.0 }
 0x10d   :  { %1332 = vmatmul.f32.vlgmr.msra.gmra.mxu0 %v1295_v17 }
 0x10e   :  { %v1280_v18 = vpop.f32.mrf.mxu2 }
 0x10f   :  { %v1293_v19 = vpop.f32.mrf.mxu3 }
 0x18a   :  { %v1333_v23 = vpop.f32.mrf.mxu0 }
 0x18b   :  { %v1334_v24 = vadd.f32 %v2012_v22, %v1333_v23 }
 0x18d   :  { %v1339_v25 = vsel %vm1338_vm0, %v1334_v24, -1e+30 }
 0x18e   :  { %v1341_v26 = vsel %vm1340_vm1, %v1339_v25, -inf }
 0x18f   :  { %1342 = vmax.xlane.f32.xlu0 %v1341_v26 }
 0x202   :  { %v1343_v27 = vpop.xlane.xlu0 %1342 }
 0x203   :  { %v1344_v28 = vsub.f32 %v1339_v25, %v1343_v27 }
 0x205   :  { %v1345_v29 = vmul.f32 1.442695, %v1344_v28 }
 0x207   :  { %2013 = vpow2.f32 %v1345_v29 }
 0x20d   :  { %v2014_v30 = vpop.eup %2013 }
 0x20e   :  { %v1347_v31 = vsel %vm1340_vm1, %v2014_v30, 0.0 }
 0x20f   :  { %1348 = vadd.xlane.f32.xlu0 %v1347_v31 }
 0x282   :  { %v1349_v32 = vpop.xlane.xlu0 %1348 }
 0x283   :  { %2015 = vlog2.f32 %v1349_v32 }
 0x289   :  { %v2016_v33 = vpop.eup %2015 }
 0x28a   :  { %v1351_v34 = vmul.f32 0.6931472, %v2016_v33 }
 0x28c   :  { %v1352_v35 = vsub.f32 %v1344_v28, %v1351_v34 }
 0x28e   :  { %1353 = vst [vmem:[#allocation2] sm:$0x3] %v1352_v35 }
 0x28f   :  { %1364 = dma.vmem_to_hbm [thread:$0]  %s1360_s27, 32, %s1362_s29, [#allocation3]  }
 0x290   :  { %2041 = dma.done.wait [#allocation3], 32  }
 0x291   :  { %2042 = vsyncadd [#allocation3], 4294967264 }
 0x292   :  { %1369 = vsyncpa [#allocation3], 1 }

</bundles_post_ra>
